<compile_context>
chip_gen: v7x
topology: tpu7x:2x2x1
jax: 0.10.0
libtpu: 0.0.40
codegen_flags: <defaults>
</compile_context>

<pallas_src>
import functools

import jax
import jax.numpy as jnp
from jax.experimental import pallas as pl
from jax.experimental.pallas import tpu as pltpu


def _round_up(x, m):
    return (x + m - 1) // m * m


def _vmem_capacity_bytes():
    cap = None
    try:
        cap = getattr(pltpu.get_tpu_info(), "vmem_capacity_bytes", None)
    except Exception:
        cap = None
    if not cap:
        cap = 64 * 1024 * 1024          # conservative fallback (v7x per-TC VMEM)
    return max(32 * 1024 * 1024, min(int(cap), 256 * 1024 * 1024))


def _compiler_params(vmem_limit):
    return pltpu.CompilerParams(
        dimension_semantics=("parallel", "parallel"),   # both axes megacore-shardable
        vmem_limit_bytes=int(vmem_limit),
    )


# ----------------------------------------------------------------------------
# Shared in-kernel compute: 3x3 "same" conv + bias + LeakyReLU(0.1) on one
# (tile_h rows) x (full padded width) tile.  Returns f32 (tile_h, Wpad, Cout).
#
#   xm_ref : (1, tile_h, Wpad, Cin)  feature-map rows [i*tile_h, (i+1)*tile_h)
#   xt_ref : (1, 1, Wpad, Cin)       row i*tile_h - 1       (clamped; masked)
#   xb_ref : (1, 1, Wpad, Cin)       row (i+1)*tile_h       (clamped; masked)
#   w_ref  : (9, Cin, Cout)          3x3 taps, row-major over (dy, dx)
#   b_ref  : (1, Cout)               f32 bias
#
# Input pad columns (0 and [W+1, Wpad)) are zero by construction; roll
# wraparound therefore only pollutes pad columns of the result, which the
# callers zero (conv1/2) or drop (head).
# ----------------------------------------------------------------------------
def _conv3x3_lrelu_tile(xm_ref, xt_ref, xb_ref, w_ref, b_ref):
    i = pl.program_id(1)
    n_row_tiles = pl.num_programs(1)
    tile_h, wpad, cin = xm_ref.shape[1], xm_ref.shape[2], xm_ref.shape[3]
    cout = w_ref.shape[-1]
    s = tile_h + 2
    m = s * wpad

    # Mask the halo rows that fall outside the image (top of tile 0 / bottom of
    # the last tile), then build one slab; a single layout-preserving flatten
    # (Wpad is sublane-aligned) feeds all 9 MXU matmuls.
    top = jnp.where(i > 0, xt_ref[0], jnp.zeros_like(xt_ref[0]))
    bot = jnp.where(i + 1 < n_row_tiles, xb_ref[0], jnp.zeros_like(xb_ref[0]))
    xslab = jnp.concatenate([top, xm_ref[0], bot], axis=0)        # (s, Wpad, Cin)
    xflat = xslab.reshape(m, cin)                                  # free reshape

    acc = jnp.zeros((tile_h, wpad, cout), jnp.float32)
    for dy in range(3):
        for dx in range(3):
            p = jnp.dot(xflat, w_ref[3 * dy + dx],
                        preferred_element_type=jnp.float32)       # (m, Cout) f32
            if dx != 1:
                # dx column shift on the f32 partial via the XLU (sublane roll).
                p = pltpu.roll(p, shift=(1 - dx) % m, axis=0)
            # dy row shift is a free leading-axis slice of the partial.
            acc = acc + p.reshape(s, wpad, cout)[dy:dy + tile_h]

    act = acc + b_ref[0]                        # bias hoisted out of the tap loop
    return jnp.where(act > 0, act, 0.1 * act)   # LeakyReLU(0.1), f32 epilogue


# ----------------------------------------------------------------------------
# Kernel 1: conv3x3 + LeakyReLU (layers 1 and 2).  Writes directly into the
# consumer's padded-W layout (pad columns zeroed in-kernel -> no jnp.pad pass).
# NOTE: the store's minor dim is C; production feature_size (256) is lane-dense.
# ----------------------------------------------------------------------------
def conv3x3_lrelu_kernel(xm_ref, xt_ref, xb_ref, w_ref, b_ref, o_ref, *, w_valid):
    act = _conv3x3_lrelu_tile(xm_ref, xt_ref, xb_ref, w_ref, b_ref)
    wpad = act.shape[1]
    col = jax.lax.broadcasted_iota(jnp.int32, (1, wpad, 1), 1)
    act = jnp.where((col >= 1) & (col <= w_valid), act, 0.0)   # zero the W pad cols
    o_ref[0] = act.astype(o_ref.dtype)


# ----------------------------------------------------------------------------
# Kernel 2: conv3(3x3)+LeakyReLU fused with conv4(1x1)+LeakyReLU and
# output(1x1)+Sigmoid.  Produces the NCHW tile with a single channel-contracting
# dot_general (transposed tiny weight) + one store; no per-channel loop.
# ----------------------------------------------------------------------------
def conv3x3_head_kernel(xm_ref, xt_ref, xb_ref, w3_ref, b3_ref, w4_ref, b4_ref,
                        wot_ref, bot_ref, o_ref, *, approx_sigmoid):
    n_out, w_out = o_ref.shape[1], o_ref.shape[3]
    act = _conv3x3_lrelu_tile(xm_ref, xt_ref, xb_ref, w3_ref, b3_ref)
    tile_h, wpad, c = act.shape
    m = tile_h * wpad

    h3 = act.astype(xm_ref.dtype).reshape(m, c)                 # cast for the MXU
    h4 = jnp.dot(h3, w4_ref[...], preferred_element_type=jnp.float32) + b4_ref[0]
    h4 = jnp.where(h4 > 0, h4, 0.1 * h4).astype(xm_ref.dtype)   # LeakyReLU(0.1)

    # (n_out, m) = wo^T . h4^T, contracting over channels; the big activation is
    # never transposed (only the tiny (C, n_out) weight is, host-side).
    zt = jax.lax.dot_general(wot_ref[...], h4, (((1,), (1,)), ((), ())),
                             preferred_element_type=jnp.float32) + bot_ref[...]
    if approx_sigmoid:
        p = pl.reciprocal(1.0 + jnp.exp(-zt), approx=True)      # EUP exp + EUP rcp
    else:
        p = 1.0 / (1.0 + jnp.exp(-zt))                          # exact sigmoid

    p = p.reshape(n_out, tile_h, wpad)[:, :, 1:1 + w_out]       # drop W pad columns
    o_ref[0] = p.astype(o_ref.dtype)                            # single NCHW store


# ----------------------------------------------------------------------------
# BlockSpecs: main row tile + clamped top/bottom 1-row halos on the same array.
# ----------------------------------------------------------------------------
def _conv_in_specs(tile_h, h, wpad, cin):
    def main_map(n, i):
        return (n, i, 0, 0)

    def top_map(n, i):
        return (n, jnp.maximum(i * tile_h - 1, 0), 0, 0)

    def bot_map(n, i):
        return (n, jnp.minimum((i + 1) * tile_h, h - 1), 0, 0)

    return [
        pl.BlockSpec((1, tile_h, wpad, cin), main_map),
        pl.BlockSpec((1, 1, wpad, cin), top_map),
        pl.BlockSpec((1, 1, wpad, cin), bot_map),
    ]


def conv3x3_lrelu(xp, w_hwio, b, tile_h, w_valid, vmem_limit):
    n, h, wpad, cin = xp.shape
    cout = w_hwio.shape[-1]
    w9 = w_hwio.reshape(9, cin, cout)
    b2 = b.reshape(1, cout).astype(jnp.float32)
    kernel = functools.partial(conv3x3_lrelu_kernel, w_valid=w_valid)
    return pl.pallas_call(
        kernel,
        out_shape=jax.ShapeDtypeStruct((n, h, wpad, cout), xp.dtype),
        grid=(n, h // tile_h),
        in_specs=_conv_in_specs(tile_h, h, wpad, cin) + [
            pl.BlockSpec((9, cin, cout), lambda n_, i: (0, 0, 0)),
            pl.BlockSpec((1, cout), lambda n_, i: (0, 0)),
        ],
        out_specs=pl.BlockSpec((1, tile_h, wpad, cout), lambda n_, i: (n_, i, 0, 0)),
        compiler_params=_compiler_params(vmem_limit),
    )(xp, xp, xp, w9, b2)


def conv3x3_head(xp, w3, b3, w4, b4, wo, bo, tile_h, w_valid, vmem_limit,
                 approx_sigmoid):
    n, h, wpad, cin = xp.shape
    c = w3.shape[-1]
    n_out = wo.shape[-1]
    w9 = w3.reshape(9, cin, c)
    b3_2 = b3.reshape(1, c).astype(jnp.float32)
    b4_2 = b4.reshape(1, c).astype(jnp.float32)
    wot = wo.T                                         # tiny (n_out, C) transpose
    bot = bo.reshape(n_out, 1).astype(jnp.float32)
    kernel = functools.partial(conv3x3_head_kernel, approx_sigmoid=approx_sigmoid)
    return pl.pallas_call(
        kernel,
        out_shape=jax.ShapeDtypeStruct((n, n_out, h, w_valid), jnp.float32),  # NCHW
        grid=(n, h // tile_h),
        in_specs=_conv_in_specs(tile_h, h, wpad, cin) + [
            pl.BlockSpec((9, cin, c), lambda n_, i: (0, 0, 0)),
            pl.BlockSpec((1, c), lambda n_, i: (0, 0)),
            pl.BlockSpec((c, c), lambda n_, i: (0, 0)),
            pl.BlockSpec((1, c), lambda n_, i: (0, 0)),
            pl.BlockSpec((n_out, c), lambda n_, i: (0, 0)),
            pl.BlockSpec((n_out, 1), lambda n_, i: (0, 0)),
        ],
        out_specs=pl.BlockSpec((1, n_out, tile_h, w_valid),
                               lambda n_, i: (n_, 0, i, 0)),
        compiler_params=_compiler_params(vmem_limit),
    )(xp, xp, xp, w9, b3_2, w4, b4_2, wot, bot)


# ----------------------------------------------------------------------------
# tile_h / VMEM-limit selection with lane-padded (128) accounting, derived from
# the actual chip's VMEM capacity; keeps >= 2 grid tiles when N == 1 (megacore).
# ----------------------------------------------------------------------------
def _choose_tile_h(n, h, w, cin_max, cout, n_out, esize):
    cap = _vmem_capacity_bytes()
    budget = int(0.30 * cap)
    vmem_limit = max(32 * 1024 * 1024, min(int(0.75 * cap), 96 * 1024 * 1024))
    mult = 8 * (4 // esize)                   # sublane packing of compute dtype
    wpad = _round_up(w + 2, mult)

    def la(cdim):
        return _round_up(cdim, 128)

    def step_bytes(t):
        s = t + 2
        x_blocks = 2 * s * wpad * la(cin_max) * esize       # main+halo, double-buffered
        slab = s * wpad * la(cin_max) * esize                # in-kernel slab copy
        partial = 2 * s * wpad * la(cout) * 4                # live f32 tap partials
        acc = t * wpad * la(cout) * 4                        # f32 accumulator
        out12 = 2 * t * wpad * la(cout) * esize              # conv output block x2
        head = t * wpad * (la(cout) * (4 + esize) + 2 * la(n_out) * 4)
        out_head = 2 * n_out * t * la(w) * 4
        weights = 9 * cin_max * la(cout) * esize + 2 * cout * la(cout) * esize
        return x_blocks + slab + partial + acc + max(out12, head + out_head) + weights

    cands = [t for t in range(8, h + 1, 8) if h % t == 0] or [h]
    if n == 1:                                # keep both TensorCores busy on v7x
        two_tile = [t for t in cands if h // t >= 2]
        if two_tile:
            cands = two_tile
    best = cands[0]
    for t in cands:
        if step_bytes(t) <= budget:
            best = max(best, t)
    return best, vmem_limit


# ----------------------------------------------------------------------------
# Parameter construction (deterministic; mirrors the PyTorch module shapes).
# ----------------------------------------------------------------------------
def init_params(key, num_features_in, feature_size, num_anchors, num_classes):
    def conv_w(k, kh, kw, cin, cout):
        return 0.05 * jax.random.normal(k, (kh, kw, cin, cout), jnp.float32)

    ks = jax.random.split(key, 10)
    return {
        "w1": conv_w(ks[0], 3, 3, num_features_in, feature_size),
        "b1": 0.01 * jax.random.normal(ks[1], (feature_size,), jnp.float32),
        "w2": conv_w(ks[2], 3, 3, feature_size, feature_size),
        "b2": 0.01 * jax.random.normal(ks[3], (feature_size,), jnp.float32),
        "w3": conv_w(ks[4], 3, 3, feature_size, feature_size),
        "b3": 0.01 * jax.random.normal(ks[5], (feature_size,), jnp.float32),
        "w4": conv_w(ks[6], 1, 1, feature_size, feature_size)[0, 0],
        "b4": 0.01 * jax.random.normal(ks[7], (feature_size,), jnp.float32),
        "wo": conv_w(ks[8], 1, 1, feature_size, num_anchors * num_classes)[0, 0],
        "bo": 0.01 * jax.random.normal(
            ks[9], (num_anchors * num_classes,), jnp.float32),
    }


# ----------------------------------------------------------------------------
# Forward pass.  Input NCHW (PyTorch convention) -> output NCHW sigmoid scores.
# ----------------------------------------------------------------------------
def multi_classification_forward(params, x_nchw, *, compute_dtype=jnp.bfloat16,
                                 tile_h=None, approx_sigmoid=True):
    cd = jnp.dtype(compute_dtype)
    n, _, h, w = x_nchw.shape
    feat = params["w1"].shape[-1]
    cin = params["w1"].shape[-2]
    n_out = params["wo"].shape[-1]

    auto_tile, vmem_limit = _choose_tile_h(
        n, h, w, max(cin, feat), feat, n_out, cd.itemsize)
    if tile_h is None:
        tile_h = auto_tile
    assert h % tile_h == 0 and (tile_h % 8 == 0 or tile_h == h), (h, tile_h)

    mult = 8 * (4 // cd.itemsize)
    wpad = _round_up(w + 2, mult)
    # NCHW -> NHWC (lane-dense C) + one cheap W-pad of the Cin-channel input
    # (fused by XLA).  Intermediate feature maps are produced directly in this
    # padded layout by the kernels -> no jnp.pad HBM passes between layers.
    x = jnp.transpose(x_nchw, (0, 2, 3, 1)).astype(cd)
    x = jnp.pad(x, ((0, 0), (0, 0), (1, wpad - w - 1), (0, 0)))

    x = conv3x3_lrelu(x, params["w1"].astype(cd), params["b1"], tile_h, w, vmem_limit)
    x = conv3x3_lrelu(x, params["w2"].astype(cd), params["b2"], tile_h, w, vmem_limit)
    # conv3 (3x3) + conv4 (1x1) + output (1x1) + sigmoid fused into one kernel;
    # the last two intermediate maps never touch HBM, result is NCHW f32.
    return conv3x3_head(x, params["w3"].astype(cd), params["b3"],
                        params["w4"].astype(cd), params["b4"],
                        params["wo"].astype(cd), params["bo"],
                        tile_h, w, vmem_limit, approx_sigmoid)


# ----------------------------------------------------------------------------
# Pure-JAX reference for validation.
# ----------------------------------------------------------------------------
def reference_forward(params, x_nchw):
    x = jnp.transpose(x_nchw, (0, 2, 3, 1))

    def conv(x, w_hwio, b, pad):
        y = jax.lax.conv_general_dilated(
            x, w_hwio, window_strides=(1, 1), padding=pad,
            dimension_numbers=("NHWC", "HWIO", "NHWC"),
            precision=jax.lax.Precision.HIGHEST)
        return y + b[None, None, None, :]

    def lrelu(v):
        return jnp.where(v > 0, v, 0.1 * v)

    x = lrelu(conv(x, params["w1"], params["b1"], "SAME"))
    x = lrelu(conv(x, params["w2"], params["b2"], "SAME"))
    x = lrelu(conv(x, params["w3"], params["b3"], "SAME"))
    x = lrelu(conv(x, params["w4"][None, None], params["b4"], "VALID"))
    x = jax.nn.sigmoid(conv(x, params["wo"][None, None], params["bo"], "VALID"))
    return jnp.transpose(x, (0, 3, 1, 2))


if __name__ == "__main__":
    N, C_in, H, W = 2, 4, 16, 16
    feature_size = 32
    num_anchors, num_classes = 1, 1

    key = jax.random.PRNGKey(0)
    k_param, k_x = jax.random.split(key)
    params = init_params(k_param, C_in, feature_size, num_anchors, num_classes)
    x = jax.random.normal(k_x, (N, C_in, H, W), jnp.float32)

    ref = jax.block_until_ready(reference_forward(params, x))

    # f32 path with exact sigmoid: strict check of the halo/roll/fusion logic.
    # tile_h=8 forces 2 row tiles per image so the halo-masking path is exercised.
    fwd_f32 = jax.jit(functools.partial(
        multi_classification_forward, compute_dtype=jnp.float32, tile_h=8,
        approx_sigmoid=False))
    out = jax.block_until_ready(fwd_f32(params, x))
    assert out.shape == (N, num_anchors * num_classes, H, W), out.shape
    assert jnp.allclose(out, ref, atol=1e-4, rtol=1e-4), "f32 mismatch vs reference"

    # Default path: bf16 activations/weights (f32 MXU accumulation + f32
    # epilogues), auto tile_h (single-row-tile path), EUP sigmoid.
    fwd_bf16 = jax.jit(multi_classification_forward)
    out_bf16 = jax.block_until_ready(fwd_bf16(params, x))
    assert out_bf16.shape == (N, num_anchors * num_classes, H, W), out_bf16.shape
    assert jnp.allclose(out_bf16, ref, atol=5e-2), "bf16 mismatch vs reference"

    print("KERNEL_OK")
</pallas_src>

<mosaic_0001>
module attributes {stable_mosaic.version = 11 : i64} {
  func.func @conv3x3_lrelu_kernel(%arg0: i32, %arg1: i32, %arg2: memref<1x8x24x4xf32, #tpu.memory_space<vmem>>, %arg3: memref<1x1x24x4xf32, #tpu.memory_space<vmem>>, %arg4: memref<1x1x24x4xf32, #tpu.memory_space<vmem>>, %arg5: memref<9x4x32xf32, #tpu.memory_space<vmem>>, %arg6: memref<1x32xf32, #tpu.memory_space<vmem>>, %arg7: memref<1x8x24x32xf32, #tpu.memory_space<vmem>>) attributes {dimension_semantics = [#tpu.dimension_semantics<parallel>, #tpu.dimension_semantics<parallel>], iteration_bounds = array<i64: 2, 2>, scalar_prefetch = 0 : i64, scratch_operands = 0 : i64, tpu.core_type = #tpu.core_type<tc>, window_params = [{transform_indices = @transform_0, window_bounds = array<i64: 1, 8, 24, 4>}, {transform_indices = @transform_1, window_bounds = array<i64: 1, 1, 24, 4>}, {transform_indices = @transform_2, window_bounds = array<i64: 1, 1, 24, 4>}, {pipeline_mode = #tpu.pipeline_mode<synchronous>, transform_indices = @transform_3, window_bounds = array<i64: 9, 4, 32>}, {pipeline_mode = #tpu.pipeline_mode<synchronous>, transform_indices = @transform_4, window_bounds = array<i64: 1, 32>}, {transform_indices = @transform_5, window_bounds = array<i64: 1, 8, 24, 32>}]} {
    %c0_i32 = arith.constant 0 : i32
    %0 = arith.cmpi sgt, %arg1, %c0_i32 : i32
    %c0 = arith.constant 0 : index
    %c0_0 = arith.constant 0 : index
    %c0_1 = arith.constant 0 : index
    %c0_2 = arith.constant 0 : index
    %1 = vector.load %arg3[%c0, %c0_0, %c0_1, %c0_2] : memref<1x1x24x4xf32, #tpu.memory_space<vmem>>, vector<1x1x24x4xf32>
    %2 = vector.shape_cast %1 : vector<1x1x24x4xf32> to vector<1x24x4xf32>
    %cst = arith.constant 0.000000e+00 : f32
    %3 = vector.broadcast %cst : f32 to vector<1x24x4xf32>
    %4 = arith.select %0, %2, %3 : vector<1x24x4xf32>
    %c1_i32 = arith.constant 1 : i32
    %5 = arith.addi %arg1, %c1_i32 : i32
    %c2_i32 = arith.constant 2 : i32
    %6 = arith.cmpi slt, %5, %c2_i32 : i32
    %c0_3 = arith.constant 0 : index
    %c0_4 = arith.constant 0 : index
    %c0_5 = arith.constant 0 : index
    %c0_6 = arith.constant 0 : index
    %7 = vector.load %arg4[%c0_3, %c0_4, %c0_5, %c0_6] : memref<1x1x24x4xf32, #tpu.memory_space<vmem>>, vector<1x1x24x4xf32>
    %8 = vector.shape_cast %7 : vector<1x1x24x4xf32> to vector<1x24x4xf32>
    %cst_7 = arith.constant 0.000000e+00 : f32
    %9 = vector.broadcast %cst_7 : f32 to vector<1x24x4xf32>
    %10 = arith.select %6, %8, %9 : vector<1x24x4xf32>
    %c0_8 = arith.constant 0 : index
    %c0_9 = arith.constant 0 : index
    %c0_10 = arith.constant 0 : index
    %c0_11 = arith.constant 0 : index
    %11 = vector.load %arg2[%c0_8, %c0_9, %c0_10, %c0_11] : memref<1x8x24x4xf32, #tpu.memory_space<vmem>>, vector<1x8x24x4xf32>
    %12 = vector.shape_cast %11 : vector<1x8x24x4xf32> to vector<8x24x4xf32>
    %13 = tpu.concatenate %4, %12, %10 in 0 : vector<1x24x4xf32>, vector<8x24x4xf32>, vector<1x24x4xf32> -> vector<10x24x4xf32>
    %14 = vector.shape_cast %13 : vector<10x24x4xf32> to vector<240x4xf32>
    %cst_12 = arith.constant 0.000000e+00 : f32
    %15 = vector.broadcast %cst_12 : f32 to vector<8x24x32xf32>
    %c0_13 = arith.constant 0 : index
    %c0_14 = arith.constant 0 : index
    %c0_15 = arith.constant 0 : index
    %16 = vector.load %arg5[%c0_13, %c0_14, %c0_15] : memref<9x4x32xf32, #tpu.memory_space<vmem>>, vector<1x4x32xf32>
    %17 = vector.shape_cast %16 : vector<1x4x32xf32> to vector<4x32xf32>
    %cst_16 = arith.constant dense<0.000000e+00> : vector<240x32xf32>
    %18 = tpu.matmul %14, %17, %cst_16 {dimension_numbers = #tpu.dot_dimension_numbers<[1], [0], [0], [1], [0, 0, 1, 1], [], []>} : vector<240x4xf32>, vector<4x32xf32>, vector<240x32xf32> -> vector<240x32xf32>
    %c1_i32_17 = arith.constant 1 : i32
    %19 = tpu.dynamic_rotate %18 by %c1_i32_17 dim 0 : vector<240x32xf32>, i32 -> vector<240x32xf32>
    %20 = vector.shape_cast %19 : vector<240x32xf32> to vector<10x24x32xf32>
    %21 = vector.extract_strided_slice %20 {offsets = [0, 0, 0], sizes = [8, 24, 32], strides = [1, 1, 1]} : vector<10x24x32xf32> to vector<8x24x32xf32>
    %22 = arith.addf %15, %21 : vector<8x24x32xf32>
    %c1 = arith.constant 1 : index
    %c0_18 = arith.constant 0 : index
    %c0_19 = arith.constant 0 : index
    %23 = vector.load %arg5[%c1, %c0_18, %c0_19] : memref<9x4x32xf32, #tpu.memory_space<vmem>>, vector<1x4x32xf32>
    %24 = vector.shape_cast %23 : vector<1x4x32xf32> to vector<4x32xf32>
    %cst_20 = arith.constant dense<0.000000e+00> : vector<240x32xf32>
    %25 = tpu.matmul %14, %24, %cst_20 {dimension_numbers = #tpu.dot_dimension_numbers<[1], [0], [0], [1], [0, 0, 1, 1], [], []>} : vector<240x4xf32>, vector<4x32xf32>, vector<240x32xf32> -> vector<240x32xf32>
    %26 = vector.shape_cast %25 : vector<240x32xf32> to vector<10x24x32xf32>
    %27 = vector.extract_strided_slice %26 {offsets = [0, 0, 0], sizes = [8, 24, 32], strides = [1, 1, 1]} : vector<10x24x32xf32> to vector<8x24x32xf32>
    %28 = arith.addf %22, %27 : vector<8x24x32xf32>
    %c2 = arith.constant 2 : index
    %c0_21 = arith.constant 0 : index
    %c0_22 = arith.constant 0 : index
    %29 = vector.load %arg5[%c2, %c0_21, %c0_22] : memref<9x4x32xf32, #tpu.memory_space<vmem>>, vector<1x4x32xf32>
    %30 = vector.shape_cast %29 : vector<1x4x32xf32> to vector<4x32xf32>
    %cst_23 = arith.constant dense<0.000000e+00> : vector<240x32xf32>
    %31 = tpu.matmul %14, %30, %cst_23 {dimension_numbers = #tpu.dot_dimension_numbers<[1], [0], [0], [1], [0, 0, 1, 1], [], []>} : vector<240x4xf32>, vector<4x32xf32>, vector<240x32xf32> -> vector<240x32xf32>
    %c239_i32 = arith.constant 239 : i32
    %32 = tpu.dynamic_rotate %31 by %c239_i32 dim 0 : vector<240x32xf32>, i32 -> vector<240x32xf32>
    %33 = vector.shape_cast %32 : vector<240x32xf32> to vector<10x24x32xf32>
    %34 = vector.extract_strided_slice %33 {offsets = [0, 0, 0], sizes = [8, 24, 32], strides = [1, 1, 1]} : vector<10x24x32xf32> to vector<8x24x32xf32>
    %35 = arith.addf %28, %34 : vector<8x24x32xf32>
    %c3 = arith.constant 3 : index
    %c0_24 = arith.constant 0 : index
    %c0_25 = arith.constant 0 : index
    %36 = vector.load %arg5[%c3, %c0_24, %c0_25] : memref<9x4x32xf32, #tpu.memory_space<vmem>>, vector<1x4x32xf32>
    %37 = vector.shape_cast %36 : vector<1x4x32xf32> to vector<4x32xf32>
    %cst_26 = arith.constant dense<0.000000e+00> : vector<240x32xf32>
    %38 = tpu.matmul %14, %37, %cst_26 {dimension_numbers = #tpu.dot_dimension_numbers<[1], [0], [0], [1], [0, 0, 1, 1], [], []>} : vector<240x4xf32>, vector<4x32xf32>, vector<240x32xf32> -> vector<240x32xf32>
    %c1_i32_27 = arith.constant 1 : i32
    %39 = tpu.dynamic_rotate %38 by %c1_i32_27 dim 0 : vector<240x32xf32>, i32 -> vector<240x32xf32>
    %40 = vector.shape_cast %39 : vector<240x32xf32> to vector<10x24x32xf32>
    %41 = vector.extract_strided_slice %40 {offsets = [1, 0, 0], sizes = [8, 24, 32], strides = [1, 1, 1]} : vector<10x24x32xf32> to vector<8x24x32xf32>
    %42 = arith.addf %35, %41 : vector<8x24x32xf32>
    %c4 = arith.constant 4 : index
    %c0_28 = arith.constant 0 : index
    %c0_29 = arith.constant 0 : index
    %43 = vector.load %arg5[%c4, %c0_28, %c0_29] : memref<9x4x32xf32, #tpu.memory_space<vmem>>, vector<1x4x32xf32>
    %44 = vector.shape_cast %43 : vector<1x4x32xf32> to vector<4x32xf32>
    %cst_30 = arith.constant dense<0.000000e+00> : vector<240x32xf32>
    %45 = tpu.matmul %14, %44, %cst_30 {dimension_numbers = #tpu.dot_dimension_numbers<[1], [0], [0], [1], [0, 0, 1, 1], [], []>} : vector<240x4xf32>, vector<4x32xf32>, vector<240x32xf32> -> vector<240x32xf32>
    %46 = vector.shape_cast %45 : vector<240x32xf32> to vector<10x24x32xf32>
    %47 = vector.extract_strided_slice %46 {offsets = [1, 0, 0], sizes = [8, 24, 32], strides = [1, 1, 1]} : vector<10x24x32xf32> to vector<8x24x32xf32>
    %48 = arith.addf %42, %47 : vector<8x24x32xf32>
    %c5 = arith.constant 5 : index
    %c0_31 = arith.constant 0 : index
    %c0_32 = arith.constant 0 : index
    %49 = vector.load %arg5[%c5, %c0_31, %c0_32] : memref<9x4x32xf32, #tpu.memory_space<vmem>>, vector<1x4x32xf32>
    %50 = vector.shape_cast %49 : vector<1x4x32xf32> to vector<4x32xf32>
    %cst_33 = arith.constant dense<0.000000e+00> : vector<240x32xf32>
    %51 = tpu.matmul %14, %50, %cst_33 {dimension_numbers = #tpu.dot_dimension_numbers<[1], [0], [0], [1], [0, 0, 1, 1], [], []>} : vector<240x4xf32>, vector<4x32xf32>, vector<240x32xf32> -> vector<240x32xf32>
    %c239_i32_34 = arith.constant 239 : i32
    %52 = tpu.dynamic_rotate %51 by %c239_i32_34 dim 0 : vector<240x32xf32>, i32 -> vector<240x32xf32>
    %53 = vector.shape_cast %52 : vector<240x32xf32> to vector<10x24x32xf32>
    %54 = vector.extract_strided_slice %53 {offsets = [1, 0, 0], sizes = [8, 24, 32], strides = [1, 1, 1]} : vector<10x24x32xf32> to vector<8x24x32xf32>
    %55 = arith.addf %48, %54 : vector<8x24x32xf32>
    %c6 = arith.constant 6 : index
    %c0_35 = arith.constant 0 : index
    %c0_36 = arith.constant 0 : index
    %56 = vector.load %arg5[%c6, %c0_35, %c0_36] : memref<9x4x32xf32, #tpu.memory_space<vmem>>, vector<1x4x32xf32>
    %57 = vector.shape_cast %56 : vector<1x4x32xf32> to vector<4x32xf32>
    %cst_37 = arith.constant dense<0.000000e+00> : vector<240x32xf32>
    %58 = tpu.matmul %14, %57, %cst_37 {dimension_numbers = #tpu.dot_dimension_numbers<[1], [0], [0], [1], [0, 0, 1, 1], [], []>} : vector<240x4xf32>, vector<4x32xf32>, vector<240x32xf32> -> vector<240x32xf32>
    %c1_i32_38 = arith.constant 1 : i32
    %59 = tpu.dynamic_rotate %58 by %c1_i32_38 dim 0 : vector<240x32xf32>, i32 -> vector<240x32xf32>
    %60 = vector.shape_cast %59 : vector<240x32xf32> to vector<10x24x32xf32>
    %61 = vector.extract_strided_slice %60 {offsets = [2, 0, 0], sizes = [8, 24, 32], strides = [1, 1, 1]} : vector<10x24x32xf32> to vector<8x24x32xf32>
    %62 = arith.addf %55, %61 : vector<8x24x32xf32>
    %c7 = arith.constant 7 : index
    %c0_39 = arith.constant 0 : index
    %c0_40 = arith.constant 0 : index
    %63 = vector.load %arg5[%c7, %c0_39, %c0_40] : memref<9x4x32xf32, #tpu.memory_space<vmem>>, vector<1x4x32xf32>
    %64 = vector.shape_cast %63 : vector<1x4x32xf32> to vector<4x32xf32>
    %cst_41 = arith.constant dense<0.000000e+00> : vector<240x32xf32>
    %65 = tpu.matmul %14, %64, %cst_41 {dimension_numbers = #tpu.dot_dimension_numbers<[1], [0], [0], [1], [0, 0, 1, 1], [], []>} : vector<240x4xf32>, vector<4x32xf32>, vector<240x32xf32> -> vector<240x32xf32>
    %66 = vector.shape_cast %65 : vector<240x32xf32> to vector<10x24x32xf32>
    %67 = vector.extract_strided_slice %66 {offsets = [2, 0, 0], sizes = [8, 24, 32], strides = [1, 1, 1]} : vector<10x24x32xf32> to vector<8x24x32xf32>
    %68 = arith.addf %62, %67 : vector<8x24x32xf32>
    %c8 = arith.constant 8 : index
    %c0_42 = arith.constant 0 : index
    %c0_43 = arith.constant 0 : index
    %69 = vector.load %arg5[%c8, %c0_42, %c0_43] : memref<9x4x32xf32, #tpu.memory_space<vmem>>, vector<1x4x32xf32>
    %70 = vector.shape_cast %69 : vector<1x4x32xf32> to vector<4x32xf32>
    %cst_44 = arith.constant dense<0.000000e+00> : vector<240x32xf32>
    %71 = tpu.matmul %14, %70, %cst_44 {dimension_numbers = #tpu.dot_dimension_numbers<[1], [0], [0], [1], [0, 0, 1, 1], [], []>} : vector<240x4xf32>, vector<4x32xf32>, vector<240x32xf32> -> vector<240x32xf32>
    %c239_i32_45 = arith.constant 239 : i32
    %72 = tpu.dynamic_rotate %71 by %c239_i32_45 dim 0 : vector<240x32xf32>, i32 -> vector<240x32xf32>
    %73 = vector.shape_cast %72 : vector<240x32xf32> to vector<10x24x32xf32>
    %74 = vector.extract_strided_slice %73 {offsets = [2, 0, 0], sizes = [8, 24, 32], strides = [1, 1, 1]} : vector<10x24x32xf32> to vector<8x24x32xf32>
    %75 = arith.addf %68, %74 : vector<8x24x32xf32>
    %c0_46 = arith.constant 0 : index
    %c0_47 = arith.constant 0 : index
    %76 = vector.load %arg6[%c0_46, %c0_47] : memref<1x32xf32, #tpu.memory_space<vmem>>, vector<1x32xf32>
    %77 = vector.shape_cast %76 : vector<1x32xf32> to vector<32xf32>
    %78 = vector.shape_cast %77 : vector<32xf32> to vector<1x1x32xf32>
    %79 = vector.broadcast %78 : vector<1x1x32xf32> to vector<8x24x32xf32>
    %80 = arith.addf %75, %79 : vector<8x24x32xf32>
    %cst_48 = arith.constant 0.000000e+00 : f32
    %81 = vector.broadcast %cst_48 : f32 to vector<8x24x32xf32>
    %82 = arith.cmpf ogt, %80, %81 : vector<8x24x32xf32>
    %cst_49 = arith.constant 1.000000e-01 : f32
    %83 = vector.broadcast %cst_49 : f32 to vector<8x24x32xf32>
    %84 = arith.mulf %83, %80 : vector<8x24x32xf32>
    %85 = arith.select %82, %80, %84 : vector<8x24x32xi1>, vector<8x24x32xf32>
    %86 = tpu.iota {dimensions = array<i32: 1>} : vector<1x24x1xi32>
    %c1_i32_50 = arith.constant 1 : i32
    %87 = vector.broadcast %c1_i32_50 : i32 to vector<1x24x1xi32>
    %88 = arith.cmpi sge, %86, %87 : vector<1x24x1xi32>
    %c16_i32 = arith.constant 16 : i32
    %89 = vector.broadcast %c16_i32 : i32 to vector<1x24x1xi32>
    %90 = arith.cmpi sle, %86, %89 : vector<1x24x1xi32>
    %91 = arith.andi %88, %90 : vector<1x24x1xi1>
    %cst_51 = arith.constant 0.000000e+00 : f32
    %92 = vector.shape_cast %91 : vector<1x24x1xi1> to vector<1x24x1xi1>
    %93 = vector.broadcast %92 : vector<1x24x1xi1> to vector<8x24x32xi1>
    %94 = vector.broadcast %cst_51 : f32 to vector<8x24x32xf32>
    %95 = arith.select %93, %85, %94 : vector<8x24x32xi1>, vector<8x24x32xf32>
    %c0_52 = arith.constant 0 : index
    %c0_53 = arith.constant 0 : index
    %c0_54 = arith.constant 0 : index
    %c0_55 = arith.constant 0 : index
    %96 = vector.load %arg7[%c0_52, %c0_53, %c0_54, %c0_55] : memref<1x8x24x32xf32, #tpu.memory_space<vmem>>, vector<1x8x24x32xf32>
    %97 = vector.shape_cast %96 : vector<1x8x24x32xf32> to vector<8x24x32xf32>
    %98 = vector.shape_cast %95 : vector<8x24x32xf32> to vector<1x8x24x32xf32>
    tpu.vector_store %arg7[%c0_52, %c0_53, %c0_54, %c0_55], %98 {strides = array<i32>} : memref<1x8x24x32xf32, #tpu.memory_space<vmem>>, vector<1x8x24x32xf32>,
    return
  }
  func.func @transform_0(%arg0: i32, %arg1: i32) -> (i32, i32, i32, i32) {
    %c0_i32 = arith.constant 0 : i32
    %c0_i32_0 = arith.constant 0 : i32
    %c0_i32_1 = arith.constant 0 : i32
    return %arg0, %arg1, %c0_i32, %c0_i32_0 : i32, i32, i32, i32
  }
  func.func @transform_1(%arg0: i32, %arg1: i32) -> (i32, i32, i32, i32) {
    %c8_i32 = arith.constant 8 : i32
    %0 = arith.muli %arg1, %c8_i32 : i32
    %c1_i32 = arith.constant 1 : i32
    %1 = arith.subi %0, %c1_i32 : i32
    %c0_i32 = arith.constant 0 : i32
    %2 = arith.maxsi %1, %c0_i32 : i32
    %c0_i32_0 = arith.constant 0 : i32
    %c0_i32_1 = arith.constant 0 : i32
    %c0_i32_2 = arith.constant 0 : i32
    return %arg0, %2, %c0_i32_0, %c0_i32_1 : i32, i32, i32, i32
  }
  func.func @transform_2(%arg0: i32, %arg1: i32) -> (i32, i32, i32, i32) {
    %c1_i32 = arith.constant 1 : i32
    %0 = arith.addi %arg1, %c1_i32 : i32
    %c8_i32 = arith.constant 8 : i32
    %1 = arith.muli %0, %c8_i32 : i32
    %c15_i32 = arith.constant 15 : i32
    %2 = arith.minsi %1, %c15_i32 : i32
    %c0_i32 = arith.constant 0 : i32
    %c0_i32_0 = arith.constant 0 : i32
    %c0_i32_1 = arith.constant 0 : i32
    return %arg0, %2, %c0_i32, %c0_i32_0 : i32, i32, i32, i32
  }
  func.func @transform_3(%arg0: i32, %arg1: i32) -> (i32, i32, i32) {
    %c0_i32 = arith.constant 0 : i32
    %c0_i32_0 = arith.constant 0 : i32
    %c0_i32_1 = arith.constant 0 : i32
    %c0_i32_2 = arith.constant 0 : i32
    return %c0_i32, %c0_i32_0, %c0_i32_1 : i32, i32, i32
  }
  func.func @transform_4(%arg0: i32, %arg1: i32) -> (i32, i32) {
    %c0_i32 = arith.constant 0 : i32
    %c0_i32_0 = arith.constant 0 : i32
    %c0_i32_1 = arith.constant 0 : i32
    return %c0_i32, %c0_i32_0 : i32, i32
  }
  func.func @transform_5(%arg0: i32, %arg1: i32) -> (i32, i32, i32, i32) {
    %c0_i32 = arith.constant 0 : i32
    %c0_i32_0 = arith.constant 0 : i32
    %c0_i32_1 = arith.constant 0 : i32
    return %arg0, %arg1, %c0_i32, %c0_i32_0 : i32, i32, i32, i32
  }
}

module attributes {stable_mosaic.version = 11 : i64} {
  func.func @conv3x3_lrelu_kernel(%arg0: i32, %arg1: i32, %arg2: memref<1x8x24x32xf32, #tpu.memory_space<vmem>>, %arg3: memref<1x1x24x32xf32, #tpu.memory_space<vmem>>, %arg4: memref<1x1x24x32xf32, #tpu.memory_space<vmem>>, %arg5: memref<9x32x32xf32, #tpu.memory_space<vmem>>, %arg6: memref<1x32xf32, #tpu.memory_space<vmem>>, %arg7: memref<1x8x24x32xf32, #tpu.memory_space<vmem>>) attributes {dimension_semantics = [#tpu.dimension_semantics<parallel>, #tpu.dimension_semantics<parallel>], iteration_bounds = array<i64: 2, 2>, scalar_prefetch = 0 : i64, scratch_operands = 0 : i64, tpu.core_type = #tpu.core_type<tc>, window_params = [{transform_indices = @transform_0, window_bounds = array<i64: 1, 8, 24, 32>}, {transform_indices = @transform_1, window_bounds = array<i64: 1, 1, 24, 32>}, {transform_indices = @transform_2, window_bounds = array<i64: 1, 1, 24, 32>}, {pipeline_mode = #tpu.pipeline_mode<synchronous>, transform_indices = @transform_3, window_bounds = array<i64: 9, 32, 32>}, {pipeline_mode = #tpu.pipeline_mode<synchronous>, transform_indices = @transform_4, window_bounds = array<i64: 1, 32>}, {transform_indices = @transform_5, window_bounds = array<i64: 1, 8, 24, 32>}]} {
    %c0_i32 = arith.constant 0 : i32
    %0 = arith.cmpi sgt, %arg1, %c0_i32 : i32
    %c0 = arith.constant 0 : index
    %c0_0 = arith.constant 0 : index
    %c0_1 = arith.constant 0 : index
    %c0_2 = arith.constant 0 : index
    %1 = vector.load %arg3[%c0, %c0_0, %c0_1, %c0_2] : memref<1x1x24x32xf32, #tpu.memory_space<vmem>>, vector<1x1x24x32xf32>
    %2 = vector.shape_cast %1 : vector<1x1x24x32xf32> to vector<1x24x32xf32>
    %cst = arith.constant 0.000000e+00 : f32
    %3 = vector.broadcast %cst : f32 to vector<1x24x32xf32>
    %4 = arith.select %0, %2, %3 : vector<1x24x32xf32>
    %c1_i32 = arith.constant 1 : i32
    %5 = arith.addi %arg1, %c1_i32 : i32
    %c2_i32 = arith.constant 2 : i32
    %6 = arith.cmpi slt, %5, %c2_i32 : i32
    %c0_3 = arith.constant 0 : index
    %c0_4 = arith.constant 0 : index
    %c0_5 = arith.constant 0 : index
    %c0_6 = arith.constant 0 : index
    %7 = vector.load %arg4[%c0_3, %c0_4, %c0_5, %c0_6] : memref<1x1x24x32xf32, #tpu.memory_space<vmem>>, vector<1x1x24x32xf32>
    %8 = vector.shape_cast %7 : vector<1x1x24x32xf32> to vector<1x24x32xf32>
    %cst_7 = arith.constant 0.000000e+00 : f32
    %9 = vector.broadcast %cst_7 : f32 to vector<1x24x32xf32>
    %10 = arith.select %6, %8, %9 : vector<1x24x32xf32>
    %c0_8 = arith.constant 0 : index
    %c0_9 = arith.constant 0 : index
    %c0_10 = arith.constant 0 : index
    %c0_11 = arith.constant 0 : index
    %11 = vector.load %arg2[%c0_8, %c0_9, %c0_10, %c0_11] : memref<1x8x24x32xf32, #tpu.memory_space<vmem>>, vector<1x8x24x32xf32>
    %12 = vector.shape_cast %11 : vector<1x8x24x32xf32> to vector<8x24x32xf32>
    %13 = tpu.concatenate %4, %12, %10 in 0 : vector<1x24x32xf32>, vector<8x24x32xf32>, vector<1x24x32xf32> -> vector<10x24x32xf32>
    %14 = vector.shape_cast %13 : vector<10x24x32xf32> to vector<240x32xf32>
    %cst_12 = arith.constant 0.000000e+00 : f32
    %15 = vector.broadcast %cst_12 : f32 to vector<8x24x32xf32>
    %c0_13 = arith.constant 0 : index
    %c0_14 = arith.constant 0 : index
    %c0_15 = arith.constant 0 : index
    %16 = vector.load %arg5[%c0_13, %c0_14, %c0_15] : memref<9x32x32xf32, #tpu.memory_space<vmem>>, vector<1x32x32xf32>
    %17 = vector.shape_cast %16 : vector<1x32x32xf32> to vector<32x32xf32>
    %cst_16 = arith.constant dense<0.000000e+00> : vector<240x32xf32>
    %18 = tpu.matmul %14, %17, %cst_16 {dimension_numbers = #tpu.dot_dimension_numbers<[1], [0], [0], [1], [0, 0, 1, 1], [], []>} : vector<240x32xf32>, vector<32x32xf32>, vector<240x32xf32> -> vector<240x32xf32>
    %c1_i32_17 = arith.constant 1 : i32
    %19 = tpu.dynamic_rotate %18 by %c1_i32_17 dim 0 : vector<240x32xf32>, i32 -> vector<240x32xf32>
    %20 = vector.shape_cast %19 : vector<240x32xf32> to vector<10x24x32xf32>
    %21 = vector.extract_strided_slice %20 {offsets = [0, 0, 0], sizes = [8, 24, 32], strides = [1, 1, 1]} : vector<10x24x32xf32> to vector<8x24x32xf32>
    %22 = arith.addf %15, %21 : vector<8x24x32xf32>
    %c1 = arith.constant 1 : index
    %c0_18 = arith.constant 0 : index
    %c0_19 = arith.constant 0 : index
    %23 = vector.load %arg5[%c1, %c0_18, %c0_19] : memref<9x32x32xf32, #tpu.memory_space<vmem>>, vector<1x32x32xf32>
    %24 = vector.shape_cast %23 : vector<1x32x32xf32> to vector<32x32xf32>
    %cst_20 = arith.constant dense<0.000000e+00> : vector<240x32xf32>
    %25 = tpu.matmul %14, %24, %cst_20 {dimension_numbers = #tpu.dot_dimension_numbers<[1], [0], [0], [1], [0, 0, 1, 1], [], []>} : vector<240x32xf32>, vector<32x32xf32>, vector<240x32xf32> -> vector<240x32xf32>
    %26 = vector.shape_cast %25 : vector<240x32xf32> to vector<10x24x32xf32>
    %27 = vector.extract_strided_slice %26 {offsets = [0, 0, 0], sizes = [8, 24, 32], strides = [1, 1, 1]} : vector<10x24x32xf32> to vector<8x24x32xf32>
    %28 = arith.addf %22, %27 : vector<8x24x32xf32>
    %c2 = arith.constant 2 : index
    %c0_21 = arith.constant 0 : index
    %c0_22 = arith.constant 0 : index
    %29 = vector.load %arg5[%c2, %c0_21, %c0_22] : memref<9x32x32xf32, #tpu.memory_space<vmem>>, vector<1x32x32xf32>
    %30 = vector.shape_cast %29 : vector<1x32x32xf32> to vector<32x32xf32>
    %cst_23 = arith.constant dense<0.000000e+00> : vector<240x32xf32>
    %31 = tpu.matmul %14, %30, %cst_23 {dimension_numbers = #tpu.dot_dimension_numbers<[1], [0], [0], [1], [0, 0, 1, 1], [], []>} : vector<240x32xf32>, vector<32x32xf32>, vector<240x32xf32> -> vector<240x32xf32>
    %c239_i32 = arith.constant 239 : i32
    %32 = tpu.dynamic_rotate %31 by %c239_i32 dim 0 : vector<240x32xf32>, i32 -> vector<240x32xf32>
    %33 = vector.shape_cast %32 : vector<240x32xf32> to vector<10x24x32xf32>
    %34 = vector.extract_strided_slice %33 {offsets = [0, 0, 0], sizes = [8, 24, 32], strides = [1, 1, 1]} : vector<10x24x32xf32> to vector<8x24x32xf32>
    %35 = arith.addf %28, %34 : vector<8x24x32xf32>
    %c3 = arith.constant 3 : index
    %c0_24 = arith.constant 0 : index
    %c0_25 = arith.constant 0 : index
    %36 = vector.load %arg5[%c3, %c0_24, %c0_25] : memref<9x32x32xf32, #tpu.memory_space<vmem>>, vector<1x32x32xf32>
    %37 = vector.shape_cast %36 : vector<1x32x32xf32> to vector<32x32xf32>
    %cst_26 = arith.constant dense<0.000000e+00> : vector<240x32xf32>
    %38 = tpu.matmul %14, %37, %cst_26 {dimension_numbers = #tpu.dot_dimension_numbers<[1], [0], [0], [1], [0, 0, 1, 1], [], []>} : vector<240x32xf32>, vector<32x32xf32>, vector<240x32xf32> -> vector<240x32xf32>
    %c1_i32_27 = arith.constant 1 : i32
    %39 = tpu.dynamic_rotate %38 by %c1_i32_27 dim 0 : vector<240x32xf32>, i32 -> vector<240x32xf32>
    %40 = vector.shape_cast %39 : vector<240x32xf32> to vector<10x24x32xf32>
    %41 = vector.extract_strided_slice %40 {offsets = [1, 0, 0], sizes = [8, 24, 32], strides = [1, 1, 1]} : vector<10x24x32xf32> to vector<8x24x32xf32>
    %42 = arith.addf %35, %41 : vector<8x24x32xf32>
    %c4 = arith.constant 4 : index
    %c0_28 = arith.constant 0 : index
    %c0_29 = arith.constant 0 : index
    %43 = vector.load %arg5[%c4, %c0_28, %c0_29] : memref<9x32x32xf32, #tpu.memory_space<vmem>>, vector<1x32x32xf32>
    %44 = vector.shape_cast %43 : vector<1x32x32xf32> to vector<32x32xf32>
    %cst_30 = arith.constant dense<0.000000e+00> : vector<240x32xf32>
    %45 = tpu.matmul %14, %44, %cst_30 {dimension_numbers = #tpu.dot_dimension_numbers<[1], [0], [0], [1], [0, 0, 1, 1], [], []>} : vector<240x32xf32>, vector<32x32xf32>, vector<240x32xf32> -> vector<240x32xf32>
    %46 = vector.shape_cast %45 : vector<240x32xf32> to vector<10x24x32xf32>
    %47 = vector.extract_strided_slice %46 {offsets = [1, 0, 0], sizes = [8, 24, 32], strides = [1, 1, 1]} : vector<10x24x32xf32> to vector<8x24x32xf32>
    %48 = arith.addf %42, %47 : vector<8x24x32xf32>
    %c5 = arith.constant 5 : index
    %c0_31 = arith.constant 0 : index
    %c0_32 = arith.constant 0 : index
    %49 = vector.load %arg5[%c5, %c0_31, %c0_32] : memref<9x32x32xf32, #tpu.memory_space<vmem>>, vector<1x32x32xf32>
    %50 = vector.shape_cast %49 : vector<1x32x32xf32> to vector<32x32xf32>
    %cst_33 = arith.constant dense<0.000000e+00> : vector<240x32xf32>
    %51 = tpu.matmul %14, %50, %cst_33 {dimension_numbers = #tpu.dot_dimension_numbers<[1], [0], [0], [1], [0, 0, 1, 1], [], []>} : vector<240x32xf32>, vector<32x32xf32>, vector<240x32xf32> -> vector<240x32xf32>
    %c239_i32_34 = arith.constant 239 : i32
    %52 = tpu.dynamic_rotate %51 by %c239_i32_34 dim 0 : vector<240x32xf32>, i32 -> vector<240x32xf32>
    %53 = vector.shape_cast %52 : vector<240x32xf32> to vector<10x24x32xf32>
    %54 = vector.extract_strided_slice %53 {offsets = [1, 0, 0], sizes = [8, 24, 32], strides = [1, 1, 1]} : vector<10x24x32xf32> to vector<8x24x32xf32>
    %55 = arith.addf %48, %54 : vector<8x24x32xf32>
    %c6 = arith.constant 6 : index
    %c0_35 = arith.constant 0 : index
    %c0_36 = arith.constant 0 : index
    %56 = vector.load %arg5[%c6, %c0_35, %c0_36] : memref<9x32x32xf32, #tpu.memory_space<vmem>>, vector<1x32x32xf32>
    %57 = vector.shape_cast %56 : vector<1x32x32xf32> to vector<32x32xf32>
    %cst_37 = arith.constant dense<0.000000e+00> : vector<240x32xf32>
    %58 = tpu.matmul %14, %57, %cst_37 {dimension_numbers = #tpu.dot_dimension_numbers<[1], [0], [0], [1], [0, 0, 1, 1], [], []>} : vector<240x32xf32>, vector<32x32xf32>, vector<240x32xf32> -> vector<240x32xf32>
    %c1_i32_38 = arith.constant 1 : i32
    %59 = tpu.dynamic_rotate %58 by %c1_i32_38 dim 0 : vector<240x32xf32>, i32 -> vector<240x32xf32>
    %60 = vector.shape_cast %59 : vector<240x32xf32> to vector<10x24x32xf32>
    %61 = vector.extract_strided_slice %60 {offsets = [2, 0, 0], sizes = [8, 24, 32], strides = [1, 1, 1]} : vector<10x24x32xf32> to vector<8x24x32xf32>
    %62 = arith.addf %55, %61 : vector<8x24x32xf32>
    %c7 = arith.constant 7 : index
    %c0_39 = arith.constant 0 : index
    %c0_40 = arith.constant 0 : index
    %63 = vector.load %arg5[%c7, %c0_39, %c0_40] : memref<9x32x32xf32, #tpu.memory_space<vmem>>, vector<1x32x32xf32>
    %64 = vector.shape_cast %63 : vector<1x32x32xf32> to vector<32x32xf32>
    %cst_41 = arith.constant dense<0.000000e+00> : vector<240x32xf32>
    %65 = tpu.matmul %14, %64, %cst_41 {dimension_numbers = #tpu.dot_dimension_numbers<[1], [0], [0], [1], [0, 0, 1, 1], [], []>} : vector<240x32xf32>, vector<32x32xf32>, vector<240x32xf32> -> vector<240x32xf32>
    %66 = vector.shape_cast %65 : vector<240x32xf32> to vector<10x24x32xf32>
    %67 = vector.extract_strided_slice %66 {offsets = [2, 0, 0], sizes = [8, 24, 32], strides = [1, 1, 1]} : vector<10x24x32xf32> to vector<8x24x32xf32>
    %68 = arith.addf %62, %67 : vector<8x24x32xf32>
    %c8 = arith.constant 8 : index
    %c0_42 = arith.constant 0 : index
    %c0_43 = arith.constant 0 : index
    %69 = vector.load %arg5[%c8, %c0_42, %c0_43] : memref<9x32x32xf32, #tpu.memory_space<vmem>>, vector<1x32x32xf32>
    %70 = vector.shape_cast %69 : vector<1x32x32xf32> to vector<32x32xf32>
    %cst_44 = arith.constant dense<0.000000e+00> : vector<240x32xf32>
    %71 = tpu.matmul %14, %70, %cst_44 {dimension_numbers = #tpu.dot_dimension_numbers<[1], [0], [0], [1], [0, 0, 1, 1], [], []>} : vector<240x32xf32>, vector<32x32xf32>, vector<240x32xf32> -> vector<240x32xf32>
    %c239_i32_45 = arith.constant 239 : i32
    %72 = tpu.dynamic_rotate %71 by %c239_i32_45 dim 0 : vector<240x32xf32>, i32 -> vector<240x32xf32>
    %73 = vector.shape_cast %72 : vector<240x32xf32> to vector<10x24x32xf32>
    %74 = vector.extract_strided_slice %73 {offsets = [2, 0, 0], sizes = [8, 24, 32], strides = [1, 1, 1]} : vector<10x24x32xf32> to vector<8x24x32xf32>
    %75 = arith.addf %68, %74 : vector<8x24x32xf32>
    %c0_46 = arith.constant 0 : index
    %c0_47 = arith.constant 0 : index
    %76 = vector.load %arg6[%c0_46, %c0_47] : memref<1x32xf32, #tpu.memory_space<vmem>>, vector<1x32xf32>
    %77 = vector.shape_cast %76 : vector<1x32xf32> to vector<32xf32>
    %78 = vector.shape_cast %77 : vector<32xf32> to vector<1x1x32xf32>
    %79 = vector.broadcast %78 : vector<1x1x32xf32> to vector<8x24x32xf32>
    %80 = arith.addf %75, %79 : vector<8x24x32xf32>
    %cst_48 = arith.constant 0.000000e+00 : f32
    %81 = vector.broadcast %cst_48 : f32 to vector<8x24x32xf32>
    %82 = arith.cmpf ogt, %80, %81 : vector<8x24x32xf32>
    %cst_49 = arith.constant 1.000000e-01 : f32
    %83 = vector.broadcast %cst_49 : f32 to vector<8x24x32xf32>
    %84 = arith.mulf %83, %80 : vector<8x24x32xf32>
    %85 = arith.select %82, %80, %84 : vector<8x24x32xi1>, vector<8x24x32xf32>
    %86 = tpu.iota {dimensions = array<i32: 1>} : vector<1x24x1xi32>
    %c1_i32_50 = arith.constant 1 : i32
    %87 = vector.broadcast %c1_i32_50 : i32 to vector<1x24x1xi32>
    %88 = arith.cmpi sge, %86, %87 : vector<1x24x1xi32>
    %c16_i32 = arith.constant 16 : i32
    %89 = vector.broadcast %c16_i32 : i32 to vector<1x24x1xi32>
    %90 = arith.cmpi sle, %86, %89 : vector<1x24x1xi32>
    %91 = arith.andi %88, %90 : vector<1x24x1xi1>
    %cst_51 = arith.constant 0.000000e+00 : f32
    %92 = vector.shape_cast %91 : vector<1x24x1xi1> to vector<1x24x1xi1>
    %93 = vector.broadcast %92 : vector<1x24x1xi1> to vector<8x24x32xi1>
    %94 = vector.broadcast %cst_51 : f32 to vector<8x24x32xf32>
    %95 = arith.select %93, %85, %94 : vector<8x24x32xi1>, vector<8x24x32xf32>
    %c0_52 = arith.constant 0 : index
    %c0_53 = arith.constant 0 : index
    %c0_54 = arith.constant 0 : index
    %c0_55 = arith.constant 0 : index
    %96 = vector.load %arg7[%c0_52, %c0_53, %c0_54, %c0_55] : memref<1x8x24x32xf32, #tpu.memory_space<vmem>>, vector<1x8x24x32xf32>
    %97 = vector.shape_cast %96 : vector<1x8x24x32xf32> to vector<8x24x32xf32>
    %98 = vector.shape_cast %95 : vector<8x24x32xf32> to vector<1x8x24x32xf32>
    tpu.vector_store %arg7[%c0_52, %c0_53, %c0_54, %c0_55], %98 {strides = array<i32>} : memref<1x8x24x32xf32, #tpu.memory_space<vmem>>, vector<1x8x24x32xf32>,
    return
  }
  func.func @transform_0(%arg0: i32, %arg1: i32) -> (i32, i32, i32, i32) {
    %c0_i32 = arith.constant 0 : i32
    %c0_i32_0 = arith.constant 0 : i32
    %c0_i32_1 = arith.constant 0 : i32
    return %arg0, %arg1, %c0_i32, %c0_i32_0 : i32, i32, i32, i32
  }
  func.func @transform_1(%arg0: i32, %arg1: i32) -> (i32, i32, i32, i32) {
    %c8_i32 = arith.constant 8 : i32
    %0 = arith.muli %arg1, %c8_i32 : i32
    %c1_i32 = arith.constant 1 : i32
    %1 = arith.subi %0, %c1_i32 : i32
    %c0_i32 = arith.constant 0 : i32
    %2 = arith.maxsi %1, %c0_i32 : i32
    %c0_i32_0 = arith.constant 0 : i32
    %c0_i32_1 = arith.constant 0 : i32
    %c0_i32_2 = arith.constant 0 : i32
    return %arg0, %2, %c0_i32_0, %c0_i32_1 : i32, i32, i32, i32
  }
  func.func @transform_2(%arg0: i32, %arg1: i32) -> (i32, i32, i32, i32) {
    %c1_i32 = arith.constant 1 : i32
    %0 = arith.addi %arg1, %c1_i32 : i32
    %c8_i32 = arith.constant 8 : i32
    %1 = arith.muli %0, %c8_i32 : i32
    %c15_i32 = arith.constant 15 : i32
    %2 = arith.minsi %1, %c15_i32 : i32
    %c0_i32 = arith.constant 0 : i32
    %c0_i32_0 = arith.constant 0 : i32
    %c0_i32_1 = arith.constant 0 : i32
    return %arg0, %2, %c0_i32, %c0_i32_0 : i32, i32, i32, i32
  }
  func.func @transform_3(%arg0: i32, %arg1: i32) -> (i32, i32, i32) {
    %c0_i32 = arith.constant 0 : i32
    %c0_i32_0 = arith.constant 0 : i32
    %c0_i32_1 = arith.constant 0 : i32
    %c0_i32_2 = arith.constant 0 : i32
    return %c0_i32, %c0_i32_0, %c0_i32_1 : i32, i32, i32
  }
  func.func @transform_4(%arg0: i32, %arg1: i32) -> (i32, i32) {
    %c0_i32 = arith.constant 0 : i32
    %c0_i32_0 = arith.constant 0 : i32
    %c0_i32_1 = arith.constant 0 : i32
    return %c0_i32, %c0_i32_0 : i32, i32
  }
  func.func @transform_5(%arg0: i32, %arg1: i32) -> (i32, i32, i32, i32) {
    %c0_i32 = arith.constant 0 : i32
    %c0_i32_0 = arith.constant 0 : i32
    %c0_i32_1 = arith.constant 0 : i32
    return %arg0, %arg1, %c0_i32, %c0_i32_0 : i32, i32, i32, i32
  }
}

module attributes {stable_mosaic.version = 11 : i64} {
  func.func @conv3x3_head_kernel(%arg0: i32, %arg1: i32, %arg2: memref<1x8x24x32xf32, #tpu.memory_space<vmem>>, %arg3: memref<1x1x24x32xf32, #tpu.memory_space<vmem>>, %arg4: memref<1x1x24x32xf32, #tpu.memory_space<vmem>>, %arg5: memref<9x32x32xf32, #tpu.memory_space<vmem>>, %arg6: memref<1x32xf32, #tpu.memory_space<vmem>>, %arg7: memref<32x32xf32, #tpu.memory_space<vmem>>, %arg8: memref<1x32xf32, #tpu.memory_space<vmem>>, %arg9: memref<1x32xf32, #tpu.memory_space<vmem>>, %arg10: memref<1x1xf32, #tpu.memory_space<vmem>>, %arg11: memref<1x1x8x16xf32, #tpu.memory_space<vmem>>) attributes {dimension_semantics = [#tpu.dimension_semantics<parallel>, #tpu.dimension_semantics<parallel>], iteration_bounds = array<i64: 2, 2>, scalar_prefetch = 0 : i64, scratch_operands = 0 : i64, tpu.core_type = #tpu.core_type<tc>, window_params = [{transform_indices = @transform_0, window_bounds = array<i64: 1, 8, 24, 32>}, {transform_indices = @transform_1, window_bounds = array<i64: 1, 1, 24, 32>}, {transform_indices = @transform_2, window_bounds = array<i64: 1, 1, 24, 32>}, {pipeline_mode = #tpu.pipeline_mode<synchronous>, transform_indices = @transform_3, window_bounds = array<i64: 9, 32, 32>}, {pipeline_mode = #tpu.pipeline_mode<synchronous>, transform_indices = @transform_4, window_bounds = array<i64: 1, 32>}, {pipeline_mode = #tpu.pipeline_mode<synchronous>, transform_indices = @transform_5, window_bounds = array<i64: 32, 32>}, {pipeline_mode = #tpu.pipeline_mode<synchronous>, transform_indices = @transform_6, window_bounds = array<i64: 1, 32>}, {pipeline_mode = #tpu.pipeline_mode<synchronous>, transform_indices = @transform_7, window_bounds = array<i64: 1, 32>}, {pipeline_mode = #tpu.pipeline_mode<synchronous>, transform_indices = @transform_8, window_bounds = array<i64: 1, 1>}, {transform_indices = @transform_9, window_bounds = array<i64: 1, 1, 8, 16>}]} {
    %c0_i32 = arith.constant 0 : i32
    %0 = arith.cmpi sgt, %arg1, %c0_i32 : i32
    %c0 = arith.constant 0 : index
    %c0_0 = arith.constant 0 : index
    %c0_1 = arith.constant 0 : index
    %c0_2 = arith.constant 0 : index
    %1 = vector.load %arg3[%c0, %c0_0, %c0_1, %c0_2] : memref<1x1x24x32xf32, #tpu.memory_space<vmem>>, vector<1x1x24x32xf32>
    %2 = vector.shape_cast %1 : vector<1x1x24x32xf32> to vector<1x24x32xf32>
    %cst = arith.constant 0.000000e+00 : f32
    %3 = vector.broadcast %cst : f32 to vector<1x24x32xf32>
    %4 = arith.select %0, %2, %3 : vector<1x24x32xf32>
    %c1_i32 = arith.constant 1 : i32
    %5 = arith.addi %arg1, %c1_i32 : i32
    %c2_i32 = arith.constant 2 : i32
    %6 = arith.cmpi slt, %5, %c2_i32 : i32
    %c0_3 = arith.constant 0 : index
    %c0_4 = arith.constant 0 : index
    %c0_5 = arith.constant 0 : index
    %c0_6 = arith.constant 0 : index
    %7 = vector.load %arg4[%c0_3, %c0_4, %c0_5, %c0_6] : memref<1x1x24x32xf32, #tpu.memory_space<vmem>>, vector<1x1x24x32xf32>
    %8 = vector.shape_cast %7 : vector<1x1x24x32xf32> to vector<1x24x32xf32>
    %cst_7 = arith.constant 0.000000e+00 : f32
    %9 = vector.broadcast %cst_7 : f32 to vector<1x24x32xf32>
    %10 = arith.select %6, %8, %9 : vector<1x24x32xf32>
    %c0_8 = arith.constant 0 : index
    %c0_9 = arith.constant 0 : index
    %c0_10 = arith.constant 0 : index
    %c0_11 = arith.constant 0 : index
    %11 = vector.load %arg2[%c0_8, %c0_9, %c0_10, %c0_11] : memref<1x8x24x32xf32, #tpu.memory_space<vmem>>, vector<1x8x24x32xf32>
    %12 = vector.shape_cast %11 : vector<1x8x24x32xf32> to vector<8x24x32xf32>
    %13 = tpu.concatenate %4, %12, %10 in 0 : vector<1x24x32xf32>, vector<8x24x32xf32>, vector<1x24x32xf32> -> vector<10x24x32xf32>
    %14 = vector.shape_cast %13 : vector<10x24x32xf32> to vector<240x32xf32>
    %cst_12 = arith.constant 0.000000e+00 : f32
    %15 = vector.broadcast %cst_12 : f32 to vector<8x24x32xf32>
    %c0_13 = arith.constant 0 : index
    %c0_14 = arith.constant 0 : index
    %c0_15 = arith.constant 0 : index
    %16 = vector.load %arg5[%c0_13, %c0_14, %c0_15] : memref<9x32x32xf32, #tpu.memory_space<vmem>>, vector<1x32x32xf32>
    %17 = vector.shape_cast %16 : vector<1x32x32xf32> to vector<32x32xf32>
    %cst_16 = arith.constant dense<0.000000e+00> : vector<240x32xf32>
    %18 = tpu.matmul %14, %17, %cst_16 {dimension_numbers = #tpu.dot_dimension_numbers<[1], [0], [0], [1], [0, 0, 1, 1], [], []>} : vector<240x32xf32>, vector<32x32xf32>, vector<240x32xf32> -> vector<240x32xf32>
    %c1_i32_17 = arith.constant 1 : i32
    %19 = tpu.dynamic_rotate %18 by %c1_i32_17 dim 0 : vector<240x32xf32>, i32 -> vector<240x32xf32>
    %20 = vector.shape_cast %19 : vector<240x32xf32> to vector<10x24x32xf32>
    %21 = vector.extract_strided_slice %20 {offsets = [0, 0, 0], sizes = [8, 24, 32], strides = [1, 1, 1]} : vector<10x24x32xf32> to vector<8x24x32xf32>
    %22 = arith.addf %15, %21 : vector<8x24x32xf32>
    %c1 = arith.constant 1 : index
    %c0_18 = arith.constant 0 : index
    %c0_19 = arith.constant 0 : index
    %23 = vector.load %arg5[%c1, %c0_18, %c0_19] : memref<9x32x32xf32, #tpu.memory_space<vmem>>, vector<1x32x32xf32>
    %24 = vector.shape_cast %23 : vector<1x32x32xf32> to vector<32x32xf32>
    %cst_20 = arith.constant dense<0.000000e+00> : vector<240x32xf32>
    %25 = tpu.matmul %14, %24, %cst_20 {dimension_numbers = #tpu.dot_dimension_numbers<[1], [0], [0], [1], [0, 0, 1, 1], [], []>} : vector<240x32xf32>, vector<32x32xf32>, vector<240x32xf32> -> vector<240x32xf32>
    %26 = vector.shape_cast %25 : vector<240x32xf32> to vector<10x24x32xf32>
    %27 = vector.extract_strided_slice %26 {offsets = [0, 0, 0], sizes = [8, 24, 32], strides = [1, 1, 1]} : vector<10x24x32xf32> to vector<8x24x32xf32>
    %28 = arith.addf %22, %27 : vector<8x24x32xf32>
    %c2 = arith.constant 2 : index
    %c0_21 = arith.constant 0 : index
    %c0_22 = arith.constant 0 : index
    %29 = vector.load %arg5[%c2, %c0_21, %c0_22] : memref<9x32x32xf32, #tpu.memory_space<vmem>>, vector<1x32x32xf32>
    %30 = vector.shape_cast %29 : vector<1x32x32xf32> to vector<32x32xf32>
    %cst_23 = arith.constant dense<0.000000e+00> : vector<240x32xf32>
    %31 = tpu.matmul %14, %30, %cst_23 {dimension_numbers = #tpu.dot_dimension_numbers<[1], [0], [0], [1], [0, 0, 1, 1], [], []>} : vector<240x32xf32>, vector<32x32xf32>, vector<240x32xf32> -> vector<240x32xf32>
    %c239_i32 = arith.constant 239 : i32
    %32 = tpu.dynamic_rotate %31 by %c239_i32 dim 0 : vector<240x32xf32>, i32 -> vector<240x32xf32>
    %33 = vector.shape_cast %32 : vector<240x32xf32> to vector<10x24x32xf32>
    %34 = vector.extract_strided_slice %33 {offsets = [0, 0, 0], sizes = [8, 24, 32], strides = [1, 1, 1]} : vector<10x24x32xf32> to vector<8x24x32xf32>
    %35 = arith.addf %28, %34 : vector<8x24x32xf32>
    %c3 = arith.constant 3 : index
    %c0_24 = arith.constant 0 : index
    %c0_25 = arith.constant 0 : index
    %36 = vector.load %arg5[%c3, %c0_24, %c0_25] : memref<9x32x32xf32, #tpu.memory_space<vmem>>, vector<1x32x32xf32>
    %37 = vector.shape_cast %36 : vector<1x32x32xf32> to vector<32x32xf32>
    %cst_26 = arith.constant dense<0.000000e+00> : vector<240x32xf32>
    %38 = tpu.matmul %14, %37, %cst_26 {dimension_numbers = #tpu.dot_dimension_numbers<[1], [0], [0], [1], [0, 0, 1, 1], [], []>} : vector<240x32xf32>, vector<32x32xf32>, vector<240x32xf32> -> vector<240x32xf32>
    %c1_i32_27 = arith.constant 1 : i32
    %39 = tpu.dynamic_rotate %38 by %c1_i32_27 dim 0 : vector<240x32xf32>, i32 -> vector<240x32xf32>
    %40 = vector.shape_cast %39 : vector<240x32xf32> to vector<10x24x32xf32>
    %41 = vector.extract_strided_slice %40 {offsets = [1, 0, 0], sizes = [8, 24, 32], strides = [1, 1, 1]} : vector<10x24x32xf32> to vector<8x24x32xf32>
    %42 = arith.addf %35, %41 : vector<8x24x32xf32>
    %c4 = arith.constant 4 : index
    %c0_28 = arith.constant 0 : index
    %c0_29 = arith.constant 0 : index
    %43 = vector.load %arg5[%c4, %c0_28, %c0_29] : memref<9x32x32xf32, #tpu.memory_space<vmem>>, vector<1x32x32xf32>
    %44 = vector.shape_cast %43 : vector<1x32x32xf32> to vector<32x32xf32>
    %cst_30 = arith.constant dense<0.000000e+00> : vector<240x32xf32>
    %45 = tpu.matmul %14, %44, %cst_30 {dimension_numbers = #tpu.dot_dimension_numbers<[1], [0], [0], [1], [0, 0, 1, 1], [], []>} : vector<240x32xf32>, vector<32x32xf32>, vector<240x32xf32> -> vector<240x32xf32>
    %46 = vector.shape_cast %45 : vector<240x32xf32> to vector<10x24x32xf32>
    %47 = vector.extract_strided_slice %46 {offsets = [1, 0, 0], sizes = [8, 24, 32], strides = [1, 1, 1]} : vector<10x24x32xf32> to vector<8x24x32xf32>
    %48 = arith.addf %42, %47 : vector<8x24x32xf32>
    %c5 = arith.constant 5 : index
    %c0_31 = arith.constant 0 : index
    %c0_32 = arith.constant 0 : index
    %49 = vector.load %arg5[%c5, %c0_31, %c0_32] : memref<9x32x32xf32, #tpu.memory_space<vmem>>, vector<1x32x32xf32>
    %50 = vector.shape_cast %49 : vector<1x32x32xf32> to vector<32x32xf32>
    %cst_33 = arith.constant dense<0.000000e+00> : vector<240x32xf32>
    %51 = tpu.matmul %14, %50, %cst_33 {dimension_numbers = #tpu.dot_dimension_numbers<[1], [0], [0], [1], [0, 0, 1, 1], [], []>} : vector<240x32xf32>, vector<32x32xf32>, vector<240x32xf32> -> vector<240x32xf32>
    %c239_i32_34 = arith.constant 239 : i32
    %52 = tpu.dynamic_rotate %51 by %c239_i32_34 dim 0 : vector<240x32xf32>, i32 -> vector<240x32xf32>
    %53 = vector.shape_cast %52 : vector<240x32xf32> to vector<10x24x32xf32>
    %54 = vector.extract_strided_slice %53 {offsets = [1, 0, 0], sizes = [8, 24, 32], strides = [1, 1, 1]} : vector<10x24x32xf32> to vector<8x24x32xf32>
    %55 = arith.addf %48, %54 : vector<8x24x32xf32>
    %c6 = arith.constant 6 : index
    %c0_35 = arith.constant 0 : index
    %c0_36 = arith.constant 0 : index
    %56 = vector.load %arg5[%c6, %c0_35, %c0_36] : memref<9x32x32xf32, #tpu.memory_space<vmem>>, vector<1x32x32xf32>
    %57 = vector.shape_cast %56 : vector<1x32x32xf32> to vector<32x32xf32>
    %cst_37 = arith.constant dense<0.000000e+00> : vector<240x32xf32>
    %58 = tpu.matmul %14, %57, %cst_37 {dimension_numbers = #tpu.dot_dimension_numbers<[1], [0], [0], [1], [0, 0, 1, 1], [], []>} : vector<240x32xf32>, vector<32x32xf32>, vector<240x32xf32> -> vector<240x32xf32>
    %c1_i32_38 = arith.constant 1 : i32
    %59 = tpu.dynamic_rotate %58 by %c1_i32_38 dim 0 : vector<240x32xf32>, i32 -> vector<240x32xf32>
    %60 = vector.shape_cast %59 : vector<240x32xf32> to vector<10x24x32xf32>
    %61 = vector.extract_strided_slice %60 {offsets = [2, 0, 0], sizes = [8, 24, 32], strides = [1, 1, 1]} : vector<10x24x32xf32> to vector<8x24x32xf32>
    %62 = arith.addf %55, %61 : vector<8x24x32xf32>
    %c7 = arith.constant 7 : index
    %c0_39 = arith.constant 0 : index
    %c0_40 = arith.constant 0 : index
    %63 = vector.load %arg5[%c7, %c0_39, %c0_40] : memref<9x32x32xf32, #tpu.memory_space<vmem>>, vector<1x32x32xf32>
    %64 = vector.shape_cast %63 : vector<1x32x32xf32> to vector<32x32xf32>
    %cst_41 = arith.constant dense<0.000000e+00> : vector<240x32xf32>
    %65 = tpu.matmul %14, %64, %cst_41 {dimension_numbers = #tpu.dot_dimension_numbers<[1], [0], [0], [1], [0, 0, 1, 1], [], []>} : vector<240x32xf32>, vector<32x32xf32>, vector<240x32xf32> -> vector<240x32xf32>
    %66 = vector.shape_cast %65 : vector<240x32xf32> to vector<10x24x32xf32>
    %67 = vector.extract_strided_slice %66 {offsets = [2, 0, 0], sizes = [8, 24, 32], strides = [1, 1, 1]} : vector<10x24x32xf32> to vector<8x24x32xf32>
    %68 = arith.addf %62, %67 : vector<8x24x32xf32>
    %c8 = arith.constant 8 : index
    %c0_42 = arith.constant 0 : index
    %c0_43 = arith.constant 0 : index
    %69 = vector.load %arg5[%c8, %c0_42, %c0_43] : memref<9x32x32xf32, #tpu.memory_space<vmem>>, vector<1x32x32xf32>
    %70 = vector.shape_cast %69 : vector<1x32x32xf32> to vector<32x32xf32>
    %cst_44 = arith.constant dense<0.000000e+00> : vector<240x32xf32>
    %71 = tpu.matmul %14, %70, %cst_44 {dimension_numbers = #tpu.dot_dimension_numbers<[1], [0], [0], [1], [0, 0, 1, 1], [], []>} : vector<240x32xf32>, vector<32x32xf32>, vector<240x32xf32> -> vector<240x32xf32>
    %c239_i32_45 = arith.constant 239 : i32
    %72 = tpu.dynamic_rotate %71 by %c239_i32_45 dim 0 : vector<240x32xf32>, i32 -> vector<240x32xf32>
    %73 = vector.shape_cast %72 : vector<240x32xf32> to vector<10x24x32xf32>
    %74 = vector.extract_strided_slice %73 {offsets = [2, 0, 0], sizes = [8, 24, 32], strides = [1, 1, 1]} : vector<10x24x32xf32> to vector<8x24x32xf32>
    %75 = arith.addf %68, %74 : vector<8x24x32xf32>
    %c0_46 = arith.constant 0 : index
    %c0_47 = arith.constant 0 : index
    %76 = vector.load %arg6[%c0_46, %c0_47] : memref<1x32xf32, #tpu.memory_space<vmem>>, vector<1x32xf32>
    %77 = vector.shape_cast %76 : vector<1x32xf32> to vector<32xf32>
    %78 = vector.shape_cast %77 : vector<32xf32> to vector<1x1x32xf32>
    %79 = vector.broadcast %78 : vector<1x1x32xf32> to vector<8x24x32xf32>
    %80 = arith.addf %75, %79 : vector<8x24x32xf32>
    %cst_48 = arith.constant 0.000000e+00 : f32
    %81 = vector.broadcast %cst_48 : f32 to vector<8x24x32xf32>
    %82 = arith.cmpf ogt, %80, %81 : vector<8x24x32xf32>
    %cst_49 = arith.constant 1.000000e-01 : f32
    %83 = vector.broadcast %cst_49 : f32 to vector<8x24x32xf32>
    %84 = arith.mulf %83, %80 : vector<8x24x32xf32>
    %85 = arith.select %82, %80, %84 : vector<8x24x32xi1>, vector<8x24x32xf32>
    %86 = vector.shape_cast %85 : vector<8x24x32xf32> to vector<192x32xf32>
    %c0_50 = arith.constant 0 : index
    %c0_51 = arith.constant 0 : index
    %87 = vector.load %arg7[%c0_50, %c0_51] : memref<32x32xf32, #tpu.memory_space<vmem>>, vector<32x32xf32>
    %cst_52 = arith.constant dense<0.000000e+00> : vector<192x32xf32>
    %88 = tpu.matmul %86, %87, %cst_52 {dimension_numbers = #tpu.dot_dimension_numbers<[1], [0], [0], [1], [0, 0, 1, 1], [], []>} : vector<192x32xf32>, vector<32x32xf32>, vector<192x32xf32> -> vector<192x32xf32>
    %c0_53 = arith.constant 0 : index
    %c0_54 = arith.constant 0 : index
    %89 = vector.load %arg8[%c0_53, %c0_54] : memref<1x32xf32, #tpu.memory_space<vmem>>, vector<1x32xf32>
    %90 = vector.shape_cast %89 : vector<1x32xf32> to vector<32xf32>
    %91 = vector.shape_cast %90 : vector<32xf32> to vector<1x32xf32>
    %92 = vector.broadcast %91 : vector<1x32xf32> to vector<192x32xf32>
    %93 = arith.addf %88, %92 : vector<192x32xf32>
    %cst_55 = arith.constant 0.000000e+00 : f32
    %94 = vector.broadcast %cst_55 : f32 to vector<192x32xf32>
    %95 = arith.cmpf ogt, %93, %94 : vector<192x32xf32>
    %cst_56 = arith.constant 1.000000e-01 : f32
    %96 = vector.broadcast %cst_56 : f32 to vector<192x32xf32>
    %97 = arith.mulf %96, %93 : vector<192x32xf32>
    %98 = arith.select %95, %93, %97 : vector<192x32xi1>, vector<192x32xf32>
    %c0_57 = arith.constant 0 : index
    %c0_58 = arith.constant 0 : index
    %99 = vector.load %arg9[%c0_57, %c0_58] : memref<1x32xf32, #tpu.memory_space<vmem>>, vector<1x32xf32>
    %cst_59 = arith.constant dense<0.000000e+00> : vector<1x192xf32>
    %100 = tpu.matmul %99, %98, %cst_59 {dimension_numbers = #tpu.dot_dimension_numbers<[1], [1], [0], [0], [0, 0, 1, 0], [], []>} : vector<1x32xf32>, vector<192x32xf32>, vector<1x192xf32> -> vector<1x192xf32>
    %c0_60 = arith.constant 0 : index
    %c0_61 = arith.constant 0 : index
    %101 = vector.load %arg10[%c0_60, %c0_61] : memref<1x1xf32, #tpu.memory_space<vmem>>, vector<1x1xf32>
    %102 = vector.broadcast %101 : vector<1x1xf32> to vector<1x192xf32>
    %103 = arith.addf %100, %102 : vector<1x192xf32>
    %cst_62 = arith.constant 0.000000e+00 : f32
    %104 = vector.broadcast %cst_62 : f32 to vector<1x192xf32>
    %105 = arith.subf %104, %103 : vector<1x192xf32>
    %106 = math.exp %105 : vector<1x192xf32>
    %cst_63 = arith.constant 1.000000e+00 : f32
    %107 = vector.broadcast %cst_63 : f32 to vector<1x192xf32>
    %108 = arith.addf %107, %106 : vector<1x192xf32>
    %cst_64 = arith.constant 1.000000e+00 : f32
    %109 = vector.broadcast %cst_64 : f32 to vector<1x192xf32>
    %110 = arith.divf %109, %108 : vector<1x192xf32>
    %111 = vector.shape_cast %110 : vector<1x192xf32> to vector<1x8x24xf32>
    %112 = vector.extract_strided_slice %111 {offsets = [0, 0, 1], sizes = [1, 8, 16], strides = [1, 1, 1]} : vector<1x8x24xf32> to vector<1x8x16xf32>
    %c0_65 = arith.constant 0 : index
    %c0_66 = arith.constant 0 : index
    %c0_67 = arith.constant 0 : index
    %c0_68 = arith.constant 0 : index
    %113 = vector.load %arg11[%c0_65, %c0_66, %c0_67, %c0_68] : memref<1x1x8x16xf32, #tpu.memory_space<vmem>>, vector<1x1x8x16xf32>
    %114 = vector.shape_cast %113 : vector<1x1x8x16xf32> to vector<1x8x16xf32>
    %115 = vector.shape_cast %112 : vector<1x8x16xf32> to vector<1x1x8x16xf32>
    tpu.vector_store %arg11[%c0_65, %c0_66, %c0_67, %c0_68], %115 {strides = array<i32>} : memref<1x1x8x16xf32, #tpu.memory_space<vmem>>, vector<1x1x8x16xf32>,
    return
  }
  func.func @transform_0(%arg0: i32, %arg1: i32) -> (i32, i32, i32, i32) {
    %c0_i32 = arith.constant 0 : i32
    %c0_i32_0 = arith.constant 0 : i32
    %c0_i32_1 = arith.constant 0 : i32
    return %arg0, %arg1, %c0_i32, %c0_i32_0 : i32, i32, i32, i32
  }
  func.func @transform_1(%arg0: i32, %arg1: i32) -> (i32, i32, i32, i32) {
    %c8_i32 = arith.constant 8 : i32
    %0 = arith.muli %arg1, %c8_i32 : i32
    %c1_i32 = arith.constant 1 : i32
    %1 = arith.subi %0, %c1_i32 : i32
    %c0_i32 = arith.constant 0 : i32
    %2 = arith.maxsi %1, %c0_i32 : i32
    %c0_i32_0 = arith.constant 0 : i32
    %c0_i32_1 = arith.constant 0 : i32
    %c0_i32_2 = arith.constant 0 : i32
    return %arg0, %2, %c0_i32_0, %c0_i32_1 : i32, i32, i32, i32
  }
  func.func @transform_2(%arg0: i32, %arg1: i32) -> (i32, i32, i32, i32) {
    %c1_i32 = arith.constant 1 : i32
    %0 = arith.addi %arg1, %c1_i32 : i32
    %c8_i32 = arith.constant 8 : i32
    %1 = arith.muli %0, %c8_i32 : i32
    %c15_i32 = arith.constant 15 : i32
    %2 = arith.minsi %1, %c15_i32 : i32
    %c0_i32 = arith.constant 0 : i32
    %c0_i32_0 = arith.constant 0 : i32
    %c0_i32_1 = arith.constant 0 : i32
    return %arg0, %2, %c0_i32, %c0_i32_0 : i32, i32, i32, i32
  }
  func.func @transform_3(%arg0: i32, %arg1: i32) -> (i32, i32, i32) {
    %c0_i32 = arith.constant 0 : i32
    %c0_i32_0 = arith.constant 0 : i32
    %c0_i32_1 = arith.constant 0 : i32
    %c0_i32_2 = arith.constant 0 : i32
    return %c0_i32, %c0_i32_0, %c0_i32_1 : i32, i32, i32
  }
  func.func @transform_4(%arg0: i32, %arg1: i32) -> (i32, i32) {
    %c0_i32 = arith.constant 0 : i32
    %c0_i32_0 = arith.constant 0 : i32
    %c0_i32_1 = arith.constant 0 : i32
    return %c0_i32, %c0_i32_0 : i32, i32
  }
  func.func @transform_5(%arg0: i32, %arg1: i32) -> (i32, i32) {
    %c0_i32 = arith.constant 0 : i32
    %c0_i32_0 = arith.constant 0 : i32
    %c0_i32_1 = arith.constant 0 : i32
    return %c0_i32, %c0_i32_0 : i32, i32
  }
  func.func @transform_6(%arg0: i32, %arg1: i32) -> (i32, i32) {
    %c0_i32 = arith.constant 0 : i32
    %c0_i32_0 = arith.constant 0 : i32
    %c0_i32_1 = arith.constant 0 : i32
    return %c0_i32, %c0_i32_0 : i32, i32
  }
  func.func @transform_7(%arg0: i32, %arg1: i32) -> (i32, i32) {
    %c0_i32 = arith.constant 0 : i32
    %c0_i32_0 = arith.constant 0 : i32
    %c0_i32_1 = arith.constant 0 : i32
    return %c0_i32, %c0_i32_0 : i32, i32
  }
  func.func @transform_8(%arg0: i32, %arg1: i32) -> (i32, i32) {
    %c0_i32 = arith.constant 0 : i32
    %c0_i32_0 = arith.constant 0 : i32
    %c0_i32_1 = arith.constant 0 : i32
    return %c0_i32, %c0_i32_0 : i32, i32
  }
  func.func @transform_9(%arg0: i32, %arg1: i32) -> (i32, i32, i32, i32) {
    %c0_i32 = arith.constant 0 : i32
    %c0_i32_0 = arith.constant 0 : i32
    %c0_i32_1 = arith.constant 0 : i32
    return %arg0, %c0_i32, %arg1, %c0_i32_0 : i32, i32, i32, i32
  }
}

</mosaic_0001>

<bundles_post_ra>
// kernel: multi_classification_forward.4
= control target key start
LH: loop header
LB: loop body
LE: loop exit
PB: predicated region body
PF: predicated region fallthrough
CT: control target
= control target key end

     0   :  { %s4615_s18 = smov 0   ;;  %s4617_s19 = smov 0   ;;  %s6240_s0 = inlined_call_operand.vmem [shape: f32[2,16,24,32], index: 0, kind: input, shape index: {}, may-alias: {0,1,2}]   ;;  %s6241_s1 = inlined_call_operand.vmem [shape: f32[2,16,24,32], index: 1, kind: input, shape index: {}, may-alias: {0,1,2}]   ;;  %s6242_s2 = inlined_call_operand.vmem [shape: f32[2,16,24,32], index: 2, kind: input, shape index: {}, may-alias: {0,1,2}]   ;;  %s6243_s3 = inlined_call_operand.vmem [shape: f32[9,32,32], index: 3, kind: input, shape index: {}]   ;;  %s6244_s4 = inlined_call_operand.vmem [shape: f32[1,32], index: 4, kind: input, shape index: {}]   ;;  %s6245_s5 = inlined_call_operand.vmem [shape: f32[2,16,24,32], index: 5, kind: output, shape index: {}]  }
   0x1   :  { %s4619_s20 = smov 0   ;;  %s4621_s21 = smov 0  }
   0x2   :  { %s4623_s22 = smov 0  }
   0x3 LB: > { %s24_s23 = sadd.s32 1, %s4575_s20  ;;  %s27_s24 = sadd.s32 1, %s4579_s21  ;;  %s4583_s22 = sphi %s4623_s22, %s15_s22   ;;  %s4579_s21 = sphi %s4621_s21, %s6251_s21   ;;  %s4575_s20 = sphi %s4619_s20, %s6250_s20   ;;  %s4571_s19 = sphi %s4617_s19, %s6249_s19   ;;  %s4567_s18 = sphi %s4615_s18, %s6248_s18  }
   0x4   : > { %p25_p0 = scmp.ge.s32.totalorder %s24_s23, 2  ;;  %p3293_p1 = scmp.ge.s32.totalorder %s4583_s22, 1 }
   0x5   : > { %p273_p2 = scmp.lt.s32.totalorder %s4583_s22, 5 }
   0x6   : > { %s6253_s23 = smov (%p25_p0, %s24_s23), 0  ;;  %s6255_s24 = smov (!%p25_p0, %s27_s24), %s4579_s21 }
   0x7   : > { %p274_p3 = pnand %p3293_p1, %p273_p2  ;;  %p29_p4 = scmp.ge.s32.totalorder %s6255_s24, 2 }
   0x8   : > { %v438_v0 = vld [vmem:[%s6243_s3] sm:$0xff] (!%p274_p3)  ;;  %v439_v1 = vld [vmem:[%s6243_s3 + $0x8] sm:$0xff] (!%p274_p3)  ;;  %v440_v2 = vld [vmem:[%s6243_s3 + $0x10] sm:$0xff] (!%p274_p3)  ;;  %s4657_s6 = sshll.u32 (!%p274_p3), %s4567_s18, 3  ;;  %p338_p5 = scmp.lt.s32.totalorder (!%p274_p3), %s4571_s19, 1  ;;  %vm442_vm0 = vcmask (!%p274_p3), 261120  }
   0x9   : > { %s6257_s24 = smov (%p29_p4, %s6255_s24), 0  ;;  %277 = sbr.rel (%p274_p3) target bundleno = 530 (0x212), region = 40 }
   0xa   : > { %v4407_v3 = vpack.c.bf16 (!%p274_p3), %v439_v1, %v438_v0  ;;  %v441_v4 = vld [vmem:[%s6243_s3 + $0x18] sm:$0xff] (!%p274_p3)  ;;  %p340_p6 = scmp.lt.s32.totalorder (!%p274_p3), %s4657_s6, 15  ;;  %s4664_s9 = sadd.s32 (!%p274_p3), 4294967295, %s4657_s6  ;;  %v3375_v5 = vld [vmem:[%s6243_s3 + $0x40] sm:$0xff] (!%p274_p3)  ;;  %v3376_v7 = vld [vmem:[%s6243_s3 + $0x48] sm:$0xff] (!%p274_p3) }
   0xb   : > { %v4411_v6 = vpack.c.bf16 (!%p274_p3), %v441_v4, %v440_v2  ;;  %v3341_v8 = vld [vmem:[%s6243_s3 + $0x20] sm:$0xff] (!%p274_p3)  ;;  %v3342_v9 = vld [vmem:[%s6243_s3 + $0x28] sm:$0xff] (!%p274_p3)  ;;  %p350_p7 = scmp.gt.s32.totalorder (!%p274_p3), %s4664_s9, 0  ;;  %p3298_p8 = scmp.lt.s32.totalorder (!%p274_p3), %s4664_s9, 15  ;;  %v4423_v10 = vpack.c.bf16 (!%p274_p3), %v3376_v7, %v3375_v5  ;;  %v3343_v12 = vld [vmem:[%s6243_s3 + $0x30] sm:$0xff] (!%p274_p3) }
   0xc   : > { %4479 = vmatprep.subr.bf16.mxu1 (!%p274_p3), %v4407_v3  ;;  %4408 = vmatprep.subr.bf16.mxu0 (!%p274_p3), %v4407_v3  ;;  %v4415_v11 = vpack.c.bf16 (!%p274_p3), %v3342_v9, %v3341_v8  ;;  %p393_p9 = scmp.gt.s32.totalorder (!%p274_p3), %s4567_s18, 0  ;;  %v3344_v13 = vld [vmem:[%s6243_s3 + $0x38] sm:$0xff] (!%p274_p3)  ;;  %s3623_s14 = sadd.s32 (!%p274_p3), 8, %s4657_s6  ;;  %v3409_v18 = vld [vmem:[%s6243_s3 + $0x60] sm:$0xff] (!%p274_p3)  ;;  %v3410_v19 = vld [vmem:[%s6243_s3 + $0x68] sm:$0xff] (!%p274_p3) }
   0xd   : > { %4481 = vmatpush3.bf16.msra.mxu1 (!%p274_p3), %v4407_v3  ;;  %4410 = vmatpush3.bf16.msra.mxu0 (!%p274_p3), %v4407_v3  ;;  %v4419_v17 = vpack.c.bf16 (!%p274_p3), %v3344_v13, %v3343_v12  ;;  %p4726_p10 = scmp.lt.s32.totalorder (!%p274_p3), %s3623_s14, 15  ;;  %s403_s30 = sadd.s32 (!%p274_p3), 1, %s4567_s18  ;;  %v4740_v22 = vpack.c.bf16 (!%p274_p3), %v3410_v19, %v3409_v18  ;;  %v3377_v23 = vld [vmem:[%s6243_s3 + $0x50] sm:$0xff] (!%p274_p3)  ;;  %v3378_v24 = vld [vmem:[%s6243_s3 + $0x58] sm:$0xff] (!%p274_p3)  ;;  %v3443_v30 = vld [vmem:[%s6243_s3 + $0x80] sm:$0xff] (!%p274_p3) }
   0xe   : > { %4480 = vmatprep.subr.bf16.mxu1 (!%p274_p3), %v4411_v6  ;;  %4412 = vmatprep.subr.bf16.mxu0 (!%p274_p3), %v4411_v6  ;;  %p4753_p11 = scmp.lt.s32.totalorder (!%p274_p3), %s403_s30, 2  ;;  %v4427_v28 = vpack.c.bf16 (!%p274_p3), %v3378_v24, %v3377_v23  ;;  %v3444_v31 = vld [vmem:[%s6243_s3 + $0x88] sm:$0xff] (!%p274_p3)  ;;  %v3411_v49 = vld [vmem:[%s6243_s3 + $0x70] sm:$0xff] (!%p274_p3)  ;;  %v3412_v50 = vld [vmem:[%s6243_s3 + $0x78] sm:$0xff] (!%p274_p3) }
   0xf   : > { %v4808_v37 = vpack.c.bf16 (!%p274_p3), %v3444_v31, %v3443_v30  ;;  %v4435_v53 = vpack.c.bf16 (!%p274_p3), %v3412_v50, %v3411_v49  ;;  %v3477_v54 = vld [vmem:[%s6243_s3 + $0xa0] sm:$0xff] (!%p274_p3)  ;;  %v3478_v55 = vld [vmem:[%s6243_s3 + $0xa8] sm:$0xff] (!%p274_p3)  ;;  %v3445_v60 = vld [vmem:[%s6243_s3 + $0x90] sm:$0xff] (!%p274_p3) }
  0x10   : > { %s6259_s19 = smov (!%p338_p5, %s4571_s19), 1  ;;  %s6263_s14 = smov (!%p4726_p10, %s3623_s14), 15  ;;  %v4912_v58 = vpack.c.bf16 %v3478_v55, %v3477_v54  ;;  %v3446_v61 = vld [vmem:[%s6243_s3 + $0x98] sm:$0xff]  ;;  %v3511_v63 = vld [vmem:[%s6243_s3 + $0xc0] sm:$0xff]  ;;  %v3512_v0 = vld [vmem:[%s6243_s3 + $0xc8] sm:$0xff] }
  0x11   : > { %s341_s25 = scalar_select %p340_p6, %s4657_s6, 15  ;;  %4482 = vmatpush3.bf16.msra.mxu1 %v4411_v6  ;;  %4414 = vmatpush3.bf16.msra.mxu0 %v4411_v6  ;;  %v4443_v62 = vpack.c.bf16 %v3446_v61, %v3445_v60  ;;  %v4955_v1 = vpack.c.bf16 %v3512_v0, %v3511_v63  ;;  %v3479_v2 = vld [vmem:[%s6243_s3 + $0xb0] sm:$0xff]  ;;  %v3480_v3 = vld [vmem:[%s6243_s3 + $0xb8] sm:$0xff]  ;;  %v3545_v5 = vld [vmem:[%s6243_s3 + $0xe0] sm:$0xff] }
  0x12   : > { %s4679_s26 = smul.u32 48, %s6259_s19  ;;  %4424 = vmatprep.subr.bf16.mxu0 %v4423_v10  ;;  %4416 = vmatprep.subr.bf16.mxu1 %v4415_v11  ;;  %s6265_s14 = smov (!%p4726_p10, %s6263_s14), 15  ;;  %v4451_v4 = vpack.c.bf16 %v3480_v3, %v3479_v2  ;;  %v3546_v6 = vld [vmem:[%s6243_s3 + $0xe8] sm:$0xff]  ;;  %v3513_v8 = vld [vmem:[%s6243_s3 + $0xd0] sm:$0xff]  ;;  %v3514_v9 = vld [vmem:[%s6243_s3 + $0xd8] sm:$0xff] }
  0x13   : > { %s4483_s27 = smul.u32 3, %s341_s25  ;;  %v5067_v7 = vpack.c.bf16 %v3546_v6, %v3545_v5  ;;  %v3580_v12 = vld [vmem:[%s6243_s3 + $0x108] sm:$0xff]  ;;  %v3548_v18 = vld [vmem:[%s6243_s3 + $0xf8] sm:$0xff] }
  0x14   : > { %s351_s28 = scalar_select %p350_p7, %s4664_s9, 0  ;;  %v3582_v23 = vld [vmem:[%s6243_s3 + $0x118] sm:$0xff] }
  0x15   : > { %s4685_s29 = sadd.s32 %s4679_s26, %s4483_s27  ;;  %s4486_s6 = smul.u32 3, %s6265_s14 }
  0x16   : > { %s3295_s10 = sshll.u32 %s4685_s29, 3  ;;  %s6261_s28 = smov (!%p3298_p8, %s351_s28), 15 }
  0x17   : > { %s4700_s13 = scalar_lea.vmem %s6240_s0, %s3295_s10  ;;  %s4485_s27 = smul.u32 3, %s6261_s28 }
  0x18   : > { %v4704_v14 = vld [vmem:[%s4700_s13 + $0x68] sm:$0xff]  ;;  %v4707_v15 = vld [vmem:[%s4700_s13 + $0x70] sm:$0xff]  ;;  %v4712_v16 = vld [vmem:[%s4700_s13 + $0x78] sm:$0xff]  ;;  %s4537_s9 = scalar_select %p4753_p11, 255, 0 }
  0x19   : > { %3962 = vmatprep.mubr.msk.f32.mxu1 %vm442_vm0, %v4704_v14  ;;  %v4733_v20 = vld [vmem:[%s4700_s13 + $0x80] sm:$0xff]  ;;  %s358_s7 = sadd.s32 %s4485_s27, %s4679_s26  ;;  %v4738_v21 = vld [vmem:[%s4700_s13 + $0x88] sm:$0xff]  ;;  %v4762_v25 = vld [vmem:[%s4700_s13 + $0x90] sm:$0xff]  ;;  %s375_s14 = sadd.s32 %s4486_s6, %s4679_s26 }
  0x1a   : > { %3963 = vmatmul.mubr.msk.f32.vlgmr.msra.gmra.mrb[0].mxu1 %vm442_vm0, %v4707_v15  ;;  %s3303_s28 = sshll.u32 %s358_s7, 3  ;;  %v4765_v26 = vld [vmem:[%s4700_s13 + $0x98] sm:$0xff]  ;;  %v4793_v33 = vld [vmem:[%s4700_s13 + $0xa0] sm:$0xff]  ;;  %v4801_v35 = vld [vmem:[%s4700_s13 + $0xa8] sm:$0xff]  ;;  %s3308_s19 = sshll.u32 %s375_s14, 3 }
  0x1b   : > { %3965 = vmatprep.mubr.msk.f32.mxu1 %vm442_vm0, %v4712_v16  ;;  %4418 = vmatpush3.bf16.msra.mxu1 %v4415_v11  ;;  %s360_s11 = scalar_lea.vmem %s6241_s1, %s3303_s28  ;;  %v4798_v34 = vld [vmem:[%s4700_s13] sm:$0xff]  ;;  %v4806_v36 = vld [vmem:[%s4700_s13 + $0x8] sm:$0xff]  ;;  %v4817_v38 = vld [vmem:[%s4700_s13 + $0xb0] sm:$0xff]  ;;  %s377_s12 = scalar_lea.vmem %s6242_s2, %s3308_s19 }
  0x1c   : > { %4420 = vmatprep.subr.bf16.mxu1 %v4419_v17  ;;  %s4528_s27 = scalar_select %p393_p9, 255, 0  ;;  %v4824_v39 = vld [vmem:[%s4700_s13 + $0x10] sm:$0xff]  ;;  %v4827_v40 = vld [vmem:[%s4700_s13 + $0xb8] sm:$0xff]  ;;  %v4843_v42 = vld [vmem:[%s377_s12] sm:%s4537_s9] }
  0x1d   : > { %v4831_v41 = vld [vmem:[%s4700_s13 + $0x18] sm:$0xff]  ;;  %v4848_v43 = vld [vmem:[%s4700_s13 + $0x20] sm:$0xff]  ;;  %v4851_v44 = vld [vmem:[%s4700_s13 + $0x28] sm:$0xff]  ;;  %s6026_s7 = scalar_lea.vmem %s6245_s5, %s3295_s10 }
  0x1e   : > { %3966 = vmatmul.mubr.msk.f32.gmra.mrb[2].mxu1 %vm442_vm0, %v4733_v20  ;;  %v4768_v27 = vld [vmem:[%s360_s11] sm:%s4528_s27]  ;;  %v4772_v29 = vld [vmem:[%s360_s11 + $0x8] sm:%s4528_s27] }
  0x1f   : > { %3968 = vmatprep.mubr.msk.f32.mxu1 %vm442_vm0, %v4738_v21  ;;  %4422 = vmatpush3.bf16.msra.mxu1 %v4419_v17  ;;  %v4788_v32 = vld [vmem:[%s360_s11 + $0x10] sm:%s4528_s27]  ;;  %v4853_v45 = vld [vmem:[%s377_s12 + $0x8] sm:%s4537_s9] }
  0x20   : > { %4432 = vmatprep.subr.bf16.mxu1 %v4740_v22  ;;  %3938 = vmatprep.mubr.msk.f32.mxu0 %vm442_vm0, %v4768_v27  ;;  %v4861_v46 = vld [vmem:[%s377_s12 + $0x10] sm:%s4537_s9]  ;;  %v4869_v48 = vld [vmem:[%s4700_s13 + $0x38] sm:$0xff]  ;;  %v4886_v51 = vld [vmem:[%s4700_s13 + $0x40] sm:$0xff] }
  0x21   : > { %3939 = vmatmul.mubr.msk.f32.vlgmr.msra.gmra.mrb[0].mxu0 %vm442_vm0, %v4772_v29  ;;  %v4866_v47 = vld [vmem:[%s4700_s13 + $0x30] sm:$0xff]  ;;  %v4889_v52 = vld [vmem:[%s4700_s13 + $0x48] sm:$0xff]  ;;  %v4910_v57 = vld [vmem:[%s4700_s13 + $0x58] sm:$0xff] }
  0x22   : > { %3969 = vmatmul.mubr.msk.f32.gmra.mrb[4].mxu1 %vm442_vm0, %v4762_v25  ;;  %4426 = vmatpush3.bf16.msra.mxu0 %v4423_v10  ;;  %v4906_v56 = vld [vmem:[%s4700_s13 + $0x50] sm:$0xff]  ;;  %v4923_v59 = vld [vmem:[%s4700_s13 + $0x60] sm:$0xff]  ;;  %v4459_v10 = vpack.c.bf16 %v3514_v9, %v3513_v8 }
  0x23   : > { %3971 = vmatprep.mubr.msk.f32.mxu1 %vm442_vm0, %v4765_v26  ;;  %3941 = vmatprep.mubr.msk.f32.mxu0 %vm442_vm0, %v4788_v32  ;;  %v3579_v11 = vld [vmem:[%s6243_s3 + $0x100] sm:$0xff]  ;;  %v3547_v17 = vld [vmem:[%s6243_s3 + $0xf0] sm:$0xff] }
  0x24   : > { %4428 = vmatprep.subr.bf16.mxu0 %v4427_v28  ;;  %v5107_v13 = vpack.c.bf16 %v3580_v12, %v3579_v11  ;;  %v4467_v19 = vpack.c.bf16 %v3548_v18, %v3547_v17 }
  0x25   : > { %3942 = vmatmul.mubr.msk.f32.gmra.mrb[2].mxu0 %vm442_vm0, %v4798_v34 }
  0x26   : > { %3972 = vmatmul.mubr.msk.f32.gmra.mrb[6].mxu1 %vm442_vm0, %v4793_v33  ;;  %3944 = vmatprep.mubr.msk.f32.mxu0 %vm442_vm0, %v4806_v36 }
  0x27   : > { %3974 = vmatprep.mubr.msk.f32.mxu1 %vm442_vm0, %v4801_v35  ;;  %4430 = vmatpush3.bf16.msra.mxu0 %v4427_v28  ;;  %v768_v28 = vlaneseq }
  0x28   : > { %4440 = vmatprep.subr.bf16.mxu0 %v4808_v37 }
  0x29   : > { %3945 = vmatmul.mubr.msk.f32.gmra.mrb[4].mxu0 %vm442_vm0, %v4824_v39  ;;  %v5340_v30 = vshrl.u32 %v768_v28, 7 }
  0x2a   : > { %3975 = vmatmul.mubr.msk.f32.gmra.mrb[8].mxu1 %vm442_vm0, %v4817_v38  ;;  %3947 = vmatprep.mubr.msk.f32.mxu0 %vm442_vm0, %v4831_v41 }
  0x2b   : > { %3977 = vmatprep.mubr.msk.f32.mxu1 %vm442_vm0, %v4827_v40  ;;  %vm770_vm1 = vcmp.lt.s32.totalorder %v5340_v30, 1  ;;  %vm1297_vm2 = vcmp.lt.s32.totalorder %v5340_v30, 7  ;;  %vm3079_vm3 = vcmp.ge.s32.totalorder %v5340_v30, 1 }
  0x2d   : > { %3948 = vmatmul.mubr.msk.f32.gmra.mrb[6].mxu0 %vm442_vm0, %v4848_v43 }
  0x2e   : > { %3978 = vmatmul.mubr.msk.f32.gmra.mrb[10].mxu1 %vm442_vm0, %v4843_v42  ;;  %3950 = vmatprep.mubr.msk.f32.mxu0 %vm442_vm0, %v4851_v44 }
  0x2f   : > { %3980 = vmatprep.mubr.msk.f32.mxu1 %vm442_vm0, %v4853_v45 }
  0x31   : > { %3951 = vmatmul.mubr.msk.f32.gmra.mrb[8].mxu0 %vm442_vm0, %v4866_v47 }
  0x32   : > { %3981 = vmatmul.mubr.msk.f32.gmra.mrb[12].mxu1 %vm442_vm0, %v4861_v46  ;;  %3953 = vmatprep.mubr.msk.f32.mxu0 %vm442_vm0, %v4869_v48 }
  0x33   : > { %3991 = vmatprep.mubr.msk.f32.mxu1 %vm442_vm0, %v4768_v27 }
  0x35   : > { %3954 = vmatmul.mubr.msk.f32.gmra.mrb[10].mxu0 %vm442_vm0, %v4886_v51 }
  0x36   : > { %3992 = vmatmul.mubr.msk.f32.vlgmr.msra.gmra.mrb[14].mxu1 %vm442_vm0, %v4772_v29  ;;  %3956 = vmatprep.mubr.msk.f32.mxu0 %vm442_vm0, %v4889_v52 }
  0x37   : > { %3994 = vmatprep.mubr.msk.f32.mxu1 %vm442_vm0, %v4788_v32  ;;  %4434 = vmatpush3.bf16.msra.mxu1 %v4740_v22  ;;  %v3581_v22 = vld [vmem:[%s6243_s3 + $0x110] sm:$0xff] }
  0x38   : > { %4436 = vmatprep.subr.bf16.mxu1 %v4435_v53  ;;  %v4475_v24 = vpack.c.bf16 %v3582_v23, %v3581_v22 }
  0x39   : > { %3957 = vmatmul.mubr.msk.f32.gmra.mrb[12].mxu0 %vm442_vm0, %v4906_v56 }
  0x3a   : > { %3995 = vmatmul.mubr.msk.f32.gmra.mrb[16].mxu1 %vm442_vm0, %v4798_v34  ;;  %3959 = vmatprep.mubr.msk.f32.mxu0 %vm442_vm0, %v4910_v57 }
  0x3b   : > { %3997 = vmatprep.mubr.msk.f32.mxu1 %vm442_vm0, %v4806_v36  ;;  %4438 = vmatpush3.bf16.msra.mxu1 %v4435_v53 }
  0x3c   : > { %4448 = vmatprep.subr.bf16.mxu1 %v4912_v58 }
  0x3d   : > { %3960 = vmatmul.mubr.msk.f32.gmra.mrb[14].mxu0 %vm442_vm0, %v4923_v59 }
  0x3e   : > { %3998 = vmatmul.mubr.msk.f32.gmra.mrb[18].mxu1 %vm442_vm0, %v4824_v39  ;;  %4044 = vmatprep.mubr.msk.f32.mxu0 %vm442_vm0, %v4768_v27 }
  0x3f   : > { %4000 = vmatprep.mubr.msk.f32.mxu1 %vm442_vm0, %v4831_v41 }
  0x41   : > { %4045 = vmatmul.mubr.msk.f32.vlgmr.msra.gmra.mrb[16].mxu0 %vm442_vm0, %v4772_v29 }
  0x42   : > { %4001 = vmatmul.mubr.msk.f32.gmra.mrb[20].mxu1 %vm442_vm0, %v4848_v43  ;;  %4442 = vmatpush3.bf16.msra.mxu0 %v4808_v37 }
  0x43   : > { %4003 = vmatprep.mubr.msk.f32.mxu1 %vm442_vm0, %v4851_v44  ;;  %4047 = vmatprep.mubr.msk.f32.mxu0 %vm442_vm0, %v4788_v32 }
  0x44   : > { %4444 = vmatprep.subr.bf16.mxu0 %v4443_v62 }
  0x45   : > { %4048 = vmatmul.mubr.msk.f32.gmra.mrb[18].mxu0 %vm442_vm0, %v4798_v34 }
  0x46   : > { %4004 = vmatmul.mubr.msk.f32.gmra.mrb[22].mxu1 %vm442_vm0, %v4866_v47  ;;  %4050 = vmatprep.mubr.msk.f32.mxu0 %vm442_vm0, %v4806_v36 }
  0x47   : > { %4006 = vmatprep.mubr.msk.f32.mxu1 %vm442_vm0, %v4869_v48  ;;  %4446 = vmatpush3.bf16.msra.mxu0 %v4443_v62 }
  0x48   : > { %4456 = vmatprep.subr.bf16.mxu0 %v4955_v1 }
  0x49   : > { %4051 = vmatmul.mubr.msk.f32.gmra.mrb[20].mxu0 %vm442_vm0, %v4824_v39 }
  0x4a   : > { %4007 = vmatmul.mubr.msk.f32.gmra.mrb[24].mxu1 %vm442_vm0, %v4886_v51  ;;  %4053 = vmatprep.mubr.msk.f32.mxu0 %vm442_vm0, %v4831_v41 }
  0x4b   : > { %4009 = vmatprep.mubr.msk.f32.mxu1 %vm442_vm0, %v4889_v52 }
  0x4d   : > { %4054 = vmatmul.mubr.msk.f32.gmra.mrb[22].mxu0 %vm442_vm0, %v4848_v43 }
  0x4e   : > { %4010 = vmatmul.mubr.msk.f32.gmra.mrb[26].mxu1 %vm442_vm0, %v4906_v56  ;;  %4056 = vmatprep.mubr.msk.f32.mxu0 %vm442_vm0, %v4851_v44 }
  0x4f   : > { %4012 = vmatprep.mubr.msk.f32.mxu1 %vm442_vm0, %v4910_v57 }
  0x51   : > { %4057 = vmatmul.mubr.msk.f32.gmra.mrb[24].mxu0 %vm442_vm0, %v4866_v47 }
  0x52   : > { %4013 = vmatmul.mubr.msk.f32.gmra.mrb[28].mxu1 %vm442_vm0, %v4923_v59  ;;  %4059 = vmatprep.mubr.msk.f32.mxu0 %vm442_vm0, %v4869_v48 }
  0x53   : > { %4015 = vmatprep.mubr.msk.f32.mxu1 %vm442_vm0, %v4704_v14 }
  0x55   : > { %4060 = vmatmul.mubr.msk.f32.gmra.mrb[26].mxu0 %vm442_vm0, %v4886_v51 }
  0x56   : > { %4016 = vmatmul.mubr.msk.f32.gmra.mrb[30].mxu1 %vm442_vm0, %v4707_v15  ;;  %4062 = vmatprep.mubr.msk.f32.mxu0 %vm442_vm0, %v4889_v52 }
  0x57   : > { %4018 = vmatprep.mubr.msk.f32.mxu1 %vm442_vm0, %v4712_v16 }
  0x59   : > { %4063 = vmatmul.mubr.msk.f32.gmra.mrb[28].mxu0 %vm442_vm0, %v4906_v56 }
  0x5a   : > { %4019 = vmatmul.mubr.msk.f32.gmra.mrb[32].mxu1 %vm442_vm0, %v4733_v20  ;;  %4065 = vmatprep.mubr.msk.f32.mxu0 %vm442_vm0, %v4910_v57 }
  0x5b   : > { %4021 = vmatprep.mubr.msk.f32.mxu1 %vm442_vm0, %v4738_v21 }
  0x5d   : > { %4066 = vmatmul.mubr.msk.f32.gmra.mrb[30].mxu0 %vm442_vm0, %v4923_v59 }
  0x5e   : > { %4022 = vmatmul.mubr.msk.f32.gmra.mrb[34].mxu1 %vm442_vm0, %v4762_v25  ;;  %4068 = vmatprep.mubr.msk.f32.mxu0 %vm442_vm0, %v4704_v14 }
  0x5f   : > { %4024 = vmatprep.mubr.msk.f32.mxu1 %vm442_vm0, %v4765_v26 }
  0x61   : > { %4069 = vmatmul.mubr.msk.f32.gmra.mrb[32].mxu0 %vm442_vm0, %v4707_v15 }
  0x62   : > { %4025 = vmatmul.mubr.msk.f32.gmra.mrb[36].mxu1 %vm442_vm0, %v4793_v33  ;;  %4071 = vmatprep.mubr.msk.f32.mxu0 %vm442_vm0, %v4712_v16 }
  0x63   : > { %4027 = vmatprep.mubr.msk.f32.mxu1 %vm442_vm0, %v4801_v35 }
  0x65   : > { %4072 = vmatmul.mubr.msk.f32.gmra.mrb[34].mxu0 %vm442_vm0, %v4733_v20 }
  0x66   : > { %4028 = vmatmul.mubr.msk.f32.gmra.mrb[38].mxu1 %vm442_vm0, %v4817_v38  ;;  %4074 = vmatprep.mubr.msk.f32.mxu0 %vm442_vm0, %v4738_v21 }
  0x67   : > { %4030 = vmatprep.mubr.msk.f32.mxu1 %vm442_vm0, %v4827_v40 }
  0x69   : > { %4075 = vmatmul.mubr.msk.f32.gmra.mrb[36].mxu0 %vm442_vm0, %v4762_v25 }
  0x6a   : > { %4031 = vmatmul.mubr.msk.f32.gmra.mrb[40].mxu1 %vm442_vm0, %v4843_v42  ;;  %4077 = vmatprep.mubr.msk.f32.mxu0 %vm442_vm0, %v4765_v26 }
  0x6b   : > { %4033 = vmatprep.mubr.msk.f32.mxu1 %vm442_vm0, %v4853_v45 }
  0x6d   : > { %4078 = vmatmul.mubr.msk.f32.gmra.mrb[38].mxu0 %vm442_vm0, %v4793_v33 }
  0x6e   : > { %4034 = vmatmul.mubr.msk.f32.gmra.mrb[42].mxu1 %vm442_vm0, %v4861_v46  ;;  %4080 = vmatprep.mubr.msk.f32.mxu0 %vm442_vm0, %v4801_v35 }
  0x6f   : > { %4097 = vmatprep.mubr.msk.f32.mxu1 %vm442_vm0, %v4768_v27 }
  0x71   : > { %4081 = vmatmul.mubr.msk.f32.gmra.mrb[40].mxu0 %vm442_vm0, %v4817_v38 }
  0x72   : > { %4098 = vmatmul.mubr.msk.f32.vlgmr.msra.gmra.mrb[44].mxu1 %vm442_vm0, %v4772_v29  ;;  %4083 = vmatprep.mubr.msk.f32.mxu0 %vm442_vm0, %v4827_v40 }
  0x73   : > { %4100 = vmatprep.mubr.msk.f32.mxu1 %vm442_vm0, %v4788_v32  ;;  %4450 = vmatpush3.bf16.msra.mxu1 %v4912_v58 }
  0x74   : > { %4452 = vmatprep.subr.bf16.mxu1 %v4451_v4 }
  0x75   : > { %4084 = vmatmul.mubr.msk.f32.gmra.mrb[42].mxu0 %vm442_vm0, %v4843_v42 }
  0x76   : > { %4101 = vmatmul.mubr.msk.f32.gmra.mrb[46].mxu1 %vm442_vm0, %v4798_v34  ;;  %4086 = vmatprep.mubr.msk.f32.mxu0 %vm442_vm0, %v4853_v45 }
  0x77   : > { %4103 = vmatprep.mubr.msk.f32.mxu1 %vm442_vm0, %v4806_v36  ;;  %4454 = vmatpush3.bf16.msra.mxu1 %v4451_v4 }
  0x78   : > { %4464 = vmatprep.subr.bf16.mxu1 %v5067_v7 }
  0x79   : > { %4087 = vmatmul.mubr.msk.f32.gmra.mrb[44].mxu0 %vm442_vm0, %v4861_v46 }
  0x7a   : > { %4104 = vmatmul.mubr.msk.f32.gmra.mrb[48].mxu1 %vm442_vm0, %v4824_v39  ;;  %4150 = vmatprep.mubr.msk.f32.mxu0 %vm442_vm0, %v4768_v27 }
  0x7b   : > { %4106 = vmatprep.mubr.msk.f32.mxu1 %vm442_vm0, %v4831_v41 }
  0x7d   : > { %4151 = vmatmul.mubr.msk.f32.vlgmr.msra.gmra.mrb[46].mxu0 %vm442_vm0, %v4772_v29 }
  0x7e   : > { %4107 = vmatmul.mubr.msk.f32.gmra.mrb[50].mxu1 %vm442_vm0, %v4848_v43  ;;  %4458 = vmatpush3.bf16.msra.mxu0 %v4955_v1 }
  0x7f   : > { %4109 = vmatprep.mubr.msk.f32.mxu1 %vm442_vm0, %v4851_v44  ;;  %4153 = vmatprep.mubr.msk.f32.mxu0 %vm442_vm0, %v4788_v32 }
  0x80   : > { %4460 = vmatprep.subr.bf16.mxu0 %v4459_v10 }
  0x81   : > { %4154 = vmatmul.mubr.msk.f32.gmra.mrb[48].mxu0 %vm442_vm0, %v4798_v34 }
  0x82   : > { %4110 = vmatmul.mubr.msk.f32.gmra.mrb[52].mxu1 %vm442_vm0, %v4866_v47  ;;  %4156 = vmatprep.mubr.msk.f32.mxu0 %vm442_vm0, %v4806_v36 }
  0x83   : > { %4112 = vmatprep.mubr.msk.f32.mxu1 %vm442_vm0, %v4869_v48  ;;  %4462 = vmatpush3.bf16.msra.mxu0 %v4459_v10 }
  0x84   : > { %4472 = vmatprep.subr.bf16.mxu0 %v5107_v13 }
  0x85   : > { %4157 = vmatmul.mubr.msk.f32.gmra.mrb[50].mxu0 %vm442_vm0, %v4824_v39 }
  0x86   : > { %4113 = vmatmul.mubr.msk.f32.gmra.mrb[54].mxu1 %vm442_vm0, %v4886_v51  ;;  %4159 = vmatprep.mubr.msk.f32.mxu0 %vm442_vm0, %v4831_v41 }
  0x87   : > { %4115 = vmatprep.mubr.msk.f32.mxu1 %vm442_vm0, %v4889_v52 }
  0x89   : > { %4160 = vmatmul.mubr.msk.f32.gmra.mrb[52].mxu0 %vm442_vm0, %v4848_v43 }
  0x8a   : > { %4116 = vmatmul.mubr.msk.f32.gmra.mrb[56].mxu1 %vm442_vm0, %v4906_v56  ;;  %4162 = vmatprep.mubr.msk.f32.mxu0 %vm442_vm0, %v4851_v44 }
  0x8b   : > { %4118 = vmatprep.mubr.msk.f32.mxu1 %vm442_vm0, %v4910_v57 }
  0x8d   : > { %4163 = vmatmul.mubr.msk.f32.gmra.mrb[54].mxu0 %vm442_vm0, %v4866_v47 }
  0x8e   : > { %4119 = vmatmul.mubr.msk.f32.gmra.mrb[58].mxu1 %vm442_vm0, %v4923_v59  ;;  %4165 = vmatprep.mubr.msk.f32.mxu0 %vm442_vm0, %v4869_v48 }
  0x8f   : > { %4121 = vmatprep.mubr.msk.f32.mxu1 %vm442_vm0, %v4704_v14 }
  0x91   : > { %4166 = vmatmul.mubr.msk.f32.gmra.mrb[56].mxu0 %vm442_vm0, %v4886_v51 }
  0x92   : > { %4122 = vmatmul.mubr.msk.f32.gmra.mrb[60].mxu1 %vm442_vm0, %v4707_v15  ;;  %4168 = vmatprep.mubr.msk.f32.mxu0 %vm442_vm0, %v4889_v52 }
  0x93   : > { %4124 = vmatprep.mubr.msk.f32.mxu1 %vm442_vm0, %v4712_v16 }
  0x95   : > { %4169 = vmatmul.mubr.msk.f32.gmra.mrb[58].mxu0 %vm442_vm0, %v4906_v56 }
  0x96   : > { %4125 = vmatmul.mubr.msk.f32.gmra.mrb[62].mxu1 %vm442_vm0, %v4733_v20  ;;  %4171 = vmatprep.mubr.msk.f32.mxu0 %vm442_vm0, %v4910_v57 }
  0x97   : > { %4127 = vmatprep.mubr.msk.f32.mxu1 %vm442_vm0, %v4738_v21 }
  0x99   : > { %4172 = vmatmul.mubr.msk.f32.gmra.mrb[60].mxu0 %vm442_vm0, %v4923_v59 }
  0x9a   : > { %4128 = vmatmul.mubr.msk.f32.gmra.mrb[64].mxu1 %vm442_vm0, %v4762_v25  ;;  %4174 = vmatprep.mubr.msk.f32.mxu0 %vm442_vm0, %v4704_v14 }
  0x9b   : > { %4130 = vmatprep.mubr.msk.f32.mxu1 %vm442_vm0, %v4765_v26 }
  0x9d   : > { %4175 = vmatmul.mubr.msk.f32.gmra.mrb[62].mxu0 %vm442_vm0, %v4707_v15 }
  0x9e   : > { %4131 = vmatmul.mubr.msk.f32.gmra.mrb[66].mxu1 %vm442_vm0, %v4793_v33  ;;  %4177 = vmatprep.mubr.msk.f32.mxu0 %vm442_vm0, %v4712_v16 }
  0x9f   : > { %4133 = vmatprep.mubr.msk.f32.mxu1 %vm442_vm0, %v4801_v35 }
  0xa1   : > { %4178 = vmatmul.mubr.msk.f32.gmra.mrb[64].mxu0 %vm442_vm0, %v4733_v20 }
  0xa2   : > { %4134 = vmatmul.mubr.msk.f32.gmra.mrb[68].mxu1 %vm442_vm0, %v4817_v38  ;;  %4180 = vmatprep.mubr.msk.f32.mxu0 %vm442_vm0, %v4738_v21 }
  0xa3   : > { %4136 = vmatprep.mubr.msk.f32.mxu1 %vm442_vm0, %v4827_v40 }
  0xa5   : > { %4181 = vmatmul.mubr.msk.f32.gmra.mrb[66].mxu0 %vm442_vm0, %v4762_v25 }
  0xa6   : > { %4137 = vmatmul.mubr.msk.f32.gmra.mrb[70].mxu1 %vm442_vm0, %v4843_v42  ;;  %4183 = vmatprep.mubr.msk.f32.mxu0 %vm442_vm0, %v4765_v26 }
  0xa7   : > { %4139 = vmatprep.mubr.msk.f32.mxu1 %vm442_vm0, %v4853_v45 }
  0xa9   : > { %4184 = vmatmul.mubr.msk.f32.gmra.mrb[68].mxu0 %vm442_vm0, %v4793_v33 }
  0xaa   : > { %4140 = vmatmul.mubr.msk.f32.gmra.mrb[72].mxu1 %vm442_vm0, %v4861_v46  ;;  %4186 = vmatprep.mubr.msk.f32.mxu0 %vm442_vm0, %v4801_v35 }
  0xab   : > { %4203 = vmatprep.mubr.msk.f32.mxu1 %vm442_vm0, %v4768_v27 }
  0xad   : > { %4187 = vmatmul.mubr.msk.f32.gmra.mrb[70].mxu0 %vm442_vm0, %v4817_v38 }
  0xae   : > { %4204 = vmatmul.mubr.msk.f32.vlgmr.msra.gmra.mrb[74].mxu1 %vm442_vm0, %v4772_v29  ;;  %4189 = vmatprep.mubr.msk.f32.mxu0 %vm442_vm0, %v4827_v40 }
  0xaf   : > { %4206 = vmatprep.mubr.msk.f32.mxu1 %vm442_vm0, %v4788_v32  ;;  %4466 = vmatpush3.bf16.msra.mxu1 %v5067_v7 }
  0xb0   : > { %4468 = vmatprep.subr.bf16.mxu1 %v4467_v19 }
  0xb1   : > { %4190 = vmatmul.mubr.msk.f32.gmra.mrb[72].mxu0 %vm442_vm0, %v4843_v42 }
  0xb2   : > { %4207 = vmatmul.mubr.msk.f32.gmra.mrb[76].mxu1 %vm442_vm0, %v4798_v34  ;;  %4192 = vmatprep.mubr.msk.f32.mxu0 %vm442_vm0, %v4853_v45 }
  0xb3   : > { %4209 = vmatprep.mubr.msk.f32.mxu1 %vm442_vm0, %v4806_v36  ;;  %4470 = vmatpush3.bf16.msra.mxu1 %v4467_v19 }
  0xb5   : > { %4193 = vmatmul.mubr.msk.f32.gmra.mrb[74].mxu0 %vm442_vm0, %v4861_v46 }
  0xb6   : > { %4210 = vmatmul.mubr.msk.f32.gmra.mrb[78].mxu1 %vm442_vm0, %v4824_v39  ;;  %4256 = vmatprep.mubr.msk.f32.mxu0 %vm442_vm0, %v4768_v27 }
  0xb7   : > { %4212 = vmatprep.mubr.msk.f32.mxu1 %vm442_vm0, %v4831_v41 }
  0xb9   : > { %4257 = vmatmul.mubr.msk.f32.vlgmr.msra.gmra.mrb[76].mxu0 %vm442_vm0, %v4772_v29 }
  0xba   : > { %4213 = vmatmul.mubr.msk.f32.gmra.mrb[80].mxu1 %vm442_vm0, %v4848_v43  ;;  %4474 = vmatpush3.bf16.msra.mxu0 %v5107_v13 }
  0xbb   : > { %4215 = vmatprep.mubr.msk.f32.mxu1 %vm442_vm0, %v4851_v44  ;;  %4259 = vmatprep.mubr.msk.f32.mxu0 %vm442_vm0, %v4788_v32 }
  0xbc   : > { %4476 = vmatprep.subr.bf16.mxu0 %v4475_v24 }
  0xbd   : > { %4260 = vmatmul.mubr.msk.f32.gmra.mrb[78].mxu0 %vm442_vm0, %v4798_v34 }
  0xbe   : > { %4216 = vmatmul.mubr.msk.f32.gmra.mrb[82].mxu1 %vm442_vm0, %v4866_v47  ;;  %4262 = vmatprep.mubr.msk.f32.mxu0 %vm442_vm0, %v4806_v36 }
  0xbf   : > { %4218 = vmatprep.mubr.msk.f32.mxu1 %vm442_vm0, %v4869_v48  ;;  %4478 = vmatpush3.bf16.msra.mxu0 %v4475_v24 }
  0xc1   : > { %4263 = vmatmul.mubr.msk.f32.gmra.mrb[80].mxu0 %vm442_vm0, %v4824_v39 }
  0xc2   : > { %4219 = vmatmul.mubr.msk.f32.gmra.mrb[84].mxu1 %vm442_vm0, %v4886_v51  ;;  %4265 = vmatprep.mubr.msk.f32.mxu0 %vm442_vm0, %v4831_v41 }
  0xc3   : > { %4221 = vmatprep.mubr.msk.f32.mxu1 %vm442_vm0, %v4889_v52 }
  0xc5   : > { %4266 = vmatmul.mubr.msk.f32.gmra.mrb[82].mxu0 %vm442_vm0, %v4848_v43 }
  0xc6   : > { %4222 = vmatmul.mubr.msk.f32.gmra.mrb[86].mxu1 %vm442_vm0, %v4906_v56  ;;  %4268 = vmatprep.mubr.msk.f32.mxu0 %vm442_vm0, %v4851_v44 }
  0xc7   : > { %4224 = vmatprep.mubr.msk.f32.mxu1 %vm442_vm0, %v4910_v57 }
  0xc9   : > { %4269 = vmatmul.mubr.msk.f32.gmra.mrb[84].mxu0 %vm442_vm0, %v4866_v47 }
  0xca   : > { %4225 = vmatmul.mubr.msk.f32.gmra.mrb[88].mxu1 %vm442_vm0, %v4923_v59  ;;  %4271 = vmatprep.mubr.msk.f32.mxu0 %vm442_vm0, %v4869_v48 }
  0xcb   : > { %4227 = vmatprep.mubr.msk.f32.mxu1 %vm442_vm0, %v4704_v14 }
  0xcd   : > { %4272 = vmatmul.mubr.msk.f32.gmra.mrb[86].mxu0 %vm442_vm0, %v4886_v51 }
  0xce   : > { %4228 = vmatmul.mubr.msk.f32.gmra.mrb[90].mxu1 %vm442_vm0, %v4707_v15  ;;  %4274 = vmatprep.mubr.msk.f32.mxu0 %vm442_vm0, %v4889_v52 }
  0xcf   : > { %4230 = vmatprep.mubr.msk.f32.mxu1 %vm442_vm0, %v4712_v16 }
  0xd1   : > { %4275 = vmatmul.mubr.msk.f32.gmra.mrb[88].mxu0 %vm442_vm0, %v4906_v56 }
  0xd2   : > { %4231 = vmatmul.mubr.msk.f32.gmra.mrb[92].mxu1 %vm442_vm0, %v4733_v20  ;;  %4277 = vmatprep.mubr.msk.f32.mxu0 %vm442_vm0, %v4910_v57 }
  0xd3   : > { %4233 = vmatprep.mubr.msk.f32.mxu1 %vm442_vm0, %v4738_v21 }
  0xd5   : > { %4278 = vmatmul.mubr.msk.f32.gmra.mrb[90].mxu0 %vm442_vm0, %v4923_v59 }
  0xd6   : > { %4234 = vmatmul.mubr.msk.f32.gmra.mrb[94].mxu1 %vm442_vm0, %v4762_v25  ;;  %4280 = vmatprep.mubr.msk.f32.mxu0 %vm442_vm0, %v4704_v14 }
  0xd7   : > { %4236 = vmatprep.mubr.msk.f32.mxu1 %vm442_vm0, %v4765_v26 }
  0xd9   : > { %4281 = vmatmul.mubr.msk.f32.gmra.mrb[92].mxu0 %vm442_vm0, %v4707_v15 }
  0xda   : > { %4237 = vmatmul.mubr.msk.f32.gmra.mrb[96].mxu1 %vm442_vm0, %v4793_v33  ;;  %4283 = vmatprep.mubr.msk.f32.mxu0 %vm442_vm0, %v4712_v16 }
  0xdb   : > { %4239 = vmatprep.mubr.msk.f32.mxu1 %vm442_vm0, %v4801_v35 }
  0xdd   : > { %4284 = vmatmul.mubr.msk.f32.gmra.mrb[94].mxu0 %vm442_vm0, %v4733_v20 }
  0xde   : > { %4240 = vmatmul.mubr.msk.f32.gmra.mrb[98].mxu1 %vm442_vm0, %v4817_v38  ;;  %4286 = vmatprep.mubr.msk.f32.mxu0 %vm442_vm0, %v4738_v21 }
  0xdf   : > { %4242 = vmatprep.mubr.msk.f32.mxu1 %vm442_vm0, %v4827_v40 }
  0xe1   : > { %4287 = vmatmul.mubr.msk.f32.gmra.mrb[96].mxu0 %vm442_vm0, %v4762_v25 }
  0xe2   : > { %4243 = vmatmul.mubr.msk.f32.gmra.mrb[100].mxu1 %vm442_vm0, %v4843_v42  ;;  %4289 = vmatprep.mubr.msk.f32.mxu0 %vm442_vm0, %v4765_v26 }
  0xe3   : > { %4245 = vmatprep.mubr.msk.f32.mxu1 %vm442_vm0, %v4853_v45 }
  0xe5   : > { %4290 = vmatmul.mubr.msk.f32.gmra.mrb[98].mxu0 %vm442_vm0, %v4793_v33 }
  0xe6   : > { %4246 = vmatmul.mubr.msk.f32.gmra.mrb[102].mxu1 %vm442_vm0, %v4861_v46  ;;  %4292 = vmatprep.mubr.msk.f32.mxu0 %vm442_vm0, %v4801_v35 }
  0xe7   : > { %4309 = vmatprep.mubr.msk.f32.mxu1 %vm442_vm0, %v4768_v27 }
  0xe9   : > { %4293 = vmatmul.mubr.msk.f32.gmra.mrb[100].mxu0 %vm442_vm0, %v4817_v38 }
  0xea   : > { %4310 = vmatmul.mubr.msk.f32.vlgmr.msra.gmra.mrb[104].mxu1 %vm442_vm0, %v4772_v29  ;;  %4295 = vmatprep.mubr.msk.f32.mxu0 %vm442_vm0, %v4827_v40 }
  0xeb   : > { %4312 = vmatprep.mubr.msk.f32.mxu1 %vm442_vm0, %v4788_v32 }
  0xed   : > { %v3964_v31 = vpop.f32.mrb[0].mxu1  ;;  %4296 = vmatmul.mubr.msk.f32.gmra.mrb[102].mxu0 %vm442_vm0, %v4843_v42 }
  0xee   : > { %4313 = vmatmul.mubr.msk.f32.gmra.mrb[106].mxu1 %vm442_vm0, %v4798_v34  ;;  %v760_v37 = vrot.slane %v3964_v31, 7  ;;  %v5344_v49 = vpop.f32.mrb[1].mxu1  ;;  %4298 = vmatprep.mubr.msk.f32.mxu0 %vm442_vm0, %v4853_v45 }
  0xef   : > { %4315 = vmatprep.mubr.msk.f32.mxu1 %vm442_vm0, %v4806_v36  ;;  %v759_v50 = vrot.slane %v5344_v49, 7 }
  0xf1   : > { %v3967_v53 = vpop.f32.mrb[2].mxu1  ;;  %v5358_v54 = vsel %vm770_vm1, %v759_v50, %v760_v37  ;;  %4299 = vmatmul.mubr.msk.f32.gmra.mrb[104].mxu0 %vm442_vm0, %v4861_v46 }
  0xf2   : > { %4316 = vmatmul.mubr.msk.f32.gmra.mrb[108].mxu1 %vm442_vm0, %v4824_v39  ;;  %v762_v55 = vrot.slane %v3967_v53, 7  ;;  %v689_v58 = vpop.f32.mrb[3].mxu1  ;;  %4362 = vmatprep.mubr.msk.f32.mxu0 %vm442_vm0, %v4768_v27 }
  0xf3   : > { %4318 = vmatprep.mubr.msk.f32.mxu1 %vm442_vm0, %v4831_v41  ;;  %v761_v60 = vrot.slane %v689_v58, 7 }
  0xf4   : > { %v3940_v0 = vpop.f32.mrb[0].mxu0 }
  0xf5   : > { %v3970_v61 = vpop.f32.mrb[4].mxu1  ;;  %v5370_v62 = vsel %vm770_vm1, %v761_v60, %v762_v55  ;;  %v5374_v63 = vsel %vm770_vm1, %v760_v37, %v761_v60  ;;  %v744_v3 = vrot.slane %v3940_v0, 7  ;;  %v599_v4 = vpop.f32.mrb[1].mxu0  ;;  %4363 = vmatmul.mubr.msk.f32.vlgmr.msra.gmra.mrb[106].mxu0 %vm442_vm0, %v4772_v29 }
  0xf6   : > { %4319 = vmatmul.mubr.msk.f32.gmra.mrb[110].mxu1 %vm442_vm0, %v4848_v43  ;;  %v764_v1 = vrot.slane %v3970_v61, 7  ;;  %v699_v2 = vpop.f32.mrb[5].mxu1  ;;  %v743_v5 = vrot.slane %v599_v4, 7  ;;  %4365 = vmatprep.mubr.msk.f32.mxu0 %vm442_vm0, %v4788_v32 }
  0xf7   : > { %4321 = vmatprep.mubr.msk.f32.mxu1 %vm442_vm0, %v4851_v44  ;;  %v763_v27 = vrot.slane %v699_v2, 7 }
  0xf8   : > { %v3943_v9 = vpop.f32.mrb[2].mxu0  ;;  %v793_v11 = vsel %vm770_vm1, %v743_v5, %v744_v3 }
  0xf9   : > { %v3973_v6 = vpop.f32.mrb[6].mxu1  ;;  %v5386_v7 = vsel %vm770_vm1, %v763_v27, %v764_v1  ;;  %v5390_v8 = vsel %vm770_vm1, %v762_v55, %v763_v27  ;;  %v746_v12 = vrot.slane %v3943_v9, 7  ;;  %v609_v32 = vpop.f32.mrb[3].mxu0  ;;  %4366 = vmatmul.mubr.msk.f32.gmra.mrb[108].mxu0 %vm442_vm0, %v4798_v34 }
  0xfa   : > { %4322 = vmatmul.mubr.msk.f32.gmra.mrb[112].mxu1 %vm442_vm0, %v4866_v47  ;;  %v766_v29 = vrot.slane %v3973_v6, 7  ;;  %v709_v10 = vpop.f32.mrb[7].mxu1  ;;  %v745_v17 = vrot.slane %v609_v32, 7  ;;  %4368 = vmatprep.mubr.msk.f32.mxu0 %vm442_vm0, %v4806_v36 }
  0xfb   : > { %4324 = vmatprep.mubr.msk.f32.mxu1 %vm442_vm0, %v4869_v48  ;;  %v765_v13 = vrot.slane %v709_v10, 7 }
  0xfc   : > { %v3946_v23 = vpop.f32.mrb[4].mxu0  ;;  %v791_v24 = vsel %vm770_vm1, %v745_v17, %v746_v12  ;;  %v792_v36 = vsel %vm770_vm1, %v744_v3, %v745_v17 }
  0xfd   : > { %v3976_v18 = vpop.f32.mrb[8].mxu1  ;;  %v5404_v19 = vsel %vm770_vm1, %v765_v13, %v766_v29  ;;  %v5408_v22 = vsel %vm770_vm1, %v764_v1, %v765_v13  ;;  %v748_v28 = vrot.slane %v3946_v23, 7  ;;  %v619_v31 = vpop.f32.mrb[5].mxu0  ;;  %4369 = vmatmul.mubr.msk.f32.gmra.mrb[110].mxu0 %vm442_vm0, %v4824_v39 }
  0xfe   : > { %4325 = vmatmul.mubr.msk.f32.gmra.mrb[114].mxu1 %vm442_vm0, %v4886_v51  ;;  %v719_v34 = vpop.f32.mrb[9].mxu1  ;;  %v747_v37 = vrot.slane %v619_v31, 7  ;;  %4371 = vmatprep.mubr.msk.f32.mxu0 %vm442_vm0, %v4831_v41 }
  0xff   : > { %4327 = vmatprep.mubr.msk.f32.mxu1 %vm442_vm0, %v4889_v52 }
 0x100   : > { %v3949_v55 = vpop.f32.mrb[6].mxu0  ;;  %v789_v60 = vsel %vm770_vm1, %v747_v37, %v748_v28  ;;  %v790_v61 = vsel %vm770_vm1, %v746_v12, %v747_v37 }
 0x101   : > { %v3979_v53 = vpop.f32.mrb[10].mxu1  ;;  %v750_v39 = vrot.slane %v3949_v55, 7  ;;  %v629_v0 = vpop.f32.mrb[7].mxu0  ;;  %4372 = vmatmul.mubr.msk.f32.gmra.mrb[112].mxu0 %vm442_vm0, %v4848_v43 }
 0x102   : > { %4328 = vmatmul.mubr.msk.f32.gmra.mrb[116].mxu1 %vm442_vm0, %v4906_v56  ;;  %v727_v58 = vpop.f32.mrb[11].mxu1  ;;  %v749_v41 = vrot.slane %v629_v0, 7  ;;  %4374 = vmatprep.mubr.msk.f32.mxu0 %vm442_vm0, %v4851_v44 }
 0x103   : > { %4330 = vmatprep.mubr.msk.f32.mxu1 %vm442_vm0, %v4910_v57 }
 0x104   : > { %v3952_v2 = vpop.f32.mrb[8].mxu0  ;;  %v787_v27 = vsel %vm770_vm1, %v749_v41, %v750_v39  ;;  %v788_v43 = vsel %vm770_vm1, %v748_v28, %v749_v41 }
 0x105   : > { %v3982_v1 = vpop.f32.mrb[12].mxu1  ;;  %v752_v6 = vrot.slane %v3952_v2, 7  ;;  %v639_v9 = vpop.f32.mrb[9].mxu0  ;;  %4375 = vmatmul.mubr.msk.f32.gmra.mrb[114].mxu0 %vm442_vm0, %v4866_v47 }
 0x106   : > { %v767_v3 = vrot.slane %v3982_v1, 7  ;;  %4331 = vmatmul.mubr.msk.f32.gmra.mrb[118].mxu1 %vm442_vm0, %v4923_v59  ;;  %v735_v4 = vpop.f32.mrb[13].mxu1  ;;  %v751_v44 = vrot.slane %v639_v9, 7  ;;  %4377 = vmatprep.mubr.msk.f32.mxu0 %vm442_vm0, %v4869_v48 }
 0x107   : > { %4333 = vmatprep.mubr.msk.f32.mxu1 %vm442_vm0, %v4704_v14 }
 0x108   : > { %v794_v29 = vsel %vm770_vm1, %v767_v3, %v743_v5  ;;  %v3955_v12 = vpop.f32.mrb[10].mxu0  ;;  %v785_v47 = vsel %vm770_vm1, %v751_v44, %v752_v6  ;;  %v786_v17 = vsel %vm770_vm1, %v750_v39, %v751_v44 }
 0x109   : > { %v3993_v10 = vpop.f32.mrb[14].mxu1  ;;  %v754_v18 = vrot.slane %v3955_v12, 7  ;;  %v649_v23 = vpop.f32.mrb[11].mxu0  ;;  %4378 = vmatmul.mubr.msk.f32.gmra.mrb[116].mxu0 %vm442_vm0, %v4886_v51 }
 0x10a   : > { %v5448_v32 = vadd.f32 %v3993_v10, %v793_v11  ;;  %v890_v13 = vpop.f32.mrb[15].mxu1  ;;  %4334 = vmatmul.mubr.msk.f32.gmra.mrb[120].mxu1 %vm442_vm0, %v4707_v15  ;;  %v753_v5 = vrot.slane %v649_v23, 7  ;;  %4380 = vmatprep.mubr.msk.f32.mxu0 %vm442_vm0, %v4889_v52 }
 0x10b   : > { %v1033_v48 = vadd.f32 %v890_v13, %v794_v29  ;;  %4336 = vmatprep.mubr.msk.f32.mxu1 %vm442_vm0, %v4712_v16 }
 0x10c   : > { %v3958_v34 = vpop.f32.mrb[12].mxu0  ;;  %v783_v37 = vsel %vm770_vm1, %v753_v5, %v754_v18  ;;  %v784_v51 = vsel %vm770_vm1, %v752_v6, %v753_v5 }
 0x10d   : > { %v3996_v11 = vpop.f32.mrb[16].mxu1  ;;  %v756_v53 = vrot.slane %v3958_v34, 7  ;;  %v659_v55 = vpop.f32.mrb[13].mxu0  ;;  %4381 = vmatmul.mubr.msk.f32.gmra.mrb[118].mxu0 %vm442_vm0, %v4906_v56 }
 0x10e   : > { %v5462_v28 = vadd.f32 %v3996_v11, %v791_v24  ;;  %v900_v31 = vpop.f32.mrb[17].mxu1  ;;  %4337 = vmatmul.mubr.msk.f32.gmra.mrb[122].mxu1 %vm442_vm0, %v4733_v20  ;;  %v755_v24 = vrot.slane %v659_v55, 7  ;;  %4383 = vmatprep.mubr.msk.f32.mxu0 %vm442_vm0, %v4910_v57 }
 0x10f   : > { %v1035_v52 = vadd.f32 %v900_v31, %v792_v36  ;;  %4339 = vmatprep.mubr.msk.f32.mxu1 %vm442_vm0, %v4738_v21 }
 0x110   : > { %v3961_v39 = vpop.f32.mrb[14].mxu0  ;;  %v781_v1 = vsel %vm770_vm1, %v755_v24, %v756_v53  ;;  %v5484_v56 = vsel %vm770_vm1, %v754_v18, %v755_v24 }
 0x111   : > { %v3999_v58 = vpop.f32.mrb[18].mxu1  ;;  %v758_v36 = vrot.slane %v3961_v39, 7  ;;  %v669_v2 = vpop.f32.mrb[15].mxu0  ;;  %4384 = vmatmul.mubr.msk.f32.gmra.mrb[120].mxu0 %vm442_vm0, %v4923_v59 }
 0x112   : > { %v5476_v0 = vadd.f32 %v3999_v58, %v789_v60  ;;  %v910_v41 = vpop.f32.mrb[19].mxu1  ;;  %4340 = vmatmul.mubr.msk.f32.gmra.mrb[124].mxu1 %vm442_vm0, %v4762_v25  ;;  %v757_v60 = vrot.slane %v669_v2, 7  ;;  %4386 = vmatprep.mubr.msk.f32.mxu0 %vm442_vm0, %v4704_v14 }
 0x113   : > { %v1037_v57 = vadd.f32 %v910_v41, %v790_v61  ;;  %4342 = vmatprep.mubr.msk.f32.mxu1 %vm442_vm0, %v4765_v26  ;;  %v5496_v4 = vsel %vm770_vm1, %v758_v36, %v759_v50 }
 0x114   : > { %v4046_v6 = vpop.f32.mrb[16].mxu0  ;;  %v779_v59 = vsel %vm770_vm1, %v757_v60, %v758_v36  ;;  %v5506_v14 = vsel %vm770_vm1, %v756_v53, %v757_v60 }
 0x115   : > { %v4002_v3 = vpop.f32.mrb[20].mxu1  ;;  %v1273_v61 = vrot.slane %v4046_v6, 1  ;;  %v1128_v49 = vpop.f32.mrb[17].mxu0  ;;  %4387 = vmatmul.mubr.msk.f32.gmra.mrb[122].mxu0 %vm442_vm0, %v4707_v15 }
 0x116   : > { %v5498_v9 = vadd.f32 %v4002_v3, %v787_v27  ;;  %v920_v44 = vpop.f32.mrb[21].mxu1  ;;  %4343 = vmatmul.mubr.msk.f32.gmra.mrb[126].mxu1 %vm442_vm0, %v4793_v33  ;;  %v1272_v27 = vrot.slane %v1128_v49, 1  ;;  %4389 = vmatprep.mubr.msk.f32.mxu0 %vm442_vm0, %v4712_v16 }
 0x117   : > { %v1039_v50 = vadd.f32 %v920_v44, %v788_v43  ;;  %4345 = vmatprep.mubr.msk.f32.mxu1 %vm442_vm0, %v4801_v35 }
 0x118   : > { %v1321_v10 = vsel %vm1297_vm2, %v1272_v27, %v1273_v61  ;;  %v4049_v12 = vpop.f32.mrb[18].mxu0 }
 0x119   : > { %v4005_v29 = vpop.f32.mrb[22].mxu1  ;;  %v1275_v15 = vrot.slane %v4049_v12, 1  ;;  %v1138_v43 = vpop.f32.mrb[19].mxu0  ;;  %4390 = vmatmul.mubr.msk.f32.gmra.mrb[124].mxu0 %vm442_vm0, %v4733_v20  ;;  %v5525_v16 = vadd.f32 %v1321_v10, %v1033_v48 }
 0x11a   : > { %v5517_v13 = vadd.f32 %v4005_v29, %v785_v47  ;;  %v930_v18 = vpop.f32.mrb[23].mxu1  ;;  %4346 = vmatmul.mubr.msk.f32.gmra.mrb[128].mxu1 %vm442_vm0, %v4817_v38  ;;  %v1274_v5 = vrot.slane %v1138_v43, 1  ;;  %4392 = vmatprep.mubr.msk.f32.mxu0 %vm442_vm0, %v4738_v21 }
 0x11b   : > { %v1041_v23 = vadd.f32 %v930_v18, %v786_v17  ;;  %4348 = vmatprep.mubr.msk.f32.mxu1 %vm442_vm0, %v4827_v40 }
 0x11c   : > { %v1319_v11 = vsel %vm1297_vm2, %v1274_v5, %v1275_v15  ;;  %v1320_v34 = vsel %vm1297_vm2, %v1273_v61, %v1274_v5  ;;  %v4052_v31 = vpop.f32.mrb[20].mxu0 }
 0x11d   : > { %v4008_v47 = vpop.f32.mrb[24].mxu1  ;;  %v1277_v17 = vrot.slane %v4052_v31, 1  ;;  %v1148_v48 = vpop.f32.mrb[21].mxu0  ;;  %4393 = vmatmul.mubr.msk.f32.gmra.mrb[126].mxu0 %vm442_vm0, %v4762_v25  ;;  %v5541_v55 = vadd.f32 %v1319_v11, %v1035_v52  ;;  %v5544_v24 = vadd.f32 %v1320_v34, %v5448_v32 }
 0x11e   : > { %v5533_v53 = vadd.f32 %v4008_v47, %v783_v37  ;;  %v940_v20 = vpop.f32.mrb[25].mxu1  ;;  %4349 = vmatmul.mubr.msk.f32.gmra.mrb[130].mxu1 %vm442_vm0, %v4843_v42  ;;  %v1276_v37 = vrot.slane %v1148_v48, 1  ;;  %4395 = vmatprep.mubr.msk.f32.mxu0 %vm442_vm0, %v4765_v26 }
 0x11f   : > { %v1043_v21 = vadd.f32 %v940_v20, %v784_v51  ;;  %4351 = vmatprep.mubr.msk.f32.mxu1 %vm442_vm0, %v4853_v45 }
 0x120   : > { %v1317_v39 = vsel %vm1297_vm2, %v1276_v37, %v1277_v17  ;;  %v1318_v25 = vsel %vm1297_vm2, %v1275_v15, %v1276_v37  ;;  %v4055_v51 = vpop.f32.mrb[22].mxu0 }
 0x121   : > { %v4011_v58 = vpop.f32.mrb[26].mxu1  ;;  %v1279_v32 = vrot.slane %v4055_v51, 1  ;;  %v1158_v52 = vpop.f32.mrb[23].mxu0  ;;  %4396 = vmatmul.mubr.msk.f32.gmra.mrb[128].mxu0 %vm442_vm0, %v4793_v33  ;;  %v5559_v2 = vadd.f32 %v1317_v39, %v1037_v57  ;;  %v5562_v60 = vadd.f32 %v1318_v25, %v5462_v28 }
 0x122   : > { %v5552_v41 = vadd.f32 %v4011_v58, %v781_v1  ;;  %v950_v36 = vpop.f32.mrb[27].mxu1  ;;  %4352 = vmatmul.mubr.msk.f32.gmra.mrb[132].mxu1 %vm442_vm0, %v4861_v46  ;;  %v1278_v3 = vrot.slane %v1158_v52, 1  ;;  %4398 = vmatprep.mubr.msk.f32.mxu0 %vm442_vm0, %v4801_v35 }
 0x123   : > { %v1045_v26 = vadd.f32 %v950_v36, %v5484_v56 }
 0x124   : > { %v1315_v6 = vsel %vm1297_vm2, %v1278_v3, %v1279_v32  ;;  %v1316_v44 = vsel %vm1297_vm2, %v1277_v17, %v1278_v3  ;;  %v4058_v61 = vpop.f32.mrb[24].mxu0 }
 0x125   : > { %v4014_v1 = vpop.f32.mrb[28].mxu1  ;;  %v1281_v57 = vrot.slane %v4058_v61, 1  ;;  %v1168_v49 = vpop.f32.mrb[25].mxu0  ;;  %4399 = vmatmul.mubr.msk.f32.gmra.mrb[130].mxu0 %vm442_vm0, %v4817_v38  ;;  %v5575_v27 = vadd.f32 %v1315_v6, %v1039_v50  ;;  %v5578_v35 = vadd.f32 %v1316_v44, %v5476_v0 }
 0x126   : > { %v5570_v33 = vadd.f32 %v4014_v1, %v779_v59  ;;  %v960_v56 = vpop.f32.mrb[29].mxu1  ;;  %v1280_v29 = vrot.slane %v1168_v49, 1  ;;  %4401 = vmatprep.mubr.msk.f32.mxu0 %vm442_vm0, %v4827_v40 }
 0x127   : > { %v1047_v28 = vadd.f32 %v960_v56, %v5506_v14 }
 0x128   : > { %v1313_v59 = vsel %vm1297_vm2, %v1280_v29, %v1281_v57  ;;  %v1314_v12 = vsel %vm1297_vm2, %v1279_v32, %v1280_v29  ;;  %v4061_v18 = vpop.f32.mrb[26].mxu0 }
 0x129   : > { %v4017_v10 = vpop.f32.mrb[30].mxu1  ;;  %v1283_v50 = vrot.slane %v4061_v18, 1  ;;  %v1178_v15 = vpop.f32.mrb[27].mxu0  ;;  %4402 = vmatmul.mubr.msk.f32.gmra.mrb[132].mxu0 %vm442_vm0, %v4843_v42  ;;  %v5592_v40 = vadd.f32 %v1313_v59, %v1041_v23  ;;  %v5595_v43 = vadd.f32 %v1314_v12, %v5498_v9 }
 0x12a   : > { %v5587_v38 = vadd.f32 %v4017_v10, %v5358_v54  ;;  %v970_v14 = vpop.f32.mrb[31].mxu1  ;;  %v1282_v5 = vrot.slane %v1178_v15, 1  ;;  %4404 = vmatprep.mubr.msk.f32.mxu0 %vm442_vm0, %v4853_v45 }
 0x12b   : > { %v1049_v0 = vadd.f32 %v970_v14, %v5496_v4 }
 0x12c   : > { %v1311_v54 = vsel %vm1297_vm2, %v1282_v5, %v1283_v50  ;;  %v1312_v11 = vsel %vm1297_vm2, %v1281_v57, %v1282_v5  ;;  %v4064_v34 = vpop.f32.mrb[28].mxu0 }
 0x12d   : > { %v4020_v47 = vpop.f32.mrb[32].mxu1  ;;  %v1285_v23 = vrot.slane %v4064_v34, 1  ;;  %v1188_v31 = vpop.f32.mrb[29].mxu0  ;;  %4405 = vmatmul.mubr.msk.f32.gmra.mrb[134].mxu0 %vm442_vm0, %v4861_v46  ;;  %v5607_v20 = vadd.f32 %v1311_v54, %v1043_v21  ;;  %v5610_v45 = vadd.f32 %v1312_v11, %v5517_v13 }
 0x12e   : > { %v1052_v42 = vadd.f32 %v4020_v47, %v5370_v62  ;;  %v980_v4 = vpop.f32.mrb[33].mxu1  ;;  %v1284_v17 = vrot.slane %v1188_v31, 1 }
 0x12f   : > { %v1051_v9 = vadd.f32 %v980_v4, %v5374_v63 }
 0x130   : > { %v1309_v37 = vsel %vm1297_vm2, %v1284_v17, %v1285_v23  ;;  %v1310_v62 = vsel %vm1297_vm2, %v1283_v50, %v1284_v17  ;;  %v4067_v58 = vpop.f32.mrb[30].mxu0 }
 0x131   : > { %v4023_v48 = vpop.f32.mrb[34].mxu1  ;;  %v1287_v46 = vrot.slane %v4067_v58, 1  ;;  %v1198_v51 = vpop.f32.mrb[31].mxu0  ;;  %v5618_v21 = vadd.f32 %v1309_v37, %v1045_v26  ;;  %v5621_v13 = vadd.f32 %v1310_v62, %v5533_v53 }
 0x132   : > { %v1054_v39 = vadd.f32 %v4023_v48, %v5386_v7  ;;  %v990_v25 = vpop.f32.mrb[35].mxu1  ;;  %v1286_v36 = vrot.slane %v1198_v51, 1 }
 0x133   : > { %v1053_v63 = vadd.f32 %v990_v25, %v5390_v8 }
 0x134   : > { %v1307_v52 = vsel %vm1297_vm2, %v1286_v36, %v1287_v46  ;;  %v1308_v3 = vsel %vm1297_vm2, %v1285_v23, %v1286_v36  ;;  %v4070_v1 = vpop.f32.mrb[32].mxu0 }
 0x135   : > { %v4026_v32 = vpop.f32.mrb[36].mxu1  ;;  %v1289_v44 = vrot.slane %v4070_v1, 1  ;;  %v1208_v61 = vpop.f32.mrb[33].mxu0  ;;  %v5629_v26 = vadd.f32 %v1307_v52, %v1047_v28  ;;  %v5632_v53 = vadd.f32 %v1308_v3, %v5552_v41 }
 0x136   : > { %v1056_v7 = vadd.f32 %v4026_v32, %v5404_v19  ;;  %v1000_v6 = vpop.f32.mrb[37].mxu1  ;;  %v1288_v56 = vrot.slane %v1208_v61, 1 }
 0x137   : > { %v1055_v8 = vadd.f32 %v1000_v6, %v5408_v22 }
 0x138   : > { %v1305_v49 = vsel %vm1297_vm2, %v1288_v56, %v1289_v44  ;;  %v1306_v29 = vsel %vm1297_vm2, %v1287_v46, %v1288_v56  ;;  %v4073_v10 = vpop.f32.mrb[34].mxu0 }
 0x139   : > { %v4029_v57 = vpop.f32.mrb[38].mxu1  ;;  %v1291_v59 = vrot.slane %v4073_v10, 1  ;;  %v1218_v12 = vpop.f32.mrb[35].mxu0  ;;  %v5638_v18 = vadd.f32 %v1305_v49, %v1049_v0  ;;  %v5641_v22 = vadd.f32 %v1306_v29, %v5570_v33 }
 0x13a   : > { %v1010_v19 = vpop.f32.mrb[39].mxu1  ;;  %v1290_v28 = vrot.slane %v1218_v12, 1 }
 0x13c   : > { %v1303_v14 = vsel %vm1297_vm2, %v1290_v28, %v1291_v59  ;;  %v1304_v50 = vsel %vm1297_vm2, %v1289_v44, %v1290_v28  ;;  %v4076_v15 = vpop.f32.mrb[36].mxu0 }
 0x13d   : > { %v4032_v41 = vpop.f32.mrb[40].mxu1  ;;  %v1293_v47 = vrot.slane %v4076_v15, 1  ;;  %v1228_v54 = vpop.f32.mrb[37].mxu0  ;;  %v5647_v11 = vadd.f32 %v1303_v14, %v1051_v9  ;;  %v5650_v0 = vadd.f32 %v1304_v50, %v5587_v38 }
 0x13e   : > { %v1018_v5 = vpop.f32.mrb[41].mxu1  ;;  %v1292_v34 = vrot.slane %v1228_v54, 1 }
 0x140   : > { %v1301_v4 = vsel %vm1297_vm2, %v1292_v34, %v1293_v47  ;;  %v1302_v23 = vsel %vm1297_vm2, %v1291_v59, %v1292_v34  ;;  %v4079_v31 = vpop.f32.mrb[38].mxu0 }
 0x141   : > { %v4035_v33 = vpop.f32.mrb[42].mxu1  ;;  %v1295_v48 = vrot.slane %v4079_v31, 1  ;;  %v1238_v37 = vpop.f32.mrb[39].mxu0  ;;  %v5656_v62 = vadd.f32 %v1301_v4, %v1053_v63  ;;  %v5658_v58 = vadd.f32 %v1302_v23, %v1052_v42 }
 0x142   : > { %v1026_v17 = vpop.f32.mrb[43].mxu1  ;;  %v1294_v9 = vrot.slane %v1238_v37, 1 }
 0x144   : > { %v1299_v38 = vsel %vm1297_vm2, %v1294_v9, %v1295_v48  ;;  %v1300_v46 = vsel %vm1297_vm2, %v1293_v47, %v1294_v9  ;;  %v4082_v51 = vpop.f32.mrb[40].mxu0 }
 0x145   : > { %v4099_v25 = vpop.f32.mrb[44].mxu1  ;;  %v1248_v32 = vpop.f32.mrb[41].mxu0  ;;  %v5664_v52 = vadd.f32 %v1299_v38, %v1055_v8  ;;  %v5666_v3 = vadd.f32 %v1300_v46, %v1054_v39 }
 0x146   : > { %v1417_v36 = vpop.f32.mrb[45].mxu1  ;;  %v1296_v1 = vrot.slane %v1248_v32, 1 }
 0x148   : > { %v1298_v42 = vsel %vm1297_vm2, %v1295_v48, %v1296_v1  ;;  %v4085_v6 = vpop.f32.mrb[42].mxu0 }
 0x149   : > { %v4102_v63 = vpop.f32.mrb[46].mxu1  ;;  %v1257_v56 = vpop.f32.mrb[43].mxu0  ;;  %v5670_v49 = vadd.f32 %v1298_v42, %v1056_v7 }
 0x14a   : > { %v1562_v44 = vrot.slane %v4102_v63, 7  ;;  %v1425_v61 = vpop.f32.mrb[47].mxu1 }
 0x14b   : > { %v1561_v57 = vrot.slane %v1425_v61, 7 }
 0x14c   : > { %v4088_v8 = vpop.f32.mrb[44].mxu0 }
 0x14d   : > { %v4105_v29 = vpop.f32.mrb[48].mxu1  ;;  %v1609_v10 = vsel %vm770_vm1, %v1561_v57, %v1562_v44  ;;  %v1265_v12 = vpop.f32.mrb[45].mxu0 }
 0x14e   : > { %v1564_v19 = vrot.slane %v4105_v29, 7  ;;  %v1435_v39 = vpop.f32.mrb[49].mxu1  ;;  %v1610_v59 = vadd.f32 %v1609_v10, %v5525_v16 }
 0x14f   : > { %v1563_v28 = vrot.slane %v1435_v39, 7 }
 0x150   : > { %v4152_v7 = vpop.f32.mrb[46].mxu0 }
 0x151   : > { %v4108_v41 = vpop.f32.mrb[50].mxu1  ;;  %v1607_v14 = vsel %vm770_vm1, %v1563_v28, %v1564_v19  ;;  %v1608_v50 = vsel %vm770_vm1, %v1562_v44, %v1563_v28  ;;  %v1705_v34 = vpop.f32.mrb[47].mxu0 }
 0x152   : > { %v1566_v15 = vrot.slane %v4108_v41, 7  ;;  %v1445_v5 = vpop.f32.mrb[51].mxu1  ;;  %v1612_v47 = vadd.f32 %v1607_v14, %v5541_v55  ;;  %v1611_v54 = vadd.f32 %v1608_v50, %v5544_v24 }
 0x153   : > { %v1565_v33 = vrot.slane %v1445_v5, 7 }
 0x154   : > { %v4155_v31 = vpop.f32.mrb[48].mxu0 }
 0x155   : > { %v4111_v4 = vpop.f32.mrb[52].mxu1  ;;  %v1605_v16 = vsel %vm770_vm1, %v1565_v33, %v1566_v15  ;;  %v1606_v23 = vsel %vm770_vm1, %v1564_v19, %v1565_v33  ;;  %v5687_v25 = vadd.f32 %v4155_v31, %v1610_v59  ;;  %v1713_v55 = vpop.f32.mrb[49].mxu0 }
 0x156   : > { %v1568_v17 = vrot.slane %v4111_v4, 7  ;;  %v1455_v48 = vpop.f32.mrb[53].mxu1  ;;  %v1614_v37 = vadd.f32 %v1605_v16, %v5559_v2  ;;  %v1613_v9 = vadd.f32 %v1606_v23, %v5562_v60 }
 0x157   : > { %v1567_v24 = vrot.slane %v1455_v48, 7 }
 0x158   : > { %v4158_v36 = vpop.f32.mrb[50].mxu0 }
 0x159   : > { %v4114_v38 = vpop.f32.mrb[54].mxu1  ;;  %v1603_v46 = vsel %vm770_vm1, %v1567_v24, %v1568_v17  ;;  %v1604_v51 = vsel %vm770_vm1, %v1566_v15, %v1567_v24  ;;  %v5695_v42 = vadd.f32 %v4158_v36, %v1612_v47  ;;  %v1722_v60 = vpop.f32.mrb[51].mxu0 }
 0x15a   : > { %v1570_v32 = vrot.slane %v4114_v38, 7  ;;  %v1465_v1 = vpop.f32.mrb[55].mxu1  ;;  %v1616_v63 = vadd.f32 %v1603_v46, %v5575_v27  ;;  %v1615_v2 = vadd.f32 %v1604_v51, %v5578_v35  ;;  %v5697_v44 = vadd.f32 %v1722_v60, %v1611_v54 }
 0x15b   : > { %v1569_v6 = vrot.slane %v1465_v1, 7 }
 0x15c   : > { %v4161_v29 = vpop.f32.mrb[52].mxu0 }
 0x15d   : > { %v4117_v61 = vpop.f32.mrb[56].mxu1  ;;  %v1601_v56 = vsel %vm770_vm1, %v1569_v6, %v1570_v32  ;;  %v1602_v57 = vsel %vm770_vm1, %v1568_v17, %v1569_v6  ;;  %v5705_v19 = vadd.f32 %v4161_v29, %v1614_v37  ;;  %v1732_v39 = vpop.f32.mrb[53].mxu0 }
 0x15e   : > { %v1572_v10 = vrot.slane %v4117_v61, 7  ;;  %v1475_v8 = vpop.f32.mrb[57].mxu1  ;;  %v1618_v27 = vadd.f32 %v1601_v56, %v5592_v40  ;;  %v1617_v35 = vadd.f32 %v1602_v57, %v5595_v43  ;;  %v5707_v12 = vadd.f32 %v1732_v39, %v1613_v9 }
 0x15f   : > { %v1571_v59 = vrot.slane %v1475_v8, 7 }
 0x160   : > { %v4164_v50 = vpop.f32.mrb[54].mxu0 }
 0x161   : > { %v4120_v28 = vpop.f32.mrb[58].mxu1  ;;  %v1599_v41 = vsel %vm770_vm1, %v1571_v59, %v1572_v10  ;;  %v1600_v14 = vsel %vm770_vm1, %v1570_v32, %v1571_v59  ;;  %v5715_v5 = vadd.f32 %v4164_v50, %v1616_v63  ;;  %v1742_v47 = vpop.f32.mrb[55].mxu0 }
 0x162   : > { %v1574_v7 = vrot.slane %v4120_v28, 7  ;;  %v1485_v15 = vpop.f32.mrb[59].mxu1  ;;  %v1620_v40 = vadd.f32 %v1599_v41, %v5607_v20  ;;  %v1619_v43 = vadd.f32 %v1600_v14, %v5610_v45  ;;  %v5717_v34 = vadd.f32 %v1742_v47, %v1615_v2 }
 0x163   : > { %v1573_v54 = vrot.slane %v1485_v15, 7 }
 0x164   : > { %v4167_v23 = vpop.f32.mrb[56].mxu0 }
 0x165   : > { %v4123_v33 = vpop.f32.mrb[60].mxu1  ;;  %v1597_v4 = vsel %vm770_vm1, %v1573_v54, %v1574_v7  ;;  %v1598_v16 = vsel %vm770_vm1, %v1572_v10, %v1573_v54  ;;  %v5725_v48 = vadd.f32 %v4167_v23, %v1618_v27  ;;  %v1752_v37 = vpop.f32.mrb[57].mxu0 }
 0x166   : > { %v1576_v31 = vrot.slane %v4123_v33, 7  ;;  %v1495_v17 = vpop.f32.mrb[61].mxu1  ;;  %v1622_v20 = vadd.f32 %v1597_v4, %v5618_v21  ;;  %v1621_v45 = vadd.f32 %v1598_v16, %v5621_v13  ;;  %v5727_v55 = vadd.f32 %v1752_v37, %v1617_v35 }
 0x167   : > { %v1575_v9 = vrot.slane %v1495_v17, 7 }
 0x168   : > { %v4170_v51 = vpop.f32.mrb[58].mxu0 }
 0x169   : > { %v4126_v24 = vpop.f32.mrb[62].mxu1  ;;  %v1595_v38 = vsel %vm770_vm1, %v1575_v9, %v1576_v31  ;;  %v1596_v46 = vsel %vm770_vm1, %v1574_v7, %v1575_v9  ;;  %v5735_v1 = vadd.f32 %v4170_v51, %v1620_v40  ;;  %v1762_v63 = vpop.f32.mrb[59].mxu0 }
 0x16a   : > { %v1578_v36 = vrot.slane %v4126_v24, 7  ;;  %v1505_v32 = vpop.f32.mrb[63].mxu1  ;;  %v1624_v21 = vadd.f32 %v1595_v38, %v5629_v26  ;;  %v1623_v13 = vadd.f32 %v1596_v46, %v5632_v53  ;;  %v5737_v60 = vadd.f32 %v1762_v63, %v1619_v43 }
 0x16b   : > { %v1577_v2 = vrot.slane %v1505_v32, 7 }
 0x16c   : > { %v4173_v57 = vpop.f32.mrb[60].mxu0 }
 0x16d   : > { %v4129_v6 = vpop.f32.mrb[64].mxu1  ;;  %v1593_v61 = vsel %vm770_vm1, %v1577_v2, %v1578_v36  ;;  %v1594_v56 = vsel %vm770_vm1, %v1576_v31, %v1577_v2  ;;  %v5745_v8 = vadd.f32 %v4173_v57, %v1622_v20  ;;  %v1772_v27 = vpop.f32.mrb[61].mxu0 }
 0x16e   : > { %v1580_v29 = vrot.slane %v4129_v6, 7  ;;  %v1515_v10 = vpop.f32.mrb[65].mxu1  ;;  %v1626_v26 = vadd.f32 %v1593_v61, %v5638_v18  ;;  %v1625_v53 = vadd.f32 %v1594_v56, %v5641_v22  ;;  %v5747_v39 = vadd.f32 %v1772_v27, %v1621_v45 }
 0x16f   : > { %v1579_v35 = vrot.slane %v1515_v10, 7 }
 0x170   : > { %v4176_v14 = vpop.f32.mrb[62].mxu0 }
 0x171   : > { %v4132_v59 = vpop.f32.mrb[66].mxu1  ;;  %v1591_v28 = vsel %vm770_vm1, %v1579_v35, %v1580_v29  ;;  %v1592_v41 = vsel %vm770_vm1, %v1578_v36, %v1579_v35  ;;  %v5755_v15 = vadd.f32 %v4176_v14, %v1624_v21  ;;  %v1782_v40 = vpop.f32.mrb[63].mxu0 }
 0x172   : > { %v1582_v50 = vrot.slane %v4132_v59, 7  ;;  %v1525_v7 = vpop.f32.mrb[67].mxu1  ;;  %v1628_v18 = vadd.f32 %v1591_v28, %v5647_v11  ;;  %v1627_v22 = vadd.f32 %v1592_v41, %v5650_v0  ;;  %v5757_v47 = vadd.f32 %v1782_v40, %v1623_v13 }
 0x173   : > { %v1581_v43 = vrot.slane %v1525_v7, 7 }
 0x174   : > { %v4179_v16 = vpop.f32.mrb[64].mxu0 }
 0x175   : > { %v4135_v54 = vpop.f32.mrb[68].mxu1  ;;  %v1589_v33 = vsel %vm770_vm1, %v1581_v43, %v1582_v50  ;;  %v1590_v4 = vsel %vm770_vm1, %v1580_v29, %v1581_v43  ;;  %v5765_v17 = vadd.f32 %v4179_v16, %v1626_v26  ;;  %v1792_v20 = vpop.f32.mrb[65].mxu0 }
 0x176   : > { %v1584_v23 = vrot.slane %v4135_v54, 7  ;;  %v1535_v31 = vpop.f32.mrb[69].mxu1  ;;  %v1630_v11 = vadd.f32 %v1589_v33, %v5656_v62  ;;  %v1629_v0 = vadd.f32 %v1590_v4, %v5658_v58  ;;  %v5767_v37 = vadd.f32 %v1792_v20, %v1625_v53 }
 0x177   : > { %v1583_v45 = vrot.slane %v1535_v31, 7 }
 0x178   : > { %v4182_v46 = vpop.f32.mrb[66].mxu0 }
 0x179   : > { %v4138_v9 = vpop.f32.mrb[70].mxu1  ;;  %v1587_v24 = vsel %vm770_vm1, %v1583_v45, %v1584_v23  ;;  %v1588_v38 = vsel %vm770_vm1, %v1582_v50, %v1583_v45  ;;  %v5775_v58 = vadd.f32 %v4182_v46, %v1628_v18  ;;  %v1802_v32 = vpop.f32.mrb[67].mxu0 }
 0x17a   : > { %v1545_v51 = vpop.f32.mrb[71].mxu1  ;;  %v1632_v36 = vadd.f32 %v1587_v24, %v5664_v52  ;;  %v1631_v62 = vadd.f32 %v1588_v38, %v5666_v3  ;;  %v5777_v13 = vadd.f32 %v1802_v32, %v1627_v22 }
 0x17b   : > { %v1585_v21 = vrot.slane %v1545_v51, 7 }
 0x17c   : > { %v4185_v6 = vpop.f32.mrb[68].mxu0 }
 0x17d   : > { %v1586_v63 = vsel %vm770_vm1, %v1584_v23, %v1585_v21  ;;  %v4141_v2 = vpop.f32.mrb[72].mxu1  ;;  %v5782_v57 = vadd.f32 %v4185_v6, %v1630_v11  ;;  %v1812_v29 = vpop.f32.mrb[69].mxu0 }
 0x17e   : > { %v1633_v61 = vadd.f32 %v1586_v63, %v5670_v49  ;;  %v1554_v56 = vpop.f32.mrb[73].mxu1  ;;  %v5784_v52 = vadd.f32 %v1812_v29, %v1629_v0 }
 0x180   : > { %v4188_v10 = vpop.f32.mrb[70].mxu0 }
 0x181   : > { %v4205_v3 = vpop.f32.mrb[74].mxu1  ;;  %v5786_v53 = vadd.f32 %v4188_v10, %v1632_v36  ;;  %v1822_v27 = vpop.f32.mrb[71].mxu0 }
 0x182   : > { %v1943_v26 = vpop.f32.mrb[75].mxu1  ;;  %v5788_v35 = vadd.f32 %v1822_v27, %v1631_v62 }
 0x184   : > { %v4191_v28 = vpop.f32.mrb[72].mxu0 }
 0x185   : > { %v4208_v59 = vpop.f32.mrb[76].mxu1  ;;  %v1832_v14 = vpop.f32.mrb[73].mxu0 }
 0x186   : > { %v1951_v41 = vpop.f32.mrb[77].mxu1  ;;  %v5790_v50 = vadd.f32 %v1832_v14, %v1633_v61  ;;  %v2087_v49 = vrot.slane %v4208_v59, 1 }
 0x188   : > { %v4194_v18 = vpop.f32.mrb[74].mxu0 }
 0x189   : > { %v4211_v7 = vpop.f32.mrb[78].mxu1  ;;  %v1841_v43 = vpop.f32.mrb[75].mxu0 }
 0x18a   : > { %v2089_v22 = vrot.slane %v4211_v7, 1  ;;  %v1960_v40 = vpop.f32.mrb[79].mxu1 }
 0x18b   : > { %v2088_v54 = vrot.slane %v1960_v40, 1 }
 0x18c   : > { %v4258_v23 = vpop.f32.mrb[76].mxu0 }
 0x18d   : > { %v2134_v33 = vsel %vm1297_vm2, %v2088_v54, %v2089_v22  ;;  %v2135_v4 = vsel %vm1297_vm2, %v2087_v49, %v2088_v54  ;;  %v4214_v16 = vpop.f32.mrb[80].mxu1  ;;  %v2231_v45 = vpop.f32.mrb[77].mxu0 }
 0x18e   : > { %v2091_v31 = vrot.slane %v4214_v16, 1  ;;  %v1970_v11 = vpop.f32.mrb[81].mxu1  ;;  %v2137_v0 = vadd.f32 %v2134_v33, %v5697_v44  ;;  %v2136_v20 = vadd.f32 %v2135_v4, %v5687_v25 }
 0x18f   : > { %v2090_v9 = vrot.slane %v1970_v11, 1 }
 0x190   : > { %v4261_v51 = vpop.f32.mrb[78].mxu0 }
 0x191   : > { %v2132_v24 = vsel %vm1297_vm2, %v2090_v9, %v2091_v31  ;;  %v2133_v38 = vsel %vm1297_vm2, %v2089_v22, %v2090_v9  ;;  %v4217_v46 = vpop.f32.mrb[82].mxu1  ;;  %v2239_v63 = vpop.f32.mrb[79].mxu0 }
 0x192   : > { %v2093_v36 = vrot.slane %v4217_v46, 1  ;;  %v1980_v62 = vpop.f32.mrb[83].mxu1  ;;  %v2139_v32 = vadd.f32 %v2132_v24, %v5707_v12  ;;  %v2138_v21 = vadd.f32 %v2133_v38, %v5695_v42 }
 0x193   : > { %v2092_v44 = vrot.slane %v1980_v62, 1 }
 0x194   : > { %v4264_v61 = vpop.f32.mrb[80].mxu0 }
 0x195   : > { %v2130_v25 = vsel %vm1297_vm2, %v2092_v44, %v2093_v36  ;;  %v2131_v2 = vsel %vm1297_vm2, %v2091_v31, %v2092_v44  ;;  %v4220_v6 = vpop.f32.mrb[84].mxu1  ;;  %v2247_v26 = vpop.f32.mrb[81].mxu0  ;;  %v2375_v22 = vrot.slane %v4264_v61, 7 }
 0x196   : > { %v2095_v56 = vrot.slane %v4220_v6, 1  ;;  %v1990_v29 = vpop.f32.mrb[85].mxu1  ;;  %v2141_v3 = vadd.f32 %v2130_v25, %v5717_v34  ;;  %v2140_v10 = vadd.f32 %v2131_v2, %v5705_v19 }
 0x197   : > { %v2094_v12 = vrot.slane %v1990_v29, 1 }
 0x198   : > { %v4267_v28 = vpop.f32.mrb[82].mxu0 }
 0x199   : > { %v2128_v42 = vsel %vm1297_vm2, %v2094_v12, %v2095_v56  ;;  %v2129_v27 = vsel %vm1297_vm2, %v2093_v36, %v2094_v12  ;;  %v4223_v59 = vpop.f32.mrb[86].mxu1  ;;  %v2377_v34 = vrot.slane %v4267_v28, 7  ;;  %v2256_v19 = vpop.f32.mrb[83].mxu0 }
 0x19a   : > { %v2097_v41 = vrot.slane %v4223_v59, 1  ;;  %v2000_v14 = vpop.f32.mrb[87].mxu1  ;;  %v5815_v49 = vadd.f32 %v2128_v42, %v5727_v55  ;;  %v5818_v7 = vadd.f32 %v2129_v27, %v5715_v5  ;;  %v2376_v40 = vrot.slane %v2256_v19, 7 }
 0x19b   : > { %v2096_v18 = vrot.slane %v2000_v14, 1 }
 0x19c   : > { %v4270_v4 = vpop.f32.mrb[84].mxu0  ;;  %v2422_v55 = vsel %vm770_vm1, %v2376_v40, %v2377_v34  ;;  %v2423_v5 = vsel %vm770_vm1, %v2375_v22, %v2376_v40 }
 0x19d   : > { %v2126_v43 = vsel %vm1297_vm2, %v2096_v18, %v2097_v41  ;;  %v2127_v54 = vsel %vm1297_vm2, %v2095_v56, %v2096_v18  ;;  %v4226_v33 = vpop.f32.mrb[88].mxu1  ;;  %v2379_v11 = vrot.slane %v4270_v4, 7  ;;  %v2266_v45 = vpop.f32.mrb[85].mxu0  ;;  %v5831_v24 = vadd.f32 %v2422_v55, %v2137_v0 }
 0x19e   : > { %v2099_v16 = vrot.slane %v4226_v33, 1  ;;  %v2010_v23 = vpop.f32.mrb[89].mxu1  ;;  %v5829_v31 = vadd.f32 %v2126_v43, %v5737_v60  ;;  %v5833_v38 = vadd.f32 %v2423_v5, %v2136_v20  ;;  %v2378_v46 = vrot.slane %v2266_v45, 7 }
 0x19f   : > { %v2098_v9 = vrot.slane %v2010_v23, 1  ;;  %v2144_v51 = vadd.f32 %v2127_v54, %v5725_v48 }
 0x1a0   : > { %v4273_v44 = vpop.f32.mrb[86].mxu0  ;;  %v2420_v2 = vsel %vm770_vm1, %v2378_v46, %v2379_v11  ;;  %v2421_v0 = vsel %vm770_vm1, %v2377_v34, %v2378_v46 }
 0x1a1   : > { %v2124_v36 = vsel %vm1297_vm2, %v2098_v9, %v2099_v16  ;;  %v2125_v62 = vsel %vm1297_vm2, %v2097_v41, %v2098_v9  ;;  %v4229_v63 = vpop.f32.mrb[90].mxu1  ;;  %v2381_v48 = vrot.slane %v4273_v44, 7  ;;  %v2276_v6 = vpop.f32.mrb[87].mxu0  ;;  %v5847_v56 = vadd.f32 %v2420_v2, %v2139_v32 }
 0x1a2   : > { %v2101_v60 = vrot.slane %v4229_v63, 1  ;;  %v2020_v25 = vpop.f32.mrb[91].mxu1  ;;  %v5845_v20 = vadd.f32 %v2124_v36, %v5747_v39  ;;  %v5849_v29 = vadd.f32 %v2421_v0, %v2138_v21  ;;  %v2380_v26 = vrot.slane %v2276_v6, 7 }
 0x1a3   : > { %v2100_v61 = vrot.slane %v2020_v25, 1  ;;  %v2146_v12 = vadd.f32 %v2125_v62, %v5735_v1 }
 0x1a4   : > { %v4276_v28 = vpop.f32.mrb[88].mxu0  ;;  %v2418_v14 = vsel %vm770_vm1, %v2380_v26, %v2381_v48  ;;  %v2419_v32 = vsel %vm770_vm1, %v2379_v11, %v2380_v26 }
 0x1a5   : > { %v2122_v42 = vsel %vm1297_vm2, %v2100_v61, %v2101_v60  ;;  %v2123_v27 = vsel %vm1297_vm2, %v2099_v16, %v2100_v61  ;;  %v4232_v59 = vpop.f32.mrb[92].mxu1  ;;  %v2383_v1 = vrot.slane %v4276_v28, 7  ;;  %v2286_v34 = vpop.f32.mrb[89].mxu0  ;;  %v5863_v18 = vadd.f32 %v2418_v14, %v2141_v3 }
 0x1a6   : > { %v2103_v39 = vrot.slane %v4232_v59, 1  ;;  %v2030_v41 = vpop.f32.mrb[93].mxu1  ;;  %v5861_v21 = vadd.f32 %v2122_v42, %v5757_v47  ;;  %v5865_v22 = vadd.f32 %v2419_v32, %v2140_v10  ;;  %v2382_v40 = vrot.slane %v2286_v34, 7 }
 0x1a7   : > { %v2102_v19 = vrot.slane %v2030_v41, 1  ;;  %v2148_v43 = vadd.f32 %v2123_v27, %v5745_v8 }
 0x1a8   : > { %v4279_v16 = vpop.f32.mrb[90].mxu0  ;;  %v2416_v55 = vsel %vm770_vm1, %v2382_v40, %v2383_v1  ;;  %v2417_v3 = vsel %vm770_vm1, %v2381_v48, %v2382_v40 }
 0x1a9   : > { %v2120_v54 = vsel %vm1297_vm2, %v2102_v19, %v2103_v39  ;;  %v2121_v33 = vsel %vm1297_vm2, %v2101_v60, %v2102_v19  ;;  %v4235_v4 = vpop.f32.mrb[94].mxu1  ;;  %v2385_v8 = vrot.slane %v4279_v16, 7  ;;  %v2296_v5 = vpop.f32.mrb[91].mxu0  ;;  %v5880_v45 = vadd.f32 %v2416_v55, %v5815_v49 }
 0x1aa   : > { %v2105_v47 = vrot.slane %v4235_v4, 1  ;;  %v2040_v23 = vpop.f32.mrb[95].mxu1  ;;  %v5877_v10 = vadd.f32 %v2120_v54, %v5767_v37  ;;  %v5883_v9 = vadd.f32 %v2417_v3, %v5818_v7  ;;  %v2384_v46 = vrot.slane %v2296_v5, 7 }
 0x1ab   : > { %v2104_v11 = vrot.slane %v2040_v23, 1  ;;  %v2150_v36 = vadd.f32 %v2121_v33, %v5755_v15 }
 0x1ac   : > { %v4282_v44 = vpop.f32.mrb[92].mxu0  ;;  %v2414_v49 = vsel %vm770_vm1, %v2384_v46, %v2385_v8  ;;  %v2415_v7 = vsel %vm770_vm1, %v2383_v1, %v2384_v46 }
 0x1ad   : > { %v2118_v62 = vsel %vm1297_vm2, %v2104_v11, %v2105_v47  ;;  %v2119_v63 = vsel %vm1297_vm2, %v2103_v39, %v2104_v11  ;;  %v4238_v37 = vpop.f32.mrb[96].mxu1  ;;  %v2387_v0 = vrot.slane %v4282_v44, 7  ;;  %v2306_v15 = vpop.f32.mrb[93].mxu0  ;;  %v5896_v6 = vadd.f32 %v2414_v49, %v5829_v31 }
 0x1ae   : > { %v2107_v60 = vrot.slane %v4238_v37, 1  ;;  %v2050_v25 = vpop.f32.mrb[97].mxu1  ;;  %v2153_v2 = vadd.f32 %v2118_v62, %v5777_v13  ;;  %v5898_v61 = vadd.f32 %v2415_v7, %v2144_v51  ;;  %v2386_v26 = vrot.slane %v2306_v15, 7 }
 0x1af   : > { %v2106_v48 = vrot.slane %v2050_v25, 1  ;;  %v2152_v42 = vadd.f32 %v2119_v63, %v5765_v17 }
 0x1b0   : > { %v4285_v39 = vpop.f32.mrb[94].mxu0  ;;  %v2412_v14 = vsel %vm770_vm1, %v2386_v26, %v2387_v0  ;;  %v2413_v31 = vsel %vm770_vm1, %v2385_v8, %v2386_v26 }
 0x1b1   : > { %v2116_v27 = vsel %vm1297_vm2, %v2106_v48, %v2107_v60  ;;  %v2117_v59 = vsel %vm1297_vm2, %v2105_v47, %v2106_v48  ;;  %v4241_v28 = vpop.f32.mrb[98].mxu1  ;;  %v2389_v32 = vrot.slane %v4285_v39, 7  ;;  %v2316_v17 = vpop.f32.mrb[95].mxu0  ;;  %v5911_v34 = vadd.f32 %v2412_v14, %v5845_v20 }
 0x1b2   : > { %v2109_v13 = vrot.slane %v4241_v28, 1  ;;  %v2060_v41 = vpop.f32.mrb[99].mxu1  ;;  %v2155_v51 = vadd.f32 %v2116_v27, %v5784_v52  ;;  %v5913_v19 = vadd.f32 %v2413_v31, %v2146_v12  ;;  %v2388_v40 = vrot.slane %v2316_v17, 7 }
 0x1b3   : > { %v2108_v1 = vrot.slane %v2060_v41, 1  ;;  %v2154_v54 = vadd.f32 %v2117_v59, %v5775_v58 }
 0x1b4   : > { %v4288_v47 = vpop.f32.mrb[96].mxu0  ;;  %v2410_v55 = vsel %vm770_vm1, %v2388_v40, %v2389_v32  ;;  %v2411_v20 = vsel %vm770_vm1, %v2387_v0, %v2388_v40 }
 0x1b5   : > { %v2114_v33 = vsel %vm1297_vm2, %v2108_v1, %v2109_v13  ;;  %v2115_v4 = vsel %vm1297_vm2, %v2107_v60, %v2108_v1  ;;  %v4244_v16 = vpop.f32.mrb[100].mxu1  ;;  %v2391_v3 = vrot.slane %v4288_v47, 7  ;;  %v2326_v58 = vpop.f32.mrb[97].mxu0  ;;  %v5926_v5 = vadd.f32 %v2410_v55, %v5861_v21 }
 0x1b6   : > { %v2111_v52 = vrot.slane %v4244_v16, 1  ;;  %v2070_v23 = vpop.f32.mrb[101].mxu1  ;;  %v2157_v12 = vadd.f32 %v2114_v33, %v5788_v35  ;;  %v5928_v11 = vadd.f32 %v2411_v20, %v2148_v43  ;;  %v2390_v46 = vrot.slane %v2326_v58, 7 }
 0x1b7   : > { %v2110_v8 = vrot.slane %v2070_v23, 1  ;;  %v2156_v62 = vadd.f32 %v2115_v4, %v5782_v57 }
 0x1b8   : > { %v4291_v60 = vpop.f32.mrb[98].mxu0  ;;  %v2408_v25 = vsel %vm770_vm1, %v2390_v46, %v2391_v3  ;;  %v2409_v21 = vsel %vm770_vm1, %v2389_v32, %v2390_v46 }
 0x1b9   : > { %v2112_v63 = vsel %vm1297_vm2, %v2110_v8, %v2111_v52  ;;  %v2113_v37 = vsel %vm1297_vm2, %v2109_v13, %v2110_v8  ;;  %v4247_v44 = vpop.f32.mrb[102].mxu1  ;;  %v2393_v57 = vrot.slane %v4291_v60, 7  ;;  %v2336_v7 = vpop.f32.mrb[99].mxu0  ;;  %v5942_v0 = vadd.f32 %v2408_v25, %v5877_v10 }
 0x1ba   : > { %v2080_v35 = vpop.f32.mrb[103].mxu1  ;;  %v2159_v43 = vadd.f32 %v2112_v63, %v5790_v50  ;;  %v2158_v49 = vadd.f32 %v2113_v37, %v5786_v53  ;;  %v5944_v15 = vadd.f32 %v2409_v21, %v2150_v36  ;;  %v2392_v48 = vrot.slane %v2336_v7, 7 }
 0x1bc   : > { %v4294_v27 = vpop.f32.mrb[100].mxu0  ;;  %v2406_v28 = vsel %vm770_vm1, %v2392_v48, %v2393_v57  ;;  %v2407_v39 = vsel %vm770_vm1, %v2391_v3, %v2392_v48 }
 0x1bd   : > { %v4311_v26 = vpop.f32.mrb[104].mxu1  ;;  %v2395_v50 = vrot.slane %v4294_v27, 7  ;;  %v2346_v13 = vpop.f32.mrb[101].mxu0  ;;  %v5950_v53 = vadd.f32 %v2406_v28, %v2153_v2  ;;  %v5952_v41 = vadd.f32 %v2407_v39, %v2152_v42 }
 0x1be   : > { %v2519_v59 = vpop.f32.mrb[105].mxu1  ;;  %v2394_v10 = vrot.slane %v2346_v13, 7 }
 0x1c0   : > { %v4297_v36 = vpop.f32.mrb[102].mxu0  ;;  %v2404_v32 = vsel %vm770_vm1, %v2394_v10, %v2395_v50  ;;  %v2405_v17 = vsel %vm770_vm1, %v2393_v57, %v2394_v10 }
 0x1c1   : > { %v4314_v14 = vpop.f32.mrb[106].mxu1  ;;  %v2397_v1 = vrot.slane %v4297_v36, 7  ;;  %v2356_v40 = vpop.f32.mrb[103].mxu0  ;;  %v5958_v33 = vadd.f32 %v2404_v32, %v2155_v51  ;;  %v5960_v4 = vadd.f32 %v2405_v17, %v2154_v54 }
 0x1c2   : > { %v2527_v31 = vpop.f32.mrb[107].mxu1  ;;  %v2396_v2 = vrot.slane %v2356_v40, 7 }
 0x1c4   : > { %v4300_v42 = vpop.f32.mrb[104].mxu0  ;;  %v2402_v52 = vsel %vm770_vm1, %v2396_v2, %v2397_v1  ;;  %v2403_v23 = vsel %vm770_vm1, %v2395_v50, %v2396_v2 }
 0x1c5   : > { %v4317_v16 = vpop.f32.mrb[108].mxu1  ;;  %v2399_v55 = vrot.slane %v4300_v42, 7  ;;  %v2366_v20 = vpop.f32.mrb[105].mxu0  ;;  %v5966_v3 = vadd.f32 %v2402_v52, %v2157_v12  ;;  %v5968_v58 = vadd.f32 %v2403_v23, %v2156_v62  ;;  %v6011_v42 = vadd.s32 16, %v5340_v30 }
 0x1c6   : > { %v2535_v47 = vpop.f32.mrb[109].mxu1  ;;  %v2398_v51 = vrot.slane %v2366_v20, 7 }
 0x1c7   : > { %vm3084_vm5 = vcmp.le.s32.totalorder %v6011_v42, 16 }
 0x1c8   : > { %v4364_v54 = vpop.f32.mrb[106].mxu0  ;;  %v2400_v37 = vsel %vm770_vm1, %v2398_v51, %v2399_v55  ;;  %v2401_v44 = vsel %vm770_vm1, %v2397_v1, %v2398_v51 }
 0x1c9   : > { %v4320_v8 = vpop.f32.mrb[110].mxu1  ;;  %v5975_v60 = vpop.f32.mrb[107].mxu0  ;;  %v5978_v12 = vadd.f32 %v2400_v37, %v2159_v43  ;;  %v5980_v62 = vadd.f32 %v2401_v44, %v2158_v49 }
 0x1ca   : > { %v2663_v46 = vadd.f32 %v4320_v8, %v5831_v24  ;;  %v2543_v63 = vpop.f32.mrb[111].mxu1 }
 0x1cb   : > { %v2662_v35 = vadd.f32 %v2543_v63, %v5833_v38 }
 0x1cc   : > { %v4367_v21 = vpop.f32.mrb[108].mxu0 }
 0x1cd   : > { %v4323_v25 = vpop.f32.mrb[112].mxu1  ;;  %v2766_v7 = vpop.f32.mrb[109].mxu0 }
 0x1ce   : > { %v5983_v57 = vadd.f32 %v4323_v25, %v5847_v56  ;;  %v2553_v24 = vpop.f32.mrb[113].mxu1 }
 0x1cf   : > { %v2664_v48 = vadd.f32 %v2553_v24, %v5849_v29 }
 0x1d0   : > { %v4370_v27 = vpop.f32.mrb[110].mxu0 }
 0x1d1   : > { %v4326_v26 = vpop.f32.mrb[114].mxu1  ;;  %v2774_v38 = vpop.f32.mrb[111].mxu0 }
 0x1d2   : > { %v5987_v59 = vadd.f32 %v4326_v26, %v5863_v18  ;;  %v2563_v28 = vpop.f32.mrb[115].mxu1 }
 0x1d3   : > { %v2666_v43 = vadd.f32 %v2563_v28, %v5865_v22  ;;  %v6001_v22 = vld [vmem:[%s6244_s4] ss:$0 sm:$0xff] }
 0x1d4   : > { %v4373_v39 = vpop.f32.mrb[112].mxu0 }
 0x1d5   : > { %v4329_v49 = vpop.f32.mrb[116].mxu1  ;;  %v2903_v13 = vrot.slane %v4373_v39, 1  ;;  %v2782_v10 = vpop.f32.mrb[113].mxu0 }
 0x1d6   : > { %v5991_v50 = vadd.f32 %v4329_v49, %v5880_v45  ;;  %v2573_v56 = vpop.f32.mrb[117].mxu1  ;;  %v2902_v29 = vrot.slane %v2782_v10, 1 }
 0x1d7   : > { %v5994_v14 = vadd.f32 %v2573_v56, %v5883_v9 }
 0x1d8   : > { %v2948_v18 = vsel %vm1297_vm2, %v2902_v29, %v2903_v13  ;;  %v4376_v31 = vpop.f32.mrb[114].mxu0 }
 0x1d9   : > { %v4332_v36 = vpop.f32.mrb[118].mxu1  ;;  %v2950_v17 = vadd.f32 %v2948_v18, %v2662_v35  ;;  %v2905_v1 = vrot.slane %v4376_v31, 1  ;;  %v2792_v40 = vpop.f32.mrb[115].mxu0 }
 0x1da   : > { %v6004_v45 = vadd.f32 %v4332_v36, %v5896_v6  ;;  %v2583_v32 = vpop.f32.mrb[119].mxu1  ;;  %v2904_v2 = vrot.slane %v2792_v40, 1 }
 0x1db   : > { %v6007_v9 = vadd.f32 %v2583_v32, %v5898_v61  ;;  %v2981_v16 = vadd.f32 %v6001_v22, %v2950_v17 }
 0x1dc   : > { %v2946_v6 = vsel %vm1297_vm2, %v2904_v2, %v2905_v1  ;;  %v2947_v52 = vsel %vm1297_vm2, %v2903_v13, %v2904_v2  ;;  %v4379_v23 = vpop.f32.mrb[116].mxu0 }
 0x1dd   : > { %v4335_v47 = vpop.f32.mrb[120].mxu1  ;;  %vm3005_vm4 = vcmp.gt.f32.partialorder %v2981_v16, 0.0  ;;  %v3029_v20 = vmul.f32 0.1, %v2981_v16  ;;  %v2951_v51 = vadd.f32 %v2947_v52, %v2663_v46  ;;  %v2952_v8 = vadd.f32 %v2946_v6, %v2664_v48  ;;  %v2802_v54 = vpop.f32.mrb[117].mxu0 }
 0x1de   : > { %v6019_v61 = vadd.f32 %v4335_v47, %v5911_v34  ;;  %v2593_v55 = vpop.f32.mrb[121].mxu1  ;;  %v2907_v63 = vrot.slane %v4379_v23, 1  ;;  %v2906_v37 = vrot.slane %v2802_v54, 1 }
 0x1df   : > { %v6029_v44 = vadd.f32 %v2593_v55, %v5913_v19  ;;  %v3053_v34 = vsel %vm3005_vm4, %v2981_v16, %v3029_v20  ;;  %v2982_v35 = vadd.f32 %v6001_v22, %v2951_v51  ;;  %v2983_v25 = vadd.f32 %v6001_v22, %v2952_v8 }
 0x1e0   : > { %v3094_v21 = vsel %vm3079_vm3, %v3053_v34, 0.0  ;;  %v2944_v24 = vsel %vm1297_vm2, %v2906_v37, %v2907_v63  ;;  %v2945_v7 = vsel %vm1297_vm2, %v2905_v1, %v2906_v37  ;;  %v4382_v48 = vpop.f32.mrb[118].mxu0 }
 0x1e1   : > { %v4338_v46 = vpop.f32.mrb[122].mxu1  ;;  %3118 = vst.msk [vmem:[%s6026_s7] sm:$0xff] %vm442_vm0, %v3094_v21  ;;  %vm3006_vm6 = vcmp.gt.f32.partialorder %v2982_v35, 0.0  ;;  %vm3007_vm7 = vcmp.gt.f32.partialorder %v2983_v25, 0.0  ;;  %v3030_v27 = vmul.f32 0.1, %v2982_v35  ;;  %v2953_v38 = vadd.f32 %v2945_v7, %v5983_v57 }
 0x1e2   : > { %v6041_v19 = vadd.f32 %v4338_v46, %v5926_v5  ;;  %v2603_v26 = vpop.f32.mrb[123].mxu1  ;;  %v3031_v28 = vmul.f32 0.1, %v2983_v25  ;;  %v2954_v49 = vadd.f32 %v2944_v24, %v2666_v43  ;;  %v2909_v39 = vrot.slane %v4382_v48, 1  ;;  %v2812_v56 = vpop.f32.mrb[119].mxu0 }
 0x1e3   : > { %v6047_v13 = vadd.f32 %v2603_v26, %v5928_v11  ;;  %v3054_v10 = vsel %vm3006_vm6, %v2982_v35, %v3030_v27  ;;  %v2908_v29 = vrot.slane %v2812_v56, 1  ;;  %v2984_v31 = vadd.f32 %v6001_v22, %v2953_v38 }
 0x1e4   : > { %v3055_v5 = vsel %vm3007_vm7, %v2983_v25, %v3031_v28  ;;  %3119 = vst.msk [vmem:[%s6026_s7 + $0x8] sm:$0xff] %vm442_vm0, %v3054_v10  ;;  %v2985_v57 = vadd.f32 %v6001_v22, %v2954_v49  ;;  %v4385_v32 = vpop.f32.mrb[120].mxu0 }
 0x1e5   : > { %v4341_v36 = vpop.f32.mrb[124].mxu1  ;;  %v3096_v18 = vsel %vm3084_vm5, %v3055_v5, 0.0  ;;  %v2942_v11 = vsel %vm1297_vm2, %v2908_v29, %v2909_v39  ;;  %v2943_v1 = vsel %vm1297_vm2, %v2907_v63, %v2908_v29  ;;  %v2911_v40 = vrot.slane %v4385_v32, 1  ;;  %v2822_v2 = vpop.f32.mrb[121].mxu0 }
 0x1e6   : > { %v6056_v43 = vadd.f32 %v4341_v36, %v5942_v0  ;;  %v2613_v17 = vpop.f32.mrb[125].mxu1  ;;  %3120 = vst.msk [vmem:[%s6026_s7 + $0x10] sm:$0xff] %vm442_vm0, %v3096_v18  ;;  %vm3008_vm8 = vcmp.gt.f32.partialorder %v2984_v31, 0.0  ;;  %vm3009_vm9 = vcmp.gt.f32.partialorder %v2985_v57, 0.0  ;;  %v3032_v47 = vmul.f32 0.1, %v2984_v31 }
 0x1e7   : > { %v6065_v16 = vadd.f32 %v2613_v17, %v5944_v15  ;;  %v3033_v0 = vmul.f32 0.1, %v2985_v57  ;;  %v2955_v6 = vadd.f32 %v2943_v1, %v5987_v59  ;;  %v2956_v52 = vadd.f32 %v2942_v11, %v5994_v14 }
 0x1e8   : > { %v2910_v23 = vrot.slane %v2822_v2, 1  ;;  %v3056_v20 = vsel %vm3008_vm8, %v2984_v31, %v3032_v47  ;;  %v4388_v8 = vpop.f32.mrb[122].mxu0 }
 0x1e9   : > { %v4344_v55 = vpop.f32.mrb[126].mxu1  ;;  %v3057_v51 = vsel %vm3009_vm9, %v2985_v57, %v3033_v0  ;;  %v3097_v15 = vsel %vm3079_vm3, %v3056_v20, 0.0  ;;  %v2986_v37 = vadd.f32 %v6001_v22, %v2955_v6  ;;  %v2987_v59 = vadd.f32 %v6001_v22, %v2956_v52  ;;  %v2832_v34 = vpop.f32.mrb[123].mxu0 }
 0x1ea   : > { %v6070_v54 = vadd.f32 %v4344_v55, %v5950_v53  ;;  %v2623_v63 = vpop.f32.mrb[127].mxu1  ;;  %3122 = vst.msk [vmem:[%s6026_s7 + $0x20] sm:$0xff] %vm442_vm0, %v3057_v51  ;;  %v2940_v14 = vsel %vm1297_vm2, %v2910_v23, %v2911_v40  ;;  %3121 = vst.msk [vmem:[%s6026_s7 + $0x18] sm:$0xff] %vm442_vm0, %v3097_v15  ;;  %v2941_v53 = vsel %vm1297_vm2, %v2909_v39, %v2910_v23  ;;  %v2913_v25 = vrot.slane %v4388_v8, 1 }
 0x1eb   : > { %v2958_v35 = vadd.f32 %v2940_v14, %v6007_v9  ;;  %v2912_v46 = vrot.slane %v2832_v34, 1  ;;  %vm3010_vm10 = vcmp.gt.f32.partialorder %v2986_v37, 0.0  ;;  %vm3011_vm11 = vcmp.gt.f32.partialorder %v2987_v59, 0.0 }
 0x1ec   : > { %v3034_v21 = vmul.f32 0.1, %v2986_v37  ;;  %v3035_v24 = vmul.f32 0.1, %v2987_v59  ;;  %v2957_v7 = vadd.f32 %v2941_v53, %v5991_v50  ;;  %v6091_v28 = vpop.f32.mrb[124].mxu0  ;;  %v2678_v17 = vadd.f32 %v2623_v63, %v5952_v41 }
 0x1ed   : > { %v2989_v48 = vadd.f32 %v6001_v22, %v2958_v35  ;;  %v2938_v26 = vsel %vm1297_vm2, %v2912_v46, %v2913_v25  ;;  %v2939_v27 = vsel %vm1297_vm2, %v2911_v40, %v2912_v46  ;;  %v4347_v9 = vpop.f32.mrb[128].mxu1  ;;  %v2842_v50 = vpop.f32.mrb[125].mxu0  ;;  %v2915_v31 = vrot.slane %v6091_v28, 1 }
 0x1ee   : > { %v3058_v38 = vsel %vm3010_vm10, %v2986_v37, %v3034_v21  ;;  %v3059_v49 = vsel %vm3011_vm11, %v2987_v59, %v3035_v24  ;;  %v2959_v39 = vadd.f32 %v2939_v27, %v6004_v45  ;;  %v2960_v56 = vadd.f32 %v2938_v26, %v6029_v44  ;;  %v2633_v10 = vpop.f32.mrb[129].mxu1 }
 0x1ef   : > { %v3099_v5 = vsel %vm3084_vm5, %v3058_v38, 0.0  ;;  %v3100_v29 = vsel %vm3079_vm3, %v3059_v49, 0.0  ;;  %v2988_v36 = vadd.f32 %v6001_v22, %v2957_v7  ;;  %vm3013_vm12 = vcmp.gt.f32.partialorder %v2989_v48, 0.0 }
 0x1f0   : > { %3123 = vst.msk [vmem:[%s6026_s7 + $0x28] sm:$0xff] %vm442_vm0, %v3099_v5  ;;  %3124 = vst.msk [vmem:[%s6026_s7 + $0x30] sm:$0xff] %vm442_vm0, %v3100_v29  ;;  %v3037_v18 = vmul.f32 0.1, %v2989_v48  ;;  %v2990_v45 = vadd.f32 %v6001_v22, %v2959_v39  ;;  %v2991_v44 = vadd.f32 %v6001_v22, %v2960_v56  ;;  %v2914_v11 = vrot.slane %v2842_v50, 1  ;;  %v4394_v1 = vpop.f32.mrb[126].mxu0 }
 0x1f1   : > { %v4350_v57 = vpop.f32.mrb[130].mxu1  ;;  %vm3012_vm13 = vcmp.gt.f32.partialorder %v2988_v36, 0.0  ;;  %v3036_v32 = vmul.f32 0.1, %v2988_v36  ;;  %v2852_v0 = vpop.f32.mrb[127].mxu0  ;;  %v6120_v8 = vadd.f32 %v4347_v9, %v5958_v33  ;;  %v2917_v14 = vrot.slane %v4394_v1, 1 }
 0x1f2   : > { %v2643_v40 = vpop.f32.mrb[131].mxu1  ;;  %v3061_v2 = vsel %vm3013_vm12, %v2989_v48, %v3037_v18  ;;  %vm3014_vm14 = vcmp.gt.f32.partialorder %v2990_v45, 0.0  ;;  %vm3015_vm15 = vcmp.gt.f32.partialorder %v2991_v44, 0.0  ;;  %v3038_v47 = vmul.f32 0.1, %v2990_v45 }
 0x1f3   : > { %v3060_v6 = vsel %vm3012_vm13, %v2988_v36, %v3036_v32  ;;  %v3102_v52 = vsel %vm3084_vm5, %v3061_v2, 0.0  ;;  %v3039_v23 = vmul.f32 0.1, %v2991_v44  ;;  %v2936_v55 = vsel %vm1297_vm2, %v2914_v11, %v2915_v31 }
 0x1f4   : > { %3125 = vst.msk [vmem:[%s6026_s7 + $0x38] sm:$0xff] %vm442_vm0, %v3060_v6  ;;  %3126 = vst.msk [vmem:[%s6026_s7 + $0x40] sm:$0xff] %vm442_vm0, %v3102_v52  ;;  %v3062_v41 = vsel %vm3014_vm14, %v2990_v45, %v3038_v47  ;;  %v2937_v20 = vsel %vm1297_vm2, %v2913_v25, %v2914_v11  ;;  %v2962_v51 = vadd.f32 %v2936_v55, %v6047_v13  ;;  %v4397_v34 = vpop.f32.mrb[128].mxu0  ;;  %v2916_v33 = vrot.slane %v2852_v0, 1 }
 0x1f5   : > { %v4353_v63 = vpop.f32.mrb[132].mxu1  ;;  %v3063_v15 = vsel %vm3015_vm15, %v2991_v44, %v3039_v23  ;;  %v3103_v37 = vsel %vm3079_vm3, %v3062_v41, 0.0  ;;  %v2961_v59 = vadd.f32 %v2937_v20, %v6019_v61  ;;  %v2680_v13 = vadd.f32 %v2633_v10, %v5960_v4  ;;  %v2862_v46 = vpop.f32.mrb[129].mxu0 }
 0x1f6   : > { %v2653_v53 = vpop.f32.mrb[133].mxu1  ;;  %3127 = vst.msk [vmem:[%s6026_s7 + $0x48] sm:$0xff] %vm442_vm0, %v3103_v37  ;;  %3128 = vst.msk [vmem:[%s6026_s7 + $0x50] sm:$0xff] %vm442_vm0, %v3063_v15  ;;  %v2993_v35 = vadd.f32 %v6001_v22, %v2962_v51  ;;  %v6132_v25 = vadd.f32 %v4350_v57, %v5966_v3  ;;  %v2919_v24 = vrot.slane %v4397_v34, 1  ;;  %v6136_v61 = vadd.f32 %v2643_v40, %v5968_v58 }
 0x1f7   : > { %v2992_v21 = vadd.f32 %v6001_v22, %v2961_v59  ;;  %v2918_v7 = vrot.slane %v2862_v46, 1  ;;  %v2934_v26 = vsel %vm1297_vm2, %v2916_v33, %v2917_v14  ;;  %v2935_v4 = vsel %vm1297_vm2, %v2915_v31, %v2916_v33 }
 0x1f8   : > { %vm3017_vm1 = vcmp.gt.f32.partialorder %v2993_v35, 0.0  ;;  %v3041_v48 = vmul.f32 0.1, %v2993_v35  ;;  %v2963_v27 = vadd.f32 %v2935_v4, %v6041_v19  ;;  %v2964_v28 = vadd.f32 %v2934_v26, %v6065_v16  ;;  %v4400_v9 = vpop.f32.mrb[130].mxu0 }
 0x1f9   : > { %vm3016_vm4 = vcmp.gt.f32.partialorder %v2992_v21, 0.0  ;;  %v3040_v3 = vmul.f32 0.1, %v2992_v21  ;;  %v2932_v38 = vsel %vm1297_vm2, %v2918_v7, %v2919_v24  ;;  %v2933_v49 = vsel %vm1297_vm2, %v2917_v14, %v2918_v7  ;;  %v2872_v56 = vpop.f32.mrb[131].mxu0 }
 0x1fa   : > { %v3065_v58 = vsel %vm3017_vm1, %v2993_v35, %v3041_v48  ;;  %v2685_v39 = vadd.f32 %v4353_v63, %v5978_v12  ;;  %v2994_v19 = vadd.f32 %v6001_v22, %v2963_v27  ;;  %v2995_v16 = vadd.f32 %v6001_v22, %v2964_v28 }
 0x1fb   : > { %v3064_v50 = vsel %vm3016_vm4, %v2992_v21, %v3040_v3  ;;  %v3106_v10 = vsel %vm3079_vm3, %v3065_v58, 0.0  ;;  %v2965_v29 = vadd.f32 %v2933_v49, %v6056_v43  ;;  %v2966_v36 = vadd.f32 %v2932_v38, %v2678_v17 }
 0x1fc   : > { %v3105_v5 = vsel %vm3084_vm5, %v3064_v50, 0.0  ;;  %3130 = vst.msk [vmem:[%s6026_s7 + $0x60] sm:$0xff] %vm442_vm0, %v3106_v10  ;;  %v2921_v18 = vrot.slane %v4400_v9, 1  ;;  %vm3018_vm6 = vcmp.gt.f32.partialorder %v2994_v19, 0.0  ;;  %vm3019_vm7 = vcmp.gt.f32.partialorder %v2995_v16, 0.0  ;;  %v4403_v11 = vpop.f32.mrb[132].mxu0 }
 0x1fd   : > { %3129 = vst.msk [vmem:[%s6026_s7 + $0x58] sm:$0xff] %vm442_vm0, %v3105_v5  ;;  %v3042_v12 = vmul.f32 0.1, %v2994_v19  ;;  %v3043_v45 = vmul.f32 0.1, %v2995_v16  ;;  %v2996_v44 = vadd.f32 %v6001_v22, %v2965_v29  ;;  %v2997_v31 = vadd.f32 %v6001_v22, %v2966_v36  ;;  %v2882_v2 = vpop.f32.mrb[133].mxu0 }
 0x1fe   : > { %v2684_v57 = vadd.f32 %v2653_v53, %v5980_v62  ;;  %v2920_v32 = vrot.slane %v2872_v56, 1  ;;  %v2901_v43 = vrot.slane %v5975_v60, 1  ;;  %v2923_v40 = vrot.slane %v4403_v11, 1 }
 0x1ff   : > { %v3066_v17 = vsel %vm3018_vm6, %v2994_v19, %v3042_v12  ;;  %v3067_v1 = vsel %vm3019_vm7, %v2995_v16, %v3043_v45  ;;  %vm3020_vm8 = vcmp.gt.f32.partialorder %v2996_v44, 0.0  ;;  %vm3021_vm9 = vcmp.gt.f32.partialorder %v2997_v31, 0.0 }
 0x200   : > { %v3108_v47 = vsel %vm3084_vm5, %v3067_v1, 0.0  ;;  %3131 = vst.msk [vmem:[%s6026_s7 + $0x68] sm:$0xff] %vm442_vm0, %v3066_v17  ;;  %v3044_v0 = vmul.f32 0.1, %v2996_v44  ;;  %v3045_v62 = vmul.f32 0.1, %v2997_v31  ;;  %v2930_v60 = vsel %vm1297_vm2, %v2920_v32, %v2921_v18 }
 0x201   : > { %3132 = vst.msk [vmem:[%s6026_s7 + $0x70] sm:$0xff] %vm442_vm0, %v3108_v47  ;;  %v2931_v6 = vsel %vm1297_vm2, %v2919_v24, %v2920_v32  ;;  %v2922_v52 = vrot.slane %v2882_v2, 1  ;;  %v4406_v23 = vpop.f32.mrb[134].mxu0  ;;  %v2968_v20 = vadd.f32 %v2930_v60, %v2680_v13 }
 0x202   : > { %v3068_v55 = vsel %vm3020_vm8, %v2996_v44, %v3044_v0  ;;  %v2967_v41 = vadd.f32 %v2931_v6, %v6070_v54  ;;  %v2925_v51 = vrot.slane %v4406_v23, 1  ;;  %v2892_v63 = vpop.f32.mrb[135].mxu0  ;;  %v3069_v15 = vsel %vm3021_vm9, %v2997_v31, %v3045_v62 }
 0x203   : > { %v3109_v37 = vsel %vm3079_vm3, %v3068_v55, 0.0  ;;  %v2928_v59 = vsel %vm1297_vm2, %v2922_v52, %v2923_v40  ;;  %v2929_v14 = vsel %vm1297_vm2, %v2921_v18, %v2922_v52  ;;  %3134 = vst.msk [vmem:[%s6026_s7 + $0x80] sm:$0xff] %vm442_vm0, %v3069_v15  ;;  %v2999_v54 = vadd.f32 %v6001_v22, %v2968_v20 }
 0x204   : > { %3133 = vst.msk [vmem:[%s6026_s7 + $0x78] sm:$0xff] %vm442_vm0, %v3109_v37  ;;  %v2998_v34 = vadd.f32 %v6001_v22, %v2967_v41  ;;  %v2969_v53 = vadd.f32 %v2929_v14, %v6120_v8  ;;  %v2970_v35 = vadd.f32 %v2928_v59, %v6136_v61  ;;  %v2949_v13 = vsel %vm1297_vm2, %v2925_v51, %v2901_v43 }
 0x205   : > { %v2924_v33 = vrot.slane %v2892_v63, 1  ;;  %vm3023_vm11 = vcmp.gt.f32.partialorder %v2999_v54, 0.0  ;;  %v3047_v21 = vmul.f32 0.1, %v2999_v54  ;;  %v2973_v48 = vadd.f32 %v2949_v13, %v2685_v39 }
 0x206   : > { %vm3022_vm10 = vcmp.gt.f32.partialorder %v2998_v34, 0.0  ;;  %v3046_v46 = vmul.f32 0.1, %v2998_v34  ;;  %v3000_v24 = vadd.f32 %v6001_v22, %v2969_v53  ;;  %v3001_v7 = vadd.f32 %v6001_v22, %v2970_v35 }
 0x207   : > { %v2926_v8 = vsel %vm1297_vm2, %v2924_v33, %v2925_v51  ;;  %v3071_v61 = vsel %vm3023_vm11, %v2999_v54, %v3047_v21  ;;  %v2927_v4 = vsel %vm1297_vm2, %v2923_v40, %v2924_v33  ;;  %v3004_v38 = vadd.f32 %v6001_v22, %v2973_v48 }
 0x208   : > { %v3070_v26 = vsel %vm3022_vm10, %v2998_v34, %v3046_v46  ;;  %v2972_v3 = vadd.f32 %v2926_v8, %v2684_v57  ;;  %v3112_v28 = vsel %vm3079_vm3, %v3071_v61, 0.0  ;;  %vm3024_vm12 = vcmp.gt.f32.partialorder %v3000_v24, 0.0 }
 0x209   : > { %v3111_v27 = vsel %vm3084_vm5, %v3070_v26, 0.0  ;;  %vm3025_vm13 = vcmp.gt.f32.partialorder %v3001_v7, 0.0  ;;  %3136 = vst.msk [vmem:[%s6026_s7 + $0x90] sm:$0xff] %vm442_vm0, %v3112_v28  ;;  %v3048_v9 = vmul.f32 0.1, %v3000_v24  ;;  %v2971_v49 = vadd.f32 %v2927_v4, %v6132_v25 }
 0x20a   : > { %3135 = vst.msk [vmem:[%s6026_s7 + $0x88] sm:$0xff] %vm442_vm0, %v3111_v27  ;;  %v3049_v58 = vmul.f32 0.1, %v3001_v7  ;;  %v3003_v39 = vadd.f32 %v6001_v22, %v2972_v3  ;;  %vm3028_vm2 = vcmp.gt.f32.partialorder %v3004_v38, 0.0  ;;  %v3052_v10 = vmul.f32 0.1, %v3004_v38 }
 0x20b   : > { %v3072_v56 = vsel %vm3024_vm12, %v3000_v24, %v3048_v9  ;;  %v3002_v16 = vadd.f32 %v6001_v22, %v2971_v49 }
 0x20c   : > { %v3073_v50 = vsel %vm3025_vm13, %v3001_v7, %v3049_v58  ;;  %3137 = vst.msk [vmem:[%s6026_s7 + $0x98] sm:$0xff] %vm442_vm0, %v3072_v56  ;;  %vm3027_vm14 = vcmp.gt.f32.partialorder %v3003_v39, 0.0  ;;  %v3051_v5 = vmul.f32 0.1, %v3003_v39  ;;  %v3076_v25 = vsel %vm3028_vm2, %v3004_v38, %v3052_v10 }
 0x20d   : > { %v3114_v19 = vsel %vm3084_vm5, %v3073_v50, 0.0  ;;  %v3117_v29 = vsel %vm3084_vm5, %v3076_v25, 0.0  ;;  %vm3026_vm15 = vcmp.gt.f32.partialorder %v3002_v16, 0.0  ;;  %v3050_v36 = vmul.f32 0.1, %v3002_v16 }
 0x20e   : > { %3138 = vst.msk [vmem:[%s6026_s7 + $0xa0] sm:$0xff] %vm442_vm0, %v3114_v19  ;;  %v3075_v18 = vsel %vm3027_vm14, %v3003_v39, %v3051_v5  ;;  %3141 = vst.msk [vmem:[%s6026_s7 + $0xb8] sm:$0xff] %vm442_vm0, %v3117_v29 }
 0x20f   : > { %3140 = vst.msk [vmem:[%s6026_s7 + $0xb0] sm:$0xff] %vm442_vm0, %v3075_v18  ;;  %v3074_v12 = vsel %vm3026_vm15, %v3002_v16, %v3050_v36 }
 0x210   : > { %v3115_v45 = vsel %vm3079_vm3, %v3074_v12, 0.0 }
 0x211   : > { %3139 = vst.msk [vmem:[%s6026_s7 + $0xa8] sm:$0xff] %vm442_vm0, %v3115_v45 }
 0x212 PF: > { %s15_s22 = sadd.s32 1, %s4583_s22   ;;  %s6248_s18 = smov %s4575_s20 }
 0x213   : > { %p12_p12 = scmp.ge.s32.totalorder %s15_s22, 6   ;;  %s6249_s19 = smov %s4579_s21 }
 0x214   : > { %s6250_s20 = smov %s6253_s23  ;;  %s6251_s21 = smov %s6257_s24 }
 0x215   :  { %14 = sbr.rel (!%p12_p12) target bundleno = 3 (0x3), region = 84 }

// kernel: multi_classification_forward.3
= control target key start
LH: loop header
LB: loop body
LE: loop exit
PB: predicated region body
PF: predicated region fallthrough
CT: control target
= control target key end

     0   :  { %s4447_s18 = smov 0   ;;  %s4449_s19 = smov 0   ;;  %s6000_s0 = inlined_call_operand.vmem [shape: f32[2,16,24,4], index: 0, kind: input, shape index: {}, may-alias: {0,1,2}]   ;;  %s6001_s1 = inlined_call_operand.vmem [shape: f32[2,16,24,4], index: 1, kind: input, shape index: {}, may-alias: {0,1,2}]   ;;  %s6002_s2 = inlined_call_operand.vmem [shape: f32[2,16,24,4], index: 2, kind: input, shape index: {}, may-alias: {0,1,2}]   ;;  %s6003_s3 = inlined_call_operand.vmem [shape: f32[9,4,32], index: 3, kind: input, shape index: {}]   ;;  %s6004_s4 = inlined_call_operand.vmem [shape: f32[1,32], index: 4, kind: input, shape index: {}]   ;;  %s6005_s5 = inlined_call_operand.vmem [shape: f32[2,16,24,32], index: 5, kind: output, shape index: {}]  }
   0x1   :  { %s4451_s20 = smov 0   ;;  %s4453_s21 = smov 0  }
   0x2   :  { %s4455_s22 = smov 0  }
   0x3 LB: > { %s24_s23 = sadd.s32 1, %s4407_s20  ;;  %s27_s24 = sadd.s32 1, %s4411_s21  ;;  %s4415_s22 = sphi %s4455_s22, %s15_s22   ;;  %s4411_s21 = sphi %s4453_s21, %s6011_s21   ;;  %s4407_s20 = sphi %s4451_s20, %s6010_s20   ;;  %s4403_s19 = sphi %s4449_s19, %s6009_s19   ;;  %s4399_s18 = sphi %s4447_s18, %s6008_s18  }
   0x4   : > { %p25_p0 = scmp.ge.s32.totalorder %s24_s23, 2  ;;  %p3295_p1 = scmp.ge.s32.totalorder %s4415_s22, 1 }
   0x5   : > { %p273_p2 = scmp.lt.s32.totalorder %s4415_s22, 5 }
   0x6   : > { %s6013_s23 = smov (%p25_p0, %s24_s23), 0  ;;  %s6015_s24 = smov (!%p25_p0, %s27_s24), %s4411_s21 }
   0x7   : > { %p274_p3 = pnand %p3295_p1, %p273_p2  ;;  %p29_p4 = scmp.ge.s32.totalorder %s6015_s24, 2 }
   0x8   : > { %v438_v0 = vld [vmem:[%s6003_s3] sm:$0xf] (!%p274_p3)  ;;  %vm530_vm0 = vcmask (!%p274_p3), 1043456   ;;  %s4483_s27 = sshll.u32 (!%p274_p3), %s4399_s18, 3  ;;  %p338_p5 = scmp.lt.s32.totalorder (!%p274_p3), %s4403_s19, 1  ;;  %vm439_vm1 = vcmask (!%p274_p3), 31744   ;;  %v769_v39 = vlaneseq (!%p274_p3) }
   0x9   : > { %s6017_s24 = smov (%p29_p4, %s6015_s24), 0  ;;  %277 = sbr.rel (%p274_p3) target bundleno = 528 (0x210), region = 40 }
   0xa   : > { %4313 = vmatprep.subr.msk.mxu1 (!%p274_p3), %vm530_vm0, %v438_v0  ;;  %p340_p6 = scmp.lt.s32.totalorder (!%p274_p3), %s4483_s27, 15  ;;  %3890 = vmatprep.subr.msk.mxu0 (!%p274_p3), %vm530_vm0, %v438_v0  ;;  %s3299_s28 = sadd.s32 (!%p274_p3), 4294967295, %s4483_s27  ;;  %v3376_v1 = vld [vmem:[%s6003_s3 + $0x8] sm:$0xf] (!%p274_p3)  ;;  %v3344_v2 = vld [vmem:[%s6003_s3 + $0x4] sm:$0xf] (!%p274_p3) }
   0xb   : > { %4314 = vmatpush3.msk.msra.mxu1 (!%p274_p3), %vm530_vm0, %v438_v0  ;;  %3891 = vmatpush3.msk.msra.mxu0 (!%p274_p3), %vm530_vm0, %v438_v0  ;;  %p350_p7 = scmp.gt.s32.totalorder (!%p274_p3), %s3299_s28, 0  ;;  %p3300_p8 = scmp.lt.s32.totalorder (!%p274_p3), %s3299_s28, 15  ;;  %v4529_v6 = vld [vmem:[%s6003_s3 + $0xc] sm:$0xf] (!%p274_p3)  ;;  %v4582_v13 = vld [vmem:[%s6003_s3 + $0x10] sm:$0xf] (!%p274_p3) }
   0xc   : > { %3984 = vmatprep.subr.msk.mxu0 (!%p274_p3), %vm530_vm0, %v3376_v1  ;;  %3937 = vmatprep.subr.msk.mxu1 (!%p274_p3), %vm530_vm0, %v3344_v2  ;;  %p393_p9 = scmp.gt.s32.totalorder (!%p274_p3), %s4399_s18, 0  ;;  %s3610_s16 = sadd.s32 (!%p274_p3), 8, %s4483_s27  ;;  %v4688_v32 = vld [vmem:[%s6003_s3 + $0x14] sm:$0xf] (!%p274_p3)  ;;  %v4730_v36 = vld [vmem:[%s6003_s3 + $0x18] sm:$0xf] (!%p274_p3) }
   0xd   : > { %p4533_p10 = scmp.lt.s32.totalorder (!%p274_p3), %s3610_s16, 15  ;;  %v4835_v37 = vld [vmem:[%s6003_s3 + $0x1c] sm:$0xf] (!%p274_p3)  ;;  %v4868_v38 = vld [vmem:[%s6003_s3 + $0x20] sm:$0xf] (!%p274_p3)  ;;  %v5100_v40 = vshrl.u32 (!%p274_p3), %v769_v39, 7 }
   0xe   : > { %vm3119_vm6 = vcmask (!%p274_p3), 261120  }
   0xf   : > { %vm771_vm2 = vcmp.lt.s32.totalorder (!%p274_p3), %v5100_v40, 1  ;;  %vm1298_vm3 = vcmp.lt.s32.totalorder (!%p274_p3), %v5100_v40, 7  ;;  %vm3080_vm4 = vcmp.ge.s32.totalorder (!%p274_p3), %v5100_v40, 1 }
  0x10   : > { %s6019_s19 = smov (!%p338_p5, %s4403_s19), 1  ;;  %s6021_s28 = smov (!%p350_p7, %s3299_s28), 0 }
  0x11   : > { %s341_s8 = scalar_select %p340_p6, %s4483_s27, 15 }
  0x12   : > { %s4500_s9 = smul.u32 48, %s6019_s19  ;;  %s6023_s28 = smov (!%p3300_p8, %s6021_s28), 15 }
  0x13   : > { %s4315_s10 = smul.u32 3, %s341_s8  ;;  %s403_s27 = sadd.s32 1, %s4399_s18 }
  0x14   : > { %s4317_s25 = smul.u32 3, %s6023_s28  ;;  %p4555_p11 = scmp.lt.s32.totalorder %s403_s27, 2 }
  0x15   : > { %s4503_s11 = sadd.s32 %s4500_s9, %s4315_s10  ;;  %s6025_s16 = smov (!%p4533_p10, %s3610_s16), 15 }
  0x16   : > { %s3297_s12 = sshll.u32 %s4503_s11, 3  ;;  %s358_s29 = sadd.s32 %s4317_s25, %s4500_s9 }
  0x17   : > { %s4512_s15 = scalar_lea.vmem %s6000_s0, %s3297_s12  ;;  %s3305_s28 = sshll.u32 %s358_s29, 3 }
  0x18   : > { %v4516_v3 = vld [vmem:[%s4512_s15 + $0x68] sm:$0xff]  ;;  %v4519_v4 = vld [vmem:[%s4512_s15 + $0x70] sm:$0xff]  ;;  %v4522_v5 = vld [vmem:[%s4512_s15 + $0x78] sm:$0xff]  ;;  %s360_s7 = scalar_lea.vmem %s6001_s1, %s3305_s28  ;;  %s6027_s16 = smov (!%p4533_p10, %s6025_s16), 15 }
  0x19   : > { %3916 = vmatprep.mubr.msk.f32.mxu1 %vm439_vm1, %v4516_v3  ;;  %v4540_v7 = vld [vmem:[%s4512_s15 + $0x80] sm:$0xff]  ;;  %v4546_v8 = vld [vmem:[%s4512_s15 + $0x88] sm:$0xff]  ;;  %s4360_s10 = scalar_select %p393_p9, 255, 0  ;;  %v4564_v9 = vld [vmem:[%s4512_s15 + $0x90] sm:$0xff] }
  0x1a   : > { %3917 = vmatmul.mubr.msk.f32.vlgmr.msra.gmra.mrb[0].mxu1 %vm439_vm1, %v4519_v4  ;;  %v4567_v10 = vld [vmem:[%s4512_s15 + $0x98] sm:$0xff]  ;;  %v4591_v15 = vld [vmem:[%s4512_s15 + $0xa0] sm:$0xff]  ;;  %v4600_v17 = vld [vmem:[%s4512_s15 + $0xa8] sm:$0xff]  ;;  %s4318_s14 = smul.u32 3, %s6027_s16 }
  0x1b   : > { %3919 = vmatprep.mubr.msk.f32.mxu1 %vm439_vm1, %v4522_v5  ;;  %3938 = vmatpush3.msk.msra.mxu1 %vm530_vm0, %v3344_v2  ;;  %v4569_v11 = vld [vmem:[%s360_s7] sm:%s4360_s10]  ;;  %v4573_v12 = vld [vmem:[%s360_s7 + $0x8] sm:%s4360_s10]  ;;  %s4369_s17 = scalar_select %p4555_p11, 255, 0 }
  0x1c   : > { %4031 = vmatprep.subr.msk.mxu1 %vm530_vm0, %v4529_v6  ;;  %3892 = vmatprep.mubr.msk.f32.mxu0 %vm439_vm1, %v4569_v11  ;;  %v4586_v14 = vld [vmem:[%s360_s7 + $0x10] sm:%s4360_s10]  ;;  %v4597_v16 = vld [vmem:[%s4512_s15] sm:$0xff]  ;;  %v4605_v18 = vld [vmem:[%s4512_s15 + $0x8] sm:$0xff]  ;;  %s375_s16 = sadd.s32 %s4318_s14, %s4500_s9 }
  0x1d   : > { %3893 = vmatmul.mubr.msk.f32.vlgmr.msra.gmra.mrb[0].mxu0 %vm439_vm1, %v4573_v12  ;;  %v4616_v19 = vld [vmem:[%s4512_s15 + $0xb0] sm:$0xff]  ;;  %v4626_v21 = vld [vmem:[%s4512_s15 + $0xb8] sm:$0xff]  ;;  %s3310_s19 = sshll.u32 %s375_s16, 3  ;;  %v4646_v24 = vld [vmem:[%s4512_s15 + $0x20] sm:$0xff] }
  0x1e   : > { %3920 = vmatmul.mubr.msk.f32.gmra.mrb[2].mxu1 %vm439_vm1, %v4540_v7  ;;  %3985 = vmatpush3.msk.msra.mxu0 %vm530_vm0, %v3376_v1  ;;  %v4623_v20 = vld [vmem:[%s4512_s15 + $0x10] sm:$0xff]  ;;  %v4630_v22 = vld [vmem:[%s4512_s15 + $0x18] sm:$0xff]  ;;  %s377_s27 = scalar_lea.vmem %s6002_s2, %s3310_s19  ;;  %v4649_v25 = vld [vmem:[%s4512_s15 + $0x28] sm:$0xff] }
  0x1f   : > { %3922 = vmatprep.mubr.msk.f32.mxu1 %vm439_vm1, %v4546_v8  ;;  %3895 = vmatprep.mubr.msk.f32.mxu0 %vm439_vm1, %v4586_v14  ;;  %v4641_v23 = vld [vmem:[%s377_s27] sm:%s4369_s17]  ;;  %v4651_v26 = vld [vmem:[%s377_s27 + $0x8] sm:%s4369_s17] }
  0x20   : > { %4078 = vmatprep.subr.msk.mxu0 %vm530_vm0, %v4582_v13  ;;  %v4659_v27 = vld [vmem:[%s377_s27 + $0x10] sm:%s4369_s17]  ;;  %v4667_v29 = vld [vmem:[%s4512_s15 + $0x38] sm:$0xff]  ;;  %v4678_v30 = vld [vmem:[%s4512_s15 + $0x40] sm:$0xff]  ;;  %s5786_s17 = scalar_lea.vmem %s6005_s5, %s3297_s12 }
  0x21   : > { %3896 = vmatmul.mubr.msk.f32.gmra.mrb[2].mxu0 %vm439_vm1, %v4597_v16  ;;  %v4664_v28 = vld [vmem:[%s4512_s15 + $0x30] sm:$0xff]  ;;  %v4681_v31 = vld [vmem:[%s4512_s15 + $0x48] sm:$0xff]  ;;  %v4702_v34 = vld [vmem:[%s4512_s15 + $0x58] sm:$0xff] }
  0x22   : > { %3923 = vmatmul.mubr.msk.f32.gmra.mrb[4].mxu1 %vm439_vm1, %v4564_v9  ;;  %3898 = vmatprep.mubr.msk.f32.mxu0 %vm439_vm1, %v4605_v18  ;;  %v4697_v33 = vld [vmem:[%s4512_s15 + $0x50] sm:$0xff]  ;;  %v4715_v35 = vld [vmem:[%s4512_s15 + $0x60] sm:$0xff] }
  0x23   : > { %3925 = vmatprep.mubr.msk.f32.mxu1 %vm439_vm1, %v4567_v10 }
  0x25   : > { %3899 = vmatmul.mubr.msk.f32.gmra.mrb[4].mxu0 %vm439_vm1, %v4623_v20 }
  0x26   : > { %3926 = vmatmul.mubr.msk.f32.gmra.mrb[6].mxu1 %vm439_vm1, %v4591_v15  ;;  %3901 = vmatprep.mubr.msk.f32.mxu0 %vm439_vm1, %v4630_v22 }
  0x27   : > { %3928 = vmatprep.mubr.msk.f32.mxu1 %vm439_vm1, %v4600_v17 }
  0x29   : > { %3902 = vmatmul.mubr.msk.f32.gmra.mrb[6].mxu0 %vm439_vm1, %v4646_v24 }
  0x2a   : > { %3929 = vmatmul.mubr.msk.f32.gmra.mrb[8].mxu1 %vm439_vm1, %v4616_v19  ;;  %3904 = vmatprep.mubr.msk.f32.mxu0 %vm439_vm1, %v4649_v25 }
  0x2b   : > { %3931 = vmatprep.mubr.msk.f32.mxu1 %vm439_vm1, %v4626_v21 }
  0x2d   : > { %3905 = vmatmul.mubr.msk.f32.gmra.mrb[8].mxu0 %vm439_vm1, %v4664_v28 }
  0x2e   : > { %3932 = vmatmul.mubr.msk.f32.gmra.mrb[10].mxu1 %vm439_vm1, %v4641_v23  ;;  %3907 = vmatprep.mubr.msk.f32.mxu0 %vm439_vm1, %v4667_v29 }
  0x2f   : > { %3934 = vmatprep.mubr.msk.f32.mxu1 %vm439_vm1, %v4651_v26 }
  0x31   : > { %3908 = vmatmul.mubr.msk.f32.gmra.mrb[10].mxu0 %vm439_vm1, %v4678_v30 }
  0x32   : > { %3935 = vmatmul.mubr.msk.f32.gmra.mrb[12].mxu1 %vm439_vm1, %v4659_v27  ;;  %3910 = vmatprep.mubr.msk.f32.mxu0 %vm439_vm1, %v4681_v31 }
  0x33   : > { %3939 = vmatprep.mubr.msk.f32.mxu1 %vm439_vm1, %v4569_v11 }
  0x35   : > { %3911 = vmatmul.mubr.msk.f32.gmra.mrb[12].mxu0 %vm439_vm1, %v4697_v33 }
  0x36   : > { %3940 = vmatmul.mubr.msk.f32.vlgmr.msra.gmra.mrb[14].mxu1 %vm439_vm1, %v4573_v12  ;;  %3913 = vmatprep.mubr.msk.f32.mxu0 %vm439_vm1, %v4702_v34 }
  0x37   : > { %3942 = vmatprep.mubr.msk.f32.mxu1 %vm439_vm1, %v4586_v14  ;;  %4032 = vmatpush3.msk.msra.mxu1 %vm530_vm0, %v4529_v6 }
  0x38   : > { %4125 = vmatprep.subr.msk.mxu1 %vm530_vm0, %v4688_v32 }
  0x39   : > { %3914 = vmatmul.mubr.msk.f32.gmra.mrb[14].mxu0 %vm439_vm1, %v4715_v35 }
  0x3a   : > { %3943 = vmatmul.mubr.msk.f32.gmra.mrb[16].mxu1 %vm439_vm1, %v4597_v16  ;;  %3986 = vmatprep.mubr.msk.f32.mxu0 %vm439_vm1, %v4569_v11 }
  0x3b   : > { %3945 = vmatprep.mubr.msk.f32.mxu1 %vm439_vm1, %v4605_v18 }
  0x3d   : > { %3987 = vmatmul.mubr.msk.f32.vlgmr.msra.gmra.mrb[16].mxu0 %vm439_vm1, %v4573_v12 }
  0x3e   : > { %3946 = vmatmul.mubr.msk.f32.gmra.mrb[18].mxu1 %vm439_vm1, %v4623_v20  ;;  %4079 = vmatpush3.msk.msra.mxu0 %vm530_vm0, %v4582_v13 }
  0x3f   : > { %3948 = vmatprep.mubr.msk.f32.mxu1 %vm439_vm1, %v4630_v22  ;;  %3989 = vmatprep.mubr.msk.f32.mxu0 %vm439_vm1, %v4586_v14 }
  0x40   : > { %4172 = vmatprep.subr.msk.mxu0 %vm530_vm0, %v4730_v36 }
  0x41   : > { %3990 = vmatmul.mubr.msk.f32.gmra.mrb[18].mxu0 %vm439_vm1, %v4597_v16 }
  0x42   : > { %3949 = vmatmul.mubr.msk.f32.gmra.mrb[20].mxu1 %vm439_vm1, %v4646_v24  ;;  %3992 = vmatprep.mubr.msk.f32.mxu0 %vm439_vm1, %v4605_v18 }
  0x43   : > { %3951 = vmatprep.mubr.msk.f32.mxu1 %vm439_vm1, %v4649_v25 }
  0x45   : > { %3993 = vmatmul.mubr.msk.f32.gmra.mrb[20].mxu0 %vm439_vm1, %v4623_v20 }
  0x46   : > { %3952 = vmatmul.mubr.msk.f32.gmra.mrb[22].mxu1 %vm439_vm1, %v4664_v28  ;;  %3995 = vmatprep.mubr.msk.f32.mxu0 %vm439_vm1, %v4630_v22 }
  0x47   : > { %3954 = vmatprep.mubr.msk.f32.mxu1 %vm439_vm1, %v4667_v29 }
  0x49   : > { %3996 = vmatmul.mubr.msk.f32.gmra.mrb[22].mxu0 %vm439_vm1, %v4646_v24 }
  0x4a   : > { %3955 = vmatmul.mubr.msk.f32.gmra.mrb[24].mxu1 %vm439_vm1, %v4678_v30  ;;  %3998 = vmatprep.mubr.msk.f32.mxu0 %vm439_vm1, %v4649_v25 }
  0x4b   : > { %3957 = vmatprep.mubr.msk.f32.mxu1 %vm439_vm1, %v4681_v31 }
  0x4d   : > { %3999 = vmatmul.mubr.msk.f32.gmra.mrb[24].mxu0 %vm439_vm1, %v4664_v28 }
  0x4e   : > { %3958 = vmatmul.mubr.msk.f32.gmra.mrb[26].mxu1 %vm439_vm1, %v4697_v33  ;;  %4001 = vmatprep.mubr.msk.f32.mxu0 %vm439_vm1, %v4667_v29 }
  0x4f   : > { %3960 = vmatprep.mubr.msk.f32.mxu1 %vm439_vm1, %v4702_v34 }
  0x51   : > { %4002 = vmatmul.mubr.msk.f32.gmra.mrb[26].mxu0 %vm439_vm1, %v4678_v30 }
  0x52   : > { %3961 = vmatmul.mubr.msk.f32.gmra.mrb[28].mxu1 %vm439_vm1, %v4715_v35  ;;  %4004 = vmatprep.mubr.msk.f32.mxu0 %vm439_vm1, %v4681_v31 }
  0x53   : > { %3963 = vmatprep.mubr.msk.f32.mxu1 %vm439_vm1, %v4516_v3 }
  0x55   : > { %4005 = vmatmul.mubr.msk.f32.gmra.mrb[28].mxu0 %vm439_vm1, %v4697_v33 }
  0x56   : > { %3964 = vmatmul.mubr.msk.f32.gmra.mrb[30].mxu1 %vm439_vm1, %v4519_v4  ;;  %4007 = vmatprep.mubr.msk.f32.mxu0 %vm439_vm1, %v4702_v34 }
  0x57   : > { %3966 = vmatprep.mubr.msk.f32.mxu1 %vm439_vm1, %v4522_v5 }
  0x59   : > { %4008 = vmatmul.mubr.msk.f32.gmra.mrb[30].mxu0 %vm439_vm1, %v4715_v35 }
  0x5a   : > { %3967 = vmatmul.mubr.msk.f32.gmra.mrb[32].mxu1 %vm439_vm1, %v4540_v7  ;;  %4010 = vmatprep.mubr.msk.f32.mxu0 %vm439_vm1, %v4516_v3 }
  0x5b   : > { %3969 = vmatprep.mubr.msk.f32.mxu1 %vm439_vm1, %v4546_v8 }
  0x5d   : > { %4011 = vmatmul.mubr.msk.f32.gmra.mrb[32].mxu0 %vm439_vm1, %v4519_v4 }
  0x5e   : > { %3970 = vmatmul.mubr.msk.f32.gmra.mrb[34].mxu1 %vm439_vm1, %v4564_v9  ;;  %4013 = vmatprep.mubr.msk.f32.mxu0 %vm439_vm1, %v4522_v5 }
  0x5f   : > { %3972 = vmatprep.mubr.msk.f32.mxu1 %vm439_vm1, %v4567_v10 }
  0x61   : > { %4014 = vmatmul.mubr.msk.f32.gmra.mrb[34].mxu0 %vm439_vm1, %v4540_v7 }
  0x62   : > { %3973 = vmatmul.mubr.msk.f32.gmra.mrb[36].mxu1 %vm439_vm1, %v4591_v15  ;;  %4016 = vmatprep.mubr.msk.f32.mxu0 %vm439_vm1, %v4546_v8 }
  0x63   : > { %3975 = vmatprep.mubr.msk.f32.mxu1 %vm439_vm1, %v4600_v17 }
  0x65   : > { %4017 = vmatmul.mubr.msk.f32.gmra.mrb[36].mxu0 %vm439_vm1, %v4564_v9 }
  0x66   : > { %3976 = vmatmul.mubr.msk.f32.gmra.mrb[38].mxu1 %vm439_vm1, %v4616_v19  ;;  %4019 = vmatprep.mubr.msk.f32.mxu0 %vm439_vm1, %v4567_v10 }
  0x67   : > { %3978 = vmatprep.mubr.msk.f32.mxu1 %vm439_vm1, %v4626_v21 }
  0x69   : > { %4020 = vmatmul.mubr.msk.f32.gmra.mrb[38].mxu0 %vm439_vm1, %v4591_v15 }
  0x6a   : > { %3979 = vmatmul.mubr.msk.f32.gmra.mrb[40].mxu1 %vm439_vm1, %v4641_v23  ;;  %4022 = vmatprep.mubr.msk.f32.mxu0 %vm439_vm1, %v4600_v17 }
  0x6b   : > { %3981 = vmatprep.mubr.msk.f32.mxu1 %vm439_vm1, %v4651_v26 }
  0x6d   : > { %4023 = vmatmul.mubr.msk.f32.gmra.mrb[40].mxu0 %vm439_vm1, %v4616_v19 }
  0x6e   : > { %3982 = vmatmul.mubr.msk.f32.gmra.mrb[42].mxu1 %vm439_vm1, %v4659_v27  ;;  %4025 = vmatprep.mubr.msk.f32.mxu0 %vm439_vm1, %v4626_v21 }
  0x6f   : > { %4033 = vmatprep.mubr.msk.f32.mxu1 %vm439_vm1, %v4569_v11 }
  0x71   : > { %4026 = vmatmul.mubr.msk.f32.gmra.mrb[42].mxu0 %vm439_vm1, %v4641_v23 }
  0x72   : > { %4034 = vmatmul.mubr.msk.f32.vlgmr.msra.gmra.mrb[44].mxu1 %vm439_vm1, %v4573_v12  ;;  %4028 = vmatprep.mubr.msk.f32.mxu0 %vm439_vm1, %v4651_v26 }
  0x73   : > { %4036 = vmatprep.mubr.msk.f32.mxu1 %vm439_vm1, %v4586_v14  ;;  %4126 = vmatpush3.msk.msra.mxu1 %vm530_vm0, %v4688_v32 }
  0x74   : > { %4219 = vmatprep.subr.msk.mxu1 %vm530_vm0, %v4835_v37 }
  0x75   : > { %4029 = vmatmul.mubr.msk.f32.gmra.mrb[44].mxu0 %vm439_vm1, %v4659_v27 }
  0x76   : > { %4037 = vmatmul.mubr.msk.f32.gmra.mrb[46].mxu1 %vm439_vm1, %v4597_v16  ;;  %4080 = vmatprep.mubr.msk.f32.mxu0 %vm439_vm1, %v4569_v11 }
  0x77   : > { %4039 = vmatprep.mubr.msk.f32.mxu1 %vm439_vm1, %v4605_v18 }
  0x79   : > { %4081 = vmatmul.mubr.msk.f32.vlgmr.msra.gmra.mrb[46].mxu0 %vm439_vm1, %v4573_v12 }
  0x7a   : > { %4040 = vmatmul.mubr.msk.f32.gmra.mrb[48].mxu1 %vm439_vm1, %v4623_v20  ;;  %4173 = vmatpush3.msk.msra.mxu0 %vm530_vm0, %v4730_v36 }
  0x7b   : > { %4042 = vmatprep.mubr.msk.f32.mxu1 %vm439_vm1, %v4630_v22  ;;  %4083 = vmatprep.mubr.msk.f32.mxu0 %vm439_vm1, %v4586_v14 }
  0x7c   : > { %4266 = vmatprep.subr.msk.mxu0 %vm530_vm0, %v4868_v38 }
  0x7d   : > { %4084 = vmatmul.mubr.msk.f32.gmra.mrb[48].mxu0 %vm439_vm1, %v4597_v16 }
  0x7e   : > { %4043 = vmatmul.mubr.msk.f32.gmra.mrb[50].mxu1 %vm439_vm1, %v4646_v24  ;;  %4086 = vmatprep.mubr.msk.f32.mxu0 %vm439_vm1, %v4605_v18 }
  0x7f   : > { %4045 = vmatprep.mubr.msk.f32.mxu1 %vm439_vm1, %v4649_v25 }
  0x81   : > { %4087 = vmatmul.mubr.msk.f32.gmra.mrb[50].mxu0 %vm439_vm1, %v4623_v20 }
  0x82   : > { %4046 = vmatmul.mubr.msk.f32.gmra.mrb[52].mxu1 %vm439_vm1, %v4664_v28  ;;  %4089 = vmatprep.mubr.msk.f32.mxu0 %vm439_vm1, %v4630_v22 }
  0x83   : > { %4048 = vmatprep.mubr.msk.f32.mxu1 %vm439_vm1, %v4667_v29 }
  0x85   : > { %4090 = vmatmul.mubr.msk.f32.gmra.mrb[52].mxu0 %vm439_vm1, %v4646_v24 }
  0x86   : > { %4049 = vmatmul.mubr.msk.f32.gmra.mrb[54].mxu1 %vm439_vm1, %v4678_v30  ;;  %4092 = vmatprep.mubr.msk.f32.mxu0 %vm439_vm1, %v4649_v25 }
  0x87   : > { %4051 = vmatprep.mubr.msk.f32.mxu1 %vm439_vm1, %v4681_v31 }
  0x89   : > { %4093 = vmatmul.mubr.msk.f32.gmra.mrb[54].mxu0 %vm439_vm1, %v4664_v28 }
  0x8a   : > { %4052 = vmatmul.mubr.msk.f32.gmra.mrb[56].mxu1 %vm439_vm1, %v4697_v33  ;;  %4095 = vmatprep.mubr.msk.f32.mxu0 %vm439_vm1, %v4667_v29 }
  0x8b   : > { %4054 = vmatprep.mubr.msk.f32.mxu1 %vm439_vm1, %v4702_v34 }
  0x8d   : > { %4096 = vmatmul.mubr.msk.f32.gmra.mrb[56].mxu0 %vm439_vm1, %v4678_v30 }
  0x8e   : > { %4055 = vmatmul.mubr.msk.f32.gmra.mrb[58].mxu1 %vm439_vm1, %v4715_v35  ;;  %4098 = vmatprep.mubr.msk.f32.mxu0 %vm439_vm1, %v4681_v31 }
  0x8f   : > { %4057 = vmatprep.mubr.msk.f32.mxu1 %vm439_vm1, %v4516_v3 }
  0x91   : > { %4099 = vmatmul.mubr.msk.f32.gmra.mrb[58].mxu0 %vm439_vm1, %v4697_v33 }
  0x92   : > { %4058 = vmatmul.mubr.msk.f32.gmra.mrb[60].mxu1 %vm439_vm1, %v4519_v4  ;;  %4101 = vmatprep.mubr.msk.f32.mxu0 %vm439_vm1, %v4702_v34 }
  0x93   : > { %4060 = vmatprep.mubr.msk.f32.mxu1 %vm439_vm1, %v4522_v5 }
  0x95   : > { %4102 = vmatmul.mubr.msk.f32.gmra.mrb[60].mxu0 %vm439_vm1, %v4715_v35 }
  0x96   : > { %4061 = vmatmul.mubr.msk.f32.gmra.mrb[62].mxu1 %vm439_vm1, %v4540_v7  ;;  %4104 = vmatprep.mubr.msk.f32.mxu0 %vm439_vm1, %v4516_v3 }
  0x97   : > { %4063 = vmatprep.mubr.msk.f32.mxu1 %vm439_vm1, %v4546_v8 }
  0x99   : > { %4105 = vmatmul.mubr.msk.f32.gmra.mrb[62].mxu0 %vm439_vm1, %v4519_v4 }
  0x9a   : > { %4064 = vmatmul.mubr.msk.f32.gmra.mrb[64].mxu1 %vm439_vm1, %v4564_v9  ;;  %4107 = vmatprep.mubr.msk.f32.mxu0 %vm439_vm1, %v4522_v5 }
  0x9b   : > { %4066 = vmatprep.mubr.msk.f32.mxu1 %vm439_vm1, %v4567_v10 }
  0x9d   : > { %4108 = vmatmul.mubr.msk.f32.gmra.mrb[64].mxu0 %vm439_vm1, %v4540_v7 }
  0x9e   : > { %4067 = vmatmul.mubr.msk.f32.gmra.mrb[66].mxu1 %vm439_vm1, %v4591_v15  ;;  %4110 = vmatprep.mubr.msk.f32.mxu0 %vm439_vm1, %v4546_v8 }
  0x9f   : > { %4069 = vmatprep.mubr.msk.f32.mxu1 %vm439_vm1, %v4600_v17 }
  0xa1   : > { %4111 = vmatmul.mubr.msk.f32.gmra.mrb[66].mxu0 %vm439_vm1, %v4564_v9 }
  0xa2   : > { %4070 = vmatmul.mubr.msk.f32.gmra.mrb[68].mxu1 %vm439_vm1, %v4616_v19  ;;  %4113 = vmatprep.mubr.msk.f32.mxu0 %vm439_vm1, %v4567_v10 }
  0xa3   : > { %4072 = vmatprep.mubr.msk.f32.mxu1 %vm439_vm1, %v4626_v21 }
  0xa5   : > { %4114 = vmatmul.mubr.msk.f32.gmra.mrb[68].mxu0 %vm439_vm1, %v4591_v15 }
  0xa6   : > { %4073 = vmatmul.mubr.msk.f32.gmra.mrb[70].mxu1 %vm439_vm1, %v4641_v23  ;;  %4116 = vmatprep.mubr.msk.f32.mxu0 %vm439_vm1, %v4600_v17 }
  0xa7   : > { %4075 = vmatprep.mubr.msk.f32.mxu1 %vm439_vm1, %v4651_v26 }
  0xa9   : > { %4117 = vmatmul.mubr.msk.f32.gmra.mrb[70].mxu0 %vm439_vm1, %v4616_v19 }
  0xaa   : > { %4076 = vmatmul.mubr.msk.f32.gmra.mrb[72].mxu1 %vm439_vm1, %v4659_v27  ;;  %4119 = vmatprep.mubr.msk.f32.mxu0 %vm439_vm1, %v4626_v21 }
  0xab   : > { %4127 = vmatprep.mubr.msk.f32.mxu1 %vm439_vm1, %v4569_v11 }
  0xad   : > { %4120 = vmatmul.mubr.msk.f32.gmra.mrb[72].mxu0 %vm439_vm1, %v4641_v23 }
  0xae   : > { %4128 = vmatmul.mubr.msk.f32.vlgmr.msra.gmra.mrb[74].mxu1 %vm439_vm1, %v4573_v12  ;;  %4122 = vmatprep.mubr.msk.f32.mxu0 %vm439_vm1, %v4651_v26 }
  0xaf   : > { %4130 = vmatprep.mubr.msk.f32.mxu1 %vm439_vm1, %v4586_v14  ;;  %4220 = vmatpush3.msk.msra.mxu1 %vm530_vm0, %v4835_v37 }
  0xb1   : > { %4123 = vmatmul.mubr.msk.f32.gmra.mrb[74].mxu0 %vm439_vm1, %v4659_v27 }
  0xb2   : > { %4131 = vmatmul.mubr.msk.f32.gmra.mrb[76].mxu1 %vm439_vm1, %v4597_v16  ;;  %4174 = vmatprep.mubr.msk.f32.mxu0 %vm439_vm1, %v4569_v11 }
  0xb3   : > { %4133 = vmatprep.mubr.msk.f32.mxu1 %vm439_vm1, %v4605_v18 }
  0xb5   : > { %4175 = vmatmul.mubr.msk.f32.vlgmr.msra.gmra.mrb[76].mxu0 %vm439_vm1, %v4573_v12 }
  0xb6   : > { %4134 = vmatmul.mubr.msk.f32.gmra.mrb[78].mxu1 %vm439_vm1, %v4623_v20  ;;  %4267 = vmatpush3.msk.msra.mxu0 %vm530_vm0, %v4868_v38 }
  0xb7   : > { %4136 = vmatprep.mubr.msk.f32.mxu1 %vm439_vm1, %v4630_v22  ;;  %4177 = vmatprep.mubr.msk.f32.mxu0 %vm439_vm1, %v4586_v14 }
  0xb9   : > { %4178 = vmatmul.mubr.msk.f32.gmra.mrb[78].mxu0 %vm439_vm1, %v4597_v16 }
  0xba   : > { %4137 = vmatmul.mubr.msk.f32.gmra.mrb[80].mxu1 %vm439_vm1, %v4646_v24  ;;  %4180 = vmatprep.mubr.msk.f32.mxu0 %vm439_vm1, %v4605_v18 }
  0xbb   : > { %4139 = vmatprep.mubr.msk.f32.mxu1 %vm439_vm1, %v4649_v25 }
  0xbd   : > { %4181 = vmatmul.mubr.msk.f32.gmra.mrb[80].mxu0 %vm439_vm1, %v4623_v20 }
  0xbe   : > { %4140 = vmatmul.mubr.msk.f32.gmra.mrb[82].mxu1 %vm439_vm1, %v4664_v28  ;;  %4183 = vmatprep.mubr.msk.f32.mxu0 %vm439_vm1, %v4630_v22 }
  0xbf   : > { %4142 = vmatprep.mubr.msk.f32.mxu1 %vm439_vm1, %v4667_v29 }
  0xc1   : > { %4184 = vmatmul.mubr.msk.f32.gmra.mrb[82].mxu0 %vm439_vm1, %v4646_v24 }
  0xc2   : > { %4143 = vmatmul.mubr.msk.f32.gmra.mrb[84].mxu1 %vm439_vm1, %v4678_v30  ;;  %4186 = vmatprep.mubr.msk.f32.mxu0 %vm439_vm1, %v4649_v25 }
  0xc3   : > { %4145 = vmatprep.mubr.msk.f32.mxu1 %vm439_vm1, %v4681_v31 }
  0xc5   : > { %4187 = vmatmul.mubr.msk.f32.gmra.mrb[84].mxu0 %vm439_vm1, %v4664_v28 }
  0xc6   : > { %4146 = vmatmul.mubr.msk.f32.gmra.mrb[86].mxu1 %vm439_vm1, %v4697_v33  ;;  %4189 = vmatprep.mubr.msk.f32.mxu0 %vm439_vm1, %v4667_v29 }
  0xc7   : > { %4148 = vmatprep.mubr.msk.f32.mxu1 %vm439_vm1, %v4702_v34 }
  0xc9   : > { %4190 = vmatmul.mubr.msk.f32.gmra.mrb[86].mxu0 %vm439_vm1, %v4678_v30 }
  0xca   : > { %4149 = vmatmul.mubr.msk.f32.gmra.mrb[88].mxu1 %vm439_vm1, %v4715_v35  ;;  %4192 = vmatprep.mubr.msk.f32.mxu0 %vm439_vm1, %v4681_v31 }
  0xcb   : > { %4151 = vmatprep.mubr.msk.f32.mxu1 %vm439_vm1, %v4516_v3 }
  0xcd   : > { %4193 = vmatmul.mubr.msk.f32.gmra.mrb[88].mxu0 %vm439_vm1, %v4697_v33 }
  0xce   : > { %4152 = vmatmul.mubr.msk.f32.gmra.mrb[90].mxu1 %vm439_vm1, %v4519_v4  ;;  %4195 = vmatprep.mubr.msk.f32.mxu0 %vm439_vm1, %v4702_v34 }
  0xcf   : > { %4154 = vmatprep.mubr.msk.f32.mxu1 %vm439_vm1, %v4522_v5 }
  0xd1   : > { %4196 = vmatmul.mubr.msk.f32.gmra.mrb[90].mxu0 %vm439_vm1, %v4715_v35 }
  0xd2   : > { %4155 = vmatmul.mubr.msk.f32.gmra.mrb[92].mxu1 %vm439_vm1, %v4540_v7  ;;  %4198 = vmatprep.mubr.msk.f32.mxu0 %vm439_vm1, %v4516_v3 }
  0xd3   : > { %4157 = vmatprep.mubr.msk.f32.mxu1 %vm439_vm1, %v4546_v8 }
  0xd5   : > { %4199 = vmatmul.mubr.msk.f32.gmra.mrb[92].mxu0 %vm439_vm1, %v4519_v4 }
  0xd6   : > { %4158 = vmatmul.mubr.msk.f32.gmra.mrb[94].mxu1 %vm439_vm1, %v4564_v9  ;;  %4201 = vmatprep.mubr.msk.f32.mxu0 %vm439_vm1, %v4522_v5 }
  0xd7   : > { %4160 = vmatprep.mubr.msk.f32.mxu1 %vm439_vm1, %v4567_v10 }
  0xd9   : > { %4202 = vmatmul.mubr.msk.f32.gmra.mrb[94].mxu0 %vm439_vm1, %v4540_v7 }
  0xda   : > { %4161 = vmatmul.mubr.msk.f32.gmra.mrb[96].mxu1 %vm439_vm1, %v4591_v15  ;;  %4204 = vmatprep.mubr.msk.f32.mxu0 %vm439_vm1, %v4546_v8 }
  0xdb   : > { %4163 = vmatprep.mubr.msk.f32.mxu1 %vm439_vm1, %v4600_v17 }
  0xdd   : > { %4205 = vmatmul.mubr.msk.f32.gmra.mrb[96].mxu0 %vm439_vm1, %v4564_v9 }
  0xde   : > { %4164 = vmatmul.mubr.msk.f32.gmra.mrb[98].mxu1 %vm439_vm1, %v4616_v19  ;;  %4207 = vmatprep.mubr.msk.f32.mxu0 %vm439_vm1, %v4567_v10 }
  0xdf   : > { %4166 = vmatprep.mubr.msk.f32.mxu1 %vm439_vm1, %v4626_v21 }
  0xe1   : > { %4208 = vmatmul.mubr.msk.f32.gmra.mrb[98].mxu0 %vm439_vm1, %v4591_v15 }
  0xe2   : > { %4167 = vmatmul.mubr.msk.f32.gmra.mrb[100].mxu1 %vm439_vm1, %v4641_v23  ;;  %4210 = vmatprep.mubr.msk.f32.mxu0 %vm439_vm1, %v4600_v17 }
  0xe3   : > { %4169 = vmatprep.mubr.msk.f32.mxu1 %vm439_vm1, %v4651_v26 }
  0xe5   : > { %4211 = vmatmul.mubr.msk.f32.gmra.mrb[100].mxu0 %vm439_vm1, %v4616_v19 }
  0xe6   : > { %4170 = vmatmul.mubr.msk.f32.gmra.mrb[102].mxu1 %vm439_vm1, %v4659_v27  ;;  %4213 = vmatprep.mubr.msk.f32.mxu0 %vm439_vm1, %v4626_v21 }
  0xe7   : > { %4221 = vmatprep.mubr.msk.f32.mxu1 %vm439_vm1, %v4569_v11 }
  0xe9   : > { %4214 = vmatmul.mubr.msk.f32.gmra.mrb[102].mxu0 %vm439_vm1, %v4641_v23 }
  0xea   : > { %4222 = vmatmul.mubr.msk.f32.vlgmr.msra.gmra.mrb[104].mxu1 %vm439_vm1, %v4573_v12  ;;  %4216 = vmatprep.mubr.msk.f32.mxu0 %vm439_vm1, %v4651_v26 }
  0xeb   : > { %4224 = vmatprep.mubr.msk.f32.mxu1 %vm439_vm1, %v4586_v14 }
  0xed   : > { %v3918_v41 = vpop.f32.mrb[0].mxu1  ;;  %4217 = vmatmul.mubr.msk.f32.gmra.mrb[104].mxu0 %vm439_vm1, %v4659_v27 }
  0xee   : > { %4225 = vmatmul.mubr.msk.f32.gmra.mrb[106].mxu1 %vm439_vm1, %v4597_v16  ;;  %v761_v42 = vrot.slane %v3918_v41, 7  ;;  %v5104_v43 = vpop.f32.mrb[1].mxu1  ;;  %4268 = vmatprep.mubr.msk.f32.mxu0 %vm439_vm1, %v4569_v11 }
  0xef   : > { %4227 = vmatprep.mubr.msk.f32.mxu1 %vm439_vm1, %v4605_v18  ;;  %v760_v44 = vrot.slane %v5104_v43, 7 }
  0xf0   : > { %v3894_v53 = vpop.f32.mrb[0].mxu0 }
  0xf1   : > { %v3921_v45 = vpop.f32.mrb[2].mxu1  ;;  %v5118_v46 = vsel %vm771_vm2, %v760_v44, %v761_v42  ;;  %v745_v56 = vrot.slane %v3894_v53, 7  ;;  %v600_v57 = vpop.f32.mrb[1].mxu0  ;;  %4269 = vmatmul.mubr.msk.f32.vlgmr.msra.gmra.mrb[106].mxu0 %vm439_vm1, %v4573_v12 }
  0xf2   : > { %4228 = vmatmul.mubr.msk.f32.gmra.mrb[108].mxu1 %vm439_vm1, %v4623_v20  ;;  %v763_v47 = vrot.slane %v3921_v45, 7  ;;  %v690_v48 = vpop.f32.mrb[3].mxu1  ;;  %v744_v59 = vrot.slane %v600_v57, 7  ;;  %4271 = vmatprep.mubr.msk.f32.mxu0 %vm439_vm1, %v4586_v14 }
  0xf3   : > { %4230 = vmatprep.mubr.msk.f32.mxu1 %vm439_vm1, %v4630_v22  ;;  %v762_v49 = vrot.slane %v690_v48, 7 }
  0xf4   : > { %v3897_v63 = vpop.f32.mrb[2].mxu0  ;;  %v794_v2 = vsel %vm771_vm2, %v744_v59, %v745_v56 }
  0xf5   : > { %v3924_v50 = vpop.f32.mrb[4].mxu1  ;;  %v5130_v51 = vsel %vm771_vm2, %v762_v49, %v763_v47  ;;  %v5134_v52 = vsel %vm771_vm2, %v761_v42, %v762_v49  ;;  %v747_v6 = vrot.slane %v3897_v63, 7  ;;  %v610_v11 = vpop.f32.mrb[3].mxu0  ;;  %4272 = vmatmul.mubr.msk.f32.gmra.mrb[108].mxu0 %vm439_vm1, %v4597_v16 }
  0xf6   : > { %4231 = vmatmul.mubr.msk.f32.gmra.mrb[110].mxu1 %vm439_vm1, %v4646_v24  ;;  %v765_v54 = vrot.slane %v3924_v50, 7  ;;  %v700_v55 = vpop.f32.mrb[5].mxu1  ;;  %v746_v13 = vrot.slane %v610_v11, 7  ;;  %4274 = vmatprep.mubr.msk.f32.mxu0 %vm439_vm1, %v4605_v18 }
  0xf7   : > { %4233 = vmatprep.mubr.msk.f32.mxu1 %vm439_vm1, %v4649_v25  ;;  %v764_v58 = vrot.slane %v700_v55, 7 }
  0xf8   : > { %v3900_v37 = vpop.f32.mrb[4].mxu0  ;;  %v792_v38 = vsel %vm771_vm2, %v746_v13, %v747_v6  ;;  %v793_v18 = vsel %vm771_vm2, %v745_v56, %v746_v13 }
  0xf9   : > { %v3927_v60 = vpop.f32.mrb[6].mxu1  ;;  %v5146_v61 = vsel %vm771_vm2, %v764_v58, %v765_v54  ;;  %v5150_v62 = vsel %vm771_vm2, %v763_v47, %v764_v58  ;;  %v749_v39 = vrot.slane %v3900_v37, 7  ;;  %v620_v41 = vpop.f32.mrb[5].mxu0  ;;  %4275 = vmatmul.mubr.msk.f32.gmra.mrb[110].mxu0 %vm439_vm1, %v4623_v20 }
  0xfa   : > { %4234 = vmatmul.mubr.msk.f32.gmra.mrb[112].mxu1 %vm439_vm1, %v4664_v28  ;;  %v767_v0 = vrot.slane %v3927_v60, 7  ;;  %v710_v1 = vpop.f32.mrb[7].mxu1  ;;  %v748_v42 = vrot.slane %v620_v41, 7  ;;  %4277 = vmatprep.mubr.msk.f32.mxu0 %vm439_vm1, %v4630_v22 }
  0xfb   : > { %4236 = vmatprep.mubr.msk.f32.mxu1 %vm439_vm1, %v4667_v29  ;;  %v766_v12 = vrot.slane %v710_v1, 7 }
  0xfc   : > { %v3903_v47 = vpop.f32.mrb[6].mxu0  ;;  %v790_v49 = vsel %vm771_vm2, %v748_v42, %v749_v39  ;;  %v791_v50 = vsel %vm771_vm2, %v747_v6, %v748_v42 }
  0xfd   : > { %v3930_v14 = vpop.f32.mrb[8].mxu1  ;;  %v5164_v32 = vsel %vm771_vm2, %v766_v12, %v767_v0  ;;  %v5168_v36 = vsel %vm771_vm2, %v765_v54, %v766_v12  ;;  %v751_v20 = vrot.slane %v3903_v47, 7  ;;  %v630_v53 = vpop.f32.mrb[7].mxu0  ;;  %4278 = vmatmul.mubr.msk.f32.gmra.mrb[112].mxu0 %vm439_vm1, %v4646_v24 }
  0xfe   : > { %4237 = vmatmul.mubr.msk.f32.gmra.mrb[114].mxu1 %vm439_vm1, %v4678_v30  ;;  %v720_v16 = vpop.f32.mrb[9].mxu1  ;;  %v750_v22 = vrot.slane %v630_v53, 7  ;;  %4280 = vmatprep.mubr.msk.f32.mxu0 %vm439_vm1, %v4649_v25 }
  0xff   : > { %4239 = vmatprep.mubr.msk.f32.mxu1 %vm439_vm1, %v4681_v31 }
 0x100   : > { %v3906_v55 = vpop.f32.mrb[8].mxu0  ;;  %v788_v58 = vsel %vm771_vm2, %v750_v22, %v751_v20  ;;  %v789_v24 = vsel %vm771_vm2, %v749_v39, %v750_v22 }
 0x101   : > { %v3933_v45 = vpop.f32.mrb[10].mxu1  ;;  %v753_v60 = vrot.slane %v3906_v55, 7  ;;  %v640_v63 = vpop.f32.mrb[9].mxu0  ;;  %4281 = vmatmul.mubr.msk.f32.gmra.mrb[114].mxu0 %vm439_vm1, %v4664_v28 }
 0x102   : > { %4240 = vmatmul.mubr.msk.f32.gmra.mrb[116].mxu1 %vm439_vm1, %v4697_v33  ;;  %v728_v48 = vpop.f32.mrb[11].mxu1  ;;  %v752_v25 = vrot.slane %v640_v63, 7  ;;  %4283 = vmatprep.mubr.msk.f32.mxu0 %vm439_vm1, %v4667_v29 }
 0x103   : > { %4242 = vmatprep.mubr.msk.f32.mxu1 %vm439_vm1, %v4702_v34 }
 0x104   : > { %v3909_v6 = vpop.f32.mrb[10].mxu0  ;;  %v786_v28 = vsel %vm771_vm2, %v752_v25, %v753_v60  ;;  %v787_v13 = vsel %vm771_vm2, %v751_v20, %v752_v25 }
 0x105   : > { %v3936_v54 = vpop.f32.mrb[12].mxu1  ;;  %v755_v14 = vrot.slane %v3909_v6, 7  ;;  %v650_v37 = vpop.f32.mrb[11].mxu0  ;;  %4284 = vmatmul.mubr.msk.f32.gmra.mrb[116].mxu0 %vm439_vm1, %v4678_v30 }
 0x106   : > { %v768_v56 = vrot.slane %v3936_v54, 7  ;;  %4243 = vmatmul.mubr.msk.f32.gmra.mrb[118].mxu1 %vm439_vm1, %v4715_v35  ;;  %v736_v57 = vpop.f32.mrb[13].mxu1  ;;  %4286 = vmatprep.mubr.msk.f32.mxu0 %vm439_vm1, %v4681_v31 }
 0x107   : > { %4245 = vmatprep.mubr.msk.f32.mxu1 %vm439_vm1, %v4516_v3 }
 0x108   : > { %v795_v0 = vsel %vm771_vm2, %v768_v56, %v744_v59  ;;  %v754_v59 = vrot.slane %v650_v37, 7  ;;  %v3912_v16 = vpop.f32.mrb[12].mxu0 }
 0x109   : > { %v3941_v1 = vpop.f32.mrb[14].mxu1  ;;  %v757_v45 = vrot.slane %v3912_v16, 7  ;;  %v660_v47 = vpop.f32.mrb[13].mxu0  ;;  %4287 = vmatmul.mubr.msk.f32.gmra.mrb[118].mxu0 %vm439_vm1, %v4697_v33 }
 0x10a   : > { %v5208_v11 = vadd.f32 %v3941_v1, %v794_v2  ;;  %v891_v12 = vpop.f32.mrb[15].mxu1  ;;  %4246 = vmatmul.mubr.msk.f32.gmra.mrb[120].mxu1 %vm439_vm1, %v4519_v4  ;;  %v784_v42 = vsel %vm771_vm2, %v754_v59, %v755_v14  ;;  %v785_v30 = vsel %vm771_vm2, %v753_v60, %v754_v59  ;;  %4289 = vmatprep.mubr.msk.f32.mxu0 %vm439_vm1, %v4702_v34 }
 0x10b   : > { %v1034_v29 = vadd.f32 %v891_v12, %v795_v0  ;;  %4248 = vmatprep.mubr.msk.f32.mxu1 %vm439_vm1, %v4522_v5 }
 0x10c   : > { %v3915_v20 = vpop.f32.mrb[14].mxu0 }
 0x10d   : > { %v3944_v2 = vpop.f32.mrb[16].mxu1  ;;  %v670_v55 = vpop.f32.mrb[15].mxu0  ;;  %4290 = vmatmul.mubr.msk.f32.gmra.mrb[120].mxu0 %vm439_vm1, %v4715_v35 }
 0x10e   : > { %v5222_v39 = vadd.f32 %v3944_v2, %v792_v38  ;;  %v901_v41 = vpop.f32.mrb[17].mxu1  ;;  %4249 = vmatmul.mubr.msk.f32.gmra.mrb[122].mxu1 %vm439_vm1, %v4540_v7  ;;  %v756_v38 = vrot.slane %v660_v47, 7  ;;  %4292 = vmatprep.mubr.msk.f32.mxu0 %vm439_vm1, %v4516_v3 }
 0x10f   : > { %v1036_v31 = vadd.f32 %v901_v41, %v793_v18  ;;  %4251 = vmatprep.mubr.msk.f32.mxu1 %vm439_vm1, %v4546_v8  ;;  %v759_v18 = vrot.slane %v3915_v20, 7 }
 0x110   : > { %v782_v54 = vsel %vm771_vm2, %v756_v38, %v757_v45  ;;  %v5244_v33 = vsel %vm771_vm2, %v755_v14, %v756_v38  ;;  %v3988_v60 = vpop.f32.mrb[16].mxu0 }
 0x111   : > { %v3947_v48 = vpop.f32.mrb[18].mxu1  ;;  %v5256_v57 = vsel %vm771_vm2, %v759_v18, %v760_v44  ;;  %v1129_v43 = vpop.f32.mrb[17].mxu0  ;;  %4293 = vmatmul.mubr.msk.f32.gmra.mrb[122].mxu0 %vm439_vm1, %v4519_v4 }
 0x112   : > { %v5236_v53 = vadd.f32 %v3947_v48, %v790_v49  ;;  %v911_v22 = vpop.f32.mrb[19].mxu1  ;;  %4252 = vmatmul.mubr.msk.f32.gmra.mrb[124].mxu1 %vm439_vm1, %v4564_v9  ;;  %v758_v49 = vrot.slane %v670_v55, 7  ;;  %4295 = vmatprep.mubr.msk.f32.mxu0 %vm439_vm1, %v4522_v5 }
 0x113   : > { %v1038_v34 = vadd.f32 %v911_v22, %v791_v50  ;;  %4254 = vmatprep.mubr.msk.f32.mxu1 %vm439_vm1, %v4567_v10  ;;  %v1274_v50 = vrot.slane %v3988_v60, 1 }
 0x114   : > { %v780_v35 = vsel %vm771_vm2, %v758_v49, %v759_v18  ;;  %v5266_v3 = vsel %vm771_vm2, %v757_v45, %v758_v49  ;;  %v3991_v6 = vpop.f32.mrb[18].mxu0 }
 0x115   : > { %v3950_v56 = vpop.f32.mrb[20].mxu1  ;;  %v1276_v4 = vrot.slane %v3991_v6, 1  ;;  %4296 = vmatmul.mubr.msk.f32.gmra.mrb[124].mxu0 %vm439_vm1, %v4540_v7 }
 0x116   : > { %v5258_v63 = vadd.f32 %v3950_v56, %v788_v58  ;;  %v921_v25 = vpop.f32.mrb[21].mxu1  ;;  %4255 = vmatmul.mubr.msk.f32.gmra.mrb[126].mxu1 %vm439_vm1, %v4591_v15  ;;  %v1273_v58 = vrot.slane %v1129_v43, 1  ;;  %4298 = vmatprep.mubr.msk.f32.mxu0 %vm439_vm1, %v4546_v8 }
 0x117   : > { %v1040_v44 = vadd.f32 %v921_v25, %v789_v24  ;;  %4257 = vmatprep.mubr.msk.f32.mxu1 %vm439_vm1, %v4600_v17  ;;  %v1139_v24 = vpop.f32.mrb[19].mxu0 }
 0x118   : > { %v1322_v1 = vsel %vm1298_vm3, %v1273_v58, %v1274_v50  ;;  %v1275_v59 = vrot.slane %v1139_v24, 1  ;;  %v3994_v41 = vpop.f32.mrb[20].mxu0 }
 0x119   : > { %v3953_v0 = vpop.f32.mrb[22].mxu1  ;;  %v5285_v5 = vadd.f32 %v1322_v1, %v1034_v29  ;;  %v1149_v29 = vpop.f32.mrb[21].mxu0  ;;  %4299 = vmatmul.mubr.msk.f32.gmra.mrb[126].mxu0 %vm439_vm1, %v4564_v9 }
 0x11a   : > { %v5277_v12 = vadd.f32 %v3953_v0, %v786_v28  ;;  %v931_v14 = vpop.f32.mrb[23].mxu1  ;;  %4258 = vmatmul.mubr.msk.f32.gmra.mrb[128].mxu1 %vm439_vm1, %v4616_v19  ;;  %v1320_v2 = vsel %vm1298_vm3, %v1275_v59, %v1276_v4  ;;  %v1321_v16 = vsel %vm1298_vm3, %v1274_v50, %v1275_v59  ;;  %4301 = vmatprep.mubr.msk.f32.mxu0 %vm439_vm1, %v4567_v10 }
 0x11b   : > { %v1042_v37 = vadd.f32 %v931_v14, %v787_v13  ;;  %4260 = vmatprep.mubr.msk.f32.mxu1 %vm439_vm1, %v4626_v21  ;;  %v1278_v13 = vrot.slane %v3994_v41, 1  ;;  %v5301_v47 = vadd.f32 %v1320_v2, %v1036_v31  ;;  %v5304_v38 = vadd.f32 %v1321_v16, %v5208_v11 }
 0x11d   : > { %v3956_v28 = vpop.f32.mrb[24].mxu1  ;;  %4302 = vmatmul.mubr.msk.f32.gmra.mrb[128].mxu0 %vm439_vm1, %v4591_v15 }
 0x11e   : > { %v5293_v45 = vadd.f32 %v3956_v28, %v784_v42  ;;  %v941_v7 = vpop.f32.mrb[25].mxu1  ;;  %4261 = vmatmul.mubr.msk.f32.gmra.mrb[130].mxu1 %vm439_vm1, %v4641_v23  ;;  %v1277_v42 = vrot.slane %v1149_v29, 1  ;;  %4304 = vmatprep.mubr.msk.f32.mxu0 %vm439_vm1, %v4600_v17 }
 0x11f   : > { %v1044_v8 = vadd.f32 %v941_v7, %v785_v30  ;;  %4263 = vmatprep.mubr.msk.f32.mxu1 %vm439_vm1, %v4651_v26  ;;  %v3997_v30 = vpop.f32.mrb[22].mxu0 }
 0x120   : > { %v1318_v20 = vsel %vm1298_vm3, %v1277_v42, %v1278_v13  ;;  %v1319_v9 = vsel %vm1298_vm3, %v1276_v4, %v1277_v42  ;;  %v1280_v11 = vrot.slane %v3997_v30, 1  ;;  %v1159_v31 = vpop.f32.mrb[23].mxu0 }
 0x121   : > { %v3959_v48 = vpop.f32.mrb[26].mxu1  ;;  %v5319_v55 = vadd.f32 %v1318_v20, %v1038_v34  ;;  %v5322_v49 = vadd.f32 %v1319_v9, %v5222_v39  ;;  %v1279_v56 = vrot.slane %v1159_v31, 1  ;;  %v4000_v50 = vpop.f32.mrb[24].mxu0  ;;  %4305 = vmatmul.mubr.msk.f32.gmra.mrb[130].mxu0 %vm439_vm1, %v4616_v19 }
 0x122   : > { %v5312_v22 = vadd.f32 %v3959_v48, %v782_v54  ;;  %v951_v18 = vpop.f32.mrb[27].mxu1  ;;  %4264 = vmatmul.mubr.msk.f32.gmra.mrb[132].mxu1 %vm439_vm1, %v4659_v27  ;;  %v1282_v34 = vrot.slane %v4000_v50, 1  ;;  %v1169_v43 = vpop.f32.mrb[25].mxu0  ;;  %4307 = vmatprep.mubr.msk.f32.mxu0 %vm439_vm1, %v4626_v21 }
 0x123   : > { %v1046_v10 = vadd.f32 %v951_v18, %v5244_v33  ;;  %v1316_v60 = vsel %vm1298_vm3, %v1279_v56, %v1280_v11  ;;  %v1317_v25 = vsel %vm1298_vm3, %v1278_v13, %v1279_v56  ;;  %v1281_v0 = vrot.slane %v1169_v43, 1 }
 0x124   : > { %v5335_v58 = vadd.f32 %v1316_v60, %v1040_v44  ;;  %v5338_v17 = vadd.f32 %v1317_v25, %v5236_v53  ;;  %v4003_v14 = vpop.f32.mrb[26].mxu0 }
 0x125   : > { %v3962_v54 = vpop.f32.mrb[28].mxu1  ;;  %v1315_v6 = vsel %vm1298_vm3, %v1280_v11, %v1281_v0  ;;  %v1284_v44 = vrot.slane %v4003_v14, 1  ;;  %v1179_v4 = vpop.f32.mrb[27].mxu0  ;;  %4308 = vmatmul.mubr.msk.f32.gmra.mrb[132].mxu0 %vm439_vm1, %v4641_v23 }
 0x126   : > { %v5330_v15 = vadd.f32 %v3962_v54, %v780_v35  ;;  %v961_v33 = vpop.f32.mrb[29].mxu1  ;;  %v1314_v35 = vsel %vm1298_vm3, %v1281_v0, %v1282_v34  ;;  %v5355_v24 = vadd.f32 %v1315_v6, %v5258_v63  ;;  %v1283_v59 = vrot.slane %v1179_v4, 1  ;;  %4310 = vmatprep.mubr.msk.f32.mxu0 %vm439_vm1, %v4651_v26 }
 0x127   : > { %v1048_v39 = vadd.f32 %v961_v33, %v5266_v3  ;;  %v5352_v21 = vadd.f32 %v1314_v35, %v1042_v37 }
 0x128   : > { %v1313_v2 = vsel %vm1298_vm3, %v1282_v34, %v1283_v59  ;;  %v4006_v16 = vpop.f32.mrb[28].mxu0 }
 0x129   : > { %v3965_v1 = vpop.f32.mrb[30].mxu1  ;;  %v1286_v37 = vrot.slane %v4006_v16, 1  ;;  %v1189_v41 = vpop.f32.mrb[29].mxu0  ;;  %4311 = vmatmul.mubr.msk.f32.gmra.mrb[134].mxu0 %vm439_vm1, %v4659_v27  ;;  %v5370_v26 = vadd.f32 %v1313_v2, %v5277_v12 }
 0x12a   : > { %v5347_v19 = vadd.f32 %v3965_v1, %v5118_v46  ;;  %v971_v3 = vpop.f32.mrb[31].mxu1  ;;  %v1312_v46 = vsel %vm1298_vm3, %v1283_v59, %v1284_v44  ;;  %v1285_v13 = vrot.slane %v1189_v41, 1 }
 0x12b   : > { %v1050_v53 = vadd.f32 %v971_v3, %v5256_v57  ;;  %v5367_v7 = vadd.f32 %v1312_v46, %v1044_v8 }
 0x12c   : > { %v1310_v42 = vsel %vm1298_vm3, %v1285_v13, %v1286_v37  ;;  %v4009_v48 = vpop.f32.mrb[30].mxu0 }
 0x12d   : > { %v3968_v28 = vpop.f32.mrb[32].mxu1  ;;  %v1288_v27 = vrot.slane %v4009_v48, 1  ;;  %v1199_v30 = vpop.f32.mrb[31].mxu0  ;;  %v5378_v8 = vadd.f32 %v1310_v42, %v1046_v10 }
 0x12e   : > { %v1053_v23 = vadd.f32 %v3968_v28, %v5130_v51  ;;  %v981_v57 = vpop.f32.mrb[33].mxu1  ;;  %v1311_v51 = vsel %vm1298_vm3, %v1284_v44, %v1285_v13  ;;  %v1287_v18 = vrot.slane %v1199_v30, 1 }
 0x12f   : > { %v1052_v63 = vadd.f32 %v981_v57, %v5134_v52  ;;  %v5381_v12 = vadd.f32 %v1311_v51, %v5293_v45 }
 0x130   : > { %v1308_v31 = vsel %vm1298_vm3, %v1287_v18, %v1288_v27  ;;  %v1309_v56 = vsel %vm1298_vm3, %v1286_v37, %v1287_v18  ;;  %v4012_v54 = vpop.f32.mrb[32].mxu0 }
 0x131   : > { %v3971_v29 = vpop.f32.mrb[34].mxu1  ;;  %v1290_v25 = vrot.slane %v4012_v54, 1  ;;  %v1209_v50 = vpop.f32.mrb[33].mxu0  ;;  %v5389_v10 = vadd.f32 %v1308_v31, %v1048_v39  ;;  %v5392_v45 = vadd.f32 %v1309_v56, %v5312_v22 }
 0x132   : > { %v1055_v20 = vadd.f32 %v3971_v29, %v5146_v61  ;;  %v991_v9 = vpop.f32.mrb[35].mxu1  ;;  %v1289_v33 = vrot.slane %v1209_v50, 1 }
 0x133   : > { %v1054_v52 = vadd.f32 %v991_v9, %v5150_v62 }
 0x134   : > { %v1306_v43 = vsel %vm1298_vm3, %v1289_v33, %v1290_v25  ;;  %v1307_v0 = vsel %vm1298_vm3, %v1288_v27, %v1289_v33  ;;  %v4015_v1 = vpop.f32.mrb[34].mxu0 }
 0x135   : > { %v3974_v11 = vpop.f32.mrb[36].mxu1  ;;  %v1292_v35 = vrot.slane %v4015_v1, 1  ;;  %v1219_v6 = vpop.f32.mrb[35].mxu0  ;;  %v5398_v14 = vadd.f32 %v1306_v43, %v1050_v53 }
 0x136   : > { %v1057_v61 = vadd.f32 %v3974_v11, %v5164_v32  ;;  %v1001_v60 = vpop.f32.mrb[37].mxu1  ;;  %v1291_v39 = vrot.slane %v1219_v6, 1 }
 0x137   : > { %v1056_v62 = vadd.f32 %v1001_v60, %v5168_v36  ;;  %v5401_v36 = vadd.f32 %v1307_v0, %v5330_v15 }
 0x138   : > { %v1304_v3 = vsel %vm1298_vm3, %v1291_v39, %v1292_v35  ;;  %v1305_v44 = vsel %vm1298_vm3, %v1290_v25, %v1291_v39  ;;  %v4018_v4 = vpop.f32.mrb[36].mxu0 }
 0x139   : > { %v3977_v34 = vpop.f32.mrb[38].mxu1  ;;  %v1294_v28 = vrot.slane %v4018_v4, 1  ;;  %v1229_v46 = vpop.f32.mrb[37].mxu0  ;;  %v5407_v2 = vadd.f32 %v1304_v3, %v1052_v63  ;;  %v5410_v53 = vadd.f32 %v1305_v44, %v5347_v19 }
 0x13a   : > { %v1011_v32 = vpop.f32.mrb[39].mxu1  ;;  %v1293_v16 = vrot.slane %v1229_v46, 1 }
 0x13c   : > { %v1302_v57 = vsel %vm1298_vm3, %v1293_v16, %v1294_v28  ;;  %v1303_v37 = vsel %vm1298_vm3, %v1292_v35, %v1293_v16  ;;  %v4021_v41 = vpop.f32.mrb[38].mxu0 }
 0x13d   : > { %v3980_v22 = vpop.f32.mrb[40].mxu1  ;;  %v1296_v29 = vrot.slane %v4021_v41, 1  ;;  %v1239_v42 = vpop.f32.mrb[39].mxu0  ;;  %v5416_v51 = vadd.f32 %v1302_v57, %v1054_v52  ;;  %v5418_v48 = vadd.f32 %v1303_v37, %v1053_v23 }
 0x13e   : > { %v1019_v59 = vpop.f32.mrb[41].mxu1  ;;  %v1295_v63 = vrot.slane %v1239_v42, 1 }
 0x140   : > { %v1300_v19 = vsel %vm1298_vm3, %v1295_v63, %v1296_v29  ;;  %v1301_v27 = vsel %vm1298_vm3, %v1294_v28, %v1295_v63  ;;  %v4024_v30 = vpop.f32.mrb[40].mxu0 }
 0x141   : > { %v3983_v15 = vpop.f32.mrb[42].mxu1  ;;  %v1249_v11 = vpop.f32.mrb[41].mxu0  ;;  %v5424_v31 = vadd.f32 %v1300_v19, %v1056_v62  ;;  %v5426_v56 = vadd.f32 %v1301_v27, %v1055_v20 }
 0x142   : > { %v1027_v13 = vpop.f32.mrb[43].mxu1  ;;  %v1297_v54 = vrot.slane %v1249_v11, 1 }
 0x144   : > { %v1299_v23 = vsel %vm1298_vm3, %v1296_v29, %v1297_v54  ;;  %v4027_v60 = vpop.f32.mrb[42].mxu0 }
 0x145   : > { %v4035_v9 = vpop.f32.mrb[44].mxu1  ;;  %v1258_v33 = vpop.f32.mrb[43].mxu0  ;;  %v5430_v43 = vadd.f32 %v1299_v23, %v1057_v61 }
 0x146   : > { %v1418_v18 = vpop.f32.mrb[45].mxu1 }
 0x148   : > { %v4030_v62 = vpop.f32.mrb[44].mxu0 }
 0x149   : > { %v4038_v52 = vpop.f32.mrb[46].mxu1  ;;  %v1266_v6 = vpop.f32.mrb[45].mxu0 }
 0x14a   : > { %v1563_v25 = vrot.slane %v4038_v52, 7  ;;  %v1426_v50 = vpop.f32.mrb[47].mxu1 }
 0x14b   : > { %v1562_v34 = vrot.slane %v1426_v50, 7 }
 0x14c   : > { %v4082_v61 = vpop.f32.mrb[46].mxu0 }
 0x14d   : > { %v4041_v0 = vpop.f32.mrb[48].mxu1  ;;  %v1610_v1 = vsel %vm771_vm2, %v1562_v34, %v1563_v25  ;;  %v1706_v16 = vpop.f32.mrb[47].mxu0 }
 0x14e   : > { %v1565_v32 = vrot.slane %v4041_v0, 7  ;;  %v1436_v20 = vpop.f32.mrb[49].mxu1  ;;  %v1611_v35 = vadd.f32 %v1610_v1, %v5285_v5 }
 0x14f   : > { %v1564_v39 = vrot.slane %v1436_v20, 7 }
 0x150   : > { %v4085_v41 = vpop.f32.mrb[48].mxu0 }
 0x151   : > { %v4044_v22 = vpop.f32.mrb[50].mxu1  ;;  %v1608_v3 = vsel %vm771_vm2, %v1564_v39, %v1565_v32  ;;  %v1609_v44 = vsel %vm771_vm2, %v1563_v25, %v1564_v39  ;;  %v5447_v9 = vadd.f32 %v4085_v41, %v1611_v35 }
 0x152   : > { %v1567_v4 = vrot.slane %v4044_v22, 7  ;;  %v1446_v59 = vpop.f32.mrb[51].mxu1  ;;  %v1613_v28 = vadd.f32 %v1608_v3, %v5301_v47  ;;  %v1612_v46 = vadd.f32 %v1609_v44, %v5304_v38  ;;  %v1714_v47 = vpop.f32.mrb[49].mxu0 }
 0x153   : > { %v1566_v15 = vrot.slane %v1446_v59, 7 }
 0x154   : > { %v4088_v18 = vpop.f32.mrb[50].mxu0 }
 0x155   : > { %v4047_v57 = vpop.f32.mrb[52].mxu1  ;;  %v1606_v5 = vsel %vm771_vm2, %v1566_v15, %v1567_v4  ;;  %v1607_v37 = vsel %vm771_vm2, %v1565_v32, %v1566_v15  ;;  %v5455_v23 = vadd.f32 %v4088_v18, %v1613_v28 }
 0x156   : > { %v1569_v13 = vrot.slane %v4047_v57, 7  ;;  %v1456_v29 = vpop.f32.mrb[53].mxu1  ;;  %v1615_v42 = vadd.f32 %v1606_v5, %v5319_v55  ;;  %v1614_v63 = vadd.f32 %v1607_v37, %v5322_v49  ;;  %v1723_v49 = vpop.f32.mrb[51].mxu0 }
 0x157   : > { %v1568_v38 = vrot.slane %v1456_v29, 7  ;;  %v5457_v25 = vadd.f32 %v1723_v49, %v1612_v46 }
 0x158   : > { %v4091_v0 = vpop.f32.mrb[52].mxu0 }
 0x159   : > { %v4050_v19 = vpop.f32.mrb[54].mxu1  ;;  %v1604_v27 = vsel %vm771_vm2, %v1568_v38, %v1569_v13  ;;  %v1605_v30 = vsel %vm771_vm2, %v1567_v4, %v1568_v38  ;;  %v5465_v32 = vadd.f32 %v4091_v0, %v1615_v42  ;;  %v1733_v20 = vpop.f32.mrb[53].mxu0 }
 0x15a   : > { %v1571_v11 = vrot.slane %v4050_v19, 7  ;;  %v1466_v54 = vpop.f32.mrb[55].mxu1  ;;  %v1617_v52 = vadd.f32 %v1604_v27, %v5335_v58  ;;  %v1616_v55 = vadd.f32 %v1605_v30, %v5338_v17  ;;  %v5467_v6 = vadd.f32 %v1733_v20, %v1614_v63 }
 0x15b   : > { %v1570_v60 = vrot.slane %v1466_v54, 7 }
 0x15c   : > { %v4094_v44 = vpop.f32.mrb[54].mxu0 }
 0x15d   : > { %v4053_v50 = vpop.f32.mrb[56].mxu1  ;;  %v1602_v33 = vsel %vm771_vm2, %v1570_v60, %v1571_v11  ;;  %v1603_v34 = vsel %vm771_vm2, %v1569_v13, %v1570_v60  ;;  %v5475_v59 = vadd.f32 %v4094_v44, %v1617_v52  ;;  %v1743_v28 = vpop.f32.mrb[55].mxu0 }
 0x15e   : > { %v1573_v1 = vrot.slane %v4053_v50, 7  ;;  %v1476_v62 = vpop.f32.mrb[57].mxu1  ;;  %v1619_v58 = vadd.f32 %v1602_v33, %v5352_v21  ;;  %v1618_v17 = vadd.f32 %v1603_v34, %v5355_v24  ;;  %v5477_v16 = vadd.f32 %v1743_v28, %v1616_v55 }
 0x15f   : > { %v1572_v35 = vrot.slane %v1476_v62, 7 }
 0x160   : > { %v4097_v37 = vpop.f32.mrb[56].mxu0 }
 0x161   : > { %v4056_v39 = vpop.f32.mrb[58].mxu1  ;;  %v1600_v22 = vsel %vm771_vm2, %v1572_v35, %v1573_v1  ;;  %v1601_v3 = vsel %vm771_vm2, %v1571_v11, %v1572_v35  ;;  %v5485_v29 = vadd.f32 %v4097_v37, %v1619_v58  ;;  %v1753_v42 = vpop.f32.mrb[57].mxu0 }
 0x162   : > { %v1575_v61 = vrot.slane %v4056_v39, 7  ;;  %v1486_v4 = vpop.f32.mrb[59].mxu1  ;;  %v1621_v21 = vadd.f32 %v1600_v22, %v5367_v7  ;;  %v1620_v24 = vadd.f32 %v1601_v3, %v5370_v26  ;;  %v5487_v47 = vadd.f32 %v1753_v42, %v1618_v17 }
 0x163   : > { %v1574_v46 = vrot.slane %v1486_v4, 7 }
 0x164   : > { %v4100_v30 = vpop.f32.mrb[58].mxu0 }
 0x165   : > { %v4059_v15 = vpop.f32.mrb[60].mxu1  ;;  %v1598_v57 = vsel %vm771_vm2, %v1574_v46, %v1575_v61  ;;  %v1599_v5 = vsel %vm771_vm2, %v1573_v1, %v1574_v46  ;;  %v5495_v54 = vadd.f32 %v4100_v30, %v1621_v21  ;;  %v1763_v52 = vpop.f32.mrb[59].mxu0 }
 0x166   : > { %v1577_v41 = vrot.slane %v4059_v15, 7  ;;  %v1496_v13 = vpop.f32.mrb[61].mxu1  ;;  %v1623_v7 = vadd.f32 %v1598_v57, %v5378_v8  ;;  %v1622_v26 = vadd.f32 %v1599_v5, %v5381_v12  ;;  %v5497_v49 = vadd.f32 %v1763_v52, %v1620_v24 }
 0x167   : > { %v1576_v63 = vrot.slane %v1496_v13, 7 }
 0x168   : > { %v4103_v34 = vpop.f32.mrb[60].mxu0 }
 0x169   : > { %v4062_v38 = vpop.f32.mrb[62].mxu1  ;;  %v1596_v19 = vsel %vm771_vm2, %v1576_v63, %v1577_v41  ;;  %v1597_v27 = vsel %vm771_vm2, %v1575_v61, %v1576_v63  ;;  %v5505_v62 = vadd.f32 %v4103_v34, %v1623_v7  ;;  %v1773_v58 = vpop.f32.mrb[61].mxu0 }
 0x16a   : > { %v1579_v18 = vrot.slane %v4062_v38, 7  ;;  %v1506_v11 = vpop.f32.mrb[63].mxu1  ;;  %v1625_v8 = vadd.f32 %v1596_v19, %v5389_v10  ;;  %v1624_v12 = vadd.f32 %v1597_v27, %v5392_v45  ;;  %v5507_v20 = vadd.f32 %v1773_v58, %v1622_v26 }
 0x16b   : > { %v1578_v55 = vrot.slane %v1506_v11, 7 }
 0x16c   : > { %v4106_v3 = vpop.f32.mrb[62].mxu0 }
 0x16d   : > { %v4065_v60 = vpop.f32.mrb[64].mxu1  ;;  %v1594_v50 = vsel %vm771_vm2, %v1578_v55, %v1579_v18  ;;  %v1595_v33 = vsel %vm771_vm2, %v1577_v41, %v1578_v55  ;;  %v5515_v4 = vadd.f32 %v4106_v3, %v1625_v8  ;;  %v1783_v21 = vpop.f32.mrb[63].mxu0 }
 0x16e   : > { %v1581_v0 = vrot.slane %v4065_v60, 7  ;;  %v1516_v1 = vpop.f32.mrb[65].mxu1  ;;  %v1627_v10 = vadd.f32 %v1594_v50, %v5398_v14  ;;  %v1626_v45 = vadd.f32 %v1595_v33, %v5401_v36  ;;  %v5517_v28 = vadd.f32 %v1783_v21, %v1624_v12 }
 0x16f   : > { %v1580_v17 = vrot.slane %v1516_v1, 7 }
 0x170   : > { %v4109_v5 = vpop.f32.mrb[64].mxu0 }
 0x171   : > { %v4068_v35 = vpop.f32.mrb[66].mxu1  ;;  %v1592_v39 = vsel %vm771_vm2, %v1580_v17, %v1581_v0  ;;  %v1593_v22 = vsel %vm771_vm2, %v1579_v18, %v1580_v17  ;;  %v5525_v13 = vadd.f32 %v4109_v5, %v1627_v10  ;;  %v1793_v7 = vpop.f32.mrb[65].mxu0 }
 0x172   : > { %v1583_v44 = vrot.slane %v4068_v35, 7  ;;  %v1526_v61 = vpop.f32.mrb[67].mxu1  ;;  %v1629_v14 = vadd.f32 %v1592_v39, %v5407_v2  ;;  %v1628_v36 = vadd.f32 %v1593_v22, %v5410_v53  ;;  %v5527_v42 = vadd.f32 %v1793_v7, %v1626_v45 }
 0x173   : > { %v1582_v24 = vrot.slane %v1526_v61, 7 }
 0x174   : > { %v4112_v27 = vpop.f32.mrb[66].mxu0 }
 0x175   : > { %v4071_v46 = vpop.f32.mrb[68].mxu1  ;;  %v1590_v15 = vsel %vm771_vm2, %v1582_v24, %v1583_v44  ;;  %v1591_v57 = vsel %vm771_vm2, %v1581_v0, %v1582_v24  ;;  %v1803_v11 = vpop.f32.mrb[67].mxu0 }
 0x176   : > { %v1585_v37 = vrot.slane %v4071_v46, 7  ;;  %v1536_v41 = vpop.f32.mrb[69].mxu1  ;;  %v1631_v2 = vadd.f32 %v1590_v15, %v5416_v51  ;;  %v1630_v53 = vadd.f32 %v1591_v57, %v5418_v48  ;;  %v5535_v48 = vadd.f32 %v4112_v27, %v1629_v14 }
 0x177   : > { %v1584_v26 = vrot.slane %v1536_v41, 7  ;;  %v5537_v12 = vadd.f32 %v1803_v11, %v1628_v36 }
 0x178   : > { %v4115_v60 = vpop.f32.mrb[68].mxu0 }
 0x179   : > { %v4074_v63 = vpop.f32.mrb[70].mxu1  ;;  %v1588_v38 = vsel %vm771_vm2, %v1584_v26, %v1585_v37  ;;  %v1589_v19 = vsel %vm771_vm2, %v1583_v44, %v1584_v26  ;;  %v5542_v34 = vadd.f32 %v4115_v60, %v1631_v2  ;;  %v1813_v0 = vpop.f32.mrb[69].mxu0 }
 0x17a   : > { %v1546_v30 = vpop.f32.mrb[71].mxu1  ;;  %v1633_v18 = vadd.f32 %v1588_v38, %v5424_v31  ;;  %v1632_v51 = vadd.f32 %v1589_v19, %v5426_v56  ;;  %v5544_v31 = vadd.f32 %v1813_v0, %v1630_v53 }
 0x17b   : > { %v1586_v8 = vrot.slane %v1546_v30, 7 }
 0x17c   : > { %v4118_v1 = vpop.f32.mrb[70].mxu0 }
 0x17d   : > { %v1587_v52 = vsel %vm771_vm2, %v1585_v37, %v1586_v8  ;;  %v4077_v55 = vpop.f32.mrb[72].mxu1  ;;  %v5546_v45 = vadd.f32 %v4118_v1, %v1633_v18  ;;  %v1823_v58 = vpop.f32.mrb[71].mxu0 }
 0x17e   : > { %v1634_v50 = vadd.f32 %v1587_v52, %v5430_v43  ;;  %v1555_v33 = vpop.f32.mrb[73].mxu1  ;;  %v5548_v17 = vadd.f32 %v1823_v58, %v1632_v51 }
 0x180   : > { %v4121_v39 = vpop.f32.mrb[72].mxu0 }
 0x181   : > { %v4129_v56 = vpop.f32.mrb[74].mxu1  ;;  %v1833_v3 = vpop.f32.mrb[73].mxu0 }
 0x182   : > { %v1944_v10 = vpop.f32.mrb[75].mxu1  ;;  %v5550_v44 = vadd.f32 %v1833_v3, %v1634_v50 }
 0x184   : > { %v4124_v14 = vpop.f32.mrb[74].mxu0 }
 0x185   : > { %v4132_v35 = vpop.f32.mrb[76].mxu1  ;;  %v1842_v24 = vpop.f32.mrb[75].mxu0 }
 0x186   : > { %v1952_v22 = vpop.f32.mrb[77].mxu1  ;;  %v2088_v43 = vrot.slane %v4132_v35, 1 }
 0x188   : > { %v4176_v37 = vpop.f32.mrb[76].mxu0 }
 0x189   : > { %v4135_v61 = vpop.f32.mrb[78].mxu1  ;;  %v2232_v26 = vpop.f32.mrb[77].mxu0 }
 0x18a   : > { %v2090_v36 = vrot.slane %v4135_v61, 1  ;;  %v1961_v21 = vpop.f32.mrb[79].mxu1 }
 0x18b   : > { %v2089_v46 = vrot.slane %v1961_v21, 1 }
 0x18c   : > { %v4179_v30 = vpop.f32.mrb[78].mxu0 }
 0x18d   : > { %v2135_v15 = vsel %vm1298_vm3, %v2089_v46, %v2090_v36  ;;  %v2136_v57 = vsel %vm1298_vm3, %v2088_v43, %v2089_v46  ;;  %v4138_v5 = vpop.f32.mrb[80].mxu1  ;;  %v2240_v52 = vpop.f32.mrb[79].mxu0 }
 0x18e   : > { %v2092_v41 = vrot.slane %v4138_v5, 1  ;;  %v1971_v2 = vpop.f32.mrb[81].mxu1  ;;  %v2138_v53 = vadd.f32 %v2135_v15, %v5457_v25  ;;  %v2137_v7 = vadd.f32 %v2136_v57, %v5447_v9 }
 0x18f   : > { %v2091_v63 = vrot.slane %v1971_v2, 1 }
 0x190   : > { %v4182_v50 = vpop.f32.mrb[80].mxu0 }
 0x191   : > { %v2133_v38 = vsel %vm1298_vm3, %v2091_v63, %v2092_v41  ;;  %v2134_v19 = vsel %vm1298_vm3, %v2090_v36, %v2091_v63  ;;  %v4141_v27 = vpop.f32.mrb[82].mxu1  ;;  %v2248_v10 = vpop.f32.mrb[81].mxu0  ;;  %v2376_v36 = vrot.slane %v4182_v50, 7 }
 0x192   : > { %v2094_v18 = vrot.slane %v4141_v27, 1  ;;  %v1981_v51 = vpop.f32.mrb[83].mxu1  ;;  %v2140_v11 = vadd.f32 %v2133_v38, %v5467_v6  ;;  %v2139_v8 = vadd.f32 %v2134_v19, %v5455_v23 }
 0x193   : > { %v2093_v25 = vrot.slane %v1981_v51, 1 }
 0x194   : > { %v4185_v39 = vpop.f32.mrb[82].mxu0 }
 0x195   : > { %v2131_v9 = vsel %vm1298_vm3, %v2093_v25, %v2094_v18  ;;  %v2132_v55 = vsel %vm1298_vm3, %v2092_v41, %v2093_v25  ;;  %v4144_v60 = vpop.f32.mrb[84].mxu1 }
 0x196   : > { %v2096_v33 = vrot.slane %v4144_v60, 1  ;;  %v1991_v0 = vpop.f32.mrb[85].mxu1  ;;  %v2142_v56 = vadd.f32 %v2131_v9, %v5477_v16  ;;  %v2141_v1 = vadd.f32 %v2132_v55, %v5465_v32  ;;  %v2378_v16 = vrot.slane %v4185_v39, 7  ;;  %v2257_v32 = vpop.f32.mrb[83].mxu0 }
 0x197   : > { %v2095_v6 = vrot.slane %v1991_v0, 1  ;;  %v2377_v21 = vrot.slane %v2257_v32, 7 }
 0x198   : > { %v4188_v57 = vpop.f32.mrb[84].mxu0 }
 0x199   : > { %v2129_v23 = vsel %vm1298_vm3, %v2095_v6, %v2096_v33  ;;  %v2130_v58 = vsel %vm1298_vm3, %v2094_v18, %v2095_v6  ;;  %v4147_v35 = vpop.f32.mrb[86].mxu1  ;;  %v2380_v2 = vrot.slane %v4188_v57, 7  ;;  %v2267_v26 = vpop.f32.mrb[85].mxu0 }
 0x19a   : > { %v2098_v22 = vrot.slane %v4147_v35, 1  ;;  %v2001_v3 = vpop.f32.mrb[87].mxu1  ;;  %v5575_v43 = vadd.f32 %v2129_v23, %v5487_v47  ;;  %v5578_v61 = vadd.f32 %v2130_v58, %v5475_v59  ;;  %v2423_v47 = vsel %vm771_vm2, %v2377_v21, %v2378_v16 }
 0x19b   : > { %v2097_v14 = vrot.slane %v2001_v3, 1  ;;  %v2424_v59 = vsel %vm771_vm2, %v2376_v36, %v2377_v21  ;;  %v5591_v38 = vadd.f32 %v2423_v47, %v2138_v53  ;;  %v2379_v27 = vrot.slane %v2267_v26, 7 }
 0x19c   : > { %v5593_v19 = vadd.f32 %v2424_v59, %v2137_v7  ;;  %v4191_v25 = vpop.f32.mrb[86].mxu0 }
 0x19d   : > { %v2127_v24 = vsel %vm1298_vm3, %v2097_v14, %v2098_v22  ;;  %v2128_v46 = vsel %vm1298_vm3, %v2096_v33, %v2097_v14  ;;  %v4150_v15 = vpop.f32.mrb[88].mxu1  ;;  %v2421_v55 = vsel %vm771_vm2, %v2379_v27, %v2380_v2  ;;  %v2422_v53 = vsel %vm771_vm2, %v2378_v16, %v2379_v27  ;;  %v2277_v60 = vpop.f32.mrb[87].mxu0 }
 0x19e   : > { %v2100_v5 = vrot.slane %v4150_v15, 1  ;;  %v2011_v37 = vpop.f32.mrb[89].mxu1  ;;  %v5589_v41 = vadd.f32 %v2127_v24, %v5497_v49  ;;  %v2145_v30 = vadd.f32 %v2128_v46, %v5485_v29  ;;  %v2382_v29 = vrot.slane %v4191_v25, 7 }
 0x19f   : > { %v2099_v63 = vrot.slane %v2011_v37, 1  ;;  %v5607_v33 = vadd.f32 %v2421_v55, %v2140_v11  ;;  %v5609_v0 = vadd.f32 %v2422_v53, %v2139_v8  ;;  %v2381_v10 = vrot.slane %v2277_v60, 7 }
 0x1a0   : > { %v4194_v39 = vpop.f32.mrb[88].mxu0 }
 0x1a1   : > { %v2125_v18 = vsel %vm1298_vm3, %v2099_v63, %v2100_v5  ;;  %v2126_v51 = vsel %vm1298_vm3, %v2098_v22, %v2099_v63  ;;  %v4153_v52 = vpop.f32.mrb[90].mxu1  ;;  %v2419_v3 = vsel %vm771_vm2, %v2381_v10, %v2382_v29  ;;  %v2420_v11 = vsel %vm771_vm2, %v2380_v2, %v2381_v10  ;;  %v2287_v16 = vpop.f32.mrb[89].mxu0 }
 0x1a2   : > { %v2102_v49 = vrot.slane %v4153_v52, 1  ;;  %v2021_v9 = vpop.f32.mrb[91].mxu1  ;;  %v5605_v7 = vadd.f32 %v2125_v18, %v5507_v20  ;;  %v2147_v6 = vadd.f32 %v2126_v51, %v5495_v54  ;;  %v2384_v54 = vrot.slane %v4194_v39, 7 }
 0x1a3   : > { %v2101_v50 = vrot.slane %v2021_v9, 1  ;;  %v5623_v14 = vadd.f32 %v2419_v3, %v2142_v56  ;;  %v5625_v36 = vadd.f32 %v2420_v11, %v2141_v1  ;;  %v2383_v21 = vrot.slane %v2287_v16, 7 }
 0x1a5   : > { %v2123_v23 = vsel %vm1298_vm3, %v2101_v50, %v2102_v49  ;;  %v2124_v58 = vsel %vm1298_vm3, %v2100_v5, %v2101_v50  ;;  %v4156_v35 = vpop.f32.mrb[92].mxu1  ;;  %v4197_v5 = vpop.f32.mrb[90].mxu0  ;;  %v2417_v47 = vsel %vm771_vm2, %v2383_v21, %v2384_v54  ;;  %v2418_v56 = vsel %vm771_vm2, %v2382_v29, %v2383_v21 }
 0x1a6   : > { %v2104_v20 = vrot.slane %v4156_v35, 1  ;;  %v2031_v22 = vpop.f32.mrb[93].mxu1  ;;  %v5621_v8 = vadd.f32 %v2123_v23, %v5517_v28  ;;  %v2149_v24 = vadd.f32 %v2124_v58, %v5505_v62  ;;  %v2386_v62 = vrot.slane %v4197_v5, 7  ;;  %v2297_v59 = vpop.f32.mrb[91].mxu0 }
 0x1a7   : > { %v2103_v32 = vrot.slane %v2031_v22, 1  ;;  %v5640_v26 = vadd.f32 %v2417_v47, %v5575_v43  ;;  %v5643_v63 = vadd.f32 %v2418_v56, %v5578_v61  ;;  %v2385_v27 = vrot.slane %v2297_v59, 7 }
 0x1a8   : > { %v4200_v25 = vpop.f32.mrb[92].mxu0 }
 0x1a9   : > { %v2121_v46 = vsel %vm1298_vm3, %v2103_v32, %v2104_v20  ;;  %v2122_v15 = vsel %vm1298_vm3, %v2102_v49, %v2103_v32  ;;  %v4159_v57 = vpop.f32.mrb[94].mxu1  ;;  %v2415_v43 = vsel %vm771_vm2, %v2385_v27, %v2386_v62  ;;  %v2416_v61 = vsel %vm771_vm2, %v2384_v54, %v2385_v27 }
 0x1aa   : > { %v2106_v28 = vrot.slane %v4159_v57, 1  ;;  %v2041_v37 = vpop.f32.mrb[95].mxu1  ;;  %v5637_v1 = vadd.f32 %v2121_v46, %v5527_v42  ;;  %v2151_v18 = vadd.f32 %v2122_v15, %v5515_v4  ;;  %v2388_v53 = vrot.slane %v4200_v25, 7  ;;  %v2307_v4 = vpop.f32.mrb[93].mxu0 }
 0x1ab   : > { %v2105_v2 = vrot.slane %v2041_v37, 1  ;;  %v5656_v60 = vadd.f32 %v2415_v43, %v5589_v41  ;;  %v5658_v50 = vadd.f32 %v2416_v61, %v2145_v30  ;;  %v2387_v10 = vrot.slane %v2307_v4, 7 }
 0x1ad   : > { %v2119_v51 = vsel %vm1298_vm3, %v2105_v2, %v2106_v28  ;;  %v2120_v52 = vsel %vm1298_vm3, %v2104_v20, %v2105_v2  ;;  %v4162_v42 = vpop.f32.mrb[96].mxu1  ;;  %v4203_v20 = vpop.f32.mrb[94].mxu0  ;;  %v2413_v3 = vsel %vm771_vm2, %v2387_v10, %v2388_v53  ;;  %v2414_v41 = vsel %vm771_vm2, %v2386_v62, %v2387_v10 }
 0x1ae   : > { %v2108_v49 = vrot.slane %v4162_v42, 1  ;;  %v2051_v9 = vpop.f32.mrb[97].mxu1  ;;  %v2154_v55 = vadd.f32 %v2119_v51, %v5537_v12  ;;  %v2153_v23 = vadd.f32 %v2120_v52, %v5525_v13  ;;  %v2390_v11 = vrot.slane %v4203_v20, 7  ;;  %v2317_v13 = vpop.f32.mrb[95].mxu0 }
 0x1af   : > { %v2107_v29 = vrot.slane %v2051_v9, 1  ;;  %v5671_v16 = vadd.f32 %v2413_v3, %v5605_v7  ;;  %v5673_v32 = vadd.f32 %v2414_v41, %v2147_v6  ;;  %v2389_v21 = vrot.slane %v2317_v13, 7 }
 0x1b1   : > { %v2117_v58 = vsel %vm1298_vm3, %v2107_v29, %v2108_v49  ;;  %v2118_v35 = vsel %vm1298_vm3, %v2106_v28, %v2107_v29  ;;  %v4165_v39 = vpop.f32.mrb[98].mxu1  ;;  %v4206_v28 = vpop.f32.mrb[96].mxu0  ;;  %v2411_v47 = vsel %vm771_vm2, %v2389_v21, %v2390_v11  ;;  %v2412_v7 = vsel %vm771_vm2, %v2388_v53, %v2389_v21 }
 0x1b2   : > { %v2110_v12 = vrot.slane %v4165_v39, 1  ;;  %v2061_v22 = vpop.f32.mrb[99].mxu1  ;;  %v2156_v30 = vadd.f32 %v2117_v58, %v5544_v31  ;;  %v2155_v46 = vadd.f32 %v2118_v35, %v5535_v48  ;;  %v2392_v56 = vrot.slane %v4206_v28, 7  ;;  %v2327_v48 = vpop.f32.mrb[97].mxu0 }
 0x1b3   : > { %v2109_v54 = vrot.slane %v2061_v22, 1  ;;  %v5686_v59 = vadd.f32 %v2411_v47, %v5621_v8  ;;  %v5688_v2 = vadd.f32 %v2412_v7, %v2149_v24  ;;  %v2391_v27 = vrot.slane %v2327_v48, 7 }
 0x1b5   : > { %v2115_v15 = vsel %vm1298_vm3, %v2109_v54, %v2110_v12  ;;  %v2116_v57 = vsel %vm1298_vm3, %v2108_v49, %v2109_v54  ;;  %v4168_v5 = vpop.f32.mrb[100].mxu1  ;;  %v4209_v49 = vpop.f32.mrb[98].mxu0  ;;  %v2409_v9 = vsel %vm771_vm2, %v2391_v27, %v2392_v56  ;;  %v2410_v8 = vsel %vm771_vm2, %v2390_v11, %v2391_v27 }
 0x1b6   : > { %v2112_v31 = vrot.slane %v4168_v5, 1  ;;  %v2071_v37 = vpop.f32.mrb[101].mxu1  ;;  %v2158_v6 = vadd.f32 %v2115_v15, %v5548_v17  ;;  %v2157_v51 = vadd.f32 %v2116_v57, %v5542_v34  ;;  %v2394_v34 = vrot.slane %v4209_v49, 7  ;;  %v2337_v61 = vpop.f32.mrb[99].mxu0 }
 0x1b7   : > { %v2111_v62 = vrot.slane %v2071_v37, 1  ;;  %v5702_v53 = vadd.f32 %v2409_v9, %v5637_v1  ;;  %v5704_v4 = vadd.f32 %v2410_v8, %v2151_v18  ;;  %v2393_v29 = vrot.slane %v2337_v61, 7 }
 0x1b8   : > { %v4212_v58 = vpop.f32.mrb[100].mxu0 }
 0x1b9   : > { %v2113_v52 = vsel %vm1298_vm3, %v2111_v62, %v2112_v31  ;;  %v2114_v42 = vsel %vm1298_vm3, %v2110_v12, %v2111_v62  ;;  %v4171_v25 = vpop.f32.mrb[102].mxu1  ;;  %v2407_v39 = vsel %vm771_vm2, %v2393_v29, %v2394_v34  ;;  %v2408_v20 = vsel %vm771_vm2, %v2392_v56, %v2393_v29  ;;  %v2347_v12 = vpop.f32.mrb[101].mxu0 }
 0x1ba   : > { %v2081_v17 = vpop.f32.mrb[103].mxu1  ;;  %v2160_v24 = vadd.f32 %v2113_v52, %v5550_v44  ;;  %v2159_v43 = vadd.f32 %v2114_v42, %v5546_v45  ;;  %v2396_v44 = vrot.slane %v4212_v58, 7  ;;  %v5710_v45 = vadd.f32 %v2407_v39, %v2154_v55 }
 0x1bb   : > { %v5712_v22 = vadd.f32 %v2408_v20, %v2153_v23  ;;  %v2395_v1 = vrot.slane %v2347_v12, 7 }
 0x1bc   : > { %v4215_v18 = vpop.f32.mrb[102].mxu0 }
 0x1bd   : > { %v4223_v10 = vpop.f32.mrb[104].mxu1  ;;  %v2405_v11 = vsel %vm771_vm2, %v2395_v1, %v2396_v44  ;;  %v2406_v13 = vsel %vm771_vm2, %v2394_v34, %v2395_v1  ;;  %v2398_v54 = vrot.slane %v4215_v18, 7  ;;  %v2357_v21 = vpop.f32.mrb[103].mxu0 }
 0x1be   : > { %v2520_v35 = vpop.f32.mrb[105].mxu1  ;;  %v5718_v15 = vadd.f32 %v2405_v11, %v2156_v30  ;;  %v5720_v57 = vadd.f32 %v2406_v13, %v2155_v46  ;;  %v2397_v55 = vrot.slane %v2357_v21, 7 }
 0x1c0   : > { %v4218_v23 = vpop.f32.mrb[104].mxu0  ;;  %v2403_v31 = vsel %vm771_vm2, %v2397_v55, %v2398_v54  ;;  %v2404_v37 = vsel %vm771_vm2, %v2396_v44, %v2397_v55 }
 0x1c1   : > { %v4226_v3 = vpop.f32.mrb[106].mxu1  ;;  %v2400_v47 = vrot.slane %v4218_v23, 7  ;;  %v2367_v7 = vpop.f32.mrb[105].mxu0  ;;  %v5726_v56 = vadd.f32 %v2403_v31, %v2158_v6  ;;  %v5728_v48 = vadd.f32 %v2404_v37, %v2157_v51  ;;  %v5771_v23 = vadd.s32 16, %v5100_v40 }
 0x1c2   : > { %v2528_v41 = vpop.f32.mrb[107].mxu1  ;;  %v2399_v30 = vrot.slane %v2367_v7, 7 }
 0x1c3   : > { %vm3085_vm7 = vcmp.le.s32.totalorder %v5771_v23, 16 }
 0x1c4   : > { %v4270_v46 = vpop.f32.mrb[106].mxu0  ;;  %v2401_v42 = vsel %vm771_vm2, %v2399_v30, %v2400_v47  ;;  %v2402_v25 = vsel %vm771_vm2, %v2398_v54, %v2399_v30 }
 0x1c5   : > { %v4229_v5 = vpop.f32.mrb[108].mxu1  ;;  %v5735_v49 = vpop.f32.mrb[107].mxu0  ;;  %v5738_v6 = vadd.f32 %v2401_v42, %v2160_v24  ;;  %v5740_v51 = vadd.f32 %v2402_v25, %v2159_v43 }
 0x1c6   : > { %v2536_v28 = vpop.f32.mrb[109].mxu1 }
 0x1c8   : > { %v4273_v8 = vpop.f32.mrb[108].mxu0 }
 0x1c9   : > { %v4232_v62 = vpop.f32.mrb[110].mxu1  ;;  %v2767_v61 = vpop.f32.mrb[109].mxu0 }
 0x1ca   : > { %v2664_v27 = vadd.f32 %v4232_v62, %v5591_v38  ;;  %v2544_v52 = vpop.f32.mrb[111].mxu1 }
 0x1cb   : > { %v2663_v17 = vadd.f32 %v2544_v52, %v5593_v19 }
 0x1cc   : > { %v4276_v58 = vpop.f32.mrb[110].mxu0 }
 0x1cd   : > { %v4235_v9 = vpop.f32.mrb[112].mxu1  ;;  %v2775_v19 = vpop.f32.mrb[111].mxu0 }
 0x1ce   : > { %v5743_v34 = vadd.f32 %v4235_v9, %v5607_v33  ;;  %v2554_v38 = vpop.f32.mrb[113].mxu1 }
 0x1cf   : > { %v2665_v29 = vadd.f32 %v2554_v38, %v5609_v0 }
 0x1d0   : > { %v4279_v20 = vpop.f32.mrb[112].mxu0 }
 0x1d1   : > { %v4238_v10 = vpop.f32.mrb[114].mxu1  ;;  %v2904_v12 = vrot.slane %v4279_v20, 1  ;;  %v2783_v1 = vpop.f32.mrb[113].mxu0 }
 0x1d2   : > { %v5747_v35 = vadd.f32 %v4238_v10, %v5623_v14  ;;  %v2564_v39 = vpop.f32.mrb[115].mxu1  ;;  %v2903_v0 = vrot.slane %v2783_v1, 1 }
 0x1d3   : > { %v2667_v24 = vadd.f32 %v2564_v39, %v5625_v36  ;;  %v5761_v36 = vld [vmem:[%s6004_s4] ss:$0 sm:$0xff] }
 0x1d4   : > { %v2949_v14 = vsel %vm1298_vm3, %v2903_v0, %v2904_v12  ;;  %v4282_v41 = vpop.f32.mrb[114].mxu0 }
 0x1d5   : > { %v4241_v43 = vpop.f32.mrb[116].mxu1  ;;  %v2951_v13 = vadd.f32 %v2949_v14, %v2663_v17  ;;  %v2906_v54 = vrot.slane %v4282_v41, 1  ;;  %v2793_v21 = vpop.f32.mrb[115].mxu0 }
 0x1d6   : > { %v5751_v44 = vadd.f32 %v4241_v43, %v5640_v26  ;;  %v2574_v33 = vpop.f32.mrb[117].mxu1  ;;  %v2905_v55 = vrot.slane %v2793_v21, 1 }
 0x1d7   : > { %v5754_v3 = vadd.f32 %v2574_v33, %v5643_v63  ;;  %v2982_v5 = vadd.f32 %v5761_v36, %v2951_v13 }
 0x1d8   : > { %v2948_v31 = vsel %vm1298_vm3, %v2904_v12, %v2905_v55  ;;  %v4285_v37 = vpop.f32.mrb[116].mxu0 }
 0x1d9   : > { %v4244_v18 = vpop.f32.mrb[118].mxu1  ;;  %vm3006_vm5 = vcmp.gt.f32.partialorder %v2982_v5, 0.0  ;;  %v3030_v7 = vmul.f32 0.1, %v2982_v5  ;;  %v2952_v30 = vadd.f32 %v2948_v31, %v2664_v27  ;;  %v2803_v46 = vpop.f32.mrb[117].mxu0  ;;  %v2908_v52 = vrot.slane %v4285_v37, 1 }
 0x1da   : > { %v5764_v26 = vadd.f32 %v4244_v18, %v5656_v60  ;;  %v2584_v11 = vpop.f32.mrb[119].mxu1  ;;  %v2947_v60 = vsel %vm1298_vm3, %v2905_v55, %v2906_v54  ;;  %v2907_v42 = vrot.slane %v2803_v46, 1 }
 0x1db   : > { %v5767_v63 = vadd.f32 %v2584_v11, %v5658_v50  ;;  %v2953_v62 = vadd.f32 %v2947_v60, %v2665_v29  ;;  %v2983_v17 = vadd.f32 %v5761_v36, %v2952_v30 }
 0x1dc   : > { %v2945_v38 = vsel %vm1298_vm3, %v2907_v42, %v2908_v52  ;;  %v2946_v61 = vsel %vm1298_vm3, %v2906_v54, %v2907_v42  ;;  %v4288_v29 = vpop.f32.mrb[118].mxu0 }
 0x1dd   : > { %v4247_v28 = vpop.f32.mrb[120].mxu1  ;;  %v2984_v27 = vadd.f32 %v5761_v36, %v2953_v62  ;;  %vm3007_vm8 = vcmp.gt.f32.partialorder %v2983_v17, 0.0  ;;  %v3031_v58 = vmul.f32 0.1, %v2983_v17  ;;  %v2954_v19 = vadd.f32 %v2946_v61, %v5743_v34  ;;  %v2813_v33 = vpop.f32.mrb[119].mxu0 }
 0x1de   : > { %v5779_v50 = vadd.f32 %v4247_v28, %v5671_v16  ;;  %v2594_v47 = vpop.f32.mrb[121].mxu1  ;;  %v3054_v16 = vsel %vm3006_vm5, %v2982_v5, %v3030_v7  ;;  %v2955_v43 = vadd.f32 %v2945_v38, %v2667_v24  ;;  %v2910_v20 = vrot.slane %v4288_v29, 1 }
 0x1df   : > { %v5789_v25 = vadd.f32 %v2594_v47, %v5673_v32  ;;  %v3095_v8 = vsel %vm3080_vm4, %v3054_v16, 0.0  ;;  %vm3008_vm9 = vcmp.gt.f32.partialorder %v2984_v27, 0.0  ;;  %v3032_v39 = vmul.f32 0.1, %v2984_v27 }
 0x1e0   : > { %3120 = vst.msk [vmem:[%s5786_s17] sm:$0xff] %vm3119_vm6, %v3095_v8  ;;  %v3055_v1 = vsel %vm3007_vm8, %v2983_v17, %v3031_v58  ;;  %v2909_v0 = vrot.slane %v2813_v33, 1  ;;  %v2985_v41 = vadd.f32 %v5761_v36, %v2954_v19  ;;  %v2986_v34 = vadd.f32 %v5761_v36, %v2955_v43  ;;  %v4291_v11 = vpop.f32.mrb[120].mxu0 }
 0x1e1   : > { %v4250_v9 = vpop.f32.mrb[122].mxu1  ;;  %3121 = vst.msk [vmem:[%s5786_s17 + $0x8] sm:$0xff] %vm3119_vm6, %v3055_v1  ;;  %v2912_v21 = vrot.slane %v4291_v11, 1  ;;  %v2823_v55 = vpop.f32.mrb[121].mxu0 }
 0x1e2   : > { %v5801_v32 = vadd.f32 %v4250_v9, %v5686_v59  ;;  %v2604_v10 = vpop.f32.mrb[123].mxu1  ;;  %v3056_v59 = vsel %vm3008_vm9, %v2984_v27, %v3032_v39  ;;  %v2944_v54 = vsel %vm1298_vm3, %v2908_v52, %v2909_v0  ;;  %vm3009_vm10 = vcmp.gt.f32.partialorder %v2985_v41, 0.0 }
 0x1e3   : > { %v5807_v12 = vadd.f32 %v2604_v10, %v5688_v2  ;;  %v3097_v14 = vsel %vm3085_vm7, %v3056_v59, 0.0  ;;  %v2943_v2 = vsel %vm1298_vm3, %v2909_v0, %v2910_v20  ;;  %vm3010_vm11 = vcmp.gt.f32.partialorder %v2986_v34, 0.0 }
 0x1e4   : > { %3122 = vst.msk [vmem:[%s5786_s17 + $0x10] sm:$0xff] %vm3119_vm6, %v3097_v14  ;;  %v3033_v28 = vmul.f32 0.1, %v2985_v41  ;;  %v2956_v60 = vadd.f32 %v2944_v54, %v5747_v35  ;;  %v2957_v31 = vadd.f32 %v2943_v2, %v5754_v3  ;;  %v2911_v37 = vrot.slane %v2823_v55, 1  ;;  %v4294_v62 = vpop.f32.mrb[122].mxu0 }
 0x1e5   : > { %v4253_v18 = vpop.f32.mrb[124].mxu1  ;;  %v2833_v16 = vpop.f32.mrb[123].mxu0  ;;  %v2914_v27 = vrot.slane %v4294_v62, 1 }
 0x1e6   : > { %v5816_v24 = vadd.f32 %v4253_v18, %v5702_v53  ;;  %v2614_v13 = vpop.f32.mrb[125].mxu1  ;;  %v3034_v53 = vmul.f32 0.1, %v2986_v34  ;;  %v3057_v7 = vsel %vm3009_vm10, %v2985_v41, %v3033_v28  ;;  %v2987_v42 = vadd.f32 %v5761_v36, %v2956_v60 }
 0x1e7   : > { %v5825_v5 = vadd.f32 %v2614_v13, %v5704_v4  ;;  %v3098_v4 = vsel %vm3080_vm4, %v3057_v7, 0.0  ;;  %v2988_v35 = vadd.f32 %v5761_v36, %v2957_v31  ;;  %v2941_v3 = vsel %vm1298_vm3, %v2911_v37, %v2912_v21 }
 0x1e8   : > { %v3058_v30 = vsel %vm3010_vm11, %v2986_v34, %v3034_v53  ;;  %3123 = vst.msk [vmem:[%s5786_s17 + $0x18] sm:$0xff] %vm3119_vm6, %v3098_v4  ;;  %v2959_v17 = vadd.f32 %v2941_v3, %v5767_v63  ;;  %v2913_v9 = vrot.slane %v2833_v16, 1  ;;  %vm3011_vm12 = vcmp.gt.f32.partialorder %v2987_v42, 0.0  ;;  %v5851_v39 = vpop.f32.mrb[124].mxu0 }
 0x1e9   : > { %v4256_v47 = vpop.f32.mrb[126].mxu1  ;;  %3124 = vst.msk [vmem:[%s5786_s17 + $0x20] sm:$0xff] %vm3119_vm6, %v3058_v30  ;;  %vm3012_vm13 = vcmp.gt.f32.partialorder %v2988_v35, 0.0  ;;  %v3035_v8 = vmul.f32 0.1, %v2987_v42  ;;  %v2916_v41 = vrot.slane %v5851_v39, 1 }
 0x1ea   : > { %v5830_v46 = vadd.f32 %v4256_v47, %v5710_v45  ;;  %v2624_v52 = vpop.f32.mrb[127].mxu1  ;;  %v2942_v45 = vsel %vm1298_vm3, %v2910_v20, %v2911_v37  ;;  %v3036_v38 = vmul.f32 0.1, %v2988_v35  ;;  %v2990_v29 = vadd.f32 %v5761_v36, %v2959_v17 }
 0x1eb   : > { %v2958_v61 = vadd.f32 %v2942_v45, %v5751_v44  ;;  %v2939_v10 = vsel %vm1298_vm3, %v2913_v9, %v2914_v27  ;;  %v2940_v58 = vsel %vm1298_vm3, %v2912_v21, %v2913_v9  ;;  %v3059_v19 = vsel %vm3011_vm12, %v2987_v42, %v3035_v8  ;;  %v2843_v44 = vpop.f32.mrb[125].mxu0 }
 0x1ec   : > { %v3060_v43 = vsel %vm3012_vm13, %v2988_v35, %v3036_v38  ;;  %v2960_v20 = vadd.f32 %v2940_v58, %v5764_v26  ;;  %v2961_v33 = vadd.f32 %v2939_v10, %v5789_v25  ;;  %v3100_v59 = vsel %vm3085_vm7, %v3059_v19, 0.0  ;;  %v4300_v54 = vpop.f32.mrb[126].mxu0 }
 0x1ed   : > { %v4259_v63 = vpop.f32.mrb[128].mxu1  ;;  %v3101_v0 = vsel %vm3080_vm4, %v3060_v43, 0.0  ;;  %v2989_v18 = vadd.f32 %v5761_v36, %v2958_v61  ;;  %vm3014_vm14 = vcmp.gt.f32.partialorder %v2990_v29, 0.0  ;;  %3125 = vst.msk [vmem:[%s5786_s17 + $0x28] sm:$0xff] %vm3119_vm6, %v3100_v59  ;;  %v3038_v14 = vmul.f32 0.1, %v2990_v29 }
 0x1ee   : > { %v2634_v1 = vpop.f32.mrb[129].mxu1  ;;  %3126 = vst.msk [vmem:[%s5786_s17 + $0x30] sm:$0xff] %vm3119_vm6, %v3101_v0  ;;  %v2991_v26 = vadd.f32 %v5761_v36, %v2960_v20  ;;  %v2992_v25 = vadd.f32 %v5761_v36, %v2961_v33  ;;  %v2679_v13 = vadd.f32 %v2624_v52, %v5712_v22  ;;  %v2915_v2 = vrot.slane %v2843_v44, 1  ;;  %v2853_v53 = vpop.f32.mrb[127].mxu0 }
 0x1ef   : > { %vm3013_vm15 = vcmp.gt.f32.partialorder %v2989_v18, 0.0  ;;  %v3037_v11 = vmul.f32 0.1, %v2989_v18  ;;  %v3062_v55 = vsel %vm3014_vm14, %v2990_v29, %v3038_v14  ;;  %v5880_v62 = vadd.f32 %v4259_v63, %v5718_v15 }
 0x1f0   : > { %vm3015_vm0 = vcmp.gt.f32.partialorder %v2991_v26, 0.0  ;;  %vm3016_vm1 = vcmp.gt.f32.partialorder %v2992_v25, 0.0  ;;  %v3039_v28 = vmul.f32 0.1, %v2991_v26  ;;  %v3103_v31 = vsel %vm3085_vm7, %v3062_v55, 0.0  ;;  %v4303_v16 = vpop.f32.mrb[128].mxu0 }
 0x1f1   : > { %v4262_v34 = vpop.f32.mrb[130].mxu1  ;;  %v3061_v60 = vsel %vm3013_vm15, %v2989_v18, %v3037_v11  ;;  %v3040_v37 = vmul.f32 0.1, %v2992_v25  ;;  %v2937_v47 = vsel %vm1298_vm3, %v2915_v2, %v2916_v41  ;;  %3128 = vst.msk [vmem:[%s5786_s17 + $0x40] sm:$0xff] %vm3119_vm6, %v3103_v31  ;;  %v2938_v7 = vsel %vm1298_vm3, %v2914_v27, %v2915_v2  ;;  %v2863_v9 = vpop.f32.mrb[129].mxu0 }
 0x1f2   : > { %v2644_v21 = vpop.f32.mrb[131].mxu1  ;;  %3127 = vst.msk [vmem:[%s5786_s17 + $0x38] sm:$0xff] %vm3119_vm6, %v3061_v60  ;;  %v3063_v22 = vsel %vm3015_vm0, %v2991_v26, %v3039_v28  ;;  %v2963_v30 = vadd.f32 %v2937_v47, %v5807_v12  ;;  %v2962_v35 = vadd.f32 %v2938_v7, %v5779_v50  ;;  %v2918_v3 = vrot.slane %v4300_v54, 1 }
 0x1f3   : > { %v3064_v4 = vsel %vm3016_vm1, %v2992_v25, %v3040_v37  ;;  %v3104_v42 = vsel %vm3080_vm4, %v3063_v22, 0.0  ;;  %v2681_v12 = vadd.f32 %v2634_v1, %v5720_v57  ;;  %v2917_v15 = vrot.slane %v2853_v53, 1 }
 0x1f4   : > { %3129 = vst.msk [vmem:[%s5786_s17 + $0x48] sm:$0xff] %vm3119_vm6, %v3104_v42  ;;  %3130 = vst.msk [vmem:[%s5786_s17 + $0x50] sm:$0xff] %vm3119_vm6, %v3064_v4  ;;  %v2994_v17 = vadd.f32 %v5761_v36, %v2963_v30  ;;  %v5892_v27 = vadd.f32 %v4262_v34, %v5726_v56  ;;  %v2993_v8 = vadd.f32 %v5761_v36, %v2962_v35  ;;  %v2920_v38 = vrot.slane %v4303_v16, 1  ;;  %v4306_v63 = vpop.f32.mrb[130].mxu0 }
 0x1f5   : > { %v4265_v52 = vpop.f32.mrb[132].mxu1  ;;  %v5896_v50 = vadd.f32 %v2644_v21, %v5728_v48  ;;  %v2919_v61 = vrot.slane %v2863_v9, 1  ;;  %v2935_v10 = vsel %vm1298_vm3, %v2917_v15, %v2918_v3  ;;  %v2936_v57 = vsel %vm1298_vm3, %v2916_v41, %v2917_v15  ;;  %v2873_v33 = vpop.f32.mrb[131].mxu0 }
 0x1f6   : > { %v2654_v45 = vpop.f32.mrb[133].mxu1  ;;  %vm3018_vm2 = vcmp.gt.f32.partialorder %v2994_v17, 0.0  ;;  %v3042_v29 = vmul.f32 0.1, %v2994_v17  ;;  %vm3017_vm5 = vcmp.gt.f32.partialorder %v2993_v8, 0.0  ;;  %v2964_v58 = vadd.f32 %v2936_v57, %v5801_v32 }
 0x1f7   : > { %v3041_v56 = vmul.f32 0.1, %v2993_v8  ;;  %v2965_v39 = vadd.f32 %v2935_v10, %v5825_v5  ;;  %v2933_v19 = vsel %vm1298_vm3, %v2919_v61, %v2920_v38  ;;  %v2934_v43 = vsel %vm1298_vm3, %v2918_v3, %v2919_v61 }
 0x1f8   : > { %v3066_v48 = vsel %vm3018_vm2, %v2994_v17, %v3042_v29  ;;  %v2686_v20 = vadd.f32 %v4265_v52, %v5738_v6  ;;  %v2995_v32 = vadd.f32 %v5761_v36, %v2964_v58  ;;  %v2966_v0 = vadd.f32 %v2934_v43, %v5816_v24  ;;  %v4309_v2 = vpop.f32.mrb[132].mxu0 }
 0x1f9   : > { %v3065_v44 = vsel %vm3017_vm5, %v2993_v8, %v3041_v56  ;;  %v3107_v1 = vsel %vm3080_vm4, %v3066_v48, 0.0  ;;  %v2996_v5 = vadd.f32 %v5761_v36, %v2965_v39  ;;  %v2967_v18 = vadd.f32 %v2933_v19, %v2679_v13  ;;  %v2883_v55 = vpop.f32.mrb[133].mxu0 }
 0x1fa   : > { %v3106_v59 = vsel %vm3085_vm7, %v3065_v44, 0.0  ;;  %3132 = vst.msk [vmem:[%s5786_s17 + $0x60] sm:$0xff] %vm3119_vm6, %v3107_v1  ;;  %v2922_v14 = vrot.slane %v4306_v63, 1  ;;  %vm3019_vm8 = vcmp.gt.f32.partialorder %v2995_v32, 0.0  ;;  %v3043_v6 = vmul.f32 0.1, %v2995_v32 }
 0x1fb   : > { %3131 = vst.msk [vmem:[%s5786_s17 + $0x58] sm:$0xff] %vm3119_vm6, %v3106_v59  ;;  %vm3020_vm9 = vcmp.gt.f32.partialorder %v2996_v5, 0.0  ;;  %v3044_v26 = vmul.f32 0.1, %v2996_v5  ;;  %v2997_v25 = vadd.f32 %v5761_v36, %v2966_v0  ;;  %v2998_v41 = vadd.f32 %v5761_v36, %v2967_v18 }
 0x1fc   : > { %v2685_v34 = vadd.f32 %v2654_v45, %v5740_v51  ;;  %v2921_v11 = vrot.slane %v2873_v33, 1  ;;  %v2902_v24 = vrot.slane %v5735_v49, 1  ;;  %v3067_v13 = vsel %vm3019_vm8, %v2995_v32, %v3043_v6  ;;  %v4312_v37 = vpop.f32.mrb[134].mxu0 }
 0x1fd   : > { %v3068_v54 = vsel %vm3020_vm9, %v2996_v5, %v3044_v26  ;;  %v2924_v21 = vrot.slane %v4309_v2, 1  ;;  %3133 = vst.msk [vmem:[%s5786_s17 + $0x68] sm:$0xff] %vm3119_vm6, %v3067_v13  ;;  %vm3021_vm10 = vcmp.gt.f32.partialorder %v2997_v25, 0.0  ;;  %vm3022_vm11 = vcmp.gt.f32.partialorder %v2998_v41, 0.0  ;;  %v2893_v52 = vpop.f32.mrb[135].mxu0 }
 0x1fe   : > { %v3109_v28 = vsel %vm3085_vm7, %v3068_v54, 0.0  ;;  %v3045_v53 = vmul.f32 0.1, %v2997_v25  ;;  %v3046_v51 = vmul.f32 0.1, %v2998_v41  ;;  %v2931_v49 = vsel %vm1298_vm3, %v2921_v11, %v2922_v14 }
 0x1ff   : > { %3134 = vst.msk [vmem:[%s5786_s17 + $0x70] sm:$0xff] %vm3119_vm6, %v3109_v28  ;;  %v2932_v60 = vsel %vm1298_vm3, %v2920_v38, %v2921_v11  ;;  %v2923_v31 = vrot.slane %v2883_v55, 1  ;;  %v2969_v7 = vadd.f32 %v2931_v49, %v2681_v12  ;;  %v2926_v30 = vrot.slane %v4312_v37, 1 }
 0x200   : > { %v3069_v47 = vsel %vm3021_vm10, %v2997_v25, %v3045_v53  ;;  %v2968_v22 = vadd.f32 %v2932_v60, %v5830_v46  ;;  %v3070_v4 = vsel %vm3022_vm11, %v2998_v41, %v3046_v51  ;;  %v2925_v15 = vrot.slane %v2893_v52, 1 }
 0x201   : > { %v3110_v42 = vsel %vm3080_vm4, %v3069_v47, 0.0  ;;  %v2929_v35 = vsel %vm1298_vm3, %v2923_v31, %v2924_v21  ;;  %v2930_v3 = vsel %vm1298_vm3, %v2922_v14, %v2923_v31  ;;  %3136 = vst.msk [vmem:[%s5786_s17 + $0x80] sm:$0xff] %vm3119_vm6, %v3070_v4  ;;  %v3000_v46 = vadd.f32 %v5761_v36, %v2969_v7 }
 0x202   : > { %3135 = vst.msk [vmem:[%s5786_s17 + $0x78] sm:$0xff] %vm3119_vm6, %v3110_v42  ;;  %v2999_v16 = vadd.f32 %v5761_v36, %v2968_v22  ;;  %v2970_v45 = vadd.f32 %v2930_v3, %v5880_v62  ;;  %v2971_v17 = vadd.f32 %v2929_v35, %v5896_v50  ;;  %v2950_v12 = vsel %vm1298_vm3, %v2926_v30, %v2902_v24 }
 0x203   : > { %vm3024_vm13 = vcmp.gt.f32.partialorder %v3000_v46, 0.0  ;;  %v3048_v8 = vmul.f32 0.1, %v3000_v46  ;;  %v2974_v29 = vadd.f32 %v2950_v12, %v2686_v20  ;;  %v2927_v62 = vsel %vm1298_vm3, %v2925_v15, %v2926_v30 }
 0x204   : > { %vm3023_vm12 = vcmp.gt.f32.partialorder %v2999_v16, 0.0  ;;  %v3047_v9 = vmul.f32 0.1, %v2999_v16  ;;  %v3001_v38 = vadd.f32 %v5761_v36, %v2970_v45  ;;  %v3002_v61 = vadd.f32 %v5761_v36, %v2971_v17 }
 0x205   : > { %v3072_v50 = vsel %vm3024_vm13, %v3000_v46, %v3048_v8  ;;  %v2928_v57 = vsel %vm1298_vm3, %v2924_v21, %v2925_v15  ;;  %v2973_v56 = vadd.f32 %v2927_v62, %v2685_v34  ;;  %v3005_v19 = vadd.f32 %v5761_v36, %v2974_v29 }
 0x206   : > { %v3071_v10 = vsel %vm3023_vm12, %v2999_v16, %v3047_v9  ;;  %v3113_v39 = vsel %vm3080_vm4, %v3072_v50, 0.0  ;;  %vm3025_vm14 = vcmp.gt.f32.partialorder %v3001_v38, 0.0  ;;  %vm3026_vm15 = vcmp.gt.f32.partialorder %v3002_v61, 0.0 }
 0x207   : > { %v3112_v58 = vsel %vm3085_vm7, %v3071_v10, 0.0  ;;  %3138 = vst.msk [vmem:[%s5786_s17 + $0x90] sm:$0xff] %vm3119_vm6, %v3113_v39  ;;  %v3049_v63 = vmul.f32 0.1, %v3001_v38  ;;  %v3050_v48 = vmul.f32 0.1, %v3002_v61  ;;  %v2972_v43 = vadd.f32 %v2928_v57, %v5892_v27 }
 0x208   : > { %3137 = vst.msk [vmem:[%s5786_s17 + $0x88] sm:$0xff] %vm3119_vm6, %v3112_v58  ;;  %v3004_v20 = vadd.f32 %v5761_v36, %v2973_v56  ;;  %vm3029_vm3 = vcmp.gt.f32.partialorder %v3005_v19, 0.0  ;;  %v3053_v1 = vmul.f32 0.1, %v3005_v19 }
 0x209   : > { %v3073_v33 = vsel %vm3025_vm14, %v3001_v38, %v3049_v63  ;;  %v3074_v44 = vsel %vm3026_vm15, %v3002_v61, %v3050_v48  ;;  %v3003_v5 = vadd.f32 %v5761_v36, %v2972_v43 }
 0x20a   : > { %v3115_v32 = vsel %vm3085_vm7, %v3074_v44, 0.0  ;;  %3139 = vst.msk [vmem:[%s5786_s17 + $0x98] sm:$0xff] %vm3119_vm6, %v3073_v33  ;;  %vm3028_vm0 = vcmp.gt.f32.partialorder %v3004_v20, 0.0  ;;  %v3052_v59 = vmul.f32 0.1, %v3004_v20  ;;  %v3077_v27 = vsel %vm3029_vm3, %v3005_v19, %v3053_v1 }
 0x20b   : > { %3140 = vst.msk [vmem:[%s5786_s17 + $0xa0] sm:$0xff] %vm3119_vm6, %v3115_v32  ;;  %v3118_v0 = vsel %vm3085_vm7, %v3077_v27, 0.0  ;;  %vm3027_vm1 = vcmp.gt.f32.partialorder %v3003_v5, 0.0  ;;  %v3051_v18 = vmul.f32 0.1, %v3003_v5 }
 0x20c   : > { %v3076_v14 = vsel %vm3028_vm0, %v3004_v20, %v3052_v59  ;;  %3143 = vst.msk [vmem:[%s5786_s17 + $0xb8] sm:$0xff] %vm3119_vm6, %v3118_v0 }
 0x20d   : > { %3142 = vst.msk [vmem:[%s5786_s17 + $0xb0] sm:$0xff] %vm3119_vm6, %v3076_v14  ;;  %v3075_v6 = vsel %vm3027_vm1, %v3003_v5, %v3051_v18 }
 0x20e   : > { %v3116_v26 = vsel %vm3080_vm4, %v3075_v6, 0.0 }
 0x20f   : > { %3141 = vst.msk [vmem:[%s5786_s17 + $0xa8] sm:$0xff] %vm3119_vm6, %v3116_v26 }
 0x210 PF: > { %s15_s22 = sadd.s32 1, %s4415_s22   ;;  %s6008_s18 = smov %s4407_s20 }
 0x211   : > { %p12_p12 = scmp.ge.s32.totalorder %s15_s22, 6   ;;  %s6009_s19 = smov %s4411_s21 }
 0x212   : > { %s6010_s20 = smov %s6013_s23  ;;  %s6011_s21 = smov %s6017_s24 }
 0x213   :  { %14 = sbr.rel (!%p12_p12) target bundleno = 3 (0x3), region = 84 }

// kernel: multi_classification_forward.5
= control target key start
LH: loop header
LB: loop body
LE: loop exit
PB: predicated region body
PF: predicated region fallthrough
CT: control target
= control target key end

     0   :  { %s7379_s0 = inlined_call_operand.vmem [shape: f32[2,16,24,32], index: 0, kind: input, shape index: {}, may-alias: {0,1,2}]   ;;  %s7380_s1 = inlined_call_operand.vmem [shape: f32[2,16,24,32], index: 1, kind: input, shape index: {}, may-alias: {0,1,2}]   ;;  %s7381_s2 = inlined_call_operand.vmem [shape: f32[2,16,24,32], index: 2, kind: input, shape index: {}, may-alias: {0,1,2}]   ;;  %s7382_s3 = inlined_call_operand.vmem [shape: f32[9,32,32], index: 3, kind: input, shape index: {}]   ;;  %s7383_s4 = inlined_call_operand.vmem [shape: f32[1,32], index: 4, kind: input, shape index: {}]   ;;  %s7384_s5 = inlined_call_operand.vmem [shape: f32[32,32], index: 5, kind: input, shape index: {}]   ;;  %s7385_s6 = inlined_call_operand.vmem [shape: f32[1,32], index: 6, kind: input, shape index: {}]   ;;  %s7386_s7 = inlined_call_operand.vmem [shape: f32[1,32], index: 7, kind: input, shape index: {}]   ;;  %s7387_s8 = inlined_call_operand.<no memory space> [shape: f32[1,1], index: 8, kind: input, shape index: {}]   ;;  %s7388_s9 = inlined_call_operand.hbm [shape: f32[2,1,16,16], index: 9, kind: output, shape index: {}]  }
   0x1   :  { %7394 = sst [smem:[#allocation11_spill]] %s7379_s0  ;;  %v14_v0 = vstv %s7387_s8 }
   0x2   :  { %15 = vst [vmem:[#allocation2] sm:$0x1] %v14_v0 }
   0x3   :  { %16 = vsyncpa [#allocation4], 0 }
   0x4   :  { %18 = vsyncpa [#allocation4 + $0x1], 0  ;;  %s5562_s11 = smov 0   ;;  %s5564_s12 = smov 0  }
   0x5   :  { %s5566_s13 = smov 0   ;;  %s5568_s14 = smov 0  }
   0x6   :  { %s5570_s15 = smov 0   ;;  %s5572_s16 = smov 0  }
   0x7   :  { %s5574_s17 = smov 0   ;;  %s5576_s18 = smov 0  }
   0x8 LB: > { %7395 = sst [smem:[#allocation6_spill]] %s5485_s16  ;;  %s3904_s8 = sadd.s32 4294967295, %s5493_s18   ;;  %s5493_s18 = sphi %s5576_s18, %s24_s18   ;;  %s5489_s17 = sphi %s5574_s17, %s7412_s17   ;;  %s5485_s16 = sphi %s5572_s16, %s7411_s16   ;;  %s5481_s15 = sphi %s5570_s15, %s7410_s15   ;;  %s5477_s14 = sphi %s5568_s14, %s7409_s14   ;;  %s5473_s13 = sphi %s5566_s13, %s7415_s13   ;;  %s5469_s12 = sphi %s5564_s12, %s7414_s12   ;;  %s5465_s11 = sphi %s5562_s11, %s7413_s11  }
   0x9   : > { %7396 = sst [smem:[#allocation7_spill]] %s5489_s17  ;;  %s3905_s19 = sadd.s32 4294967294, %s5493_s18  }
   0xa   : > { %s33_s20 = sadd.s32 1, %s5485_s16  ;;  %s36_s21 = sadd.s32 1, %s5489_s17 }
   0xb   : > { %p34_p0 = scmp.ge.s32.totalorder %s33_s20, 2  ;;  %p281_p1 = scmp.ne.s32.totalorder %s5473_s13, %s5469_s12 }
   0xc   : > { %p282_p2 = scmp.eq.s32.totalorder %s3904_s8, 3  ;;  %p287_p5 = scmp.ne.s32.totalorder %s5469_s12, %s5465_s11 }
   0xd   : > { %s7417_s20 = smov (%p34_p0, %s33_s20), 0  ;;  %s7419_s21 = smov (!%p34_p0, %s36_s21), %s5489_s17 }
   0xe   : > { %7397 = sst [smem:[#allocation8_spill]] %s7417_s20  ;;  %s267_s22 = ssub.s32 %s5485_s16, %s7417_s20 }
   0xf   : > { %p5613_p3 = por %p282_p2, %p281_p1  ;;  %p38_p4 = scmp.ge.s32.totalorder %s7419_s21, 2 }
  0x10   : > { %p288_p6 = scmp.eq.s32.totalorder %s3905_s19, 3  ;;  %p3914_p7 = scmp.ge.s32.totalorder %s5493_s18, 1 }
  0x11   : > { %s7421_s21 = smov (%p38_p4, %s7419_s21), 0  ;;  %p378_p9 = scmp.lt.s32.totalorder %s5493_s18, 5 }
  0x12   : > { %7399 = sst [smem:[#allocation9_spill]] %s7421_s21  ;;  %p5622_p8 = por %p288_p6, %p287_p5 }
  0x13   : > { %s266_s25 = ssub.s32 %s5489_s17, %s7421_s21  ;;  %s271_s26 = sadd.s32 1, %s5473_s13 }
  0x14   : > { %s268_s27 = sor.u32 %s267_s22, %s266_s25  ;;  %p379_p10 = pnand %p3914_p7, %p378_p9 }
  0x15   : > { %p269_p11 = scmp.eq.s32.totalorder %s268_s27, 0  ;;  %v535_v1 = vld [vmem:[%s7382_s3] sm:$0xff] (!%p379_p10)  ;;  %v536_v2 = vld [vmem:[%s7382_s3 + $0x8] sm:$0xff] (!%p379_p10)  ;;  %v537_v3 = vld [vmem:[%s7382_s3 + $0x10] sm:$0xff] (!%p379_p10)  ;;  %s5643_s22 = sshll.u32 (!%p379_p10), %s5477_s14, 3  ;;  %vm539_vm0 = vcmask (!%p379_p10), 261120  }
  0x16   : > { %382 = sbr.rel (%p379_p10) target bundleno = 1324 (0x52c), region = 56  ;;  %p446_p12 = scmp.lt.s32.totalorder (!%p379_p10), %s5481_s15, 1  ;;  %v5152_v4 = vpack.c.bf16 (!%p379_p10), %v536_v2, %v535_v1  ;;  %v538_v5 = vld [vmem:[%s7382_s3 + $0x18] sm:$0xff] (!%p379_p10)  ;;  %v3995_v6 = vld [vmem:[%s7382_s3 + $0x40] sm:$0xff] (!%p379_p10)  ;;  %v3996_v8 = vld [vmem:[%s7382_s3 + $0x48] sm:$0xff] (!%p379_p10) }
  0x17   : > { %s5631_s28 = scalar_select %p269_p11, %s5473_s13, %s271_s26  }
  0x18   : > { %p448_p13 = scmp.lt.s32.totalorder (!%p379_p10), %s5643_s22, 15  ;;  %s5651_s27 = sadd.s32 (!%p379_p10), 4294967295, %s5643_s22  ;;  %v5156_v7 = vpack.c.bf16 (!%p379_p10), %v538_v5, %v537_v3  ;;  %v3961_v9 = vld [vmem:[%s7382_s3 + $0x20] sm:$0xff] (!%p379_p10)  ;;  %v3962_v10 = vld [vmem:[%s7382_s3 + $0x28] sm:$0xff] (!%p379_p10)  ;;  %5280 = vmatprep.subr.bf16.mxu1 (!%p379_p10), %v5152_v4  ;;  %5153 = vmatprep.subr.bf16.mxu0 (!%p379_p10), %v5152_v4  ;;  %v5168_v11 = vpack.c.bf16 (!%p379_p10), %v3996_v8, %v3995_v6  ;;  %v3963_v13 = vld [vmem:[%s7382_s3 + $0x30] sm:$0xff] (!%p379_p10) }
  0x19   : > { %7401 = sst [smem:[#allocation10_spill]] %s5631_s28  ;;  %5282 = vmatpush3.bf16.msra.mxu1 (!%p379_p10), %v5152_v4  ;;  %5155 = vmatpush3.bf16.msra.mxu0 (!%p379_p10), %v5152_v4  ;;  %p458_p0 = scmp.gt.s32.totalorder (!%p379_p10), %s5651_s27, 0  ;;  %v5160_v12 = vpack.c.bf16 (!%p379_p10), %v3962_v10, %v3961_v9  ;;  %v3964_v14 = vld [vmem:[%s7382_s3 + $0x38] sm:$0xff] (!%p379_p10)  ;;  %v4029_v19 = vld [vmem:[%s7382_s3 + $0x60] sm:$0xff] (!%p379_p10)  ;;  %v4030_v20 = vld [vmem:[%s7382_s3 + $0x68] sm:$0xff] (!%p379_p10) }
  0x1a   : > { %5281 = vmatprep.subr.bf16.mxu1 (!%p379_p10), %v5156_v7  ;;  %5157 = vmatprep.subr.bf16.mxu0 (!%p379_p10), %v5156_v7  ;;  %p3920_p1 = scmp.lt.s32.totalorder (!%p379_p10), %s5651_s27, 15  ;;  %p490_p2 = scmp.gt.s32.totalorder (!%p379_p10), %s5477_s14, 0  ;;  %v5164_v18 = vpack.c.bf16 (!%p379_p10), %v3964_v14, %v3963_v13  ;;  %v5723_v23 = vpack.c.bf16 (!%p379_p10), %v4030_v20, %v4029_v19  ;;  %v3997_v24 = vld [vmem:[%s7382_s3 + $0x50] sm:$0xff] (!%p379_p10)  ;;  %v3998_v25 = vld [vmem:[%s7382_s3 + $0x58] sm:$0xff] (!%p379_p10)  ;;  %v4063_v31 = vld [vmem:[%s7382_s3 + $0x80] sm:$0xff] (!%p379_p10) }
  0x1b   : > { %s7402_s0 = sld [smem:[#allocation11_spill]] (!%p379_p10)  ;;  %s500_s26 = sadd.s32 (!%p379_p10), 1, %s5477_s14  ;;  %v5172_v29 = vpack.c.bf16 (!%p379_p10), %v3998_v25, %v3997_v24  ;;  %v4064_v32 = vld [vmem:[%s7382_s3 + $0x88] sm:$0xff] (!%p379_p10)  ;;  %v4031_v46 = vld [vmem:[%s7382_s3 + $0x70] sm:$0xff] (!%p379_p10)  ;;  %v4032_v47 = vld [vmem:[%s7382_s3 + $0x78] sm:$0xff] (!%p379_p10) }
  0x1c   : > { %p5730_p5 = scmp.lt.s32.totalorder (!%p379_p10), %s500_s26, 2  ;;  %v5791_v38 = vpack.c.bf16 (!%p379_p10), %v4064_v32, %v4063_v31  ;;  %v5180_v50 = vpack.c.bf16 (!%p379_p10), %v4032_v47, %v4031_v46  ;;  %v4097_v51 = vld [vmem:[%s7382_s3 + $0xa0] sm:$0xff] (!%p379_p10)  ;;  %v4098_v52 = vld [vmem:[%s7382_s3 + $0xa8] sm:$0xff] (!%p379_p10)  ;;  %v4065_v61 = vld [vmem:[%s7382_s3 + $0x90] sm:$0xff] (!%p379_p10)  ;;  %s5500_s19 = smov (!%p379_p10), 56  }
  0x1d   : > { %s447_s21 = scalar_select %p446_p12, %s5481_s15, 1  ;;  %5283 = vmatpush3.bf16.msra.mxu1 %v5156_v7  ;;  %5159 = vmatpush3.bf16.msra.mxu0 %v5156_v7  ;;  %v5875_v55 = vpack.c.bf16 %v4098_v52, %v4097_v51  ;;  %v4066_v62 = vld [vmem:[%s7382_s3 + $0x98] sm:$0xff]  ;;  %v4131_v0 = vld [vmem:[%s7382_s3 + $0xc0] sm:$0xff]  ;;  %v4132_v1 = vld [vmem:[%s7382_s3 + $0xc8] sm:$0xff] }
  0x1e   : > { %s449_s29 = scalar_select %p448_p13, %s5643_s22, 15  ;;  %5169 = vmatprep.subr.bf16.mxu0 %v5168_v11  ;;  %5161 = vmatprep.subr.bf16.mxu1 %v5160_v12  ;;  %v5188_v63 = vpack.c.bf16 %v4066_v62, %v4065_v61  ;;  %v5944_v2 = vpack.c.bf16 %v4132_v1, %v4131_v0  ;;  %v4099_v3 = vld [vmem:[%s7382_s3 + $0xb0] sm:$0xff]  ;;  %v4100_v4 = vld [vmem:[%s7382_s3 + $0xb8] sm:$0xff]  ;;  %v4165_v6 = vld [vmem:[%s7382_s3 + $0xe0] sm:$0xff] }
  0x1f   : > { %s5667_s30 = smul.u32 48, %s447_s21  ;;  %v5196_v5 = vpack.c.bf16 %v4100_v4, %v4099_v3  ;;  %v4166_v7 = vld [vmem:[%s7382_s3 + $0xe8] sm:$0xff]  ;;  %v4133_v9 = vld [vmem:[%s7382_s3 + $0xd0] sm:$0xff]  ;;  %v4134_v10 = vld [vmem:[%s7382_s3 + $0xd8] sm:$0xff]  ;;  %s4285_s26 = sshll.u32 %s5481_s15, 1 }
  0x20   : > { %s5284_s20 = smul.u32 3, %s449_s29  ;;  %v6044_v8 = vpack.c.bf16 %v4166_v7, %v4165_v6  ;;  %v4200_v13 = vld [vmem:[%s7382_s3 + $0x108] sm:$0xff]  ;;  %v4168_v19 = vld [vmem:[%s7382_s3 + $0xf8] sm:$0xff] }
  0x21   : > { %s459_s10 = scalar_select %p458_p0, %s5651_s27, 0  ;;  %v4202_v24 = vld [vmem:[%s7382_s3 + $0x118] sm:$0xff] }
  0x22   : > { %s452_s8 = sadd.s32 %s5667_s30, %s5284_s20  ;;  %s7393_s20 = sadd.s32 8, %s5643_s22 }
  0x23   : > { %s3917_s17 = sshll.u32 %s452_s8, 3  ;;  %s7423_s10 = smov (!%p3920_p1, %s459_s10), 15 }
  0x24   : > { %s5683_s28 = scalar_lea.vmem %s7402_s0, %s3917_s17  ;;  %s5286_s25 = smul.u32 3, %s7423_s10 }
  0x25   : > { %v5687_v15 = vld [vmem:[%s5683_s28 + $0x78] sm:$0xff]  ;;  %v5690_v16 = vld [vmem:[%s5683_s28 + $0x80] sm:$0xff]  ;;  %v5695_v17 = vld [vmem:[%s5683_s28 + $0x88] sm:$0xff]  ;;  %p5709_p4 = scmp.lt.s32.totalorder %s7393_s20, 15  ;;  %s7405_s0 = sadd.s32 8, %s5643_s22 }
  0x26   : > { %4666 = vmatprep.mubr.msk.f32.mxu1 %vm539_vm0, %v5687_v15  ;;  %v5716_v21 = vld [vmem:[%s5683_s28 + $0x90] sm:$0xff]  ;;  %s466_s21 = sadd.s32 %s5286_s25, %s5667_s30  ;;  %v5721_v22 = vld [vmem:[%s5683_s28 + $0x98] sm:$0xff]  ;;  %v5745_v26 = vld [vmem:[%s5683_s28 + $0xa0] sm:$0xff]  ;;  %s5502_s25 = smov 32  }
  0x27   : > { %4667 = vmatmul.mubr.msk.f32.vlgmr.msra.gmra.mrb[0].mxu1 %vm539_vm0, %v5690_v16  ;;  %s3925_s10 = sshll.u32 %s466_s21, 3  ;;  %v5748_v27 = vld [vmem:[%s5683_s28 + $0xa8] sm:$0xff]  ;;  %s7425_s0 = smov (!%p5709_p4, %s7405_s0), 15  ;;  %v5776_v34 = vld [vmem:[%s5683_s28 + $0xb0] sm:$0xff]  ;;  %v5781_v35 = vld [vmem:[%s5683_s28] sm:$0xff] }
  0x28   : > { %4669 = vmatprep.mubr.msk.f32.mxu1 %vm539_vm0, %v5695_v17  ;;  %5163 = vmatpush3.bf16.msra.mxu1 %v5160_v12  ;;  %s468_s17 = scalar_lea.vmem %s7380_s1, %s3925_s10  ;;  %v5784_v36 = vld [vmem:[%s5683_s28 + $0xb8] sm:$0xff]  ;;  %s7427_s0 = smov (!%p5709_p4, %s7425_s0), 15  ;;  %v5789_v37 = vld [vmem:[%s5683_s28 + $0x8] sm:$0xff]  ;;  %v5804_v39 = vld [vmem:[%s5683_s28 + $0x10] sm:$0xff] }
  0x29   : > { %5165 = vmatprep.subr.bf16.mxu1 %v5164_v18  ;;  %s5374_s21 = scalar_select %p490_p2, 255, 0  ;;  %v5808_v40 = vld [vmem:[%s5683_s28 + $0x18] sm:$0xff]  ;;  %v5821_v42 = vld [vmem:[%s5683_s28 + $0x20] sm:$0xff]  ;;  %v5826_v43 = vld [vmem:[%s5683_s28 + $0x28] sm:$0xff] }
  0x2a   : > { %s5287_s22 = smul.u32 3, %s7427_s0  ;;  %v5845_v48 = vld [vmem:[%s5683_s28 + $0x30] sm:$0xff]  ;;  %v5850_v49 = vld [vmem:[%s5683_s28 + $0x38] sm:$0xff]  ;;  %v5865_v53 = vld [vmem:[%s5683_s28 + $0x40] sm:$0xff]  ;;  %s5507_s8 = smov 127  }
  0x2b   : > { %4670 = vmatmul.mubr.msk.f32.gmra.mrb[2].mxu1 %vm539_vm0, %v5716_v21  ;;  %v5751_v28 = vld [vmem:[%s468_s17] sm:%s5374_s21]  ;;  %v5755_v30 = vld [vmem:[%s468_s17 + $0x8] sm:%s5374_s21]  ;;  %s5383_s27 = scalar_select %p5730_p5, 255, 0 }
  0x2c   : > { %4672 = vmatprep.mubr.msk.f32.mxu1 %vm539_vm0, %v5721_v22  ;;  %5167 = vmatpush3.bf16.msra.mxu1 %v5164_v18  ;;  %v5771_v33 = vld [vmem:[%s468_s17 + $0x10] sm:%s5374_s21]  ;;  %s483_s16 = sadd.s32 %s5287_s22, %s5667_s30  ;;  %v5870_v54 = vld [vmem:[%s5683_s28 + $0x48] sm:$0xff]  ;;  %v5887_v57 = vld [vmem:[%s5683_s28 + $0x58] sm:$0xff]  ;;  %s5504_s30 = smov 88  }
  0x2d   : > { %5177 = vmatprep.subr.bf16.mxu1 %v5723_v23  ;;  %4639 = vmatprep.mubr.msk.f32.mxu0 %vm539_vm0, %v5751_v28  ;;  %s3930_s17 = sshll.u32 %s483_s16, 3  ;;  %v5882_v56 = vld [vmem:[%s5683_s28 + $0x50] sm:$0xff]  ;;  %v5897_v58 = vld [vmem:[%s5683_s28 + $0x60] sm:$0xff]  ;;  %v5902_v59 = vld [vmem:[%s5683_s28 + $0x68] sm:$0xff]  ;;  %s5498_s16 = smov 104  }
  0x2e   : > { %4640 = vmatmul.mubr.msk.f32.vlgmr.msra.gmra.mrb[0].mxu0 %vm539_vm0, %v5755_v30  ;;  %s485_s21 = scalar_lea.vmem %s7381_s2, %s3930_s17  ;;  %v5911_v60 = vld [vmem:[%s5683_s28 + $0x70] sm:$0xff]  ;;  %v4199_v12 = vld [vmem:[%s7382_s3 + $0x100] sm:$0xff]  ;;  %s5499_s17 = smov 8  }
  0x2f   : > { %4673 = vmatmul.mubr.msk.f32.gmra.mrb[4].mxu1 %vm539_vm0, %v5745_v26  ;;  %5171 = vmatpush3.bf16.msra.mxu0 %v5168_v11  ;;  %v5816_v41 = vld [vmem:[%s485_s21] sm:%s5383_s27]  ;;  %v5828_v44 = vld [vmem:[%s485_s21 + $0x8] sm:%s5383_s27]  ;;  %v5204_v11 = vpack.c.bf16 %v4134_v10, %v4133_v9  ;;  %v6096_v14 = vpack.c.bf16 %v4200_v13, %v4199_v12  ;;  %s5501_s28 = smov 80   ;;  %s442_s0 = sand.u32 1, %s5469_s12  }
  0x30   : > { %4675 = vmatprep.mubr.msk.f32.mxu1 %vm539_vm0, %v5748_v27  ;;  %4642 = vmatprep.mubr.msk.f32.mxu0 %vm539_vm0, %v5771_v33  ;;  %v5832_v45 = vld [vmem:[%s485_s21 + $0x10] sm:%s5383_s27]  ;;  %s5503_s21 = smov 112   ;;  %s3915_s20 = sshll.u32 %s442_s0, 3 }
  0x31   : > { %5173 = vmatprep.subr.bf16.mxu0 %v5172_v29  ;;  %v4167_v18 = vld [vmem:[%s7382_s3 + $0xf0] sm:$0xff]  ;;  %s3777_s10 = sadd.s32 %s5477_s14, %s4285_s26  ;;  %s444_s22 = scalar_lea.vmem [#allocation3], %s3915_s20 }
  0x32   : > { %4643 = vmatmul.mubr.msk.f32.gmra.mrb[2].mxu0 %vm539_vm0, %v5781_v35  ;;  %v5212_v20 = vpack.c.bf16 %v4168_v19, %v4167_v18  ;;  %s4286_s29 = sshll.u32 %s3777_s10, 7  ;;  %s3781_s27 = sshll.u32 %s444_s22, 4  ;;  %s7328_s27 = int_to_ptr.vmem [resolvable:$true] %s3781_s27 }
  0x33   : > { %4676 = vmatmul.mubr.msk.f32.gmra.mrb[6].mxu1 %vm539_vm0, %v5776_v34  ;;  %4645 = vmatprep.mubr.msk.f32.mxu0 %vm539_vm0, %v5789_v37  ;;  %s5508_s14 = smov [#allocation3]  }
  0x34   : > { %4678 = vmatprep.mubr.msk.f32.mxu1 %vm539_vm0, %v5784_v36  ;;  %5175 = vmatpush3.bf16.msra.mxu0 %v5172_v29  ;;  %v865_v29 = vlaneseq  ;;  %s5403_s15 = sshll.u32 %s5508_s14, 4  ;;  %s5404_s15 = int_to_ptr.vmem [resolvable:$false] %s5403_s15 }
  0x35   : > { %5185 = vmatprep.subr.bf16.mxu0 %v5791_v38  ;;  %p5406_p10 = scmp.lt.s32.totalorder %s7328_s27, %s5404_s15 }
  0x36   : > { %4646 = vmatmul.mubr.msk.f32.gmra.mrb[4].mxu0 %vm539_vm0, %v5804_v39  ;;  %v6319_v31 = vshrl.u32 %v865_v29, 7 }
  0x37   : > { %4648 = vmatprep.mubr.msk.f32.mxu0 %vm539_vm0, %v5808_v40  ;;  %4679 = vmatmul.mubr.msk.f32.gmra.mrb[8].mxu1 %vm539_vm0, %v5816_v41 }
  0x38   : > { %4681 = vmatprep.mubr.msk.f32.mxu1 %vm539_vm0, %v5828_v44  ;;  %vm867_vm1 = vcmp.lt.s32.totalorder %v6319_v31, 1  ;;  %vm1394_vm2 = vcmp.lt.s32.totalorder %v6319_v31, 7 }
  0x3a   : > { %4649 = vmatmul.mubr.msk.f32.gmra.mrb[6].mxu0 %vm539_vm0, %v5821_v42 }
  0x3b   : > { %4651 = vmatprep.mubr.msk.f32.mxu0 %vm539_vm0, %v5826_v43  ;;  %4682 = vmatmul.mubr.msk.f32.gmra.mrb[10].mxu1 %vm539_vm0, %v5832_v45 }
  0x3c   : > { %4692 = vmatprep.mubr.msk.f32.mxu1 %vm539_vm0, %v5751_v28 }
  0x3e   : > { %4652 = vmatmul.mubr.msk.f32.gmra.mrb[8].mxu0 %vm539_vm0, %v5845_v48 }
  0x3f   : > { %4654 = vmatprep.mubr.msk.f32.mxu0 %vm539_vm0, %v5850_v49  ;;  %4693 = vmatmul.mubr.msk.f32.vlgmr.msra.gmra.mrb[12].mxu1 %vm539_vm0, %v5755_v30 }
  0x40   : > { %4695 = vmatprep.mubr.msk.f32.mxu1 %vm539_vm0, %v5771_v33  ;;  %5179 = vmatpush3.bf16.msra.mxu1 %v5723_v23  ;;  %v4201_v23 = vld [vmem:[%s7382_s3 + $0x110] sm:$0xff] }
  0x41   : > { %5181 = vmatprep.subr.bf16.mxu1 %v5180_v50  ;;  %v5220_v25 = vpack.c.bf16 %v4202_v24, %v4201_v23 }
  0x42   : > { %4655 = vmatmul.mubr.msk.f32.gmra.mrb[10].mxu0 %vm539_vm0, %v5865_v53 }
  0x43   : > { %4657 = vmatprep.mubr.msk.f32.mxu0 %vm539_vm0, %v5870_v54  ;;  %4696 = vmatmul.mubr.msk.f32.gmra.mrb[14].mxu1 %vm539_vm0, %v5781_v35 }
  0x44   : > { %4698 = vmatprep.mubr.msk.f32.mxu1 %vm539_vm0, %v5789_v37  ;;  %5183 = vmatpush3.bf16.msra.mxu1 %v5180_v50 }
  0x45   : > { %5193 = vmatprep.subr.bf16.mxu1 %v5875_v55 }
  0x46   : > { %4658 = vmatmul.mubr.msk.f32.gmra.mrb[12].mxu0 %vm539_vm0, %v5882_v56 }
  0x47   : > { %4660 = vmatprep.mubr.msk.f32.mxu0 %vm539_vm0, %v5887_v57  ;;  %4699 = vmatmul.mubr.msk.f32.gmra.mrb[16].mxu1 %vm539_vm0, %v5804_v39 }
  0x48   : > { %4701 = vmatprep.mubr.msk.f32.mxu1 %vm539_vm0, %v5808_v40 }
  0x4a   : > { %4661 = vmatmul.mubr.msk.f32.gmra.mrb[14].mxu0 %vm539_vm0, %v5897_v58 }
  0x4b   : > { %4663 = vmatprep.mubr.msk.f32.mxu0 %vm539_vm0, %v5902_v59  ;;  %4702 = vmatmul.mubr.msk.f32.gmra.mrb[18].mxu1 %vm539_vm0, %v5821_v42 }
  0x4c   : > { %4704 = vmatprep.mubr.msk.f32.mxu1 %vm539_vm0, %v5826_v43 }
  0x4e   : > { %4664 = vmatmul.mubr.msk.f32.gmra.mrb[16].mxu0 %vm539_vm0, %v5911_v60 }
  0x4f   : > { %4745 = vmatprep.mubr.msk.f32.mxu0 %vm539_vm0, %v5751_v28  ;;  %4705 = vmatmul.mubr.msk.f32.gmra.mrb[20].mxu1 %vm539_vm0, %v5845_v48 }
  0x50   : > { %4707 = vmatprep.mubr.msk.f32.mxu1 %vm539_vm0, %v5850_v49 }
  0x52   : > { %4746 = vmatmul.mubr.msk.f32.vlgmr.msra.gmra.mrb[18].mxu0 %vm539_vm0, %v5755_v30 }
  0x53   : > { %5187 = vmatpush3.bf16.msra.mxu0 %v5791_v38  ;;  %4748 = vmatprep.mubr.msk.f32.mxu0 %vm539_vm0, %v5771_v33 }
  0x54   : > { %4708 = vmatmul.mubr.msk.f32.gmra.mrb[22].mxu1 %vm539_vm0, %v5865_v53  ;;  %5189 = vmatprep.subr.bf16.mxu0 %v5188_v63 }
  0x55   : > { %4710 = vmatprep.mubr.msk.f32.mxu1 %vm539_vm0, %v5870_v54 }
  0x56   : > { %4749 = vmatmul.mubr.msk.f32.gmra.mrb[20].mxu0 %vm539_vm0, %v5781_v35 }
  0x57   : > { %4751 = vmatprep.mubr.msk.f32.mxu0 %vm539_vm0, %v5789_v37  ;;  %5191 = vmatpush3.bf16.msra.mxu0 %v5188_v63 }
  0x58   : > { %4711 = vmatmul.mubr.msk.f32.gmra.mrb[24].mxu1 %vm539_vm0, %v5882_v56  ;;  %5201 = vmatprep.subr.bf16.mxu0 %v5944_v2 }
  0x59   : > { %4713 = vmatprep.mubr.msk.f32.mxu1 %vm539_vm0, %v5887_v57 }
  0x5a   : > { %4752 = vmatmul.mubr.msk.f32.gmra.mrb[22].mxu0 %vm539_vm0, %v5804_v39 }
  0x5b   : > { %4754 = vmatprep.mubr.msk.f32.mxu0 %vm539_vm0, %v5808_v40 }
  0x5c   : > { %4714 = vmatmul.mubr.msk.f32.gmra.mrb[26].mxu1 %vm539_vm0, %v5897_v58 }
  0x5d   : > { %4716 = vmatprep.mubr.msk.f32.mxu1 %vm539_vm0, %v5902_v59 }
  0x5e   : > { %4755 = vmatmul.mubr.msk.f32.gmra.mrb[24].mxu0 %vm539_vm0, %v5821_v42 }
  0x5f   : > { %4757 = vmatprep.mubr.msk.f32.mxu0 %vm539_vm0, %v5826_v43 }
  0x60   : > { %4717 = vmatmul.mubr.msk.f32.gmra.mrb[28].mxu1 %vm539_vm0, %v5911_v60 }
  0x61   : > { %4719 = vmatprep.mubr.msk.f32.mxu1 %vm539_vm0, %v5687_v15 }
  0x62   : > { %4758 = vmatmul.mubr.msk.f32.gmra.mrb[26].mxu0 %vm539_vm0, %v5845_v48 }
  0x63   : > { %4760 = vmatprep.mubr.msk.f32.mxu0 %vm539_vm0, %v5850_v49 }
  0x64   : > { %4720 = vmatmul.mubr.msk.f32.gmra.mrb[30].mxu1 %vm539_vm0, %v5690_v16 }
  0x65   : > { %4722 = vmatprep.mubr.msk.f32.mxu1 %vm539_vm0, %v5695_v17 }
  0x66   : > { %4761 = vmatmul.mubr.msk.f32.gmra.mrb[28].mxu0 %vm539_vm0, %v5865_v53 }
  0x67   : > { %4763 = vmatprep.mubr.msk.f32.mxu0 %vm539_vm0, %v5870_v54 }
  0x68   : > { %4723 = vmatmul.mubr.msk.f32.gmra.mrb[32].mxu1 %vm539_vm0, %v5716_v21 }
  0x69   : > { %4725 = vmatprep.mubr.msk.f32.mxu1 %vm539_vm0, %v5721_v22 }
  0x6a   : > { %4764 = vmatmul.mubr.msk.f32.gmra.mrb[30].mxu0 %vm539_vm0, %v5882_v56 }
  0x6b   : > { %4766 = vmatprep.mubr.msk.f32.mxu0 %vm539_vm0, %v5887_v57 }
  0x6c   : > { %4726 = vmatmul.mubr.msk.f32.gmra.mrb[34].mxu1 %vm539_vm0, %v5745_v26 }
  0x6d   : > { %4728 = vmatprep.mubr.msk.f32.mxu1 %vm539_vm0, %v5748_v27 }
  0x6e   : > { %4767 = vmatmul.mubr.msk.f32.gmra.mrb[32].mxu0 %vm539_vm0, %v5897_v58 }
  0x6f   : > { %4769 = vmatprep.mubr.msk.f32.mxu0 %vm539_vm0, %v5902_v59 }
  0x70   : > { %4729 = vmatmul.mubr.msk.f32.gmra.mrb[36].mxu1 %vm539_vm0, %v5776_v34 }
  0x71   : > { %4731 = vmatprep.mubr.msk.f32.mxu1 %vm539_vm0, %v5784_v36 }
  0x72   : > { %4770 = vmatmul.mubr.msk.f32.gmra.mrb[34].mxu0 %vm539_vm0, %v5911_v60 }
  0x73   : > { %4772 = vmatprep.mubr.msk.f32.mxu0 %vm539_vm0, %v5687_v15 }
  0x74   : > { %4732 = vmatmul.mubr.msk.f32.gmra.mrb[38].mxu1 %vm539_vm0, %v5816_v41 }
  0x75   : > { %4734 = vmatprep.mubr.msk.f32.mxu1 %vm539_vm0, %v5828_v44 }
  0x76   : > { %4773 = vmatmul.mubr.msk.f32.gmra.mrb[36].mxu0 %vm539_vm0, %v5690_v16 }
  0x77   : > { %4775 = vmatprep.mubr.msk.f32.mxu0 %vm539_vm0, %v5695_v17 }
  0x78   : > { %4735 = vmatmul.mubr.msk.f32.gmra.mrb[40].mxu1 %vm539_vm0, %v5832_v45 }
  0x79   : > { %4798 = vmatprep.mubr.msk.f32.mxu1 %vm539_vm0, %v5751_v28 }
  0x7a   : > { %4776 = vmatmul.mubr.msk.f32.gmra.mrb[38].mxu0 %vm539_vm0, %v5716_v21 }
  0x7b   : > { %4778 = vmatprep.mubr.msk.f32.mxu0 %vm539_vm0, %v5721_v22 }
  0x7c   : > { %4799 = vmatmul.mubr.msk.f32.vlgmr.msra.gmra.mrb[42].mxu1 %vm539_vm0, %v5755_v30 }
  0x7d   : > { %4801 = vmatprep.mubr.msk.f32.mxu1 %vm539_vm0, %v5771_v33  ;;  %5195 = vmatpush3.bf16.msra.mxu1 %v5875_v55 }
  0x7e   : > { %4779 = vmatmul.mubr.msk.f32.gmra.mrb[40].mxu0 %vm539_vm0, %v5745_v26  ;;  %5197 = vmatprep.subr.bf16.mxu1 %v5196_v5 }
  0x7f   : > { %4781 = vmatprep.mubr.msk.f32.mxu0 %vm539_vm0, %v5748_v27 }
  0x80   : > { %4802 = vmatmul.mubr.msk.f32.gmra.mrb[44].mxu1 %vm539_vm0, %v5781_v35 }
  0x81   : > { %4804 = vmatprep.mubr.msk.f32.mxu1 %vm539_vm0, %v5789_v37  ;;  %5199 = vmatpush3.bf16.msra.mxu1 %v5196_v5 }
  0x82   : > { %4782 = vmatmul.mubr.msk.f32.gmra.mrb[42].mxu0 %vm539_vm0, %v5776_v34  ;;  %5209 = vmatprep.subr.bf16.mxu1 %v6044_v8 }
  0x83   : > { %4784 = vmatprep.mubr.msk.f32.mxu0 %vm539_vm0, %v5784_v36 }
  0x84   : > { %4805 = vmatmul.mubr.msk.f32.gmra.mrb[46].mxu1 %vm539_vm0, %v5804_v39 }
  0x85   : > { %4807 = vmatprep.mubr.msk.f32.mxu1 %vm539_vm0, %v5808_v40 }
  0x86   : > { %4785 = vmatmul.mubr.msk.f32.gmra.mrb[44].mxu0 %vm539_vm0, %v5816_v41 }
  0x87   : > { %4787 = vmatprep.mubr.msk.f32.mxu0 %vm539_vm0, %v5828_v44 }
  0x88   : > { %4808 = vmatmul.mubr.msk.f32.gmra.mrb[48].mxu1 %vm539_vm0, %v5821_v42 }
  0x89   : > { %4810 = vmatprep.mubr.msk.f32.mxu1 %vm539_vm0, %v5826_v43 }
  0x8a   : > { %4788 = vmatmul.mubr.msk.f32.gmra.mrb[46].mxu0 %vm539_vm0, %v5832_v45 }
  0x8b   : > { %4851 = vmatprep.mubr.msk.f32.mxu0 %vm539_vm0, %v5751_v28 }
  0x8c   : > { %4811 = vmatmul.mubr.msk.f32.gmra.mrb[50].mxu1 %vm539_vm0, %v5845_v48 }
  0x8d   : > { %4813 = vmatprep.mubr.msk.f32.mxu1 %vm539_vm0, %v5850_v49 }
  0x8e   : > { %4852 = vmatmul.mubr.msk.f32.vlgmr.msra.gmra.mrb[48].mxu0 %vm539_vm0, %v5755_v30 }
  0x8f   : > { %5203 = vmatpush3.bf16.msra.mxu0 %v5944_v2  ;;  %4854 = vmatprep.mubr.msk.f32.mxu0 %vm539_vm0, %v5771_v33 }
  0x90   : > { %4814 = vmatmul.mubr.msk.f32.gmra.mrb[52].mxu1 %vm539_vm0, %v5865_v53  ;;  %5205 = vmatprep.subr.bf16.mxu0 %v5204_v11 }
  0x91   : > { %4816 = vmatprep.mubr.msk.f32.mxu1 %vm539_vm0, %v5870_v54 }
  0x92   : > { %4855 = vmatmul.mubr.msk.f32.gmra.mrb[50].mxu0 %vm539_vm0, %v5781_v35 }
  0x93   : > { %4857 = vmatprep.mubr.msk.f32.mxu0 %vm539_vm0, %v5789_v37  ;;  %5207 = vmatpush3.bf16.msra.mxu0 %v5204_v11 }
  0x94   : > { %4817 = vmatmul.mubr.msk.f32.gmra.mrb[54].mxu1 %vm539_vm0, %v5882_v56  ;;  %5217 = vmatprep.subr.bf16.mxu0 %v6096_v14 }
  0x95   : > { %4819 = vmatprep.mubr.msk.f32.mxu1 %vm539_vm0, %v5887_v57 }
  0x96   : > { %4858 = vmatmul.mubr.msk.f32.gmra.mrb[52].mxu0 %vm539_vm0, %v5804_v39 }
  0x97   : > { %4860 = vmatprep.mubr.msk.f32.mxu0 %vm539_vm0, %v5808_v40 }
  0x98   : > { %4820 = vmatmul.mubr.msk.f32.gmra.mrb[56].mxu1 %vm539_vm0, %v5897_v58 }
  0x99   : > { %4822 = vmatprep.mubr.msk.f32.mxu1 %vm539_vm0, %v5902_v59 }
  0x9a   : > { %4861 = vmatmul.mubr.msk.f32.gmra.mrb[54].mxu0 %vm539_vm0, %v5821_v42 }
  0x9b   : > { %4863 = vmatprep.mubr.msk.f32.mxu0 %vm539_vm0, %v5826_v43 }
  0x9c   : > { %4823 = vmatmul.mubr.msk.f32.gmra.mrb[58].mxu1 %vm539_vm0, %v5911_v60 }
  0x9d   : > { %4825 = vmatprep.mubr.msk.f32.mxu1 %vm539_vm0, %v5687_v15 }
  0x9e   : > { %4864 = vmatmul.mubr.msk.f32.gmra.mrb[56].mxu0 %vm539_vm0, %v5845_v48 }
  0x9f   : > { %4866 = vmatprep.mubr.msk.f32.mxu0 %vm539_vm0, %v5850_v49 }
  0xa0   : > { %4826 = vmatmul.mubr.msk.f32.gmra.mrb[60].mxu1 %vm539_vm0, %v5690_v16 }
  0xa1   : > { %4828 = vmatprep.mubr.msk.f32.mxu1 %vm539_vm0, %v5695_v17 }
  0xa2   : > { %4867 = vmatmul.mubr.msk.f32.gmra.mrb[58].mxu0 %vm539_vm0, %v5865_v53 }
  0xa3   : > { %4869 = vmatprep.mubr.msk.f32.mxu0 %vm539_vm0, %v5870_v54 }
  0xa4   : > { %4829 = vmatmul.mubr.msk.f32.gmra.mrb[62].mxu1 %vm539_vm0, %v5716_v21 }
  0xa5   : > { %4831 = vmatprep.mubr.msk.f32.mxu1 %vm539_vm0, %v5721_v22 }
  0xa6   : > { %4870 = vmatmul.mubr.msk.f32.gmra.mrb[60].mxu0 %vm539_vm0, %v5882_v56 }
  0xa7   : > { %4872 = vmatprep.mubr.msk.f32.mxu0 %vm539_vm0, %v5887_v57 }
  0xa8   : > { %4832 = vmatmul.mubr.msk.f32.gmra.mrb[64].mxu1 %vm539_vm0, %v5745_v26 }
  0xa9   : > { %4834 = vmatprep.mubr.msk.f32.mxu1 %vm539_vm0, %v5748_v27 }
  0xaa   : > { %4873 = vmatmul.mubr.msk.f32.gmra.mrb[62].mxu0 %vm539_vm0, %v5897_v58 }
  0xab   : > { %4875 = vmatprep.mubr.msk.f32.mxu0 %vm539_vm0, %v5902_v59 }
  0xac   : > { %4835 = vmatmul.mubr.msk.f32.gmra.mrb[66].mxu1 %vm539_vm0, %v5776_v34 }
  0xad   : > { %4837 = vmatprep.mubr.msk.f32.mxu1 %vm539_vm0, %v5784_v36 }
  0xae   : > { %4876 = vmatmul.mubr.msk.f32.gmra.mrb[64].mxu0 %vm539_vm0, %v5911_v60 }
  0xaf   : > { %4878 = vmatprep.mubr.msk.f32.mxu0 %vm539_vm0, %v5687_v15 }
  0xb0   : > { %4838 = vmatmul.mubr.msk.f32.gmra.mrb[68].mxu1 %vm539_vm0, %v5816_v41 }
  0xb1   : > { %4840 = vmatprep.mubr.msk.f32.mxu1 %vm539_vm0, %v5828_v44 }
  0xb2   : > { %4879 = vmatmul.mubr.msk.f32.gmra.mrb[66].mxu0 %vm539_vm0, %v5690_v16 }
  0xb3   : > { %4881 = vmatprep.mubr.msk.f32.mxu0 %vm539_vm0, %v5695_v17 }
  0xb4   : > { %4841 = vmatmul.mubr.msk.f32.gmra.mrb[70].mxu1 %vm539_vm0, %v5832_v45 }
  0xb5   : > { %4904 = vmatprep.mubr.msk.f32.mxu1 %vm539_vm0, %v5751_v28 }
  0xb6   : > { %4882 = vmatmul.mubr.msk.f32.gmra.mrb[68].mxu0 %vm539_vm0, %v5716_v21 }
  0xb7   : > { %4884 = vmatprep.mubr.msk.f32.mxu0 %vm539_vm0, %v5721_v22 }
  0xb8   : > { %4905 = vmatmul.mubr.msk.f32.vlgmr.msra.gmra.mrb[72].mxu1 %vm539_vm0, %v5755_v30 }
  0xb9   : > { %4907 = vmatprep.mubr.msk.f32.mxu1 %vm539_vm0, %v5771_v33  ;;  %5211 = vmatpush3.bf16.msra.mxu1 %v6044_v8 }
  0xba   : > { %4885 = vmatmul.mubr.msk.f32.gmra.mrb[70].mxu0 %vm539_vm0, %v5745_v26  ;;  %5213 = vmatprep.subr.bf16.mxu1 %v5212_v20 }
  0xbb   : > { %4887 = vmatprep.mubr.msk.f32.mxu0 %vm539_vm0, %v5748_v27 }
  0xbc   : > { %4908 = vmatmul.mubr.msk.f32.gmra.mrb[74].mxu1 %vm539_vm0, %v5781_v35 }
  0xbd   : > { %4910 = vmatprep.mubr.msk.f32.mxu1 %vm539_vm0, %v5789_v37  ;;  %5215 = vmatpush3.bf16.msra.mxu1 %v5212_v20 }
  0xbe   : > { %4888 = vmatmul.mubr.msk.f32.gmra.mrb[72].mxu0 %vm539_vm0, %v5776_v34 }
  0xbf   : > { %4890 = vmatprep.mubr.msk.f32.mxu0 %vm539_vm0, %v5784_v36 }
  0xc0   : > { %4911 = vmatmul.mubr.msk.f32.gmra.mrb[76].mxu1 %vm539_vm0, %v5804_v39 }
  0xc1   : > { %4913 = vmatprep.mubr.msk.f32.mxu1 %vm539_vm0, %v5808_v40 }
  0xc2   : > { %4891 = vmatmul.mubr.msk.f32.gmra.mrb[74].mxu0 %vm539_vm0, %v5816_v41 }
  0xc3   : > { %4893 = vmatprep.mubr.msk.f32.mxu0 %vm539_vm0, %v5828_v44 }
  0xc4   : > { %4914 = vmatmul.mubr.msk.f32.gmra.mrb[78].mxu1 %vm539_vm0, %v5821_v42 }
  0xc5   : > { %4916 = vmatprep.mubr.msk.f32.mxu1 %vm539_vm0, %v5826_v43 }
  0xc6   : > { %4894 = vmatmul.mubr.msk.f32.gmra.mrb[76].mxu0 %vm539_vm0, %v5832_v45 }
  0xc7   : > { %4957 = vmatprep.mubr.msk.f32.mxu0 %vm539_vm0, %v5751_v28 }
  0xc8   : > { %4917 = vmatmul.mubr.msk.f32.gmra.mrb[80].mxu1 %vm539_vm0, %v5845_v48 }
  0xc9   : > { %4919 = vmatprep.mubr.msk.f32.mxu1 %vm539_vm0, %v5850_v49 }
  0xca   : > { %4958 = vmatmul.mubr.msk.f32.vlgmr.msra.gmra.mrb[78].mxu0 %vm539_vm0, %v5755_v30 }
  0xcb   : > { %5219 = vmatpush3.bf16.msra.mxu0 %v6096_v14  ;;  %4960 = vmatprep.mubr.msk.f32.mxu0 %vm539_vm0, %v5771_v33 }
  0xcc   : > { %4920 = vmatmul.mubr.msk.f32.gmra.mrb[82].mxu1 %vm539_vm0, %v5865_v53  ;;  %5221 = vmatprep.subr.bf16.mxu0 %v5220_v25 }
  0xcd   : > { %4922 = vmatprep.mubr.msk.f32.mxu1 %vm539_vm0, %v5870_v54 }
  0xce   : > { %4961 = vmatmul.mubr.msk.f32.gmra.mrb[80].mxu0 %vm539_vm0, %v5781_v35 }
  0xcf   : > { %4963 = vmatprep.mubr.msk.f32.mxu0 %vm539_vm0, %v5789_v37  ;;  %5223 = vmatpush3.bf16.msra.mxu0 %v5220_v25 }
  0xd0   : > { %4923 = vmatmul.mubr.msk.f32.gmra.mrb[84].mxu1 %vm539_vm0, %v5882_v56 }
  0xd1   : > { %4925 = vmatprep.mubr.msk.f32.mxu1 %vm539_vm0, %v5887_v57 }
  0xd2   : > { %4964 = vmatmul.mubr.msk.f32.gmra.mrb[82].mxu0 %vm539_vm0, %v5804_v39 }
  0xd3   : > { %4966 = vmatprep.mubr.msk.f32.mxu0 %vm539_vm0, %v5808_v40 }
  0xd4   : > { %4926 = vmatmul.mubr.msk.f32.gmra.mrb[86].mxu1 %vm539_vm0, %v5897_v58 }
  0xd5   : > { %4928 = vmatprep.mubr.msk.f32.mxu1 %vm539_vm0, %v5902_v59 }
  0xd6   : > { %4967 = vmatmul.mubr.msk.f32.gmra.mrb[84].mxu0 %vm539_vm0, %v5821_v42 }
  0xd7   : > { %4969 = vmatprep.mubr.msk.f32.mxu0 %vm539_vm0, %v5826_v43 }
  0xd8   : > { %4929 = vmatmul.mubr.msk.f32.gmra.mrb[88].mxu1 %vm539_vm0, %v5911_v60 }
  0xd9   : > { %4931 = vmatprep.mubr.msk.f32.mxu1 %vm539_vm0, %v5687_v15 }
  0xda   : > { %4970 = vmatmul.mubr.msk.f32.gmra.mrb[86].mxu0 %vm539_vm0, %v5845_v48 }
  0xdb   : > { %4972 = vmatprep.mubr.msk.f32.mxu0 %vm539_vm0, %v5850_v49 }
  0xdc   : > { %4932 = vmatmul.mubr.msk.f32.gmra.mrb[90].mxu1 %vm539_vm0, %v5690_v16 }
  0xdd   : > { %4934 = vmatprep.mubr.msk.f32.mxu1 %vm539_vm0, %v5695_v17 }
  0xde   : > { %4973 = vmatmul.mubr.msk.f32.gmra.mrb[88].mxu0 %vm539_vm0, %v5865_v53 }
  0xdf   : > { %4975 = vmatprep.mubr.msk.f32.mxu0 %vm539_vm0, %v5870_v54 }
  0xe0   : > { %4935 = vmatmul.mubr.msk.f32.gmra.mrb[92].mxu1 %vm539_vm0, %v5716_v21 }
  0xe1   : > { %4937 = vmatprep.mubr.msk.f32.mxu1 %vm539_vm0, %v5721_v22 }
  0xe2   : > { %4976 = vmatmul.mubr.msk.f32.gmra.mrb[90].mxu0 %vm539_vm0, %v5882_v56 }
  0xe3   : > { %4978 = vmatprep.mubr.msk.f32.mxu0 %vm539_vm0, %v5887_v57 }
  0xe4   : > { %4938 = vmatmul.mubr.msk.f32.gmra.mrb[94].mxu1 %vm539_vm0, %v5745_v26 }
  0xe5   : > { %4940 = vmatprep.mubr.msk.f32.mxu1 %vm539_vm0, %v5748_v27 }
  0xe6   : > { %4979 = vmatmul.mubr.msk.f32.gmra.mrb[92].mxu0 %vm539_vm0, %v5897_v58 }
  0xe7   : > { %4981 = vmatprep.mubr.msk.f32.mxu0 %vm539_vm0, %v5902_v59 }
  0xe8   : > { %4941 = vmatmul.mubr.msk.f32.gmra.mrb[96].mxu1 %vm539_vm0, %v5776_v34 }
  0xe9   : > { %4943 = vmatprep.mubr.msk.f32.mxu1 %vm539_vm0, %v5784_v36 }
  0xea   : > { %4982 = vmatmul.mubr.msk.f32.gmra.mrb[94].mxu0 %vm539_vm0, %v5911_v60 }
  0xeb   : > { %4984 = vmatprep.mubr.msk.f32.mxu0 %vm539_vm0, %v5687_v15 }
  0xec   : > { %4944 = vmatmul.mubr.msk.f32.gmra.mrb[98].mxu1 %vm539_vm0, %v5816_v41 }
  0xed   : > { %4946 = vmatprep.mubr.msk.f32.mxu1 %vm539_vm0, %v5828_v44 }
  0xee   : > { %4985 = vmatmul.mubr.msk.f32.gmra.mrb[96].mxu0 %vm539_vm0, %v5690_v16 }
  0xef   : > { %4987 = vmatprep.mubr.msk.f32.mxu0 %vm539_vm0, %v5695_v17 }
  0xf0   : > { %4947 = vmatmul.mubr.msk.f32.gmra.mrb[100].mxu1 %vm539_vm0, %v5832_v45 }
  0xf1   : > { %5010 = vmatprep.mubr.msk.f32.mxu1 %vm539_vm0, %v5751_v28 }
  0xf2   : > { %4988 = vmatmul.mubr.msk.f32.gmra.mrb[98].mxu0 %vm539_vm0, %v5716_v21 }
  0xf3   : > { %4990 = vmatprep.mubr.msk.f32.mxu0 %vm539_vm0, %v5721_v22 }
  0xf4   : > { %5011 = vmatmul.mubr.msk.f32.vlgmr.msra.gmra.mrb[102].mxu1 %vm539_vm0, %v5755_v30 }
  0xf5   : > { %5013 = vmatprep.mubr.msk.f32.mxu1 %vm539_vm0, %v5771_v33 }
  0xf6   : > { %4991 = vmatmul.mubr.msk.f32.gmra.mrb[100].mxu0 %vm539_vm0, %v5745_v26 }
  0xf7   : > { %4993 = vmatprep.mubr.msk.f32.mxu0 %vm539_vm0, %v5748_v27 }
  0xf8   : > { %5014 = vmatmul.mubr.msk.f32.gmra.mrb[104].mxu1 %vm539_vm0, %v5781_v35 }
  0xf9   : > { %5016 = vmatprep.mubr.msk.f32.mxu1 %vm539_vm0, %v5789_v37 }
  0xfa   : > { %v4668_v32 = vpop.f32.mrb[0].mxu1  ;;  %4994 = vmatmul.mubr.msk.f32.gmra.mrb[102].mxu0 %vm539_vm0, %v5776_v34 }
  0xfb   : > { %v859_v38 = vrot.slane %v4668_v32, 7  ;;  %v6325_v46 = vpop.f32.mrb[1].mxu1  ;;  %4996 = vmatprep.mubr.msk.f32.mxu0 %vm539_vm0, %v5784_v36 }
  0xfc   : > { %v858_v47 = vrot.slane %v6325_v46, 7  ;;  %5017 = vmatmul.mubr.msk.f32.gmra.mrb[106].mxu1 %vm539_vm0, %v5804_v39 }
  0xfd   : > { %5019 = vmatprep.mubr.msk.f32.mxu1 %vm539_vm0, %v5808_v40 }
  0xfe   : > { %v4671_v50 = vpop.f32.mrb[2].mxu1  ;;  %v6339_v51 = vsel %vm867_vm1, %v858_v47, %v859_v38  ;;  %4997 = vmatmul.mubr.msk.f32.gmra.mrb[104].mxu0 %vm539_vm0, %v5816_v41 }
  0xff   : > { %v861_v52 = vrot.slane %v4671_v50, 7  ;;  %v796_v55 = vpop.f32.mrb[3].mxu1  ;;  %4999 = vmatprep.mubr.msk.f32.mxu0 %vm539_vm0, %v5828_v44 }
 0x100   : > { %v860_v61 = vrot.slane %v796_v55, 7  ;;  %5020 = vmatmul.mubr.msk.f32.gmra.mrb[108].mxu1 %vm539_vm0, %v5821_v42 }
 0x101   : > { %v4641_v1 = vpop.f32.mrb[0].mxu0  ;;  %5022 = vmatprep.mubr.msk.f32.mxu1 %vm539_vm0, %v5826_v43 }
 0x102   : > { %v4674_v62 = vpop.f32.mrb[4].mxu1  ;;  %v6351_v63 = vsel %vm867_vm1, %v860_v61, %v861_v52  ;;  %v6355_v0 = vsel %vm867_vm1, %v859_v38, %v860_v61  ;;  %v841_v4 = vrot.slane %v4641_v1, 7  ;;  %v696_v5 = vpop.f32.mrb[1].mxu0  ;;  %5000 = vmatmul.mubr.msk.f32.gmra.mrb[106].mxu0 %vm539_vm0, %v5832_v45 }
 0x103   : > { %v863_v2 = vrot.slane %v4674_v62, 7  ;;  %v806_v3 = vpop.f32.mrb[5].mxu1  ;;  %v840_v7 = vrot.slane %v696_v5, 7  ;;  %5063 = vmatprep.mubr.msk.f32.mxu0 %vm539_vm0, %v5751_v28 }
 0x104   : > { %v862_v6 = vrot.slane %v806_v3, 7  ;;  %5023 = vmatmul.mubr.msk.f32.gmra.mrb[110].mxu1 %vm539_vm0, %v5845_v48 }
 0x105   : > { %v4644_v11 = vpop.f32.mrb[2].mxu0  ;;  %5025 = vmatprep.mubr.msk.f32.mxu1 %vm539_vm0, %v5850_v49  ;;  %v890_v28 = vsel %vm867_vm1, %v840_v7, %v841_v4 }
 0x106   : > { %v4677_v8 = vpop.f32.mrb[6].mxu1  ;;  %v6367_v9 = vsel %vm867_vm1, %v862_v6, %v863_v2  ;;  %v6371_v10 = vsel %vm867_vm1, %v861_v52, %v862_v6  ;;  %v843_v13 = vrot.slane %v4644_v11, 7  ;;  %v706_v14 = vpop.f32.mrb[3].mxu0  ;;  %5064 = vmatmul.mubr.msk.f32.vlgmr.msra.gmra.mrb[108].mxu0 %vm539_vm0, %v5755_v30 }
 0x107   : > { %v816_v12 = vpop.f32.mrb[7].mxu1  ;;  %v842_v18 = vrot.slane %v706_v14, 7  ;;  %5066 = vmatprep.mubr.msk.f32.mxu0 %vm539_vm0, %v5771_v33 }
 0x108   : > { %5026 = vmatmul.mubr.msk.f32.gmra.mrb[112].mxu1 %vm539_vm0, %v5865_v53 }
 0x109   : > { %v4647_v19 = vpop.f32.mrb[4].mxu0  ;;  %5028 = vmatprep.mubr.msk.f32.mxu1 %vm539_vm0, %v5870_v54  ;;  %v888_v20 = vsel %vm867_vm1, %v842_v18, %v843_v13  ;;  %v889_v23 = vsel %vm867_vm1, %v841_v4, %v842_v18 }
 0x10a   : > { %v845_v24 = vrot.slane %v4647_v19, 7  ;;  %v716_v25 = vpop.f32.mrb[5].mxu0  ;;  %5067 = vmatmul.mubr.msk.f32.gmra.mrb[110].mxu0 %vm539_vm0, %v5781_v35  ;;  %v4680_v30 = vpop.f32.mrb[8].mxu1 }
 0x10b   : > { %v844_v33 = vrot.slane %v716_v25, 7  ;;  %5069 = vmatprep.mubr.msk.f32.mxu0 %vm539_vm0, %v5789_v37  ;;  %v824_v29 = vpop.f32.mrb[9].mxu1 }
 0x10c   : > { %5029 = vmatmul.mubr.msk.f32.gmra.mrb[114].mxu1 %vm539_vm0, %v5882_v56 }
 0x10d   : > { %v4650_v32 = vpop.f32.mrb[6].mxu0  ;;  %5031 = vmatprep.mubr.msk.f32.mxu1 %vm539_vm0, %v5887_v57  ;;  %v886_v38 = vsel %vm867_vm1, %v844_v33, %v845_v24  ;;  %v887_v50 = vsel %vm867_vm1, %v843_v13, %v844_v33 }
 0x10e   : > { %v847_v35 = vrot.slane %v4650_v32, 7  ;;  %v726_v52 = vpop.f32.mrb[7].mxu0  ;;  %5070 = vmatmul.mubr.msk.f32.gmra.mrb[112].mxu0 %vm539_vm0, %v5804_v39  ;;  %v4683_v37 = vpop.f32.mrb[10].mxu1 }
 0x10f   : > { %v846_v55 = vrot.slane %v726_v52, 7  ;;  %v864_v61 = vrot.slane %v4683_v37, 7  ;;  %5072 = vmatprep.mubr.msk.f32.mxu0 %vm539_vm0, %v5808_v40  ;;  %v832_v62 = vpop.f32.mrb[11].mxu1 }
 0x110   : > { %5032 = vmatmul.mubr.msk.f32.gmra.mrb[116].mxu1 %vm539_vm0, %v5897_v58 }
 0x111   : > { %v4653_v1 = vpop.f32.mrb[8].mxu0  ;;  %5034 = vmatprep.mubr.msk.f32.mxu1 %vm539_vm0, %v5902_v59  ;;  %v891_v2 = vsel %vm867_vm1, %v864_v61, %v840_v7  ;;  %v884_v39 = vsel %vm867_vm1, %v846_v55, %v847_v35  ;;  %v885_v3 = vsel %vm867_vm1, %v845_v24, %v846_v55 }
 0x112   : > { %v849_v4 = vrot.slane %v4653_v1, 7  ;;  %v736_v5 = vpop.f32.mrb[9].mxu0  ;;  %5073 = vmatmul.mubr.msk.f32.gmra.mrb[114].mxu0 %vm539_vm0, %v5821_v42  ;;  %v4694_v40 = vpop.f32.mrb[12].mxu1 }
 0x113   : > { %v848_v6 = vrot.slane %v736_v5, 7  ;;  %v6417_v8 = vadd.f32 %v4694_v40, %v890_v28  ;;  %5075 = vmatprep.mubr.msk.f32.mxu0 %vm539_vm0, %v5826_v43  ;;  %v987_v11 = vpop.f32.mrb[13].mxu1 }
 0x114   : > { %v6421_v7 = vadd.f32 %v987_v11, %v891_v2  ;;  %5035 = vmatmul.mubr.msk.f32.gmra.mrb[118].mxu1 %vm539_vm0, %v5911_v60 }
 0x115   : > { %v4656_v12 = vpop.f32.mrb[10].mxu0  ;;  %5037 = vmatprep.mubr.msk.f32.mxu1 %vm539_vm0, %v5687_v15  ;;  %v882_v42 = vsel %vm867_vm1, %v848_v6, %v849_v4  ;;  %v883_v28 = vsel %vm867_vm1, %v847_v35, %v848_v6 }
 0x116   : > { %v851_v13 = vrot.slane %v4656_v12, 7  ;;  %v746_v14 = vpop.f32.mrb[11].mxu0  ;;  %5076 = vmatmul.mubr.msk.f32.gmra.mrb[116].mxu0 %vm539_vm0, %v5845_v48  ;;  %v4697_v43 = vpop.f32.mrb[14].mxu1 }
 0x117   : > { %v850_v18 = vrot.slane %v746_v14, 7  ;;  %v6433_v19 = vadd.f32 %v4697_v43, %v888_v20  ;;  %5078 = vmatprep.mubr.msk.f32.mxu0 %vm539_vm0, %v5850_v49  ;;  %v997_v24 = vpop.f32.mrb[15].mxu1 }
 0x118   : > { %v6437_v25 = vadd.f32 %v997_v24, %v889_v23  ;;  %5038 = vmatmul.mubr.msk.f32.gmra.mrb[120].mxu1 %vm539_vm0, %v5690_v16 }
 0x119   : > { %v4659_v30 = vpop.f32.mrb[12].mxu0  ;;  %5040 = vmatprep.mubr.msk.f32.mxu1 %vm539_vm0, %v5695_v17  ;;  %v880_v48 = vsel %vm867_vm1, %v850_v18, %v851_v13  ;;  %v881_v20 = vsel %vm867_vm1, %v849_v4, %v850_v18 }
 0x11a   : > { %v853_v33 = vrot.slane %v4659_v30, 7  ;;  %v756_v29 = vpop.f32.mrb[13].mxu0  ;;  %5079 = vmatmul.mubr.msk.f32.gmra.mrb[118].mxu0 %vm539_vm0, %v5865_v53  ;;  %v4700_v49 = vpop.f32.mrb[16].mxu1 }
 0x11b   : > { %v852_v23 = vrot.slane %v756_v29, 7  ;;  %v6449_v32 = vadd.f32 %v4700_v49, %v886_v38  ;;  %5081 = vmatprep.mubr.msk.f32.mxu0 %vm539_vm0, %v5870_v54  ;;  %v1007_v35 = vpop.f32.mrb[17].mxu1 }
 0x11c   : > { %v6453_v52 = vadd.f32 %v1007_v35, %v887_v50  ;;  %5041 = vmatmul.mubr.msk.f32.gmra.mrb[122].mxu1 %vm539_vm0, %v5716_v21 }
 0x11d   : > { %v4662_v37 = vpop.f32.mrb[14].mxu0  ;;  %5043 = vmatprep.mubr.msk.f32.mxu1 %vm539_vm0, %v5721_v22  ;;  %v878_v53 = vsel %vm867_vm1, %v852_v23, %v853_v33  ;;  %v879_v38 = vsel %vm867_vm1, %v851_v13, %v852_v23 }
 0x11e   : > { %v855_v55 = vrot.slane %v4662_v37, 7  ;;  %v766_v61 = vpop.f32.mrb[15].mxu0  ;;  %5082 = vmatmul.mubr.msk.f32.gmra.mrb[120].mxu0 %vm539_vm0, %v5882_v56  ;;  %v4703_v54 = vpop.f32.mrb[18].mxu1 }
 0x11f   : > { %v854_v50 = vrot.slane %v766_v61, 7  ;;  %v6465_v62 = vadd.f32 %v4703_v54, %v884_v39  ;;  %5084 = vmatprep.mubr.msk.f32.mxu0 %vm539_vm0, %v5887_v57  ;;  %v1017_v1 = vpop.f32.mrb[19].mxu1 }
 0x120   : > { %v6469_v2 = vadd.f32 %v1017_v1, %v885_v3  ;;  %5044 = vmatmul.mubr.msk.f32.gmra.mrb[124].mxu1 %vm539_vm0, %v5745_v26 }
 0x121   : > { %v4665_v4 = vpop.f32.mrb[16].mxu0  ;;  %5046 = vmatprep.mubr.msk.f32.mxu1 %vm539_vm0, %v5748_v27  ;;  %v876_v56 = vsel %vm867_vm1, %v854_v50, %v855_v55  ;;  %v877_v39 = vsel %vm867_vm1, %v853_v33, %v854_v50 }
 0x122   : > { %v857_v5 = vrot.slane %v4665_v4, 7  ;;  %v776_v40 = vpop.f32.mrb[17].mxu0  ;;  %5085 = vmatmul.mubr.msk.f32.gmra.mrb[122].mxu0 %vm539_vm0, %v5897_v58  ;;  %v4706_v57 = vpop.f32.mrb[20].mxu1 }
 0x123   : > { %v856_v3 = vrot.slane %v776_v40, 7  ;;  %v6481_v6 = vadd.f32 %v4706_v57, %v882_v42  ;;  %5087 = vmatprep.mubr.msk.f32.mxu0 %vm539_vm0, %v5902_v59  ;;  %v1027_v11 = vpop.f32.mrb[21].mxu1 }
 0x124   : > { %v6485_v12 = vadd.f32 %v1027_v11, %v883_v28  ;;  %5047 = vmatmul.mubr.msk.f32.gmra.mrb[126].mxu1 %vm539_vm0, %v5776_v34  ;;  %v6493_v13 = vsel %vm867_vm1, %v857_v5, %v858_v47 }
 0x125   : > { %v4747_v58 = vpop.f32.mrb[18].mxu0  ;;  %5049 = vmatprep.mubr.msk.f32.mxu1 %vm539_vm0, %v5784_v36  ;;  %v874_v42 = vsel %vm867_vm1, %v856_v3, %v857_v5  ;;  %v875_v59 = vsel %vm867_vm1, %v855_v55, %v856_v3 }
 0x126   : > { %v1370_v28 = vrot.slane %v4747_v58, 1  ;;  %v1225_v14 = vpop.f32.mrb[19].mxu0  ;;  %5088 = vmatmul.mubr.msk.f32.gmra.mrb[124].mxu0 %vm539_vm0, %v5911_v60 }
 0x127   : > { %v1369_v46 = vrot.slane %v1225_v14, 1  ;;  %v4709_v47 = vpop.f32.mrb[22].mxu1  ;;  %5090 = vmatprep.mubr.msk.f32.mxu0 %vm539_vm0, %v5687_v15 }
 0x128   : > { %v6506_v43 = vadd.f32 %v4709_v47, %v880_v48  ;;  %v1037_v18 = vpop.f32.mrb[23].mxu1  ;;  %5050 = vmatmul.mubr.msk.f32.gmra.mrb[128].mxu1 %vm539_vm0, %v5816_v41 }
 0x129   : > { %v1418_v24 = vsel %vm1394_vm2, %v1369_v46, %v1370_v28  ;;  %v4750_v30 = vpop.f32.mrb[20].mxu0  ;;  %v6512_v33 = vadd.f32 %v1037_v18, %v881_v20  ;;  %5052 = vmatprep.mubr.msk.f32.mxu1 %vm539_vm0, %v5828_v44  ;;  %v3175_v18 = vld [vmem:[%s7384_s5 + $0x8] sm:$0xff] }
 0x12a   : > { %v1372_v60 = vrot.slane %v4750_v30, 1  ;;  %v1235_v29 = vpop.f32.mrb[21].mxu0  ;;  %5091 = vmatmul.mubr.msk.f32.gmra.mrb[126].mxu0 %vm539_vm0, %v5690_v16  ;;  %v6519_v15 = vadd.f32 %v1418_v24, %v6421_v7 }
 0x12b   : > { %v1371_v48 = vrot.slane %v1235_v29, 1  ;;  %v4712_v49 = vpop.f32.mrb[24].mxu1  ;;  %5093 = vmatprep.mubr.msk.f32.mxu0 %vm539_vm0, %v5695_v17 }
 0x12c   : > { %v6523_v23 = vadd.f32 %v4712_v49, %v878_v53  ;;  %v1047_v20 = vpop.f32.mrb[25].mxu1  ;;  %5053 = vmatmul.mubr.msk.f32.gmra.mrb[130].mxu1 %vm539_vm0, %v5832_v45 }
 0x12d   : > { %v1416_v35 = vsel %vm1394_vm2, %v1371_v48, %v1372_v60  ;;  %v1417_v16 = vsel %vm1394_vm2, %v1370_v28, %v1371_v48  ;;  %v4753_v37 = vpop.f32.mrb[22].mxu0  ;;  %v6531_v7 = vadd.f32 %v1047_v20, %v879_v38 }
 0x12e   : > { %v1374_v55 = vrot.slane %v4753_v37, 1  ;;  %v1245_v61 = vpop.f32.mrb[23].mxu0  ;;  %5094 = vmatmul.mubr.msk.f32.gmra.mrb[128].mxu0 %vm539_vm0, %v5716_v21  ;;  %v6536_v17 = vadd.f32 %v1416_v35, %v6437_v25  ;;  %v6539_v53 = vadd.f32 %v1417_v16, %v6417_v8 }
 0x12f   : > { %v1373_v54 = vrot.slane %v1245_v61, 1  ;;  %v4715_v50 = vpop.f32.mrb[26].mxu1  ;;  %5096 = vmatprep.mubr.msk.f32.mxu0 %vm539_vm0, %v5721_v22 }
 0x130   : > { %v6543_v1 = vadd.f32 %v4715_v50, %v876_v56  ;;  %v1057_v38 = vpop.f32.mrb[27].mxu1 }
 0x131   : > { %v1414_v4 = vsel %vm1394_vm2, %v1373_v54, %v1374_v55  ;;  %v1415_v21 = vsel %vm1394_vm2, %v1372_v60, %v1373_v54  ;;  %v4756_v5 = vpop.f32.mrb[24].mxu0  ;;  %v6549_v25 = vadd.f32 %v1057_v38, %v877_v39 }
 0x132   : > { %v1376_v40 = vrot.slane %v4756_v5, 1  ;;  %v1255_v8 = vpop.f32.mrb[25].mxu0  ;;  %5097 = vmatmul.mubr.msk.f32.gmra.mrb[130].mxu0 %vm539_vm0, %v5745_v26  ;;  %v6554_v57 = vadd.f32 %v1414_v4, %v6453_v52  ;;  %v6557_v22 = vadd.f32 %v1415_v21, %v6433_v19 }
 0x133   : > { %v1375_v56 = vrot.slane %v1255_v8, 1  ;;  %v4718_v3 = vpop.f32.mrb[28].mxu1  ;;  %5099 = vmatprep.mubr.msk.f32.mxu0 %vm539_vm0, %v5748_v27 }
 0x134   : > { %v6561_v11 = vadd.f32 %v4718_v3, %v874_v42  ;;  %v1067_v39 = vpop.f32.mrb[29].mxu1 }
 0x135   : > { %v1412_v58 = vsel %vm1394_vm2, %v1375_v56, %v1376_v40  ;;  %v1413_v26 = vsel %vm1394_vm2, %v1374_v55, %v1375_v56  ;;  %v4759_v28 = vpop.f32.mrb[26].mxu0  ;;  %v6567_v52 = vadd.f32 %v1067_v39, %v875_v59  ;;  %v3174_v59 = vld [vmem:[%s7384_s5] sm:$0xff] }
 0x136   : > { %v1378_v14 = vrot.slane %v4759_v28, 1  ;;  %v1265_v19 = vpop.f32.mrb[27].mxu0  ;;  %5100 = vmatmul.mubr.msk.f32.gmra.mrb[132].mxu0 %vm539_vm0, %v5776_v34  ;;  %v6572_v46 = vadd.f32 %v1412_v58, %v6469_v2  ;;  %v6575_v27 = vadd.f32 %v1413_v26, %v6449_v32  ;;  %v5224_v24 = vpack.c.bf16 %v3175_v18, %v3174_v59 }
 0x137   : > { %v1377_v42 = vrot.slane %v1265_v19, 1  ;;  %v4721_v47 = vpop.f32.mrb[30].mxu1  ;;  %5102 = vmatprep.mubr.msk.f32.mxu0 %vm539_vm0, %v5784_v36 }
 0x138   : > { %v6586_v34 = vadd.f32 %v4721_v47, %v6339_v51  ;;  %v1077_v2 = vpop.f32.mrb[31].mxu1  ;;  %5225 = vmatprep.subr.bf16.mxu1 %v5224_v24 }
 0x139   : > { %v1410_v32 = vsel %vm1394_vm2, %v1377_v42, %v1378_v14  ;;  %v1411_v30 = vsel %vm1394_vm2, %v1376_v40, %v1377_v42  ;;  %v4762_v36 = vpop.f32.mrb[28].mxu0  ;;  %v1148_v60 = vadd.f32 %v1077_v2, %v6493_v13  ;;  %5227 = vmatpush3.bf16.msra.mxu1 %v5224_v24 }
 0x13a   : > { %v1380_v29 = vrot.slane %v4762_v36, 1  ;;  %v1275_v48 = vpop.f32.mrb[29].mxu0  ;;  %5103 = vmatmul.mubr.msk.f32.gmra.mrb[134].mxu0 %vm539_vm0, %v5816_v41  ;;  %v6596_v49 = vadd.f32 %v1410_v32, %v6485_v12  ;;  %v6599_v51 = vadd.f32 %v1411_v30, %v6465_v62 }
 0x13b   : > { %v1379_v20 = vrot.slane %v1275_v48, 1  ;;  %v4724_v35 = vpop.f32.mrb[32].mxu1  ;;  %5105 = vmatprep.mubr.msk.f32.mxu0 %vm539_vm0, %v5828_v44 }
 0x13c   : > { %v6604_v13 = vadd.f32 %v4724_v35, %v6351_v63  ;;  %v1087_v16 = vpop.f32.mrb[33].mxu1 }
 0x13d   : > { %v1408_v41 = vsel %vm1394_vm2, %v1379_v20, %v1380_v29  ;;  %v1409_v12 = vsel %vm1394_vm2, %v1378_v14, %v1379_v20  ;;  %v4765_v37 = vpop.f32.mrb[30].mxu0  ;;  %v1150_v62 = vadd.f32 %v1087_v16, %v6355_v0 }
 0x13e   : > { %v1382_v55 = vrot.slane %v4765_v37, 1  ;;  %v1285_v61 = vpop.f32.mrb[31].mxu0  ;;  %5106 = vmatmul.mubr.msk.f32.gmra.mrb[136].mxu0 %vm539_vm0, %v5832_v45  ;;  %v6614_v44 = vadd.f32 %v1408_v41, %v6512_v33  ;;  %v6617_v63 = vadd.f32 %v1409_v12, %v6481_v6 }
 0x13f   : > { %v1381_v54 = vrot.slane %v1285_v61, 1  ;;  %v4727_v50 = vpop.f32.mrb[34].mxu1 }
 0x140   : > { %v6620_v38 = vadd.f32 %v4727_v50, %v6367_v9  ;;  %v1097_v4 = vpop.f32.mrb[35].mxu1 }
 0x141   : > { %v1406_v0 = vsel %vm1394_vm2, %v1381_v54, %v1382_v55  ;;  %v1407_v21 = vsel %vm1394_vm2, %v1380_v29, %v1381_v54  ;;  %v4768_v5 = vpop.f32.mrb[32].mxu0  ;;  %v1152_v45 = vadd.f32 %v1097_v4, %v6371_v10 }
 0x142   : > { %v1384_v33 = vrot.slane %v4768_v5, 1  ;;  %v1295_v40 = vpop.f32.mrb[33].mxu0  ;;  %v6628_v6 = vadd.f32 %v1406_v0, %v6531_v7  ;;  %v6631_v8 = vadd.f32 %v1407_v21, %v6506_v43 }
 0x143   : > { %v1383_v9 = vrot.slane %v1295_v40, 1  ;;  %v4730_v56 = vpop.f32.mrb[36].mxu1 }
 0x144   : > { %v1107_v3 = vpop.f32.mrb[37].mxu1 }
 0x145   : > { %v1404_v39 = vsel %vm1394_vm2, %v1383_v9, %v1384_v33  ;;  %v1405_v58 = vsel %vm1394_vm2, %v1382_v55, %v1383_v9  ;;  %v4771_v26 = vpop.f32.mrb[34].mxu0 }
 0x146   : > { %v1386_v28 = vrot.slane %v4771_v26, 1  ;;  %v1305_v10 = vpop.f32.mrb[35].mxu0  ;;  %v6638_v14 = vadd.f32 %v1404_v39, %v6549_v25  ;;  %v6641_v7 = vadd.f32 %v1405_v58, %v6523_v23 }
 0x147   : > { %v1385_v43 = vrot.slane %v1305_v10, 1  ;;  %v4733_v19 = vpop.f32.mrb[38].mxu1  ;;  %v3176_v10 = vld [vmem:[%s7384_s5 + $0x10] sm:$0xff] }
 0x148   : > { %v1115_v42 = vpop.f32.mrb[39].mxu1 }
 0x149   : > { %v1402_v47 = vsel %vm1394_vm2, %v1385_v43, %v1386_v28  ;;  %v1403_v59 = vsel %vm1394_vm2, %v1384_v33, %v1385_v43  ;;  %v4774_v18 = vpop.f32.mrb[36].mxu0  ;;  %v3177_v43 = vld [vmem:[%s7384_s5 + $0x18] sm:$0xff] }
 0x14a   : > { %v1388_v2 = vrot.slane %v4774_v18, 1  ;;  %v1315_v24 = vpop.f32.mrb[37].mxu0  ;;  %v6648_v32 = vadd.f32 %v1402_v47, %v6567_v52  ;;  %v6651_v25 = vadd.f32 %v1403_v59, %v6543_v1  ;;  %v5228_v47 = vpack.c.bf16 %v3177_v43, %v3176_v10 }
 0x14b   : > { %v1387_v23 = vrot.slane %v1315_v24, 1  ;;  %v4736_v30 = vpop.f32.mrb[40].mxu1 }
 0x14c   : > { %v1123_v36 = vpop.f32.mrb[41].mxu1  ;;  %5229 = vmatprep.subr.bf16.mxu1 %v5228_v47 }
 0x14d   : > { %v1400_v29 = vsel %vm1394_vm2, %v1387_v23, %v1388_v2  ;;  %v1401_v48 = vsel %vm1394_vm2, %v1386_v28, %v1387_v23  ;;  %v4777_v20 = vpop.f32.mrb[38].mxu0  ;;  %5231 = vmatpush3.bf16.msra.mxu1 %v5228_v47 }
 0x14e   : > { %v1390_v35 = vrot.slane %v4777_v20, 1  ;;  %v1325_v16 = vpop.f32.mrb[39].mxu0  ;;  %v6657_v41 = vadd.f32 %v1400_v29, %v1148_v60  ;;  %v6660_v52 = vadd.f32 %v1401_v48, %v6561_v11 }
 0x14f   : > { %v1389_v12 = vrot.slane %v1325_v16, 1  ;;  %v4800_v1 = vpop.f32.mrb[42].mxu1 }
 0x150   : > { %v1514_v37 = vpop.f32.mrb[43].mxu1 }
 0x151   : > { %v1398_v55 = vsel %vm1394_vm2, %v1389_v12, %v1390_v35  ;;  %v1399_v61 = vsel %vm1394_vm2, %v1388_v2, %v1389_v12  ;;  %v4780_v54 = vpop.f32.mrb[40].mxu0 }
 0x152   : > { %v1392_v50 = vrot.slane %v4780_v54, 1  ;;  %v1335_v4 = vpop.f32.mrb[41].mxu0  ;;  %v6666_v0 = vadd.f32 %v1398_v55, %v1150_v62  ;;  %v6669_v60 = vadd.f32 %v1399_v61, %v6586_v34 }
 0x153   : > { %v1391_v21 = vrot.slane %v1335_v4, 1  ;;  %v4803_v11 = vpop.f32.mrb[44].mxu1 }
 0x154   : > { %v1659_v5 = vrot.slane %v4803_v11, 7  ;;  %v1522_v33 = vpop.f32.mrb[45].mxu1 }
 0x155   : > { %v1396_v40 = vsel %vm1394_vm2, %v1391_v21, %v1392_v50  ;;  %v1397_v9 = vsel %vm1394_vm2, %v1390_v35, %v1391_v21  ;;  %v4783_v56 = vpop.f32.mrb[42].mxu0  ;;  %v1658_v3 = vrot.slane %v1522_v33, 7 }
 0x156   : > { %v1345_v39 = vpop.f32.mrb[43].mxu0  ;;  %v6675_v58 = vadd.f32 %v1396_v40, %v1152_v45  ;;  %v6678_v62 = vadd.f32 %v1397_v9, %v6604_v13 }
 0x157   : > { %v1393_v34 = vrot.slane %v1345_v39, 1  ;;  %v4806_v26 = vpop.f32.mrb[46].mxu1  ;;  %v1706_v28 = vsel %vm867_vm1, %v1658_v3, %v1659_v5 }
 0x158   : > { %v1661_v19 = vrot.slane %v4806_v26, 7  ;;  %v1532_v42 = vpop.f32.mrb[47].mxu1  ;;  %v1707_v45 = vadd.f32 %v1706_v28, %v6519_v15 }
 0x159   : > { %v1395_v13 = vsel %vm1394_vm2, %v1392_v50, %v1393_v34  ;;  %v4786_v59 = vpop.f32.mrb[44].mxu0  ;;  %v1660_v18 = vrot.slane %v1532_v42, 7 }
 0x15a   : > { %v1354_v2 = vpop.f32.mrb[45].mxu0  ;;  %v6692_v24 = vadd.f32 %v1395_v13, %v6620_v38 }
 0x15b   : > { %v4809_v23 = vpop.f32.mrb[48].mxu1  ;;  %v1704_v30 = vsel %vm867_vm1, %v1660_v18, %v1661_v19  ;;  %v1705_v36 = vsel %vm867_vm1, %v1659_v5, %v1660_v18 }
 0x15c   : > { %v1663_v15 = vrot.slane %v4809_v23, 7  ;;  %v1542_v29 = vpop.f32.mrb[49].mxu1  ;;  %v1709_v48 = vadd.f32 %v1704_v30, %v6536_v17  ;;  %v1708_v20 = vadd.f32 %v1705_v36, %v6539_v53 }
 0x15d   : > { %v4789_v35 = vpop.f32.mrb[46].mxu0  ;;  %v1662_v16 = vrot.slane %v1542_v29, 7 }
 0x15e   : > { %v1362_v12 = vpop.f32.mrb[47].mxu0 }
 0x15f   : > { %v4812_v38 = vpop.f32.mrb[50].mxu1  ;;  %v1702_v1 = vsel %vm867_vm1, %v1662_v16, %v1663_v15  ;;  %v1703_v37 = vsel %vm867_vm1, %v1661_v19, %v1662_v16 }
 0x160   : > { %v1665_v55 = vrot.slane %v4812_v38, 7  ;;  %v1552_v61 = vpop.f32.mrb[51].mxu1  ;;  %v1711_v54 = vadd.f32 %v1702_v1, %v6554_v57  ;;  %v1710_v50 = vadd.f32 %v1703_v37, %v6557_v22 }
 0x161   : > { %v4853_v4 = vpop.f32.mrb[48].mxu0  ;;  %v1664_v17 = vrot.slane %v1552_v61, 7 }
 0x162   : > { %v1802_v21 = vpop.f32.mrb[49].mxu0 }
 0x163   : > { %v4815_v53 = vpop.f32.mrb[52].mxu1  ;;  %v1700_v11 = vsel %vm867_vm1, %v1664_v17, %v1665_v55  ;;  %v1701_v5 = vsel %vm867_vm1, %v1663_v15, %v1664_v17 }
 0x164   : > { %v1667_v33 = vrot.slane %v4815_v53, 7  ;;  %v1562_v40 = vpop.f32.mrb[53].mxu1  ;;  %v1713_v9 = vadd.f32 %v1700_v11, %v6572_v46  ;;  %v1712_v56 = vadd.f32 %v1701_v5, %v6575_v27 }
 0x165   : > { %v4856_v3 = vpop.f32.mrb[50].mxu0  ;;  %v1666_v57 = vrot.slane %v1562_v40, 7 }
 0x166   : > { %v6712_v39 = vadd.f32 %v4856_v3, %v1707_v45  ;;  %v1810_v22 = vpop.f32.mrb[51].mxu0 }
 0x167   : > { %v4818_v34 = vpop.f32.mrb[54].mxu1  ;;  %v1698_v26 = vsel %vm867_vm1, %v1666_v57, %v1667_v33  ;;  %v1699_v28 = vsel %vm867_vm1, %v1665_v55, %v1666_v57 }
 0x168   : > { %v1669_v10 = vrot.slane %v4818_v34, 7  ;;  %v1572_v43 = vpop.f32.mrb[55].mxu1  ;;  %v1715_v19 = vadd.f32 %v1698_v26, %v6596_v49  ;;  %v1714_v46 = vadd.f32 %v1699_v28, %v6599_v51 }
 0x169   : > { %v4859_v42 = vpop.f32.mrb[52].mxu0  ;;  %v1668_v27 = vrot.slane %v1572_v43, 7 }
 0x16a   : > { %v6720_v47 = vadd.f32 %v4859_v42, %v1709_v48  ;;  %v1819_v45 = vpop.f32.mrb[53].mxu0 }
 0x16b   : > { %v6722_v13 = vadd.f32 %v1819_v45, %v1708_v20  ;;  %v4821_v59 = vpop.f32.mrb[56].mxu1  ;;  %v1696_v18 = vsel %vm867_vm1, %v1668_v27, %v1669_v10  ;;  %v1697_v2 = vsel %vm867_vm1, %v1667_v33, %v1668_v27 }
 0x16c   : > { %v1671_v23 = vrot.slane %v4821_v59, 7  ;;  %v1582_v30 = vpop.f32.mrb[57].mxu1  ;;  %v1717_v49 = vadd.f32 %v1696_v18, %v6614_v44  ;;  %v1716_v51 = vadd.f32 %v1697_v2, %v6617_v63 }
 0x16d   : > { %v4862_v36 = vpop.f32.mrb[54].mxu0  ;;  %v1670_v15 = vrot.slane %v1582_v30, 7 }
 0x16e   : > { %v6730_v29 = vadd.f32 %v4862_v36, %v1711_v54  ;;  %v1829_v48 = vpop.f32.mrb[55].mxu0 }
 0x16f   : > { %v6732_v20 = vadd.f32 %v1829_v48, %v1710_v50  ;;  %v4824_v35 = vpop.f32.mrb[58].mxu1  ;;  %v1694_v16 = vsel %vm867_vm1, %v1670_v15, %v1671_v23  ;;  %v1695_v12 = vsel %vm867_vm1, %v1669_v10, %v1670_v15 }
 0x170   : > { %v1673_v38 = vrot.slane %v4824_v35, 7  ;;  %v1592_v1 = vpop.f32.mrb[59].mxu1  ;;  %v1719_v44 = vadd.f32 %v1694_v16, %v6628_v6  ;;  %v1718_v63 = vadd.f32 %v1695_v12, %v6631_v8 }
 0x171   : > { %v4865_v37 = vpop.f32.mrb[56].mxu0  ;;  %v1672_v55 = vrot.slane %v1592_v1, 7 }
 0x172   : > { %v6740_v61 = vadd.f32 %v4865_v37, %v1713_v9  ;;  %v1839_v54 = vpop.f32.mrb[57].mxu0 }
 0x173   : > { %v6742_v50 = vadd.f32 %v1839_v54, %v1712_v56  ;;  %v4827_v4 = vpop.f32.mrb[60].mxu1  ;;  %v1692_v17 = vsel %vm867_vm1, %v1672_v55, %v1673_v38  ;;  %v1693_v21 = vsel %vm867_vm1, %v1671_v23, %v1672_v55 }
 0x174   : > { %v1675_v53 = vrot.slane %v4827_v4, 7  ;;  %v1602_v11 = vpop.f32.mrb[61].mxu1  ;;  %v1721_v6 = vadd.f32 %v1692_v17, %v6638_v14  ;;  %v1720_v8 = vadd.f32 %v1693_v21, %v6641_v7 }
 0x175   : > { %v4868_v5 = vpop.f32.mrb[58].mxu0  ;;  %v1674_v33 = vrot.slane %v1602_v11, 7 }
 0x176   : > { %v6750_v40 = vadd.f32 %v4868_v5, %v1715_v19  ;;  %v1849_v9 = vpop.f32.mrb[59].mxu0 }
 0x177   : > { %v6752_v56 = vadd.f32 %v1849_v9, %v1714_v46  ;;  %v4830_v3 = vpop.f32.mrb[62].mxu1  ;;  %v1690_v57 = vsel %vm867_vm1, %v1674_v33, %v1675_v53  ;;  %v1691_v22 = vsel %vm867_vm1, %v1673_v38, %v1674_v33 }
 0x178   : > { %v1677_v34 = vrot.slane %v4830_v3, 7  ;;  %v1612_v26 = vpop.f32.mrb[63].mxu1  ;;  %v1723_v14 = vadd.f32 %v1690_v57, %v6648_v32  ;;  %v1722_v7 = vadd.f32 %v1691_v22, %v6651_v25 }
 0x179   : > { %v4871_v28 = vpop.f32.mrb[60].mxu0  ;;  %v1676_v10 = vrot.slane %v1612_v26, 7 }
 0x17a   : > { %v6760_v43 = vadd.f32 %v4871_v28, %v1717_v49  ;;  %v1859_v19 = vpop.f32.mrb[61].mxu0 }
 0x17b   : > { %v6762_v46 = vadd.f32 %v1859_v19, %v1716_v51  ;;  %v4833_v42 = vpop.f32.mrb[64].mxu1  ;;  %v1688_v27 = vsel %vm867_vm1, %v1676_v10, %v1677_v34  ;;  %v1689_v45 = vsel %vm867_vm1, %v1675_v53, %v1676_v10 }
 0x17c   : > { %v1679_v59 = vrot.slane %v4833_v42, 7  ;;  %v1622_v18 = vpop.f32.mrb[65].mxu1  ;;  %v1725_v32 = vadd.f32 %v1688_v27, %v6657_v41  ;;  %v1724_v25 = vadd.f32 %v1689_v45, %v6660_v52 }
 0x17d   : > { %v4874_v2 = vpop.f32.mrb[62].mxu0  ;;  %v1678_v23 = vrot.slane %v1622_v18, 7 }
 0x17e   : > { %v6770_v30 = vadd.f32 %v4874_v2, %v1719_v44  ;;  %v1869_v49 = vpop.f32.mrb[63].mxu0 }
 0x17f   : > { %v6772_v51 = vadd.f32 %v1869_v49, %v1718_v63  ;;  %v4836_v36 = vpop.f32.mrb[66].mxu1  ;;  %v1686_v15 = vsel %vm867_vm1, %v1678_v23, %v1679_v59  ;;  %v1687_v48 = vsel %vm867_vm1, %v1677_v34, %v1678_v23 }
 0x180   : > { %v1681_v35 = vrot.slane %v4836_v36, 7  ;;  %v1632_v16 = vpop.f32.mrb[67].mxu1  ;;  %v1727_v41 = vadd.f32 %v1686_v15, %v6666_v0  ;;  %v1726_v52 = vadd.f32 %v1687_v48, %v6669_v60 }
 0x181   : > { %v4877_v12 = vpop.f32.mrb[64].mxu0  ;;  %v1680_v38 = vrot.slane %v1632_v16, 7 }
 0x182   : > { %v6780_v1 = vadd.f32 %v4877_v12, %v1721_v6  ;;  %v1879_v44 = vpop.f32.mrb[65].mxu0 }
 0x183   : > { %v6782_v63 = vadd.f32 %v1879_v44, %v1720_v8  ;;  %v4839_v37 = vpop.f32.mrb[68].mxu1  ;;  %v1684_v55 = vsel %vm867_vm1, %v1680_v38, %v1681_v35  ;;  %v1685_v54 = vsel %vm867_vm1, %v1679_v59, %v1680_v38 }
 0x184   : > { %v1642_v4 = vpop.f32.mrb[69].mxu1  ;;  %v1729_v17 = vadd.f32 %v1684_v55, %v6675_v58  ;;  %v1728_v0 = vadd.f32 %v1685_v54, %v6678_v62 }
 0x185   : > { %v4880_v60 = vpop.f32.mrb[66].mxu0  ;;  %v1682_v21 = vrot.slane %v1642_v4, 7 }
 0x186   : > { %v6790_v53 = vadd.f32 %v4880_v60, %v1723_v14  ;;  %v1889_v11 = vpop.f32.mrb[67].mxu0 }
 0x187   : > { %v6792_v6 = vadd.f32 %v1889_v11, %v1722_v7  ;;  %v4842_v8 = vpop.f32.mrb[70].mxu1  ;;  %v1683_v5 = vsel %vm867_vm1, %v1681_v35, %v1682_v21 }
 0x188   : > { %v1651_v33 = vpop.f32.mrb[71].mxu1  ;;  %v1730_v9 = vadd.f32 %v1683_v5, %v6692_v24 }
 0x189   : > { %v4883_v3 = vpop.f32.mrb[68].mxu0 }
 0x18a   : > { %v6797_v57 = vadd.f32 %v4883_v3, %v1725_v32  ;;  %v1899_v58 = vpop.f32.mrb[69].mxu0 }
 0x18b   : > { %v6799_v22 = vadd.f32 %v1899_v58, %v1724_v25  ;;  %v4906_v62 = vpop.f32.mrb[72].mxu1 }
 0x18c   : > { %v2040_v34 = vpop.f32.mrb[73].mxu1 }
 0x18d   : > { %v4886_v26 = vpop.f32.mrb[70].mxu0 }
 0x18e   : > { %v6801_v14 = vadd.f32 %v4886_v26, %v1727_v41  ;;  %v1909_v7 = vpop.f32.mrb[71].mxu0 }
 0x18f   : > { %v6803_v28 = vadd.f32 %v1909_v7, %v1726_v52  ;;  %v4909_v10 = vpop.f32.mrb[74].mxu1 }
 0x190   : > { %v2048_v19 = vpop.f32.mrb[75].mxu1  ;;  %v2184_v59 = vrot.slane %v4909_v10, 1 }
 0x191   : > { %v4889_v42 = vpop.f32.mrb[72].mxu0 }
 0x192   : > { %v6805_v27 = vadd.f32 %v4889_v42, %v1729_v17  ;;  %v1919_v24 = vpop.f32.mrb[73].mxu0 }
 0x193   : > { %v6807_v45 = vadd.f32 %v1919_v24, %v1728_v0  ;;  %v4912_v18 = vpop.f32.mrb[76].mxu1 }
 0x194   : > { %v2186_v32 = vrot.slane %v4912_v18, 1  ;;  %v2057_v25 = vpop.f32.mrb[77].mxu1 }
 0x195   : > { %v4892_v2 = vpop.f32.mrb[74].mxu0  ;;  %v2185_v23 = vrot.slane %v2057_v25, 1 }
 0x196   : > { %v1929_v49 = vpop.f32.mrb[75].mxu0 }
 0x197   : > { %v6809_v36 = vadd.f32 %v1929_v49, %v1730_v9  ;;  %v2231_v15 = vsel %vm1394_vm2, %v2185_v23, %v2186_v32  ;;  %v2232_v48 = vsel %vm1394_vm2, %v2184_v59, %v2185_v23  ;;  %v4915_v35 = vpop.f32.mrb[78].mxu1 }
 0x198   : > { %v2188_v16 = vrot.slane %v4915_v35, 1  ;;  %v2067_v41 = vpop.f32.mrb[79].mxu1  ;;  %v2234_v52 = vadd.f32 %v2231_v15, %v6722_v13  ;;  %v2233_v12 = vadd.f32 %v2232_v48, %v6712_v39 }
 0x199   : > { %v4895_v38 = vpop.f32.mrb[76].mxu0  ;;  %v2187_v44 = vrot.slane %v2067_v41, 1 }
 0x19a   : > { %v1938_v37 = vpop.f32.mrb[77].mxu0 }
 0x19b   : > { %v2229_v55 = vsel %vm1394_vm2, %v2187_v44, %v2188_v16  ;;  %v2230_v54 = vsel %vm1394_vm2, %v2186_v32, %v2187_v44  ;;  %v4918_v4 = vpop.f32.mrb[80].mxu1 }
 0x19c   : > { %v2190_v17 = vrot.slane %v4918_v4, 1  ;;  %v2077_v0 = vpop.f32.mrb[81].mxu1  ;;  %v6822_v60 = vadd.f32 %v2229_v55, %v6732_v20  ;;  %v6825_v21 = vadd.f32 %v2230_v54, %v6720_v47 }
 0x19d   : > { %v4959_v13 = vpop.f32.mrb[78].mxu0  ;;  %v2189_v39 = vrot.slane %v2077_v0, 1 }
 0x19e   : > { %v2328_v11 = vpop.f32.mrb[79].mxu0 }
 0x19f   : > { %v2227_v8 = vsel %vm1394_vm2, %v2189_v39, %v2190_v17  ;;  %v2228_v5 = vsel %vm1394_vm2, %v2188_v16, %v2189_v39  ;;  %v4921_v33 = vpop.f32.mrb[82].mxu1 }
 0x1a0   : > { %v2192_v9 = vrot.slane %v4921_v33, 1  ;;  %v2087_v3 = vpop.f32.mrb[83].mxu1  ;;  %v6832_v58 = vadd.f32 %v2227_v8, %v6742_v50  ;;  %v6835_v20 = vadd.f32 %v2228_v5, %v6730_v29 }
 0x1a1   : > { %v4962_v47 = vpop.f32.mrb[80].mxu0  ;;  %v2191_v62 = vrot.slane %v2087_v3, 1 }
 0x1a2   : > { %v2336_v34 = vpop.f32.mrb[81].mxu0 }
 0x1a3   : > { %v2225_v26 = vsel %vm1394_vm2, %v2191_v62, %v2192_v9  ;;  %v2226_v7 = vsel %vm1394_vm2, %v2190_v17, %v2191_v62  ;;  %v4924_v10 = vpop.f32.mrb[84].mxu1 }
 0x1a4   : > { %v2194_v19 = vrot.slane %v4924_v10, 1  ;;  %v2097_v42 = vpop.f32.mrb[85].mxu1  ;;  %v6842_v24 = vadd.f32 %v2225_v26, %v6752_v56  ;;  %v6845_v50 = vadd.f32 %v2226_v7, %v6740_v61 }
 0x1a5   : > { %v4965_v29 = vpop.f32.mrb[82].mxu0  ;;  %v2193_v59 = vrot.slane %v2097_v42, 1 }
 0x1a6   : > { %v2344_v18 = vpop.f32.mrb[83].mxu0  ;;  %v2472_v41 = vrot.slane %v4965_v29, 7 }
 0x1a7   : > { %v2223_v32 = vsel %vm1394_vm2, %v2193_v59, %v2194_v19  ;;  %v2224_v25 = vsel %vm1394_vm2, %v2192_v9, %v2193_v59  ;;  %v4927_v2 = vpop.f32.mrb[86].mxu1 }
 0x1a8   : > { %v2196_v23 = vrot.slane %v4927_v2, 1  ;;  %v2107_v49 = vpop.f32.mrb[87].mxu1  ;;  %v6852_v15 = vadd.f32 %v2223_v32, %v6762_v46  ;;  %v6855_v56 = vadd.f32 %v2224_v25, %v6750_v40 }
 0x1a9   : > { %v4968_v61 = vpop.f32.mrb[84].mxu0  ;;  %v2195_v48 = vrot.slane %v2107_v49, 1 }
 0x1aa   : > { %v2474_v35 = vrot.slane %v4968_v61, 7  ;;  %v2353_v16 = vpop.f32.mrb[85].mxu0 }
 0x1ab   : > { %v2221_v38 = vsel %vm1394_vm2, %v2195_v48, %v2196_v23  ;;  %v2222_v44 = vsel %vm1394_vm2, %v2194_v19, %v2195_v48  ;;  %v2473_v37 = vrot.slane %v2353_v16, 7  ;;  %v4930_v55 = vpop.f32.mrb[88].mxu1 }
 0x1ac   : > { %v2198_v54 = vrot.slane %v4930_v55, 1  ;;  %v2117_v4 = vpop.f32.mrb[89].mxu1  ;;  %v6862_v46 = vadd.f32 %v2221_v38, %v6772_v51  ;;  %v6865_v40 = vadd.f32 %v2222_v44, %v6760_v43 }
 0x1ad   : > { %v4971_v17 = vpop.f32.mrb[86].mxu0  ;;  %v2197_v0 = vrot.slane %v2117_v4, 1  ;;  %v2519_v13 = vsel %vm867_vm1, %v2473_v37, %v2474_v35  ;;  %v2520_v39 = vsel %vm867_vm1, %v2472_v41, %v2473_v37 }
 0x1ae   : > { %v2476_v11 = vrot.slane %v4971_v17, 7  ;;  %v2363_v8 = vpop.f32.mrb[87].mxu0  ;;  %v6871_v5 = vadd.f32 %v2519_v13, %v2234_v52  ;;  %v6873_v33 = vadd.f32 %v2520_v39, %v2233_v12 }
 0x1af   : > { %v2219_v51 = vsel %vm1394_vm2, %v2197_v0, %v2198_v54  ;;  %v2220_v43 = vsel %vm1394_vm2, %v2196_v23, %v2197_v0  ;;  %v2475_v9 = vrot.slane %v2363_v8, 7  ;;  %v4933_v3 = vpop.f32.mrb[90].mxu1 }
 0x1b0   : > { %v2200_v47 = vrot.slane %v4933_v3, 1  ;;  %v2127_v62 = vpop.f32.mrb[91].mxu1  ;;  %v6880_v34 = vadd.f32 %v2219_v51, %v6782_v63  ;;  %v6883_v26 = vadd.f32 %v2220_v43, %v6770_v30 }
 0x1b1   : > { %v4974_v52 = vpop.f32.mrb[88].mxu0  ;;  %v2199_v7 = vrot.slane %v2127_v62, 1  ;;  %v2517_v12 = vsel %vm867_vm1, %v2475_v9, %v2476_v11  ;;  %v2518_v10 = vsel %vm867_vm1, %v2474_v35, %v2475_v9 }
 0x1b2   : > { %v2478_v19 = vrot.slane %v4974_v52, 7  ;;  %v2373_v42 = vpop.f32.mrb[89].mxu0  ;;  %v6890_v29 = vadd.f32 %v2517_v12, %v6822_v60  ;;  %v6893_v59 = vadd.f32 %v2518_v10, %v6825_v21 }
 0x1b3   : > { %v2217_v30 = vsel %vm1394_vm2, %v2199_v7, %v2200_v47  ;;  %v2218_v63 = vsel %vm1394_vm2, %v2198_v54, %v2199_v7  ;;  %v2477_v18 = vrot.slane %v2373_v42, 7  ;;  %v4936_v32 = vpop.f32.mrb[92].mxu1 }
 0x1b4   : > { %v2202_v25 = vrot.slane %v4936_v32, 1  ;;  %v2137_v2 = vpop.f32.mrb[93].mxu1  ;;  %v6900_v23 = vadd.f32 %v2217_v30, %v6792_v6  ;;  %v6903_v49 = vadd.f32 %v2218_v63, %v6780_v1 }
 0x1b5   : > { %v4977_v60 = vpop.f32.mrb[90].mxu0  ;;  %v2201_v61 = vrot.slane %v2137_v2, 1  ;;  %v2515_v21 = vsel %vm867_vm1, %v2477_v18, %v2478_v19  ;;  %v2516_v48 = vsel %vm867_vm1, %v2476_v11, %v2477_v18 }
 0x1b6   : > { %v2480_v35 = vrot.slane %v4977_v60, 7  ;;  %v2383_v16 = vpop.f32.mrb[91].mxu0  ;;  %v6910_v41 = vadd.f32 %v2515_v21, %v6832_v58  ;;  %v6913_v38 = vadd.f32 %v2516_v48, %v6835_v20 }
 0x1b7   : > { %v2215_v1 = vsel %vm1394_vm2, %v2201_v61, %v2202_v25  ;;  %v2216_v6 = vsel %vm1394_vm2, %v2200_v47, %v2201_v61  ;;  %v2479_v44 = vrot.slane %v2383_v16, 7  ;;  %v4939_v37 = vpop.f32.mrb[94].mxu1 }
 0x1b8   : > { %v2204_v55 = vrot.slane %v4939_v37, 1  ;;  %v2147_v54 = vpop.f32.mrb[95].mxu1  ;;  %v6920_v4 = vadd.f32 %v2215_v1, %v6799_v22  ;;  %v6923_v17 = vadd.f32 %v2216_v6, %v6790_v53 }
 0x1b9   : > { %v4980_v58 = vpop.f32.mrb[92].mxu0  ;;  %v2203_v0 = vrot.slane %v2147_v54, 1  ;;  %v2513_v20 = vsel %vm867_vm1, %v2479_v44, %v2480_v35  ;;  %v2514_v13 = vsel %vm867_vm1, %v2478_v19, %v2479_v44 }
 0x1ba   : > { %v2482_v39 = vrot.slane %v4980_v58, 7  ;;  %v2393_v11 = vpop.f32.mrb[93].mxu0  ;;  %v6930_v8 = vadd.f32 %v2513_v20, %v6842_v24  ;;  %v6933_v51 = vadd.f32 %v2514_v13, %v6845_v50 }
 0x1bb   : > { %v2213_v53 = vsel %vm1394_vm2, %v2203_v0, %v2204_v55  ;;  %v2214_v22 = vsel %vm1394_vm2, %v2202_v25, %v2203_v0  ;;  %v2481_v43 = vrot.slane %v2393_v11, 7  ;;  %v4942_v9 = vpop.f32.mrb[96].mxu1 }
 0x1bc   : > { %v2206_v3 = vrot.slane %v4942_v9, 1  ;;  %v2157_v47 = vpop.f32.mrb[97].mxu1  ;;  %v6940_v62 = vadd.f32 %v2213_v53, %v6803_v28  ;;  %v6943_v52 = vadd.f32 %v2214_v22, %v6797_v57 }
 0x1bd   : > { %v4983_v24 = vpop.f32.mrb[94].mxu0  ;;  %v2205_v7 = vrot.slane %v2157_v47, 1  ;;  %v2511_v50 = vsel %vm867_vm1, %v2481_v43, %v2482_v39  ;;  %v2512_v12 = vsel %vm867_vm1, %v2480_v35, %v2481_v43 }
 0x1be   : > { %v2484_v10 = vrot.slane %v4983_v24, 7  ;;  %v2403_v19 = vpop.f32.mrb[95].mxu0  ;;  %v6950_v42 = vadd.f32 %v2511_v50, %v6852_v15  ;;  %v6953_v30 = vadd.f32 %v2512_v12, %v6855_v56 }
 0x1bf   : > { %v2211_v57 = vsel %vm1394_vm2, %v2205_v7, %v2206_v3  ;;  %v2212_v28 = vsel %vm1394_vm2, %v2204_v55, %v2205_v7  ;;  %v2483_v63 = vrot.slane %v2403_v19, 7  ;;  %v4945_v18 = vpop.f32.mrb[98].mxu1 }
 0x1c0   : > { %v2208_v32 = vrot.slane %v4945_v18, 1  ;;  %v2167_v25 = vpop.f32.mrb[99].mxu1  ;;  %v6960_v2 = vadd.f32 %v2211_v57, %v6807_v45  ;;  %v6963_v60 = vadd.f32 %v2212_v28, %v6801_v14 }
 0x1c1   : > { %v4986_v15 = vpop.f32.mrb[96].mxu0  ;;  %v2207_v61 = vrot.slane %v2167_v25, 1  ;;  %v2509_v56 = vsel %vm867_vm1, %v2483_v63, %v2484_v10  ;;  %v2510_v21 = vsel %vm867_vm1, %v2482_v39, %v2483_v63 }
 0x1c2   : > { %v2486_v48 = vrot.slane %v4986_v15, 7  ;;  %v2413_v35 = vpop.f32.mrb[97].mxu0  ;;  %v6970_v16 = vadd.f32 %v2509_v56, %v6862_v46  ;;  %v6973_v1 = vadd.f32 %v2510_v21, %v6865_v40 }
 0x1c3   : > { %v2209_v14 = vsel %vm1394_vm2, %v2207_v61, %v2208_v32  ;;  %v2210_v45 = vsel %vm1394_vm2, %v2206_v3, %v2207_v61  ;;  %v2485_v6 = vrot.slane %v2413_v35, 7  ;;  %v4948_v44 = vpop.f32.mrb[100].mxu1 }
 0x1c4   : > { %v2177_v37 = vpop.f32.mrb[101].mxu1  ;;  %v2256_v55 = vadd.f32 %v2209_v14, %v6809_v36  ;;  %v2255_v54 = vadd.f32 %v2210_v45, %v6805_v27 }
 0x1c5   : > { %v4989_v58 = vpop.f32.mrb[98].mxu0  ;;  %v2507_v46 = vsel %vm867_vm1, %v2485_v6, %v2486_v48  ;;  %v2508_v40 = vsel %vm867_vm1, %v2484_v10, %v2485_v6 }
 0x1c6   : > { %v2488_v0 = vrot.slane %v4989_v58, 7  ;;  %v2423_v20 = vpop.f32.mrb[99].mxu0  ;;  %v6986_v13 = vadd.f32 %v2507_v46, %v6880_v34  ;;  %v6989_v39 = vadd.f32 %v2508_v40, %v6883_v26 }
 0x1c7   : > { %v2487_v11 = vrot.slane %v2423_v20, 7  ;;  %v5012_v53 = vpop.f32.mrb[102].mxu1 }
 0x1c8   : > { %v2616_v36 = vpop.f32.mrb[103].mxu1 }
 0x1c9   : > { %v4992_v22 = vpop.f32.mrb[100].mxu0  ;;  %v2505_v27 = vsel %vm867_vm1, %v2487_v11, %v2488_v0  ;;  %v2506_v43 = vsel %vm867_vm1, %v2486_v48, %v2487_v11 }
 0x1ca   : > { %v2490_v9 = vrot.slane %v4992_v22, 7  ;;  %v2433_v3 = vpop.f32.mrb[101].mxu0  ;;  %v6996_v47 = vadd.f32 %v2505_v27, %v6900_v23  ;;  %v6999_v34 = vadd.f32 %v2506_v43, %v6903_v49 }
 0x1cb   : > { %v2489_v26 = vrot.slane %v2433_v3, 7  ;;  %v5015_v24 = vpop.f32.mrb[104].mxu1 }
 0x1cc   : > { %v2624_v7 = vpop.f32.mrb[105].mxu1 }
 0x1cd   : > { %v4995_v50 = vpop.f32.mrb[102].mxu0  ;;  %v2503_v12 = vsel %vm867_vm1, %v2489_v26, %v2490_v9  ;;  %v2504_v10 = vsel %vm867_vm1, %v2488_v0, %v2489_v26 }
 0x1ce   : > { %v2492_v19 = vrot.slane %v4995_v50, 7  ;;  %v2443_v57 = vpop.f32.mrb[103].mxu0  ;;  %v7006_v28 = vadd.f32 %v2503_v12, %v6920_v4  ;;  %v7009_v23 = vadd.f32 %v2504_v10, %v6923_v17 }
 0x1cf   : > { %v2491_v49 = vrot.slane %v2443_v57, 7  ;;  %v5018_v63 = vpop.f32.mrb[106].mxu1 }
 0x1d0   : > { %v2632_v18 = vpop.f32.mrb[107].mxu1 }
 0x1d1   : > { %v4998_v32 = vpop.f32.mrb[104].mxu0  ;;  %v2501_v25 = vsel %vm867_vm1, %v2491_v49, %v2492_v19  ;;  %v2502_v15 = vsel %vm867_vm1, %v2490_v9, %v2491_v49 }
 0x1d2   : > { %v2494_v61 = vrot.slane %v4998_v32, 7  ;;  %v2453_v56 = vpop.f32.mrb[105].mxu0  ;;  %v7016_v21 = vadd.f32 %v2501_v25, %v6940_v62  ;;  %v7019_v4 = vadd.f32 %v2502_v15, %v6943_v52 }
 0x1d3   : > { %v2493_v17 = vrot.slane %v2453_v56, 7  ;;  %v5021_v48 = vpop.f32.mrb[108].mxu1 }
 0x1d4   : > { %v2760_v35 = vadd.f32 %v5021_v48, %v6871_v5  ;;  %v2640_v14 = vpop.f32.mrb[109].mxu1 }
 0x1d5   : > { %v5001_v45 = vpop.f32.mrb[106].mxu0  ;;  %v2759_v6 = vadd.f32 %v2640_v14, %v6873_v33  ;;  %v2499_v44 = vsel %vm867_vm1, %v2493_v17, %v2494_v61  ;;  %v2500_v37 = vsel %vm867_vm1, %v2492_v19, %v2493_v17 }
 0x1d6   : > { %v2496_v58 = vrot.slane %v5001_v45, 7  ;;  %v2463_v62 = vpop.f32.mrb[107].mxu0  ;;  %v7028_v46 = vadd.f32 %v2499_v44, %v6960_v2  ;;  %v7031_v52 = vadd.f32 %v2500_v37, %v6963_v60 }
 0x1d7   : > { %v2495_v40 = vrot.slane %v2463_v62, 7  ;;  %v5024_v5 = vpop.f32.mrb[110].mxu1 }
 0x1d8   : > { %v7034_v0 = vadd.f32 %v5024_v5, %v6890_v29  ;;  %v2650_v33 = vpop.f32.mrb[111].mxu1 }
 0x1d9   : > { %v5065_v20 = vpop.f32.mrb[108].mxu0  ;;  %v2761_v11 = vadd.f32 %v2650_v33, %v6893_v59  ;;  %v2497_v53 = vsel %vm867_vm1, %v2495_v40, %v2496_v58  ;;  %v2498_v36 = vsel %vm867_vm1, %v2494_v61, %v2495_v40 }
 0x1da   : > { %v7041_v2 = vpop.f32.mrb[109].mxu0  ;;  %v7043_v22 = vadd.f32 %v2497_v53, %v2256_v55  ;;  %v7045_v60 = vadd.f32 %v2498_v36, %v2255_v54 }
 0x1db   : > { %v5027_v27 = vpop.f32.mrb[112].mxu1 }
 0x1dc   : > { %v7048_v29 = vadd.f32 %v5027_v27, %v6910_v41  ;;  %v2660_v43 = vpop.f32.mrb[113].mxu1 }
 0x1dd   : > { %v5068_v9 = vpop.f32.mrb[110].mxu0  ;;  %v2763_v59 = vadd.f32 %v2660_v43, %v6913_v38 }
 0x1de   : > { %v2863_v3 = vpop.f32.mrb[111].mxu0 }
 0x1df   : > { %v5030_v26 = vpop.f32.mrb[114].mxu1 }
 0x1e0   : > { %v7052_v24 = vadd.f32 %v5030_v26, %v6930_v8  ;;  %v2670_v7 = vpop.f32.mrb[115].mxu1 }
 0x1e1   : > { %v5071_v50 = vpop.f32.mrb[112].mxu0  ;;  %v7055_v55 = vadd.f32 %v2670_v7, %v6933_v51 }
 0x1e2   : > { %v2871_v54 = vpop.f32.mrb[113].mxu0 }
 0x1e3   : > { %v5033_v12 = vpop.f32.mrb[116].mxu1 }
 0x1e4   : > { %v7058_v10 = vadd.f32 %v5033_v12, %v6950_v42  ;;  %v2680_v41 = vpop.f32.mrb[117].mxu1 }
 0x1e5   : > { %v5074_v19 = vpop.f32.mrb[114].mxu0  ;;  %v7061_v57 = vadd.f32 %v2680_v41, %v6953_v30  ;;  %v7074_v30 = vld [vmem:[%s7383_s4] ss:$0 sm:$0xff] }
 0x1e6   : > { %v3000_v38 = vrot.slane %v5074_v19, 1  ;;  %v2879_v49 = vpop.f32.mrb[115].mxu0 }
 0x1e7   : > { %v2999_v63 = vrot.slane %v2879_v49, 1  ;;  %v5036_v8 = vpop.f32.mrb[118].mxu1 }
 0x1e8   : > { %v7064_v18 = vadd.f32 %v5036_v8, %v6970_v16  ;;  %v2690_v32 = vpop.f32.mrb[119].mxu1 }
 0x1e9   : > { %v3045_v51 = vsel %vm1394_vm2, %v2999_v63, %v3000_v38  ;;  %v5077_v25 = vpop.f32.mrb[116].mxu0  ;;  %v7069_v42 = vadd.f32 %v2690_v32, %v6973_v1 }
 0x1ea   : > { %v3047_v15 = vadd.f32 %v3045_v51, %v2759_v6  ;;  %v3002_v61 = vrot.slane %v5077_v25, 1  ;;  %v2889_v56 = vpop.f32.mrb[117].mxu0 }
 0x1eb   : > { %v3001_v17 = vrot.slane %v2889_v56, 1  ;;  %v5039_v48 = vpop.f32.mrb[120].mxu1 }
 0x1ec   : > { %v7077_v16 = vadd.f32 %v5039_v48, %v6986_v13  ;;  %v2700_v14 = vpop.f32.mrb[121].mxu1  ;;  %v3078_v45 = vadd.f32 %v7074_v30, %v3047_v15 }
 0x1ed   : > { %v3043_v1 = vsel %vm1394_vm2, %v3001_v17, %v3002_v61  ;;  %v3044_v44 = vsel %vm1394_vm2, %v3000_v38, %v3001_v17  ;;  %v5080_v37 = vpop.f32.mrb[118].mxu0  ;;  %v7085_v58 = vadd.f32 %v2700_v14, %v6989_v39 }
 0x1ee   : > { %v3048_v6 = vadd.f32 %v3044_v44, %v2760_v35  ;;  %v3049_v62 = vadd.f32 %v3043_v1, %v2761_v11  ;;  %v3004_v40 = vrot.slane %v5080_v37, 1  ;;  %v2899_v5 = vpop.f32.mrb[119].mxu0  ;;  %vm3102_vm3 = vcmp.gt.f32.partialorder %v3078_v45, 0.0 }
 0x1ef   : > { %v3003_v13 = vrot.slane %v2899_v5, 1  ;;  %v5042_v33 = vpop.f32.mrb[122].mxu1  ;;  %v3126_v20 = vmul.f32 0.1, %v3078_v45 }
 0x1f0   : > { %v3079_v53 = vadd.f32 %v7074_v30, %v3048_v6  ;;  %v7089_v36 = vadd.f32 %v5042_v33, %v6996_v47  ;;  %v2710_v27 = vpop.f32.mrb[123].mxu1  ;;  %v3080_v43 = vadd.f32 %v7074_v30, %v3049_v62 }
 0x1f1   : > { %v3041_v39 = vsel %vm1394_vm2, %v3003_v13, %v3004_v40  ;;  %v3042_v35 = vsel %vm1394_vm2, %v3002_v61, %v3003_v13  ;;  %v5083_v11 = vpop.f32.mrb[120].mxu0  ;;  %v3150_v9 = vsel %vm3102_vm3, %v3078_v45, %v3126_v20  ;;  %v7097_v3 = vadd.f32 %v2710_v27, %v6999_v34 }
 0x1f2   : > { %v3127_v26 = vmul.f32 0.1, %v3079_v53  ;;  %v3050_v7 = vadd.f32 %v3042_v35, %v7034_v0  ;;  %v3051_v50 = vadd.f32 %v3041_v39, %v2763_v59  ;;  %v3006_v47 = vrot.slane %v5083_v11, 1  ;;  %5116 = vmatprep.mubr.msk.f32.mxu1 %vm539_vm0, %v3150_v9  ;;  %v2909_v54 = vpop.f32.mrb[121].mxu0 }
 0x1f3   : > { %v3005_v12 = vrot.slane %v2909_v54, 1  ;;  %v5045_v41 = vpop.f32.mrb[124].mxu1  ;;  %vm3103_vm4 = vcmp.gt.f32.partialorder %v3079_v53, 0.0  ;;  %vm3104_vm5 = vcmp.gt.f32.partialorder %v3080_v43, 0.0  ;;  %v3128_v19 = vmul.f32 0.1, %v3080_v43 }
 0x1f4   : > { %v7102_v38 = vadd.f32 %v5045_v41, %v7006_v28  ;;  %v3151_v49 = vsel %vm3103_vm4, %v3079_v53, %v3127_v26  ;;  %v2720_v63 = vpop.f32.mrb[125].mxu1  ;;  %v3081_v34 = vadd.f32 %v7074_v30, %v3050_v7  ;;  %v3082_v8 = vadd.f32 %v7074_v30, %v3051_v50 }
 0x1f5   : > { %v3039_v0 = vsel %vm1394_vm2, %v3005_v12, %v3006_v47  ;;  %v3040_v59 = vsel %vm1394_vm2, %v3004_v40, %v3005_v12  ;;  %v5086_v32 = vpop.f32.mrb[122].mxu0  ;;  %5117 = vmatmul.mubr.msk.f32.vlgmr.msra.gmra.mrb[132].mxu1 %vm539_vm0, %v3151_v49  ;;  %v7112_v51 = vadd.f32 %v2720_v63, %v7009_v23  ;;  %v3152_v28 = vsel %vm3104_vm5, %v3080_v43, %v3128_v19 }
 0x1f6   : > { %v3052_v25 = vadd.f32 %v3040_v59, %v7048_v29  ;;  %v3053_v15 = vadd.f32 %v3039_v0, %v7055_v55  ;;  %v3008_v61 = vrot.slane %v5086_v32, 1  ;;  %v2919_v56 = vpop.f32.mrb[123].mxu0  ;;  %5119 = vmatprep.mubr.msk.f32.mxu1 %vm539_vm0, %v3152_v28  ;;  %vm3105_vm6 = vcmp.gt.f32.partialorder %v3081_v34, 0.0 }
 0x1f7   : > { %v3007_v17 = vrot.slane %v2919_v56, 1  ;;  %v5048_v48 = vpop.f32.mrb[126].mxu1  ;;  %v3129_v14 = vmul.f32 0.1, %v3081_v34  ;;  %vm3106_vm7 = vcmp.gt.f32.partialorder %v3082_v8, 0.0 }
 0x1f8   : > { %v7118_v45 = vadd.f32 %v5048_v48, %v7016_v21  ;;  %v2730_v1 = vpop.f32.mrb[127].mxu1  ;;  %v3130_v23 = vmul.f32 0.1, %v3082_v8  ;;  %v3083_v44 = vadd.f32 %v7074_v30, %v3052_v25  ;;  %v3084_v29 = vadd.f32 %v7074_v30, %v3053_v15 }
 0x1f9   : > { %v3037_v55 = vsel %vm1394_vm2, %v3007_v17, %v3008_v61  ;;  %v3038_v37 = vsel %vm1394_vm2, %v3006_v47, %v3007_v17  ;;  %v5089_v6 = vpop.f32.mrb[124].mxu0  ;;  %v3153_v62 = vsel %vm3105_vm6, %v3081_v34, %v3129_v14  ;;  %v7127_v40 = vadd.f32 %v2730_v1, %v7019_v4 }
 0x1fa   : > { %v3054_v21 = vadd.f32 %v3038_v37, %v7052_v24  ;;  %v3055_v5 = vadd.f32 %v3037_v55, %v7061_v57  ;;  %v3010_v13 = vrot.slane %v5089_v6, 1  ;;  %5120 = vmatmul.mubr.msk.f32.gmra.mrb[134].mxu1 %vm539_vm0, %v3153_v62  ;;  %v2929_v33 = vpop.f32.mrb[125].mxu0  ;;  %v3154_v20 = vsel %vm3106_vm7, %v3082_v8, %v3130_v23 }
 0x1fb   : > { %v3009_v53 = vrot.slane %v2929_v33, 1  ;;  %5122 = vmatprep.mubr.msk.f32.mxu1 %vm539_vm0, %v3154_v20  ;;  %v5051_v27 = vpop.f32.mrb[128].mxu1  ;;  %vm3107_vm8 = vcmp.gt.f32.partialorder %v3083_v44, 0.0  ;;  %v3131_v43 = vmul.f32 0.1, %v3083_v44  ;;  %vm3108_vm9 = vcmp.gt.f32.partialorder %v3084_v29, 0.0 }
 0x1fc   : > { %v7135_v4 = vadd.f32 %v5051_v27, %v7028_v46  ;;  %v2740_v39 = vpop.f32.mrb[129].mxu1  ;;  %v3132_v24 = vmul.f32 0.1, %v3084_v29  ;;  %v3085_v57 = vadd.f32 %v7074_v30, %v3054_v21  ;;  %v3086_v35 = vadd.f32 %v7074_v30, %v3055_v5 }
 0x1fd   : > { %v3035_v11 = vsel %vm1394_vm2, %v3009_v53, %v3010_v13  ;;  %v3036_v9 = vsel %vm1394_vm2, %v3008_v61, %v3009_v53  ;;  %v5092_v26 = vpop.f32.mrb[126].mxu0  ;;  %v3155_v7 = vsel %vm3107_vm8, %v3083_v44, %v3131_v43  ;;  %v7144_v50 = vadd.f32 %v2740_v39, %v7031_v52 }
 0x1fe   : > { %v3056_v46 = vadd.f32 %v3036_v9, %v7058_v10  ;;  %v3057_v47 = vadd.f32 %v3035_v11, %v7069_v42  ;;  %v3012_v54 = vrot.slane %v5092_v26, 1  ;;  %5123 = vmatmul.mubr.msk.f32.gmra.mrb[136].mxu1 %vm539_vm0, %v3155_v7  ;;  %v2939_v12 = vpop.f32.mrb[127].mxu0  ;;  %v3156_v41 = vsel %vm3108_vm9, %v3084_v29, %v3132_v24 }
 0x1ff   : > { %v3011_v19 = vrot.slane %v2939_v12, 1  ;;  %5125 = vmatprep.mubr.msk.f32.mxu1 %vm539_vm0, %v3156_v41  ;;  %v5054_v49 = vpop.f32.mrb[130].mxu1  ;;  %vm3109_vm10 = vcmp.gt.f32.partialorder %v3085_v57, 0.0  ;;  %v3133_v63 = vmul.f32 0.1, %v3085_v57  ;;  %vm3110_vm11 = vcmp.gt.f32.partialorder %v3086_v35, 0.0 }
 0x200   : > { %v7152_v52 = vadd.f32 %v5054_v49, %v7043_v22  ;;  %v2750_v34 = vpop.f32.mrb[131].mxu1  ;;  %v3134_v10 = vmul.f32 0.1, %v3086_v35  ;;  %v3087_v42 = vadd.f32 %v7074_v30, %v3056_v46  ;;  %v3088_v8 = vadd.f32 %v7074_v30, %v3057_v47 }
 0x201   : > { %v3033_v0 = vsel %vm1394_vm2, %v3011_v19, %v3012_v54  ;;  %v3034_v59 = vsel %vm1394_vm2, %v3010_v13, %v3011_v19  ;;  %v5095_v32 = vpop.f32.mrb[128].mxu0  ;;  %v3157_v28 = vsel %vm3109_vm10, %v3085_v57, %v3133_v63  ;;  %v7161_v25 = vadd.f32 %v2750_v34, %v7045_v60 }
 0x202   : > { %v3058_v22 = vadd.f32 %v3034_v59, %v7064_v18  ;;  %v3059_v15 = vadd.f32 %v3033_v0, %v7085_v58  ;;  %v3014_v61 = vrot.slane %v5095_v32, 1  ;;  %5126 = vmatmul.mubr.msk.f32.gmra.mrb[138].mxu1 %vm539_vm0, %v3157_v28  ;;  %v2949_v56 = vpop.f32.mrb[129].mxu0  ;;  %v3158_v17 = vsel %vm3110_vm11, %v3086_v35, %v3134_v10 }
 0x203   : > { %v3013_v48 = vrot.slane %v2949_v56, 1  ;;  %5128 = vmatprep.mubr.msk.f32.mxu1 %vm539_vm0, %v3158_v17  ;;  %vm3111_vm12 = vcmp.gt.f32.partialorder %v3087_v42, 0.0  ;;  %v3135_v14 = vmul.f32 0.1, %v3087_v42  ;;  %vm3112_vm13 = vcmp.gt.f32.partialorder %v3088_v8, 0.0 }
 0x204   : > { %v3136_v1 = vmul.f32 0.1, %v3088_v8  ;;  %v3089_v60 = vadd.f32 %v7074_v30, %v3058_v22  ;;  %v3090_v23 = vadd.f32 %v7074_v30, %v3059_v15 }
 0x205   : > { %v3031_v18 = vsel %vm1394_vm2, %v3013_v48, %v3014_v61  ;;  %v3032_v58 = vsel %vm1394_vm2, %v3012_v54, %v3013_v48  ;;  %v5098_v44 = vpop.f32.mrb[130].mxu0  ;;  %v3159_v29 = vsel %vm3111_vm12, %v3087_v42, %v3135_v14 }
 0x206   : > { %v3060_v55 = vadd.f32 %v3032_v58, %v7077_v16  ;;  %v3061_v37 = vadd.f32 %v3031_v18, %v7097_v3  ;;  %v3016_v6 = vrot.slane %v5098_v44, 1  ;;  %5129 = vmatmul.mubr.msk.f32.gmra.mrb[140].mxu1 %vm539_vm0, %v3159_v29  ;;  %v2959_v62 = vpop.f32.mrb[131].mxu0  ;;  %v3160_v21 = vsel %vm3112_vm13, %v3088_v8, %v3136_v1 }
 0x207   : > { %v3015_v5 = vrot.slane %v2959_v62, 1  ;;  %5131 = vmatprep.mubr.msk.f32.mxu1 %vm539_vm0, %v3160_v21  ;;  %vm3113_vm14 = vcmp.gt.f32.partialorder %v3089_v60, 0.0  ;;  %v3137_v13 = vmul.f32 0.1, %v3089_v60  ;;  %vm3114_vm15 = vcmp.gt.f32.partialorder %v3090_v23, 0.0 }
 0x208   : > { %v3138_v33 = vmul.f32 0.1, %v3090_v23  ;;  %v3091_v20 = vadd.f32 %v7074_v30, %v3060_v55  ;;  %v3092_v53 = vadd.f32 %v7074_v30, %v3061_v37 }
 0x209   : > { %v3029_v16 = vsel %vm1394_vm2, %v3015_v5, %v3016_v6  ;;  %v3030_v3 = vsel %vm1394_vm2, %v3014_v61, %v3015_v5  ;;  %v5101_v27 = vpop.f32.mrb[132].mxu0  ;;  %v3161_v43 = vsel %vm3113_vm14, %v3089_v60, %v3137_v13  ;;  %vm7241_vm14 = vmpackc.low %vm539_vm0, %vm539_vm0 }
 0x20a   : > { %v3062_v39 = vadd.f32 %v3030_v3, %v7089_v36  ;;  %v3063_v24 = vadd.f32 %v3029_v16, %v7112_v51  ;;  %v3018_v57 = vrot.slane %v5101_v27, 1  ;;  %5132 = vmatmul.mubr.msk.f32.gmra.mrb[142].mxu1 %vm539_vm0, %v3161_v43  ;;  %v2969_v35 = vpop.f32.mrb[133].mxu0  ;;  %v3162_v11 = vsel %vm3114_vm15, %v3090_v23, %v3138_v33  ;;  %v3515_v43 = vld [vmem:[#allocation2] sm:$0x1] }
 0x20b   : > { %v3017_v9 = vrot.slane %v2969_v35, 1  ;;  %5134 = vmatprep.mubr.msk.f32.mxu1 %vm539_vm0, %v3162_v11  ;;  %vm3115_vm1 = vcmp.gt.f32.partialorder %v3091_v20, 0.0  ;;  %v3139_v26 = vmul.f32 0.1, %v3091_v20  ;;  %vm3116_vm3 = vcmp.gt.f32.partialorder %v3092_v53, 0.0 }
 0x20c   : > { %v3140_v7 = vmul.f32 0.1, %v3092_v53  ;;  %v3093_v46 = vadd.f32 %v7074_v30, %v3062_v39  ;;  %v3094_v47 = vadd.f32 %v7074_v30, %v3063_v24  ;;  %v5496_v27 = vmov 0.0   ;;  %v7234_v24 = vld [vmem:[%s7385_s6] ss:$0 sm:$0xff] }
 0x20d   : > { %v3027_v36 = vsel %vm1394_vm2, %v3017_v9, %v3018_v57  ;;  %v3028_v51 = vsel %vm1394_vm2, %v3016_v6, %v3017_v9  ;;  %v5104_v54 = vpop.f32.mrb[134].mxu0  ;;  %v3163_v12 = vsel %vm3115_vm1, %v3091_v20, %v3139_v26  ;;  %3664 = vmatprep.mubr.f32.mxu0 %v5496_v27  ;;  %v5497_v39 = vmov 0  }
 0x20e   : > { %v3064_v41 = vadd.f32 %v3028_v51, %v7102_v38  ;;  %v3065_v19 = vadd.f32 %v3027_v36, %v7127_v40  ;;  %v3020_v49 = vrot.slane %v5104_v54, 1  ;;  %5135 = vmatmul.mubr.msk.f32.gmra.mrb[144].mxu1 %vm539_vm0, %v3163_v12  ;;  %v2979_v63 = vpop.f32.mrb[135].mxu0  ;;  %v3164_v34 = vsel %vm3116_vm3, %v3092_v53, %v3140_v7  ;;  %5372 = vset.pattern.permute.xlu0 %v5497_v39 }
 0x20f   : > { %v3019_v10 = vrot.slane %v2979_v63, 1  ;;  %5137 = vmatprep.mubr.msk.f32.mxu1 %vm539_vm0, %v3164_v34  ;;  %vm3117_vm4 = vcmp.gt.f32.partialorder %v3093_v46, 0.0  ;;  %v3141_v42 = vmul.f32 0.1, %v3093_v46  ;;  %vm3118_vm5 = vcmp.gt.f32.partialorder %v3094_v47, 0.0  ;;  %3518 = vperm.xlu0 %5372, %v3515_v43  }
 0x210   : > { %v3142_v8 = vmul.f32 0.1, %v3094_v47  ;;  %v3095_v0 = vadd.f32 %v7074_v30, %v3064_v41  ;;  %v3096_v59 = vadd.f32 %v7074_v30, %v3065_v19  ;;  %v2998_v38 = vrot.slane %v7041_v2, 1 }
 0x211   : > { %v3025_v40 = vsel %vm1394_vm2, %v3019_v10, %v3020_v49  ;;  %v3026_v32 = vsel %vm1394_vm2, %v3018_v57, %v3019_v10  ;;  %v5107_v28 = vpop.f32.mrb[136].mxu0  ;;  %v3165_v22 = vsel %vm3117_vm4, %v3093_v46, %v3141_v42 }
 0x212   : > { %v3066_v15 = vadd.f32 %v3026_v32, %v7118_v45  ;;  %v3067_v61 = vadd.f32 %v3025_v40, %v7144_v50  ;;  %v3022_v56 = vrot.slane %v5107_v28, 1  ;;  %5138 = vmatmul.mubr.msk.f32.gmra.mrb[146].mxu1 %vm539_vm0, %v3165_v22  ;;  %v2989_v17 = vpop.f32.mrb[137].mxu0  ;;  %v3166_v48 = vsel %vm3118_vm5, %v3094_v47, %v3142_v8 }
 0x213   : > { %v3021_v14 = vrot.slane %v2989_v17, 1  ;;  %5140 = vmatprep.mubr.msk.f32.mxu1 %vm539_vm0, %v3166_v48  ;;  %vm3119_vm6 = vcmp.gt.f32.partialorder %v3095_v0, 0.0  ;;  %v3143_v2 = vmul.f32 0.1, %v3095_v0  ;;  %vm3120_vm7 = vcmp.gt.f32.partialorder %v3096_v59, 0.0 }
 0x214   : > { %v3046_v1 = vsel %vm1394_vm2, %v3022_v56, %v2998_v38  ;;  %v3144_v60 = vmul.f32 0.1, %v3096_v59  ;;  %v3097_v23 = vadd.f32 %v7074_v30, %v3066_v15  ;;  %v3098_v45 = vadd.f32 %v7074_v30, %v3067_v61 }
 0x215   : > { %v3070_v50 = vadd.f32 %v3046_v1, %v7152_v52  ;;  %v3023_v18 = vsel %vm1394_vm2, %v3021_v14, %v3022_v56  ;;  %v3024_v58 = vsel %vm1394_vm2, %v3020_v49, %v3021_v14  ;;  %v3167_v44 = vsel %vm3119_vm6, %v3095_v0, %v3143_v2 }
 0x216   : > { %v3068_v29 = vadd.f32 %v3024_v58, %v7135_v4  ;;  %v3069_v55 = vadd.f32 %v3023_v18, %v7161_v25  ;;  %5141 = vmatmul.mubr.msk.f32.gmra.mrb[148].mxu1 %vm539_vm0, %v3167_v44  ;;  %v3168_v37 = vsel %vm3120_vm7, %v3096_v59, %v3144_v60  ;;  %vm3121_vm8 = vcmp.gt.f32.partialorder %v3097_v23, 0.0 }
 0x217   : > { %5143 = vmatprep.mubr.msk.f32.mxu1 %vm539_vm0, %v3168_v37  ;;  %v3145_v6 = vmul.f32 0.1, %v3097_v23  ;;  %vm3122_vm9 = vcmp.gt.f32.partialorder %v3098_v45, 0.0  ;;  %v3146_v52 = vmul.f32 0.1, %v3098_v45  ;;  %v3101_v33 = vadd.f32 %v7074_v30, %v3070_v50 }
 0x218   : > { %v3099_v62 = vadd.f32 %v7074_v30, %v3068_v29  ;;  %v3100_v21 = vadd.f32 %v7074_v30, %v3069_v55  ;;  %v5495_v30 = vmov 0.0|0.0  }
 0x219   : > { %v3169_v5 = vsel %vm3121_vm8, %v3097_v23, %v3145_v6  ;;  %v3170_v13 = vsel %vm3122_vm9, %v3098_v45, %v3146_v52  ;;  %v3149_v16 = vmul.f32 0.1, %v3101_v33  ;;  %vm3125_vm11 = vcmp.gt.f32.partialorder %v3101_v33, 0.0  ;;  %5232 = vmatprep.subr.bf16.mxu0 %v5495_v30 }
 0x21a   : > { %5144 = vmatmul.mubr.msk.f32.gmra.mrb[150].mxu1 %vm539_vm0, %v3169_v5  ;;  %vm3123_vm2 = vcmp.gt.f32.partialorder %v3099_v62, 0.0  ;;  %v3147_v4 = vmul.f32 0.1, %v3099_v62  ;;  %vm3124_vm10 = vcmp.gt.f32.partialorder %v3100_v21, 0.0  ;;  %v3148_v25 = vmul.f32 0.1, %v3100_v21 }
 0x21b   : > { %5146 = vmatprep.mubr.msk.f32.mxu1 %vm539_vm0, %v3170_v13  ;;  %v3173_v3 = vsel %vm3125_vm11, %v3101_v33, %v3149_v16 }
 0x21c   : > { %v3171_v20 = vsel %vm3123_vm2, %v3099_v62, %v3147_v4  ;;  %v3172_v53 = vsel %vm3124_vm10, %v3100_v21, %v3148_v25 }
 0x21e   : > { %5147 = vmatmul.mubr.msk.f32.gmra.mrb[152].mxu1 %vm539_vm0, %v3171_v20 }
 0x21f   : > { %5149 = vmatprep.mubr.msk.f32.mxu1 %vm539_vm0, %v3172_v53 }
 0x222   : > { %5150 = vmatmul.mubr.msk.f32.gmra.mrb[154].mxu1 %vm539_vm0, %v3173_v3 }
 0x2c8   : > { %v5118_v57 = vpop.f32.mrb[132].mxu1 }
 0x2c9   : > { %v3329_v35 = vadd.f32 %v5118_v57, %v7234_v24  ;;  %v3323_v11 = vpop.f32.mrb[133].mxu1 }
 0x2ca   : > { %v3324_v9 = vadd.f32 %v7234_v24, %v3323_v11 }
 0x2cb   : > { %vm3443_vm12 = vcmp.gt.f32.partialorder %v3329_v35, 0.0  ;;  %v3467_v26 = vmul.f32 0.1, %v3329_v35 }
 0x2cc   : > { %vm3442_vm13 = vcmp.gt.f32.partialorder %v3324_v9, 0.0  ;;  %v3466_v7 = vmul.f32 0.1, %v3324_v9 }
 0x2cd   : > { %v3491_v46 = vsel %vm3443_vm12, %v3329_v35, %v3467_v26  ;;  %v5121_v47 = vpop.f32.mrb[134].mxu1 }
 0x2ce   : > { %v3490_v36 = vsel %vm3442_vm13, %v3324_v9, %v3466_v7  ;;  %v3339_v51 = vadd.f32 %v5121_v47, %v7234_v24  ;;  %v3333_v54 = vpop.f32.mrb[135].mxu1 }
 0x2cf   : > { %v5233_v41 = vpack.c.bf16 %v3491_v46, %v3490_v36  ;;  %v3334_v19 = vadd.f32 %v7234_v24, %v3333_v54 }
 0x2d0   : > { %vm3445_vm15 = vcmp.gt.f32.partialorder %v3339_v51, 0.0  ;;  %v3469_v49 = vmul.f32 0.1, %v3339_v51 }
 0x2d1   : > { %vm3444_vm1 = vcmp.gt.f32.partialorder %v3334_v19, 0.0  ;;  %v3468_v63 = vmul.f32 0.1, %v3334_v19  ;;  %v5124_v34 = vpop.f32.mrb[136].mxu1  ;;  %5235 = vmatpush1.bf16.xpose.msk.msra.mxu0 %vm7241_vm14, %v5233_v41 }
 0x2d2   : > { %v3493_v10 = vsel %vm3445_vm15, %v3339_v51, %v3469_v49  ;;  %v3349_v42 = vadd.f32 %v5124_v34, %v7234_v24  ;;  %v3343_v8 = vpop.f32.mrb[137].mxu1  ;;  %5236 = vmatprep.subr.bf16.mxu0 %v5495_v30 }
 0x2d3   : > { %v3492_v0 = vsel %vm3444_vm1, %v3334_v19, %v3468_v63  ;;  %v3344_v59 = vadd.f32 %v7234_v24, %v3343_v8 }
 0x2d4   : > { %v5237_v38 = vpack.c.bf16 %v3493_v10, %v3492_v0  ;;  %vm3447_vm3 = vcmp.gt.f32.partialorder %v3349_v42, 0.0  ;;  %v3471_v40 = vmul.f32 0.1, %v3349_v42 }
 0x2d5   : > { %vm3446_vm4 = vcmp.gt.f32.partialorder %v3344_v59, 0.0  ;;  %v3470_v32 = vmul.f32 0.1, %v3344_v59  ;;  %v5127_v28 = vpop.f32.mrb[138].mxu1 }
 0x2d6   : > { %v3495_v22 = vsel %vm3447_vm3, %v3349_v42, %v3471_v40  ;;  %v3359_v15 = vadd.f32 %v5127_v28, %v7234_v24  ;;  %v3353_v61 = vpop.f32.mrb[139].mxu1 }
 0x2d7   : > { %v3494_v56 = vsel %vm3446_vm4, %v3344_v59, %v3470_v32  ;;  %v3354_v17 = vadd.f32 %v7234_v24, %v3353_v61 }
 0x2d8   : > { %v5241_v48 = vpack.c.bf16 %v3495_v22, %v3494_v56  ;;  %vm3449_vm5 = vcmp.gt.f32.partialorder %v3359_v15, 0.0  ;;  %v3473_v14 = vmul.f32 0.1, %v3359_v15 }
 0x2d9   : > { %vm3448_vm6 = vcmp.gt.f32.partialorder %v3354_v17, 0.0  ;;  %v3472_v2 = vmul.f32 0.1, %v3354_v17  ;;  %v5130_v1 = vpop.f32.mrb[140].mxu1  ;;  %5239 = vmatpush1.bf16.xpose.msk.msra.mxu0 %vm7241_vm14, %v5237_v38 }
 0x2da   : > { %v3497_v60 = vsel %vm3449_vm5, %v3359_v15, %v3473_v14  ;;  %v3369_v23 = vadd.f32 %v5130_v1, %v7234_v24  ;;  %v3363_v45 = vpop.f32.mrb[141].mxu1  ;;  %5240 = vmatprep.subr.bf16.mxu0 %v5495_v30 }
 0x2db   : > { %v3496_v50 = vsel %vm3448_vm6, %v3354_v17, %v3472_v2  ;;  %v3364_v18 = vadd.f32 %v7234_v24, %v3363_v45 }
 0x2dc   : > { %v5245_v58 = vpack.c.bf16 %v3497_v60, %v3496_v50  ;;  %vm3451_vm7 = vcmp.gt.f32.partialorder %v3369_v23, 0.0  ;;  %v3475_v44 = vmul.f32 0.1, %v3369_v23 }
 0x2dd   : > { %vm3450_vm8 = vcmp.gt.f32.partialorder %v3364_v18, 0.0  ;;  %v3474_v29 = vmul.f32 0.1, %v3364_v18  ;;  %v5133_v55 = vpop.f32.mrb[142].mxu1 }
 0x2de   : > { %v3499_v37 = vsel %vm3451_vm7, %v3369_v23, %v3475_v44  ;;  %v3379_v6 = vadd.f32 %v5133_v55, %v7234_v24  ;;  %v3373_v52 = vpop.f32.mrb[143].mxu1 }
 0x2df   : > { %v3498_v62 = vsel %vm3450_vm8, %v3364_v18, %v3474_v29  ;;  %v3374_v21 = vadd.f32 %v7234_v24, %v3373_v52 }
 0x2e0   : > { %v5249_v5 = vpack.c.bf16 %v3499_v37, %v3498_v62  ;;  %vm3453_vm9 = vcmp.gt.f32.partialorder %v3379_v6, 0.0  ;;  %v3477_v13 = vmul.f32 0.1, %v3379_v6 }
 0x2e1   : > { %vm3452_vm2 = vcmp.gt.f32.partialorder %v3374_v21, 0.0  ;;  %v3476_v33 = vmul.f32 0.1, %v3374_v21  ;;  %v5136_v4 = vpop.f32.mrb[144].mxu1  ;;  %5243 = vmatpush1.bf16.xpose.msk.msra.mxu0 %vm7241_vm14, %v5241_v48 }
 0x2e2   : > { %v7262_v25 = vsel %vm3453_vm9, %v3379_v6, %v3477_v13  ;;  %v3389_v20 = vadd.f32 %v5136_v4, %v7234_v24  ;;  %v3383_v53 = vpop.f32.mrb[145].mxu1  ;;  %5244 = vmatprep.subr.bf16.mxu0 %v5495_v30  ;;  %v3519_v13 = vpop.permute.xlu0 %3518 }
 0x2e3   : > { %v7266_v16 = vsel %vm3452_vm2, %v3374_v21, %v3476_v33  ;;  %v3384_v3 = vadd.f32 %v7234_v24, %v3383_v53 }
 0x2e4   : > { %v5253_v27 = vpack.c.bf16 %v7262_v25, %v7266_v16  ;;  %vm3455_vm10 = vcmp.gt.f32.partialorder %v3389_v20, 0.0  ;;  %v3479_v43 = vmul.f32 0.1, %v3389_v20 }
 0x2e5   : > { %vm3454_vm11 = vcmp.gt.f32.partialorder %v3384_v3, 0.0  ;;  %v3478_v39 = vmul.f32 0.1, %v3384_v3  ;;  %v5139_v57 = vpop.f32.mrb[146].mxu1 }
 0x2e6   : > { %v7271_v35 = vsel %vm3455_vm10, %v3389_v20, %v3479_v43  ;;  %v3399_v11 = vadd.f32 %v5139_v57, %v7234_v24  ;;  %v3393_v9 = vpop.f32.mrb[147].mxu1 }
 0x2e7   : > { %v3502_v26 = vsel %vm3454_vm11, %v3384_v3, %v3478_v39  ;;  %v3394_v7 = vadd.f32 %v7234_v24, %v3393_v9  ;;  %v5505_v9 = vmov 1983009808  }
 0x2e8   : > { %v5257_v46 = vpack.c.bf16 %v7271_v35, %v3502_v26  ;;  %vm3457_vm12 = vcmp.gt.f32.partialorder %v3399_v11, 0.0  ;;  %v3481_v47 = vmul.f32 0.1, %v3399_v11  ;;  %v3712_v26 = vunpack.c.l.s4 %v5505_v9 }
 0x2e9   : > { %vm3456_vm13 = vcmp.gt.f32.partialorder %v3394_v7, 0.0  ;;  %v3480_v36 = vmul.f32 0.1, %v3394_v7  ;;  %v5142_v51 = vpop.f32.mrb[148].mxu1  ;;  %5247 = vmatpush1.bf16.xpose.msk.msra.mxu0 %vm7241_vm14, %v5245_v58 }
 0x2ea   : > { %v3505_v54 = vsel %vm3457_vm12, %v3399_v11, %v3481_v47  ;;  %v3409_v41 = vadd.f32 %v5142_v51, %v7234_v24  ;;  %v3403_v19 = vpop.f32.mrb[149].mxu1  ;;  %5248 = vmatprep.subr.bf16.mxu0 %v5495_v30  ;;  %v3713_v47 = vunpack.c.0.s8 %v3712_v26 }
 0x2eb   : > { %v3504_v49 = vsel %vm3456_vm13, %v3394_v7, %v3480_v36  ;;  %v3404_v63 = vadd.f32 %v7234_v24, %v3403_v19 }
 0x2ec   : > { %v5261_v34 = vpack.c.bf16 %v3505_v54, %v3504_v49  ;;  %vm3459_vm15 = vcmp.gt.f32.partialorder %v3409_v41, 0.0  ;;  %v3483_v10 = vmul.f32 0.1, %v3409_v41  ;;  %v3716_v54 = vsub.s32 %v3713_v47, %v6319_v31 }
 0x2ed   : > { %vm3458_vm1 = vcmp.gt.f32.partialorder %v3404_v63, 0.0  ;;  %v3482_v42 = vmul.f32 0.1, %v3404_v63  ;;  %v5145_v8 = vpop.f32.mrb[150].mxu1  ;;  %v5506_v49 = vmov 1934713408  }
 0x2ee   : > { %v3507_v0 = vsel %vm3459_vm15, %v3409_v41, %v3483_v10  ;;  %v3419_v59 = vadd.f32 %v5145_v8, %v7234_v24  ;;  %v3413_v38 = vpop.f32.mrb[151].mxu1 }
 0x2ef   : > { %v3506_v40 = vsel %vm3458_vm1, %v3404_v63, %v3482_v42  ;;  %v3414_v32 = vadd.f32 %v7234_v24, %v3413_v38  ;;  %v3744_v63 = vunpack.c.l.s4 %v5506_v49 }
 0x2f0   : > { %v5265_v28 = vpack.c.bf16 %v3507_v0, %v3506_v40  ;;  %vm3461_vm3 = vcmp.gt.f32.partialorder %v3419_v59, 0.0  ;;  %v3485_v22 = vmul.f32 0.1, %v3419_v59 }
 0x2f1   : > { %vm3460_vm4 = vcmp.gt.f32.partialorder %v3414_v32, 0.0  ;;  %v3484_v15 = vmul.f32 0.1, %v3414_v32  ;;  %v5148_v61 = vpop.f32.mrb[152].mxu1  ;;  %5251 = vmatpush1.bf16.xpose.msk.msra.mxu0 %vm7241_vm14, %v5249_v5  ;;  %v3523_v5 = vsub.s32 0, %v6319_v31  ;;  %v3745_v0 = vunpack.c.0.s8 %v3744_v63 }
 0x2f2   : > { %v3509_v56 = vsel %vm3461_vm3, %v3419_v59, %v3485_v22  ;;  %v3429_v17 = vadd.f32 %v5148_v61, %v7234_v24  ;;  %v3423_v48 = vpop.f32.mrb[153].mxu1  ;;  %5252 = vmatprep.subr.bf16.mxu0 %v5495_v30 }
 0x2f3   : > { %v3508_v14 = vsel %vm3460_vm4, %v3414_v32, %v3484_v15  ;;  %v3424_v2 = vadd.f32 %v7234_v24, %v3423_v48  ;;  %v3524_v33 = vrot.slane %v3519_v13, %v3523_v5 }
 0x2f4   : > { %v5269_v1 = vpack.c.bf16 %v3509_v56, %v3508_v14  ;;  %vm3463_vm5 = vcmp.gt.f32.partialorder %v3429_v17, 0.0  ;;  %v3487_v60 = vmul.f32 0.1, %v3429_v17  ;;  %v3748_v56 = vsub.s32 %v3745_v0, %v6319_v31 }
 0x2f5   : > { %vm3462_vm6 = vcmp.gt.f32.partialorder %v3424_v2, 0.0  ;;  %v3486_v23 = vmul.f32 0.1, %v3424_v2  ;;  %v5151_v45 = vpop.f32.mrb[154].mxu1 }
 0x2f6   : > { %v3511_v50 = vsel %vm3463_vm5, %v3429_v17, %v3487_v60  ;;  %v3439_v18 = vadd.f32 %v5151_v45, %v7234_v24  ;;  %v3433_v58 = vpop.f32.mrb[155].mxu1 }
 0x2f7   : > { %v3510_v44 = vsel %vm3462_vm6, %v3424_v2, %v3486_v23  ;;  %v3434_v29 = vadd.f32 %v7234_v24, %v3433_v58  ;;  %v3514_v24 = vld [vmem:[%s7386_s7] sm:$0x1] }
 0x2f8   : > { %v5273_v55 = vpack.c.bf16 %v3511_v50, %v3510_v44  ;;  %vm3465_vm7 = vcmp.gt.f32.partialorder %v3439_v18, 0.0  ;;  %v3489_v37 = vmul.f32 0.1, %v3439_v18 }
 0x2f9   : > { %vm3464_vm8 = vcmp.gt.f32.partialorder %v3434_v29, 0.0  ;;  %v3488_v6 = vmul.f32 0.1, %v3434_v29  ;;  %5255 = vmatpush1.bf16.xpose.msk.msra.mxu0 %vm7241_vm14, %v5253_v27 }
 0x2fa   : > { %v3513_v52 = vsel %vm3465_vm7, %v3439_v18, %v3489_v37  ;;  %5256 = vmatprep.subr.bf16.mxu0 %v5495_v30 }
 0x2fb   : > { %v3512_v62 = vsel %vm3464_vm8, %v3434_v29, %v3488_v6 }
 0x2fc   : > { %v5277_v21 = vpack.c.bf16 %v3513_v52, %v3512_v62 }
 0x301   : > { %5259 = vmatpush1.bf16.xpose.msk.msra.mxu0 %vm7241_vm14, %v5257_v46 }
 0x302   : > { %5260 = vmatprep.subr.bf16.mxu0 %v5495_v30 }
 0x309   : > { %5263 = vmatpush1.bf16.xpose.msk.msra.mxu0 %vm7241_vm14, %v5261_v34 }
 0x30a   : > { %5264 = vmatprep.subr.bf16.mxu0 %v5495_v30 }
 0x311   : > { %5267 = vmatpush1.bf16.xpose.msk.msra.mxu0 %vm7241_vm14, %v5265_v28 }
 0x312   : > { %5268 = vmatprep.subr.bf16.mxu0 %v5495_v30 }
 0x319   : > { %5271 = vmatpush1.bf16.xpose.msk.msra.mxu0 %vm7241_vm14, %v5269_v1 }
 0x31a   : > { %5272 = vmatprep.subr.bf16.mxu0 %v5495_v30 }
 0x321   : > { %5275 = vmatpush1.bf16.xpose.msk.msra.mxu0 %vm7241_vm14, %v5273_v55 }
 0x322   : > { %5276 = vmatprep.subr.bf16.mxu0 %v5495_v30 }
 0x329   : > { %5279 = vmatpush1.bf16.xpose.msk.msra.mxu0 %vm7241_vm14, %v5277_v21  ;;  %vm3763_vm14 = vcmask 130048  }
 0x330   : > { %4283 = vmatmul.mubr.msk.f32.vlgmr.msra.gmra.mrb[138].mxu0 %vm539_vm0, %v3514_v24  ;;  %vm3701_vm0 = vcmask 64512  }
 0x403   : > { %v3666_v4 = vpop.f32.mrb[138].mxu0 }
 0x404   : > { %v3667_v25 = vadd.f32 %v3666_v4, %v3524_v33  ;;  %v3668_v20 = vpop.f32.mrb[139].mxu0 }
 0x405   : > { %v3669_v53 = vadd.f32 %v3668_v20, %v3524_v33 }
 0x406   : > { %v3671_v16 = vsub.f32 0.0, %v3667_v25 }
 0x407   : > { %v3672_v3 = vsub.f32 0.0, %v3669_v53 }
 0x408   : > { %v3673_v30 = vmul.f32 1.442695, %v3671_v16 }
 0x409   : > { %v3675_v12 = vmul.f32 1.442695, %v3672_v3 }
 0x40a   : > { %5391 = vpow2.f32 %v3673_v30 }
 0x40b   : > { %5393 = vpow2.f32 %v3675_v12 }
 0x414   : > { %v5392_v27 = vpop.eup %5391 }
 0x415   : > { %v3677_v43 = vadd.f32 1.0, %v5392_v27  ;;  %v5394_v39 = vpop.eup %5393 }
 0x416   : > { %v3678_v57 = vadd.f32 1.0, %v5394_v39 }
 0x417   : > { %5395 = vrcp.f32 %v3677_v43 }
 0x418   : > { %5397 = vrcp.f32 %v3678_v57 }
 0x421   : > { %v5396_v35 = vpop.eup %5395 }
 0x422   : > { %3684 = vrot.lane.b32.xlu1 %v5396_v35, %s5498_s16  ;;  %3697 = vrot.lane.b32.xlu0 %v5396_v35, %s5499_s17  ;;  %v5398_v11 = vpop.eup %5397 }
 0x426   : > { %3690 = vrot.lane.b32.xlu1 %v5396_v35, %s5500_s19  ;;  %3687 = vrot.lane.b32.xlu0 %v5396_v35, %s5501_s28  ;;  %s7326_s19 = scalar_lea.hbm %s7388_s9, %s4286_s29  ;;  %s3766_s28 = scalar_lea.sflag [#allocation4], %s442_s0 }
 0x42a   : > { %3699 = vrot.lane.b32.xlu1 %v5398_v11, %s5499_s17  ;;  %3693 = vrot.lane.b32.xlu0 %v5396_v35, %s5502_s25  ;;  %s5399_s25 = scalar_lea.vmem %s7328_s27, 128 }
 0x42b   : > { %p5400_p6 = scmp.ne.s32.totalorder %s7328_s27, %s5399_s25 }
 0x42d   : > { %p5401_p7 = pnand %p5400_p6, %p5613_p3 }
 0x42e   : > { %3704 = vrot.lane.b32.xlu1 %v5398_v11, %s5503_s21  ;;  %3707 = vrot.lane.b32.xlu0 %v5398_v11, %s5504_s30  ;;  %s5405_s21 = scalar_lea.vmem %s5404_s15, 256 }
 0x42f   : > { %p5402_p9 = pneg %p5401_p7  ;;  %p5407_p11 = scmp.lt.s32.totalorder %s5405_s21, %s5399_s25 }
 0x431   : > { %p5408_p12 = por %p5407_p11, %p5406_p10 }
 0x433   : > { %p5409_p13 = pnand %p5408_p12, %p5402_p9 }
 0x494   : > { %v3685_v7 = vpop.permute.xlu1 %3684  ;;  %v3698_v46 = vpop.permute.xlu0 %3697 }
 0x498   : > { %v3691_v36 = vpop.permute.xlu1 %3690  ;;  %v3688_v51 = vpop.permute.xlu0 %3687 }
 0x499   : > { %v3718_v41 = vcombine.low %v3685_v7, %v3691_v36  ;;  %v3710_v19 = vcombine.low %v5396_v35, %v3688_v51 }
 0x49b   : > { %v3725_v42 = vrot.slane %v3718_v41, %v3716_v54  ;;  %v3717_v8 = vrot.slane %v3710_v19, %v3716_v54 }
 0x49c   : > { %v3700_v34 = vpop.permute.xlu1 %3699  ;;  %v3694_v10 = vpop.permute.xlu0 %3693 }
 0x49d   : > { %v3702_v38 = vsel %vm3701_vm0, %v3698_v46, %v3700_v34  ;;  %v3742_v22 = vcombine.low %v3717_v8, %v3725_v42 }
 0x49f   : > { %v3749_v48 = vrot.slane %v3742_v22, %v3748_v56 }
 0x4a0   : > { %v3705_v59 = vpop.permute.xlu1 %3704  ;;  %v3708_v40 = vpop.permute.xlu0 %3707 }
 0x4a1   : > { %v3726_v32 = vcombine.low %v3694_v10, %v3705_v59  ;;  %v3734_v28 = vcombine.low %v3702_v38, %v3708_v40 }
 0x4a3   : > { %v3733_v15 = vrot.slane %v3726_v32, %v3716_v54  ;;  %v3741_v61 = vrot.slane %v3734_v28, %v3716_v54 }
 0x4a5   : > { %v3750_v17 = vcombine.low %v3733_v15, %v3741_v61 }
 0x4a7   : > { %v3757_v14 = vrot.slane %v3750_v17, %v3748_v56 }
 0x4a9   : > { %v3758_v2 = vcombine.low %v3749_v48, %v3757_v14 }
 0x4ab   : > { %3760 = vrot.lane.b32.xlu1 %v3758_v2, %s5507_s8 }
 0x51d   : > { %v3761_v31 = vpop.permute.xlu1 %3760 }
 0x51e   : > { %3764 = vst.msk [vmem:[%s444_s22] sm:$0xff] %vm3763_vm14, %v3761_v31 }
 0x51f   : > { %5412 = shalt.err (!%p5409_p13)
}
 0x520   : > { %s5413_s30 = scalar_lea.hbm %s7326_s19, 128  ;;  %s5417_s20 = scalar_lea.hbm %s7388_s9, 512 }
 0x521   : > { %p5414_p0 = scmp.ne.s32.totalorder %s7326_s19, %s5413_s30  ;;  %p5418_p4 = scmp.lt.u32.totalorder %s7326_s19, %s7388_s9 }
 0x522   : > { %p5419_p5 = scmp.lt.u32.totalorder %s5417_s20, %s5413_s30  ;;  %p5421_p7 = scmp.lt.u32.totalorder %s5413_s30, %s7326_s19 }
 0x523   : > { %p5415_p1 = pnand %p5414_p0, %p5613_p3 }
 0x524   : > { %p5420_p6 = por %p5419_p5, %p5418_p4 }
 0x525   : > { %p5416_p2 = pneg %p5415_p1 }
 0x526   : > { %p5422_p9 = por %p5421_p7, %p5420_p6 }
 0x528   : > { %p5423_p10 = pnand %p5422_p9, %p5416_p2 }
 0x52a   : > { %5426 = shalt.err (!%p5423_p10)
}
 0x52b   : > { %5288 = dma.vmem_to_hbm [thread:$0]  (%p5613_p3), %s7328_s27, 128, %s7326_s19, %s3766_s28  }
 0x52c PF: > { %p5294_p11 = scmp.ge.s32.totalorder %s5493_s18, 2  ;;  %s3793_s29 = sand.u32 1, %s5465_s11  }
 0x52d   : > { %s3794_s22 = scalar_lea.sflag [#allocation4], %s3793_s29 }
 0x52e   : > { %p5291_p12 = pnand %p5294_p11, %p5622_p8 }
 0x530   : > { %5460 = dma.done.wait (!%p5291_p12), %s3794_s22, 128  }
 0x531   : > { %5462 = vsyncadd (!%p5291_p12), %s3794_s22, 4294967168  ;;  %s24_s18 = sadd.s32 1, %s5493_s18   ;;  %s7408_s23 = sld [smem:[#allocation10_spill]] }
 0x532   : > { %p21_p13 = scmp.ge.s32.totalorder %s24_s18, 6   ;;  %s7409_s14 = sld [smem:[#allocation6_spill]] }
 0x533   : > { %s7410_s15 = sld [smem:[#allocation7_spill]]  ;;  %s7411_s16 = sld [smem:[#allocation8_spill]] }
 0x534   : > { %s7412_s17 = sld [smem:[#allocation9_spill]]  ;;  %s7413_s11 = smov %s5469_s12 }
 0x535   : > { %s7414_s12 = smov %s5473_s13  ;;  %23 = sbr.rel (!%p21_p13) target bundleno = 8 (0x8), region = 105 }
 0x537   : > { %s7415_s13 = smov %s7408_s23 }
 0x53c   :  { %3799 = vsyncpa [#allocation4], 1 }
 0x53d   :  { %3801 = vsyncpa [#allocation4 + $0x1], 1 }

</bundles_post_ra>
